<compile_context>
chip_gen: v7x
topology: tpu7x:2x2x1
jax: 0.10.0
libtpu: 0.0.40
codegen_flags: <defaults>
</compile_context>

<pallas_src>
import functools

import jax
import jax.numpy as jnp
from jax import lax
from jax.experimental import pallas as pl
from jax.experimental.pallas import tpu as pltpu

LANES = 128          # lane-pad Cout of Pallas layers for dense vst stores
KH = KW = 4          # every conv in the module is 4x4
PALLAS_MIN_M = 512   # below this, pallas_call launch overhead exceeds the work


def _round_up(x, m):
    return (x + m - 1) // m * m


# ----------------------------------------------------------------------------
# Pallas kernel: fused (bf16 patches @ bf16 BN-scale-folded weights)
#                + per-channel BN shift -> LeakyReLU(0.2) -> bf16 store
# ----------------------------------------------------------------------------
def _conv_matmul_kernel(p_ref, w_ref, b_ref, o_ref):
    acc = jnp.dot(p_ref[...], w_ref[...], preferred_element_type=jnp.float32)
    y = acc + b_ref[...]                    # per-output-channel BN shift (f32)
    y = jnp.where(y > 0, y, 0.2 * y)        # LeakyReLU(0.2)
    o_ref[...] = y.astype(o_ref.dtype)


def pallas_conv_matmul(patches, w2d, bias2d):
    """patches (M,K) bf16, w2d (K,128) bf16, bias2d (1,128) f32 -> (M,128) bf16."""
    M, K = patches.shape
    Cout = w2d.shape[1]                     # lane-padded to 128
    # As few grid steps as possible (per-step fixed cost dominates at these
    # sizes), but always >= 2 so v7x can split the M axis over its 2 TCs.
    if M >= 8192:
        TM = 4096
    else:
        TM = max(256, _round_up(M // 2, 256))
    Mp = _round_up(M, TM)
    if Mp != M:
        patches = jnp.pad(patches, ((0, Mp - M), (0, 0)))

    out = pl.pallas_call(
        _conv_matmul_kernel,
        out_shape=jax.ShapeDtypeStruct((Mp, Cout), jnp.bfloat16),
        grid=(Mp // TM,),
        in_specs=[
            pl.BlockSpec((TM, K), lambda i: (i, 0)),      # patch tile
            pl.BlockSpec((K, Cout), lambda i: (0, 0)),    # full weight, resident
            pl.BlockSpec((1, Cout), lambda i: (0, 0)),    # BN shift
        ],
        out_specs=pl.BlockSpec((TM, Cout), lambda i: (i, 0)),
        compiler_params=pltpu.CompilerParams(dimension_semantics=("parallel",)),
    )(patches, w2d, bias2d)
    return out[:M] if Mp != M else out


# ----------------------------------------------------------------------------
# Patch extraction + per-layer glue (plain JAX; fused by the surrounding jit)
# ----------------------------------------------------------------------------
def extract_patches(h_nhwc, stride, padding):
    """NHWC -> (N, Ho, Wo, Cin*KH*KW); weights are permuted to this feature order."""
    return lax.conv_general_dilated_patches(
        h_nhwc,
        filter_shape=(KH, KW),
        window_strides=stride,
        padding=((padding[0], padding[0]), (padding[1], padding[1])),
        dimension_numbers=("NHWC", "HWIO", "NHWC"),
    )


def conv_layer(h_nhwc, layer):
    patches = extract_patches(h_nhwc, layer["stride"], layer["padding"])
    N, Ho, Wo, _ = patches.shape
    p2d = patches.reshape(N * Ho * Wo, -1)
    cout = layer["cout"]
    if layer["use_pallas"]:
        out = pallas_conv_matmul(p2d.astype(jnp.bfloat16),
                                 layer["w2d"], layer["bias2d"])
        out = out[:, :cout]      # drop lane padding before the next layer's im2col
    else:
        # Tiny M (tail layers / sigmoid head): one small XLA dot beats a
        # pallas_call's launch + pipeline-prologue overhead.
        y = jnp.dot(p2d.astype(jnp.float32), layer["w2d"],
                    preferred_element_type=jnp.float32,
                    precision=lax.Precision.HIGHEST) + layer["bias2d"]
        out = jax.nn.sigmoid(y) if layer["act"] == "sigmoid" else jnp.where(y > 0, y, 0.2 * y)
    return out.reshape(N, Ho, Wo, cout)


# ----------------------------------------------------------------------------
# Parameters (deterministic, synthetic) and one-time weight preparation
# ----------------------------------------------------------------------------
_CONV_SPECS = [  # (cin, cout, stride)
    (2, 20, (3, 4)),
    (20, 40, (4, 2)),
    (40, 60, (4, 2)),
    (60, 80, (2, 2)),
]


def init_params(key):
    """Raw (PyTorch-layout) synthetic parameters; eval-mode BN pre-folded to scale/bias."""
    keys = jax.random.split(key, 4 * 5 + 1)
    ki = 0
    convs = []
    for cin, cout, _ in _CONV_SPECS:
        w = 0.05 * jax.random.normal(keys[ki], (cout, cin, KH, KW), jnp.float32); ki += 1
        gamma = 1.0 + 0.1 * jax.random.normal(keys[ki], (cout,), jnp.float32); ki += 1
        beta = 0.1 * jax.random.normal(keys[ki], (cout,), jnp.float32); ki += 1
        run_mean = 0.1 * jax.random.normal(keys[ki], (cout,), jnp.float32); ki += 1
        run_var = 1.0 + 0.1 * jnp.abs(jax.random.normal(keys[ki], (cout,), jnp.float32)); ki += 1
        scale = gamma / jnp.sqrt(run_var + 1e-5)          # eval-mode BN folded
        bias = beta - run_mean * scale
        convs.append((w, scale, bias))
    dis_w = 0.05 * jax.random.normal(keys[ki], (1, 80, KH, KW), jnp.float32)
    # note: the `att` head is never used in forward(), so it is omitted.
    return {"convs": convs, "dis_w": dis_w}


def _patches_perm(cin):
    """perm[f] = flat (kh*KW + kw)*cin + c index of the input element that
    conv_general_dilated_patches places at feature f (derived numerically so
    the weight layout always matches the patches feature ordering)."""
    probe = jnp.arange(KH * KW * cin, dtype=jnp.float32).reshape(1, KH, KW, cin)
    feat = lax.conv_general_dilated_patches(
        probe, filter_shape=(KH, KW), window_strides=(1, 1),
        padding=((0, 0), (0, 0)), dimension_numbers=("NHWC", "HWIO", "NHWC"))
    return feat.reshape(KH * KW * cin).astype(jnp.int32)


def _weight_to_matmul(w_oihw, cin, cout):
    """(Cout, Cin, KH, KW) -> (K, Cout) in the patches feature order."""
    w_flat = jnp.transpose(w_oihw, (2, 3, 1, 0)).reshape(KH * KW * cin, cout)
    return w_flat[_patches_perm(cin)]


def prepare_layers(params, n, h, w):
    """One-time prep: fold BN scale into weights, permute to the patches
    feature order, pad Cout to 128 lanes for Pallas layers (lane-dense
    stores), cast Pallas weights to bf16.  Real channel counts propagate
    between layers (no padded-K contractions downstream)."""
    layers = []
    for (w_raw, scale, bias), (cin, cout, stride) in zip(params["convs"], _CONV_SPECS):
        ho = (h + 2 - KH) // stride[0] + 1
        wo = (w + 2 - KW) // stride[1] + 1
        use_pallas = (n * ho * wo) >= PALLAS_MIN_M
        wf = w_raw * scale[:, None, None, None]           # fold BN scale (once)
        w2d = _weight_to_matmul(wf, cin, cout)             # (K = cin*16, Cout)
        b = bias
        if use_pallas:
            w2d = jnp.pad(w2d, ((0, 0), (0, LANES - cout))).astype(jnp.bfloat16)
            b = jnp.pad(b, (0, LANES - cout))               # padded channels -> 0
        else:
            w2d = w2d.astype(jnp.float32)
        layers.append(dict(stride=stride, padding=(1, 1), act="leaky_relu",
                           use_pallas=use_pallas, cout=cout, w2d=w2d,
                           bias2d=b.reshape(1, -1).astype(jnp.float32)))
        h, w = ho, wo

    # dis head: Conv2d(80, 1, k=4, s=1, p=0, bias=False) + Sigmoid.  M == N,
    # so it runs on the XLA path (numerically-stable jax.nn.sigmoid).
    layers.append(dict(stride=(1, 1), padding=(0, 0), act="sigmoid",
                       use_pallas=False, cout=1,
                       w2d=_weight_to_matmul(params["dis_w"], 80, 1).astype(jnp.float32),
                       bias2d=jnp.zeros((1, 1), jnp.float32)))
    return layers


def discriminator_forward(layers, x_nchw):
    h = x_nchw.transpose(0, 2, 3, 1).astype(jnp.bfloat16)   # NCHW -> NHWC once
    for layer in layers:
        h = conv_layer(h, layer)
    return h.transpose(0, 3, 1, 2)                           # (N, 1, 1, 1) NCHW


def reference_forward(params, x_nchw):
    """Float32 lax.conv reference of the PyTorch module (eval-mode BN)."""
    h = x_nchw.astype(jnp.float32)
    for (w, scale, bias), (_, _, stride) in zip(params["convs"], _CONV_SPECS):
        h = lax.conv_general_dilated(h, w, stride, ((1, 1), (1, 1)),
                                     dimension_numbers=("NCHW", "OIHW", "NCHW"),
                                     precision=lax.Precision.HIGHEST)
        h = h * scale[None, :, None, None] + bias[None, :, None, None]
        h = jnp.where(h > 0, h, 0.2 * h)
    h = lax.conv_general_dilated(h, params["dis_w"], (1, 1), ((0, 0), (0, 0)),
                                 dimension_numbers=("NCHW", "OIHW", "NCHW"),
                                 precision=lax.Precision.HIGHEST)
    return jax.nn.sigmoid(h)


if __name__ == "__main__":
    key = jax.random.PRNGKey(0)
    pkey, xkey = jax.random.split(key)
    params = init_params(pkey)

    # Smallest spatial size consistent with the module's stride/kernel chain:
    # H: 384 -> 128 -> 32 -> 8 -> 4 -> 1 ; W: 128 -> 32 -> 16 -> 8 -> 4 -> 1
    N, C, H, W = 2, 2, 384, 128
    x = jax.random.normal(xkey, (N, C, H, W), jnp.float32)

    layers = prepare_layers(params, N, H, W)
    fwd = jax.jit(functools.partial(discriminator_forward, layers))
    out = jax.block_until_ready(fwd(x))
    assert out.shape == (N, 1, 1, 1), out.shape

    ref = jax.block_until_ready(jax.jit(reference_forward)(params, x))
    max_err = float(jnp.max(jnp.abs(out.astype(jnp.float32) - ref)))
    # bf16 activations/weights with f32 accumulation vs f32 reference.
    assert max_err < 5e-2, f"max |pallas - f32 reference| = {max_err}"
    print("KERNEL_OK")
</pallas_src>

<mosaic_0001>
module attributes {stable_mosaic.version = 11 : i64} {
  func.func @_conv_matmul_kernel(%arg0: i32, %arg1: memref<4096x32xbf16, #tpu.memory_space<vmem>>, %arg2: memref<32x128xbf16, #tpu.memory_space<vmem>>, %arg3: memref<1x128xf32, #tpu.memory_space<vmem>>, %arg4: memref<4096x128xbf16, #tpu.memory_space<vmem>>) attributes {dimension_semantics = [#tpu.dimension_semantics<parallel>], iteration_bounds = array<i64: 2>, scalar_prefetch = 0 : i64, scratch_operands = 0 : i64, tpu.core_type = #tpu.core_type<tc>, window_params = [{transform_indices = @transform_0, window_bounds = array<i64: 4096, 32>}, {pipeline_mode = #tpu.pipeline_mode<synchronous>, transform_indices = @transform_1, window_bounds = array<i64: 32, 128>}, {pipeline_mode = #tpu.pipeline_mode<synchronous>, transform_indices = @transform_2, window_bounds = array<i64: 1, 128>}, {transform_indices = @transform_3, window_bounds = array<i64: 4096, 128>}]} {
    %c0 = arith.constant 0 : index
    %c0_0 = arith.constant 0 : index
    %0 = vector.load %arg1[%c0, %c0_0] : memref<4096x32xbf16, #tpu.memory_space<vmem>>, vector<4096x32xbf16>
    %c0_1 = arith.constant 0 : index
    %c0_2 = arith.constant 0 : index
    %1 = vector.load %arg2[%c0_1, %c0_2] : memref<32x128xbf16, #tpu.memory_space<vmem>>, vector<32x128xbf16>
    %cst = arith.constant dense<0.000000e+00> : vector<4096x128xf32>
    %2 = tpu.matmul %0, %1, %cst {dimension_numbers = #tpu.dot_dimension_numbers<[1], [0], [0], [1], [0, 0, 1, 1], [], []>} : vector<4096x32xbf16>, vector<32x128xbf16>, vector<4096x128xf32> -> vector<4096x128xf32>
    %c0_3 = arith.constant 0 : index
    %c0_4 = arith.constant 0 : index
    %3 = vector.load %arg3[%c0_3, %c0_4] : memref<1x128xf32, #tpu.memory_space<vmem>>, vector<1x128xf32>
    %4 = vector.broadcast %3 : vector<1x128xf32> to vector<4096x128xf32>
    %5 = arith.addf %2, %4 : vector<4096x128xf32>
    %cst_5 = arith.constant 0.000000e+00 : f32
    %6 = vector.broadcast %cst_5 : f32 to vector<4096x128xf32>
    %7 = arith.cmpf ogt, %5, %6 : vector<4096x128xf32>
    %cst_6 = arith.constant 2.000000e-01 : f32
    %8 = vector.broadcast %cst_6 : f32 to vector<4096x128xf32>
    %9 = arith.mulf %8, %5 : vector<4096x128xf32>
    %10 = arith.select %7, %5, %9 : vector<4096x128xi1>, vector<4096x128xf32>
    %11 = arith.truncf %10 : vector<4096x128xf32> to vector<4096x128xbf16>
    %c0_7 = arith.constant 0 : index
    %c0_8 = arith.constant 0 : index
    %12 = vector.load %arg4[%c0_7, %c0_8] : memref<4096x128xbf16, #tpu.memory_space<vmem>>, vector<4096x128xbf16>
    tpu.vector_store %arg4[%c0_7, %c0_8], %11 {strides = array<i32>} : memref<4096x128xbf16, #tpu.memory_space<vmem>>, vector<4096x128xbf16>,
    return
  }
  func.func @transform_0(%arg0: i32) -> (i32, i32) {
    %c0_i32 = arith.constant 0 : i32
    %c0_i32_0 = arith.constant 0 : i32
    return %arg0, %c0_i32 : i32, i32
  }
  func.func @transform_1(%arg0: i32) -> (i32, i32) {
    %c0_i32 = arith.constant 0 : i32
    %c0_i32_0 = arith.constant 0 : i32
    %c0_i32_1 = arith.constant 0 : i32
    return %c0_i32, %c0_i32_0 : i32, i32
  }
  func.func @transform_2(%arg0: i32) -> (i32, i32) {
    %c0_i32 = arith.constant 0 : i32
    %c0_i32_0 = arith.constant 0 : i32
    %c0_i32_1 = arith.constant 0 : i32
    return %c0_i32, %c0_i32_0 : i32, i32
  }
  func.func @transform_3(%arg0: i32) -> (i32, i32) {
    %c0_i32 = arith.constant 0 : i32
    %c0_i32_0 = arith.constant 0 : i32
    return %arg0, %c0_i32 : i32, i32
  }
}

module attributes {stable_mosaic.version = 11 : i64} {
  func.func @_conv_matmul_kernel(%arg0: i32, %arg1: memref<512x320xbf16, #tpu.memory_space<vmem>>, %arg2: memref<320x128xbf16, #tpu.memory_space<vmem>>, %arg3: memref<1x128xf32, #tpu.memory_space<vmem>>, %arg4: memref<512x128xbf16, #tpu.memory_space<vmem>>) attributes {dimension_semantics = [#tpu.dimension_semantics<parallel>], iteration_bounds = array<i64: 2>, scalar_prefetch = 0 : i64, scratch_operands = 0 : i64, tpu.core_type = #tpu.core_type<tc>, window_params = [{transform_indices = @transform_0, window_bounds = array<i64: 512, 320>}, {pipeline_mode = #tpu.pipeline_mode<synchronous>, transform_indices = @transform_1, window_bounds = array<i64: 320, 128>}, {pipeline_mode = #tpu.pipeline_mode<synchronous>, transform_indices = @transform_2, window_bounds = array<i64: 1, 128>}, {transform_indices = @transform_3, window_bounds = array<i64: 512, 128>}]} {
    %c0 = arith.constant 0 : index
    %c0_0 = arith.constant 0 : index
    %0 = vector.load %arg1[%c0, %c0_0] : memref<512x320xbf16, #tpu.memory_space<vmem>>, vector<512x320xbf16>
    %c0_1 = arith.constant 0 : index
    %c0_2 = arith.constant 0 : index
    %1 = vector.load %arg2[%c0_1, %c0_2] : memref<320x128xbf16, #tpu.memory_space<vmem>>, vector<320x128xbf16>
    %cst = arith.constant dense<0.000000e+00> : vector<512x128xf32>
    %2 = tpu.matmul %0, %1, %cst {dimension_numbers = #tpu.dot_dimension_numbers<[1], [0], [0], [1], [0, 0, 1, 1], [], []>} : vector<512x320xbf16>, vector<320x128xbf16>, vector<512x128xf32> -> vector<512x128xf32>
    %c0_3 = arith.constant 0 : index
    %c0_4 = arith.constant 0 : index
    %3 = vector.load %arg3[%c0_3, %c0_4] : memref<1x128xf32, #tpu.memory_space<vmem>>, vector<1x128xf32>
    %4 = vector.broadcast %3 : vector<1x128xf32> to vector<512x128xf32>
    %5 = arith.addf %2, %4 : vector<512x128xf32>
    %cst_5 = arith.constant 0.000000e+00 : f32
    %6 = vector.broadcast %cst_5 : f32 to vector<512x128xf32>
    %7 = arith.cmpf ogt, %5, %6 : vector<512x128xf32>
    %cst_6 = arith.constant 2.000000e-01 : f32
    %8 = vector.broadcast %cst_6 : f32 to vector<512x128xf32>
    %9 = arith.mulf %8, %5 : vector<512x128xf32>
    %10 = arith.select %7, %5, %9 : vector<512x128xi1>, vector<512x128xf32>
    %11 = arith.truncf %10 : vector<512x128xf32> to vector<512x128xbf16>
    %c0_7 = arith.constant 0 : index
    %c0_8 = arith.constant 0 : index
    %12 = vector.load %arg4[%c0_7, %c0_8] : memref<512x128xbf16, #tpu.memory_space<vmem>>, vector<512x128xbf16>
    tpu.vector_store %arg4[%c0_7, %c0_8], %11 {strides = array<i32>} : memref<512x128xbf16, #tpu.memory_space<vmem>>, vector<512x128xbf16>,
    return
  }
  func.func @transform_0(%arg0: i32) -> (i32, i32) {
    %c0_i32 = arith.constant 0 : i32
    %c0_i32_0 = arith.constant 0 : i32
    return %arg0, %c0_i32 : i32, i32
  }
  func.func @transform_1(%arg0: i32) -> (i32, i32) {
    %c0_i32 = arith.constant 0 : i32
    %c0_i32_0 = arith.constant 0 : i32
    %c0_i32_1 = arith.constant 0 : i32
    return %c0_i32, %c0_i32_0 : i32, i32
  }
  func.func @transform_2(%arg0: i32) -> (i32, i32) {
    %c0_i32 = arith.constant 0 : i32
    %c0_i32_0 = arith.constant 0 : i32
    %c0_i32_1 = arith.constant 0 : i32
    return %c0_i32, %c0_i32_0 : i32, i32
  }
  func.func @transform_3(%arg0: i32) -> (i32, i32) {
    %c0_i32 = arith.constant 0 : i32
    %c0_i32_0 = arith.constant 0 : i32
    return %arg0, %c0_i32 : i32, i32
  }
}

</mosaic_0001>

<bundles_post_ra>
// kernel: discriminator_forward.2
= control target key start
LH: loop header
LB: loop body
LE: loop exit
PB: predicated region body
PF: predicated region fallthrough
CT: control target
= control target key end

     0   :  { %s13155_s12 = smov 0   ;;  %s15899_s0 = inlined_call_operand.vmem [shape: bf16[8192,32], index: 0, kind: input, shape index: {}]   ;;  %s15900_s1 = inlined_call_operand.vmem [shape: bf16[32,128], index: 1, kind: input, shape index: {}]   ;;  %s15901_s2 = inlined_call_operand.vmem [shape: f32[1,128], index: 2, kind: input, shape index: {}]   ;;  %s15902_s3 = inlined_call_operand.vmem [shape: bf16[8192,128], index: 3, kind: output, shape index: {}]  }
   0x1 LB: > { %s8992_s13 = sadd.s32 4294967295, %s13133_s12   ;;  %p8996_p0 = scmp.ge.s32.totalorder %s13133_s12, 1  ;;  %s13133_s12 = sphi %s13155_s12, %s13_s12  }
   0x2   : > { %p138_p1 = scmp.lt.s32.totalorder %s13133_s12, 3 }
   0x4   : > { %p139_p2 = pnand %p8996_p0, %p138_p1 }
   0x6   : > { %142 = sbr.rel (%p139_p2) target bundleno = 820 (0x334), region = 32 }
   0xd   : > { %v12863_v0 = vld [vmem:[%s15900_s1] sm:$0xff]   ;;  %s8997_s16 = sshll.u32 %s8992_s13, 9  ;;  %v12864_v1 = vld [vmem:[%s15900_s1 + $0x8] sm:$0xff]   ;;  %vm1990_vm0 = vcmask 261120  }
   0xe   : > { %p163_p3 = scmp.lt.s32.totalorder %s8997_s16, 1023  ;;  %12335 = vmatprep.subr.bf16.mxu0 %v12863_v0  ;;  %12851 = vmatprep.subr.bf16.mxu1 %v12863_v0 }
   0xf   : > { %12336 = vmatpush3.bf16.msra.mxu0 %v12863_v0  ;;  %12853 = vmatpush3.bf16.msra.mxu1 %v12863_v0 }
  0x10   : > { %s15970_s16 = smov (!%p163_p3, %s8997_s16), 1023  ;;  %12337 = vmatprep.subr.bf16.mxu0 %v12864_v1  ;;  %12852 = vmatprep.subr.bf16.mxu1 %v12864_v1 }
  0x11   : > { %s8998_s19 = sshll.u32 %s15970_s16, 2 }
  0x12   : > { %s13177_s22 = scalar_lea.vmem %s15899_s0, %s8998_s19  ;;  %s13428_s27 = scalar_lea.vmem %s15902_s3, %s8998_s19 }
  0x13   : > { %12338 = vmatpush3.bf16.msra.mxu0 %v12864_v1  ;;  %12854 = vmatpush3.bf16.msra.mxu1 %v12864_v1  ;;  %v12865_v2 = vld [vmem:[%s13177_s22] sm:$0xff]   ;;  %v12867_v4 = vld [vmem:[%s13177_s22 + $0x8] sm:$0xff]   ;;  %v12869_v6 = vld [vmem:[%s13177_s22 + $0x10] sm:$0xff]  }
  0x14   : > { %v12866_v3 = vld [vmem:[%s13177_s22 + $0x400] sm:$0xff]   ;;  %12339 = vmatprep.mubr.msk.bf16.mxu0 %vm1990_vm0, %v12865_v2  ;;  %v12868_v5 = vld [vmem:[%s13177_s22 + $0x408] sm:$0xff]   ;;  %v12870_v7 = vld [vmem:[%s13177_s22 + $0x410] sm:$0xff]  }
  0x15   : > { %12595 = vmatprep.mubr.msk.bf16.mxu1 %vm1990_vm0, %v12866_v3  ;;  %v12871_v8 = vld [vmem:[%s13177_s22 + $0x18] sm:$0xff]   ;;  %v12873_v10 = vld [vmem:[%s13177_s22 + $0x20] sm:$0xff]   ;;  %v12875_v12 = vld [vmem:[%s13177_s22 + $0x28] sm:$0xff]  }
  0x16   : > { %12340 = vmatmul.mubr.msk.bf16.vlgmr.msra.gmra.mrb[0].mxu0 %vm1990_vm0, %v12867_v4  ;;  %12596 = vmatmul.mubr.msk.bf16.vlgmr.msra.gmra.mrb[0].mxu1 %vm1990_vm0, %v12868_v5  ;;  %v12872_v9 = vld [vmem:[%s13177_s22 + $0x418] sm:$0xff]   ;;  %v12874_v11 = vld [vmem:[%s13177_s22 + $0x420] sm:$0xff]   ;;  %v12876_v13 = vld [vmem:[%s13177_s22 + $0x428] sm:$0xff]  }
  0x17   : > { %12343 = vmatprep.mubr.msk.bf16.mxu0 %vm1990_vm0, %v12869_v6  ;;  %12599 = vmatprep.mubr.msk.bf16.mxu1 %vm1990_vm0, %v12870_v7  ;;  %v12877_v14 = vld [vmem:[%s13177_s22 + $0x30] sm:$0xff]   ;;  %v12879_v16 = vld [vmem:[%s13177_s22 + $0x38] sm:$0xff]   ;;  %v12881_v18 = vld [vmem:[%s13177_s22 + $0x40] sm:$0xff]  }
  0x18   : > { %v12878_v15 = vld [vmem:[%s13177_s22 + $0x430] sm:$0xff]   ;;  %v12880_v17 = vld [vmem:[%s13177_s22 + $0x438] sm:$0xff]   ;;  %v12882_v19 = vld [vmem:[%s13177_s22 + $0x440] sm:$0xff]  }
  0x19   : > { %v12883_v20 = vld [vmem:[%s13177_s22 + $0x48] sm:$0xff]   ;;  %v12885_v22 = vld [vmem:[%s13177_s22 + $0x50] sm:$0xff]   ;;  %v12887_v24 = vld [vmem:[%s13177_s22 + $0x58] sm:$0xff]  }
  0x1a   : > { %v12884_v21 = vld [vmem:[%s13177_s22 + $0x448] sm:$0xff]   ;;  %v12886_v23 = vld [vmem:[%s13177_s22 + $0x450] sm:$0xff]   ;;  %v12888_v25 = vld [vmem:[%s13177_s22 + $0x458] sm:$0xff]  }
  0x1b   : > { %v12889_v26 = vld [vmem:[%s13177_s22 + $0x60] sm:$0xff]   ;;  %v12891_v28 = vld [vmem:[%s13177_s22 + $0x68] sm:$0xff]   ;;  %v12893_v30 = vld [vmem:[%s13177_s22 + $0x70] sm:$0xff]  }
  0x1c   : > { %v12890_v27 = vld [vmem:[%s13177_s22 + $0x460] sm:$0xff]   ;;  %v12892_v29 = vld [vmem:[%s13177_s22 + $0x468] sm:$0xff]   ;;  %v12894_v31 = vld [vmem:[%s13177_s22 + $0x470] sm:$0xff]  }
  0x1d   : > { %v12895_v32 = vld [vmem:[%s13177_s22 + $0x78] sm:$0xff]   ;;  %v12897_v34 = vld [vmem:[%s13177_s22 + $0x80] sm:$0xff]   ;;  %v12899_v36 = vld [vmem:[%s13177_s22 + $0x88] sm:$0xff]  }
  0x1e   : > { %12344 = vmatmul.mubr.msk.bf16.gmra.mrb[4].mxu0 %vm1990_vm0, %v12871_v8  ;;  %12600 = vmatmul.mubr.msk.bf16.gmra.mrb[4].mxu1 %vm1990_vm0, %v12872_v9  ;;  %v12896_v33 = vld [vmem:[%s13177_s22 + $0x478] sm:$0xff]   ;;  %v12898_v35 = vld [vmem:[%s13177_s22 + $0x480] sm:$0xff]   ;;  %v12900_v37 = vld [vmem:[%s13177_s22 + $0x488] sm:$0xff]  }
  0x1f   : > { %12347 = vmatprep.mubr.msk.bf16.mxu0 %vm1990_vm0, %v12873_v10  ;;  %12603 = vmatprep.mubr.msk.bf16.mxu1 %vm1990_vm0, %v12874_v11  ;;  %v12901_v38 = vld [vmem:[%s13177_s22 + $0x90] sm:$0xff]   ;;  %v12903_v40 = vld [vmem:[%s13177_s22 + $0x98] sm:$0xff]   ;;  %v12905_v42 = vld [vmem:[%s13177_s22 + $0xa0] sm:$0xff]  }
  0x20   : > { %v12902_v39 = vld [vmem:[%s13177_s22 + $0x490] sm:$0xff]   ;;  %v12904_v41 = vld [vmem:[%s13177_s22 + $0x498] sm:$0xff]   ;;  %v12906_v43 = vld [vmem:[%s13177_s22 + $0x4a0] sm:$0xff]  }
  0x21   : > { %v12907_v44 = vld [vmem:[%s13177_s22 + $0xa8] sm:$0xff]   ;;  %v12909_v46 = vld [vmem:[%s13177_s22 + $0xb0] sm:$0xff]   ;;  %v12911_v48 = vld [vmem:[%s13177_s22 + $0xb8] sm:$0xff]  }
  0x22   : > { %v12908_v45 = vld [vmem:[%s13177_s22 + $0x4a8] sm:$0xff]   ;;  %v12910_v47 = vld [vmem:[%s13177_s22 + $0x4b0] sm:$0xff]   ;;  %v12912_v49 = vld [vmem:[%s13177_s22 + $0x4b8] sm:$0xff]  }
  0x23   : > { %v12913_v50 = vld [vmem:[%s13177_s22 + $0xc0] sm:$0xff]   ;;  %v12915_v52 = vld [vmem:[%s13177_s22 + $0xc8] sm:$0xff]   ;;  %v12917_v54 = vld [vmem:[%s13177_s22 + $0xd0] sm:$0xff]  }
  0x24   : > { %v12914_v51 = vld [vmem:[%s13177_s22 + $0x4c0] sm:$0xff]   ;;  %v12916_v53 = vld [vmem:[%s13177_s22 + $0x4c8] sm:$0xff]   ;;  %v12918_v55 = vld [vmem:[%s13177_s22 + $0x4d0] sm:$0xff]  }
  0x25   : > { %v12919_v56 = vld [vmem:[%s13177_s22 + $0xd8] sm:$0xff]   ;;  %v12921_v58 = vld [vmem:[%s13177_s22 + $0xe0] sm:$0xff]   ;;  %v12923_v60 = vld [vmem:[%s13177_s22 + $0xe8] sm:$0xff]  }
  0x26   : > { %12348 = vmatmul.mubr.msk.bf16.gmra.mrb[8].mxu0 %vm1990_vm0, %v12875_v12  ;;  %12604 = vmatmul.mubr.msk.bf16.gmra.mrb[8].mxu1 %vm1990_vm0, %v12876_v13  ;;  %v12920_v57 = vld [vmem:[%s13177_s22 + $0x4d8] sm:$0xff]   ;;  %v12922_v59 = vld [vmem:[%s13177_s22 + $0x4e0] sm:$0xff]   ;;  %v12924_v61 = vld [vmem:[%s13177_s22 + $0x4e8] sm:$0xff]  }
  0x27   : > { %12351 = vmatprep.mubr.msk.bf16.mxu0 %vm1990_vm0, %v12877_v14  ;;  %12607 = vmatprep.mubr.msk.bf16.mxu1 %vm1990_vm0, %v12878_v15  ;;  %v12925_v62 = vld [vmem:[%s13177_s22 + $0xf0] sm:$0xff]   ;;  %v12927_v0 = vld [vmem:[%s13177_s22 + $0xf8] sm:$0xff]   ;;  %v12929_v2 = vld [vmem:[%s13177_s22 + $0x100] sm:$0xff]  }
  0x28   : > { %v12926_v63 = vld [vmem:[%s13177_s22 + $0x4f0] sm:$0xff]   ;;  %v12928_v1 = vld [vmem:[%s13177_s22 + $0x4f8] sm:$0xff]   ;;  %v12930_v3 = vld [vmem:[%s13177_s22 + $0x500] sm:$0xff]  }
  0x29   : > { %v12931_v4 = vld [vmem:[%s13177_s22 + $0x108] sm:$0xff]   ;;  %v12933_v6 = vld [vmem:[%s13177_s22 + $0x110] sm:$0xff]   ;;  %v12935_v8 = vld [vmem:[%s13177_s22 + $0x118] sm:$0xff]  }
  0x2a   : > { %v12932_v5 = vld [vmem:[%s13177_s22 + $0x508] sm:$0xff]   ;;  %v12934_v7 = vld [vmem:[%s13177_s22 + $0x510] sm:$0xff]   ;;  %v12936_v9 = vld [vmem:[%s13177_s22 + $0x518] sm:$0xff]  }
  0x2b   : > { %v12937_v10 = vld [vmem:[%s13177_s22 + $0x120] sm:$0xff]   ;;  %v12939_v12 = vld [vmem:[%s13177_s22 + $0x128] sm:$0xff]   ;;  %v12941_v14 = vld [vmem:[%s13177_s22 + $0x130] sm:$0xff]  }
  0x2c   : > { %v12938_v11 = vld [vmem:[%s13177_s22 + $0x520] sm:$0xff]   ;;  %v12940_v13 = vld [vmem:[%s13177_s22 + $0x528] sm:$0xff]   ;;  %v12942_v15 = vld [vmem:[%s13177_s22 + $0x530] sm:$0xff]  }
  0x2e   : > { %12352 = vmatmul.mubr.msk.bf16.gmra.mrb[12].mxu0 %vm1990_vm0, %v12879_v16  ;;  %12608 = vmatmul.mubr.msk.bf16.gmra.mrb[12].mxu1 %vm1990_vm0, %v12880_v17  ;;  %v12943_v16 = vld [vmem:[%s13177_s22 + $0x138] sm:$0xff]  }
  0x2f   : > { %12355 = vmatprep.mubr.msk.bf16.mxu0 %vm1990_vm0, %v12881_v18  ;;  %12611 = vmatprep.mubr.msk.bf16.mxu1 %vm1990_vm0, %v12882_v19  ;;  %v12944_v17 = vld [vmem:[%s13177_s22 + $0x538] sm:$0xff]   ;;  %v12945_v18 = vld [vmem:[%s13177_s22 + $0x140] sm:$0xff]  }
  0x30   : > { %v12946_v19 = vld [vmem:[%s13177_s22 + $0x540] sm:$0xff]  }
  0x36   : > { %12356 = vmatmul.mubr.msk.bf16.gmra.mrb[16].mxu0 %vm1990_vm0, %v12883_v20  ;;  %12612 = vmatmul.mubr.msk.bf16.gmra.mrb[16].mxu1 %vm1990_vm0, %v12884_v21  ;;  %v12947_v20 = vld [vmem:[%s13177_s22 + $0x148] sm:$0xff]  }
  0x37   : > { %12359 = vmatprep.mubr.msk.bf16.mxu0 %vm1990_vm0, %v12885_v22  ;;  %12615 = vmatprep.mubr.msk.bf16.mxu1 %vm1990_vm0, %v12886_v23  ;;  %v12948_v21 = vld [vmem:[%s13177_s22 + $0x548] sm:$0xff]   ;;  %v12949_v22 = vld [vmem:[%s13177_s22 + $0x150] sm:$0xff]  }
  0x38   : > { %v12950_v23 = vld [vmem:[%s13177_s22 + $0x550] sm:$0xff]  }
  0x3e   : > { %12360 = vmatmul.mubr.msk.bf16.gmra.mrb[20].mxu0 %vm1990_vm0, %v12887_v24  ;;  %12616 = vmatmul.mubr.msk.bf16.gmra.mrb[20].mxu1 %vm1990_vm0, %v12888_v25  ;;  %v12951_v24 = vld [vmem:[%s13177_s22 + $0x158] sm:$0xff]  }
  0x3f   : > { %12363 = vmatprep.mubr.msk.bf16.mxu0 %vm1990_vm0, %v12889_v26  ;;  %12619 = vmatprep.mubr.msk.bf16.mxu1 %vm1990_vm0, %v12890_v27  ;;  %v12952_v25 = vld [vmem:[%s13177_s22 + $0x558] sm:$0xff]   ;;  %v12953_v26 = vld [vmem:[%s13177_s22 + $0x160] sm:$0xff]  }
  0x40   : > { %v12954_v27 = vld [vmem:[%s13177_s22 + $0x560] sm:$0xff]  }
  0x46   : > { %12364 = vmatmul.mubr.msk.bf16.gmra.mrb[24].mxu0 %vm1990_vm0, %v12891_v28  ;;  %12620 = vmatmul.mubr.msk.bf16.gmra.mrb[24].mxu1 %vm1990_vm0, %v12892_v29  ;;  %v12955_v28 = vld [vmem:[%s13177_s22 + $0x168] sm:$0xff]  }
  0x47   : > { %12367 = vmatprep.mubr.msk.bf16.mxu0 %vm1990_vm0, %v12893_v30  ;;  %12623 = vmatprep.mubr.msk.bf16.mxu1 %vm1990_vm0, %v12894_v31  ;;  %v12956_v29 = vld [vmem:[%s13177_s22 + $0x568] sm:$0xff]   ;;  %v12957_v30 = vld [vmem:[%s13177_s22 + $0x170] sm:$0xff]  }
  0x48   : > { %v12958_v31 = vld [vmem:[%s13177_s22 + $0x570] sm:$0xff]  }
  0x4e   : > { %12368 = vmatmul.mubr.msk.bf16.gmra.mrb[28].mxu0 %vm1990_vm0, %v12895_v32  ;;  %12624 = vmatmul.mubr.msk.bf16.gmra.mrb[28].mxu1 %vm1990_vm0, %v12896_v33  ;;  %v12959_v32 = vld [vmem:[%s13177_s22 + $0x178] sm:$0xff]  }
  0x4f   : > { %12371 = vmatprep.mubr.msk.bf16.mxu0 %vm1990_vm0, %v12897_v34  ;;  %12627 = vmatprep.mubr.msk.bf16.mxu1 %vm1990_vm0, %v12898_v35  ;;  %v12960_v33 = vld [vmem:[%s13177_s22 + $0x578] sm:$0xff]   ;;  %v12961_v34 = vld [vmem:[%s13177_s22 + $0x180] sm:$0xff]  }
  0x50   : > { %v12962_v35 = vld [vmem:[%s13177_s22 + $0x580] sm:$0xff]  }
  0x56   : > { %12372 = vmatmul.mubr.msk.bf16.gmra.mrb[32].mxu0 %vm1990_vm0, %v12899_v36  ;;  %12628 = vmatmul.mubr.msk.bf16.gmra.mrb[32].mxu1 %vm1990_vm0, %v12900_v37  ;;  %v12963_v36 = vld [vmem:[%s13177_s22 + $0x188] sm:$0xff]  }
  0x57   : > { %12375 = vmatprep.mubr.msk.bf16.mxu0 %vm1990_vm0, %v12901_v38  ;;  %12631 = vmatprep.mubr.msk.bf16.mxu1 %vm1990_vm0, %v12902_v39  ;;  %v12964_v37 = vld [vmem:[%s13177_s22 + $0x588] sm:$0xff]   ;;  %v12965_v38 = vld [vmem:[%s13177_s22 + $0x190] sm:$0xff]  }
  0x58   : > { %v12966_v39 = vld [vmem:[%s13177_s22 + $0x590] sm:$0xff]  }
  0x5e   : > { %12376 = vmatmul.mubr.msk.bf16.gmra.mrb[36].mxu0 %vm1990_vm0, %v12903_v40  ;;  %12632 = vmatmul.mubr.msk.bf16.gmra.mrb[36].mxu1 %vm1990_vm0, %v12904_v41  ;;  %v12967_v40 = vld [vmem:[%s13177_s22 + $0x198] sm:$0xff]  }
  0x5f   : > { %12379 = vmatprep.mubr.msk.bf16.mxu0 %vm1990_vm0, %v12905_v42  ;;  %12635 = vmatprep.mubr.msk.bf16.mxu1 %vm1990_vm0, %v12906_v43  ;;  %v12968_v41 = vld [vmem:[%s13177_s22 + $0x598] sm:$0xff]   ;;  %v12969_v42 = vld [vmem:[%s13177_s22 + $0x1a0] sm:$0xff]  }
  0x60   : > { %v12970_v43 = vld [vmem:[%s13177_s22 + $0x5a0] sm:$0xff]  }
  0x66   : > { %12380 = vmatmul.mubr.msk.bf16.gmra.mrb[40].mxu0 %vm1990_vm0, %v12907_v44  ;;  %12636 = vmatmul.mubr.msk.bf16.gmra.mrb[40].mxu1 %vm1990_vm0, %v12908_v45  ;;  %v12971_v44 = vld [vmem:[%s13177_s22 + $0x1a8] sm:$0xff]  }
  0x67   : > { %12383 = vmatprep.mubr.msk.bf16.mxu0 %vm1990_vm0, %v12909_v46  ;;  %12639 = vmatprep.mubr.msk.bf16.mxu1 %vm1990_vm0, %v12910_v47  ;;  %v12972_v45 = vld [vmem:[%s13177_s22 + $0x5a8] sm:$0xff]   ;;  %v12973_v46 = vld [vmem:[%s13177_s22 + $0x1b0] sm:$0xff]  }
  0x68   : > { %v12974_v47 = vld [vmem:[%s13177_s22 + $0x5b0] sm:$0xff]  }
  0x6e   : > { %12384 = vmatmul.mubr.msk.bf16.gmra.mrb[44].mxu0 %vm1990_vm0, %v12911_v48  ;;  %12640 = vmatmul.mubr.msk.bf16.gmra.mrb[44].mxu1 %vm1990_vm0, %v12912_v49  ;;  %v13399_v48 = vld [vmem:[%s15901_s2] ss:$0 sm:$0xff]  ;;  %v12975_v49 = vld [vmem:[%s13177_s22 + $0x1b8] sm:$0xff]  }
  0x6f   : > { %12387 = vmatprep.mubr.msk.bf16.mxu0 %vm1990_vm0, %v12913_v50  ;;  %12643 = vmatprep.mubr.msk.bf16.mxu1 %vm1990_vm0, %v12914_v51  ;;  %v12976_v51 = vld [vmem:[%s13177_s22 + $0x5b8] sm:$0xff]  }
  0x76   : > { %12388 = vmatmul.mubr.msk.bf16.gmra.mrb[48].mxu0 %vm1990_vm0, %v12915_v52  ;;  %12644 = vmatmul.mubr.msk.bf16.gmra.mrb[48].mxu1 %vm1990_vm0, %v12916_v53  ;;  %v12977_v52 = vld [vmem:[%s13177_s22 + $0x1c0] sm:$0xff]  }
  0x77   : > { %12391 = vmatprep.mubr.msk.bf16.mxu0 %vm1990_vm0, %v12917_v54  ;;  %12647 = vmatprep.mubr.msk.bf16.mxu1 %vm1990_vm0, %v12918_v55 }
  0x7e   : > { %12392 = vmatmul.mubr.msk.bf16.gmra.mrb[52].mxu0 %vm1990_vm0, %v12919_v56  ;;  %12648 = vmatmul.mubr.msk.bf16.gmra.mrb[52].mxu1 %vm1990_vm0, %v12920_v57 }
  0x7f   : > { %12395 = vmatprep.mubr.msk.bf16.mxu0 %vm1990_vm0, %v12921_v58  ;;  %12651 = vmatprep.mubr.msk.bf16.mxu1 %vm1990_vm0, %v12922_v59 }
  0x86   : > { %12396 = vmatmul.mubr.msk.bf16.gmra.mrb[56].mxu0 %vm1990_vm0, %v12923_v60  ;;  %12652 = vmatmul.mubr.msk.bf16.gmra.mrb[56].mxu1 %vm1990_vm0, %v12924_v61 }
  0x87   : > { %12399 = vmatprep.mubr.msk.bf16.mxu0 %vm1990_vm0, %v12925_v62  ;;  %12655 = vmatprep.mubr.msk.bf16.mxu1 %vm1990_vm0, %v12926_v63 }
  0x8e   : > { %12400 = vmatmul.mubr.msk.bf16.gmra.mrb[60].mxu0 %vm1990_vm0, %v12927_v0  ;;  %12656 = vmatmul.mubr.msk.bf16.gmra.mrb[60].mxu1 %vm1990_vm0, %v12928_v1  ;;  %v12978_v1 = vld [vmem:[%s13177_s22 + $0x5c0] sm:$0xff]  }
  0x8f   : > { %12403 = vmatprep.mubr.msk.bf16.mxu0 %vm1990_vm0, %v12929_v2  ;;  %12659 = vmatprep.mubr.msk.bf16.mxu1 %vm1990_vm0, %v12930_v3 }
  0x96   : > { %12404 = vmatmul.mubr.msk.bf16.gmra.mrb[64].mxu0 %vm1990_vm0, %v12931_v4  ;;  %12660 = vmatmul.mubr.msk.bf16.gmra.mrb[64].mxu1 %vm1990_vm0, %v12932_v5 }
  0x97   : > { %12407 = vmatprep.mubr.msk.bf16.mxu0 %vm1990_vm0, %v12933_v6  ;;  %12663 = vmatprep.mubr.msk.bf16.mxu1 %vm1990_vm0, %v12934_v7 }
  0x9e   : > { %12408 = vmatmul.mubr.msk.bf16.gmra.mrb[68].mxu0 %vm1990_vm0, %v12935_v8  ;;  %12664 = vmatmul.mubr.msk.bf16.gmra.mrb[68].mxu1 %vm1990_vm0, %v12936_v9 }
  0x9f   : > { %12411 = vmatprep.mubr.msk.bf16.mxu0 %vm1990_vm0, %v12937_v10  ;;  %12667 = vmatprep.mubr.msk.bf16.mxu1 %vm1990_vm0, %v12938_v11 }
  0xa6   : > { %12412 = vmatmul.mubr.msk.bf16.gmra.mrb[72].mxu0 %vm1990_vm0, %v12939_v12  ;;  %12668 = vmatmul.mubr.msk.bf16.gmra.mrb[72].mxu1 %vm1990_vm0, %v12940_v13  ;;  %v12979_v13 = vld [vmem:[%s13177_s22 + $0x1c8] sm:$0xff]  }
  0xa7   : > { %12415 = vmatprep.mubr.msk.bf16.mxu0 %vm1990_vm0, %v12941_v14  ;;  %12671 = vmatprep.mubr.msk.bf16.mxu1 %vm1990_vm0, %v12942_v15 }
  0xae   : > { %12416 = vmatmul.mubr.msk.bf16.gmra.mrb[76].mxu0 %vm1990_vm0, %v12943_v16  ;;  %12672 = vmatmul.mubr.msk.bf16.gmra.mrb[76].mxu1 %vm1990_vm0, %v12944_v17 }
  0xaf   : > { %12419 = vmatprep.mubr.msk.bf16.mxu0 %vm1990_vm0, %v12945_v18  ;;  %12675 = vmatprep.mubr.msk.bf16.mxu1 %vm1990_vm0, %v12946_v19  ;;  %v12980_v18 = vld [vmem:[%s13177_s22 + $0x5c8] sm:$0xff]   ;;  %v12981_v19 = vld [vmem:[%s13177_s22 + $0x1d0] sm:$0xff]  }
  0xb6   : > { %12420 = vmatmul.mubr.msk.bf16.gmra.mrb[80].mxu0 %vm1990_vm0, %v12947_v20  ;;  %12676 = vmatmul.mubr.msk.bf16.gmra.mrb[80].mxu1 %vm1990_vm0, %v12948_v21 }
  0xb7   : > { %12423 = vmatprep.mubr.msk.bf16.mxu0 %vm1990_vm0, %v12949_v22  ;;  %12679 = vmatprep.mubr.msk.bf16.mxu1 %vm1990_vm0, %v12950_v23 }
  0xbe   : > { %12424 = vmatmul.mubr.msk.bf16.gmra.mrb[84].mxu0 %vm1990_vm0, %v12951_v24  ;;  %12680 = vmatmul.mubr.msk.bf16.gmra.mrb[84].mxu1 %vm1990_vm0, %v12952_v25  ;;  %v12982_v24 = vld [vmem:[%s13177_s22 + $0x5d0] sm:$0xff]  }
  0xbf   : > { %12427 = vmatprep.mubr.msk.bf16.mxu0 %vm1990_vm0, %v12953_v26  ;;  %12683 = vmatprep.mubr.msk.bf16.mxu1 %vm1990_vm0, %v12954_v27 }
  0xc6   : > { %12428 = vmatmul.mubr.msk.bf16.gmra.mrb[88].mxu0 %vm1990_vm0, %v12955_v28  ;;  %12684 = vmatmul.mubr.msk.bf16.gmra.mrb[88].mxu1 %vm1990_vm0, %v12956_v29 }
  0xc7   : > { %12431 = vmatprep.mubr.msk.bf16.mxu0 %vm1990_vm0, %v12957_v30  ;;  %12687 = vmatprep.mubr.msk.bf16.mxu1 %vm1990_vm0, %v12958_v31 }
  0xce   : > { %12432 = vmatmul.mubr.msk.bf16.gmra.mrb[92].mxu0 %vm1990_vm0, %v12959_v32  ;;  %12688 = vmatmul.mubr.msk.bf16.gmra.mrb[92].mxu1 %vm1990_vm0, %v12960_v33 }
  0xcf   : > { %12435 = vmatprep.mubr.msk.bf16.mxu0 %vm1990_vm0, %v12961_v34  ;;  %12691 = vmatprep.mubr.msk.bf16.mxu1 %vm1990_vm0, %v12962_v35 }
  0xd6   : > { %12436 = vmatmul.mubr.msk.bf16.gmra.mrb[96].mxu0 %vm1990_vm0, %v12963_v36  ;;  %12692 = vmatmul.mubr.msk.bf16.gmra.mrb[96].mxu1 %vm1990_vm0, %v12964_v37 }
  0xd7   : > { %12439 = vmatprep.mubr.msk.bf16.mxu0 %vm1990_vm0, %v12965_v38  ;;  %12695 = vmatprep.mubr.msk.bf16.mxu1 %vm1990_vm0, %v12966_v39 }
  0xde   : > { %12440 = vmatmul.mubr.msk.bf16.gmra.mrb[100].mxu0 %vm1990_vm0, %v12967_v40  ;;  %12696 = vmatmul.mubr.msk.bf16.gmra.mrb[100].mxu1 %vm1990_vm0, %v12968_v41 }
  0xdf   : > { %12443 = vmatprep.mubr.msk.bf16.mxu0 %vm1990_vm0, %v12969_v42  ;;  %12699 = vmatprep.mubr.msk.bf16.mxu1 %vm1990_vm0, %v12970_v43 }
  0xe6   : > { %12444 = vmatmul.mubr.msk.bf16.gmra.mrb[104].mxu0 %vm1990_vm0, %v12971_v44  ;;  %12700 = vmatmul.mubr.msk.bf16.gmra.mrb[104].mxu1 %vm1990_vm0, %v12972_v45 }
  0xe7   : > { %12447 = vmatprep.mubr.msk.bf16.mxu0 %vm1990_vm0, %v12973_v46  ;;  %12703 = vmatprep.mubr.msk.bf16.mxu1 %vm1990_vm0, %v12974_v47 }
  0xe9   : > { %v12341_v50 = vpop.f32.mrb[0].mxu0  ;;  %v12597_v54 = vpop.f32.mrb[0].mxu1 }
  0xea   : > { %v2802_v53 = vadd.f32 %v12341_v50, %v13399_v48  ;;  %v2793_v55 = vpop.f32.mrb[1].mxu0  ;;  %v3826_v56 = vadd.f32 %v12597_v54, %v13399_v48  ;;  %v3817_v58 = vpop.f32.mrb[1].mxu1  ;;  %v12983_v50 = vld [vmem:[%s13177_s22 + $0x1d8] sm:$0xff]  }
  0xeb   : > { %v2794_v57 = vadd.f32 %v13399_v48, %v2793_v55  ;;  %v12342_v59 = vpop.f32.mrb[2].mxu0  ;;  %v3818_v61 = vadd.f32 %v13399_v48, %v3817_v58  ;;  %v12598_v63 = vpop.f32.mrb[2].mxu1  ;;  %v12984_v55 = vld [vmem:[%s13177_s22 + $0x5d8] sm:$0xff]   ;;  %v12985_v58 = vld [vmem:[%s13177_s22 + $0x1e0] sm:$0xff]  }
  0xec   : > { %vm4842_vm1 = vcmp.gt.f32.partialorder %v2802_v53, 0.0  ;;  %v5354_v60 = vmul.f32 0.2, %v2802_v53  ;;  %v2805_v62 = vadd.f32 %v12342_v59, %v13399_v48  ;;  %v2796_v0 = vpop.f32.mrb[3].mxu0  ;;  %vm5098_vm2 = vcmp.gt.f32.partialorder %v3826_v56, 0.0  ;;  %v3820_v5 = vpop.f32.mrb[3].mxu1 }
  0xed   : > { %v5610_v2 = vmul.f32 0.2, %v3826_v56  ;;  %vm4840_vm3 = vcmp.gt.f32.partialorder %v2794_v57, 0.0  ;;  %v5352_v3 = vmul.f32 0.2, %v2794_v57  ;;  %vm5096_vm4 = vcmp.gt.f32.partialorder %v3818_v61, 0.0 }
  0xee   : > { %v5608_v4 = vmul.f32 0.2, %v3818_v61  ;;  %vm4843_vm5 = vcmp.gt.f32.partialorder %v2805_v62, 0.0  ;;  %12448 = vmatmul.mubr.msk.bf16.gmra.mrb[108].mxu0 %vm1990_vm0, %v12975_v49  ;;  %v5866_v6 = vsel %vm4842_vm1, %v2802_v53, %v5354_v60  ;;  %v5355_v7 = vmul.f32 0.2, %v2805_v62  ;;  %12704 = vmatmul.mubr.msk.bf16.gmra.mrb[108].mxu1 %vm1990_vm0, %v12976_v51 }
  0xef   : > { %v3829_v8 = vadd.f32 %v12598_v63, %v13399_v48  ;;  %12451 = vmatprep.mubr.msk.bf16.mxu0 %vm1990_vm0, %v12977_v52  ;;  %v6122_v9 = vsel %vm5098_vm2, %v3826_v56, %v5610_v2  ;;  %v5864_v10 = vsel %vm4840_vm3, %v2794_v57, %v5352_v3  ;;  %v2797_v11 = vadd.f32 %v13399_v48, %v2796_v0 }
  0xf0   : > { %v3821_v12 = vadd.f32 %v13399_v48, %v3820_v5  ;;  %12707 = vmatprep.mubr.msk.bf16.mxu1 %vm1990_vm0, %v12978_v1  ;;  %v6120_v14 = vsel %vm5096_vm4, %v3818_v61, %v5608_v4  ;;  %v5867_v15 = vsel %vm4843_vm5, %v2805_v62, %v5355_v7  ;;  %v12986_v61 = vld [vmem:[%s13177_s22 + $0x5e0] sm:$0xff]  }
  0xf1   : > { %vm5099_vm6 = vcmp.gt.f32.partialorder %v3829_v8, 0.0  ;;  %v5611_v16 = vmul.f32 0.2, %v3829_v8  ;;  %v12345_v17 = vpop.f32.mrb[4].mxu0  ;;  %v10550_v20 = vpack.c.bf16 %v5867_v15, %v5866_v6  ;;  %vm4841_vm7 = vcmp.gt.f32.partialorder %v2797_v11, 0.0  ;;  %v12601_v22 = vpop.f32.mrb[4].mxu1 }
  0xf2   : > { %v5353_v21 = vmul.f32 0.2, %v2797_v11  ;;  %vm5097_vm8 = vcmp.gt.f32.partialorder %v3821_v12, 0.0  ;;  %v2809_v23 = vpop.f32.mrb[5].mxu0  ;;  %v5609_v26 = vmul.f32 0.2, %v3821_v12  ;;  %v2818_v27 = vadd.f32 %v12345_v17, %v13399_v48 }
  0xf3   : > { %v6123_v25 = vsel %vm5099_vm6, %v3829_v8, %v5611_v16  ;;  %v3842_v28 = vadd.f32 %v12601_v22, %v13399_v48  ;;  %v3833_v29 = vpop.f32.mrb[5].mxu1  ;;  %v12346_v30 = vpop.f32.mrb[6].mxu0  ;;  %11822 = vst [vmem:[%s13428_s27 + $0x8] sm:$0xff] %v10550_v20   ;;  %v2810_v33 = vadd.f32 %v13399_v48, %v2809_v23 }
  0xf4   : > { %v11190_v31 = vpack.c.bf16 %v6123_v25, %v6122_v9  ;;  %v5865_v32 = vsel %vm4841_vm7, %v2797_v11, %v5353_v21  ;;  %v3834_v34 = vadd.f32 %v13399_v48, %v3833_v29  ;;  %v12602_v35 = vpop.f32.mrb[6].mxu1  ;;  %v2812_v36 = vpop.f32.mrb[7].mxu0  ;;  %v6121_v38 = vsel %vm5097_vm8, %v3821_v12, %v5609_v26 }
  0xf5   : > { %v10545_v37 = vpack.c.bf16 %v5865_v32, %v5864_v10  ;;  %vm4846_vm9 = vcmp.gt.f32.partialorder %v2818_v27, 0.0  ;;  %v5358_v39 = vmul.f32 0.2, %v2818_v27  ;;  %v3836_v40 = vpop.f32.mrb[7].mxu1  ;;  %v11185_v41 = vpack.c.bf16 %v6121_v38, %v6120_v14 }
  0xf6   : > { %11950 = vst [vmem:[%s13428_s27 + $0x408] sm:$0xff] %v11190_v31   ;;  %vm5102_vm10 = vcmp.gt.f32.partialorder %v3842_v28, 0.0  ;;  %v5614_v42 = vmul.f32 0.2, %v3842_v28  ;;  %vm4844_vm11 = vcmp.gt.f32.partialorder %v2810_v33, 0.0  ;;  %12452 = vmatmul.mubr.msk.bf16.gmra.mrb[112].mxu0 %vm1990_vm0, %v12979_v13  ;;  %12708 = vmatmul.mubr.msk.bf16.gmra.mrb[112].mxu1 %vm1990_vm0, %v12980_v18  ;;  %v2821_v46 = vadd.f32 %v12346_v30, %v13399_v48 }
  0xf7   : > { %10546 = vst [vmem:[%s13428_s27] sm:$0xff] %v10545_v37   ;;  %v5870_v43 = vsel %vm4846_vm9, %v2818_v27, %v5358_v39  ;;  %v5356_v44 = vmul.f32 0.2, %v2810_v33  ;;  %12455 = vmatprep.mubr.msk.bf16.mxu0 %vm1990_vm0, %v12981_v19  ;;  %11949 = vst [vmem:[%s13428_s27 + $0x400] sm:$0xff] %v11185_v41   ;;  %v5612_v45 = vmul.f32 0.2, %v3834_v34  ;;  %v3845_v47 = vadd.f32 %v12602_v35, %v13399_v48  ;;  %v12988_v27 = vld [vmem:[%s13177_s22 + $0x5e8] sm:$0xff]  }
  0xf8   : > { %v2813_v49 = vadd.f32 %v13399_v48, %v2812_v36  ;;  %12711 = vmatprep.mubr.msk.bf16.mxu1 %vm1990_vm0, %v12982_v24  ;;  %v6126_v51 = vsel %vm5102_vm10, %v3842_v28, %v5614_v42  ;;  %vm5100_vm12 = vcmp.gt.f32.partialorder %v3834_v34, 0.0  ;;  %v3837_v53 = vadd.f32 %v13399_v48, %v3836_v40  ;;  %v12987_v24 = vld [vmem:[%s13177_s22 + $0x1e8] sm:$0xff]   ;;  %v12989_v35 = vld [vmem:[%s13177_s22 + $0x1f0] sm:$0xff]  }
  0xf9   : > { %v5868_v52 = vsel %vm4844_vm11, %v2810_v33, %v5356_v44  ;;  %v12349_v54 = vpop.f32.mrb[8].mxu0  ;;  %vm4847_vm13 = vcmp.gt.f32.partialorder %v2821_v46, 0.0  ;;  %v5359_v56 = vmul.f32 0.2, %v2821_v46  ;;  %vm5103_vm14 = vcmp.gt.f32.partialorder %v3845_v47, 0.0  ;;  %v12605_v2 = vpop.f32.mrb[8].mxu1 }
  0xfa   : > { %v5615_v57 = vmul.f32 0.2, %v3845_v47  ;;  %vm4845_vm15 = vcmp.gt.f32.partialorder %v2813_v49, 0.0  ;;  %v5357_v59 = vmul.f32 0.2, %v2813_v49  ;;  %vm5101_vm1 = vcmp.gt.f32.partialorder %v3837_v53, 0.0 }
  0xfb   : > { %v5613_v60 = vmul.f32 0.2, %v3837_v53  ;;  %v6124_v62 = vsel %vm5100_vm12, %v3834_v34, %v5612_v45  ;;  %v5871_v63 = vsel %vm4847_vm13, %v2821_v46, %v5359_v56  ;;  %v2834_v1 = vadd.f32 %v12349_v54, %v13399_v48  ;;  %v2825_v3 = vpop.f32.mrb[9].mxu0  ;;  %v3849_v8 = vpop.f32.mrb[9].mxu1  ;;  %v12990_v41 = vld [vmem:[%s13177_s22 + $0x5f0] sm:$0xff]  }
  0xfc   : > { %v6127_v0 = vsel %vm5103_vm14, %v3845_v47, %v5615_v57  ;;  %v10560_v4 = vpack.c.bf16 %v5871_v63, %v5870_v43  ;;  %v5869_v6 = vsel %vm4845_vm15, %v2813_v49, %v5357_v59  ;;  %v12350_v9 = vpop.f32.mrb[10].mxu0  ;;  %v12606_v13 = vpop.f32.mrb[10].mxu1  ;;  %v3858_v15 = vadd.f32 %v12605_v2, %v13399_v48 }
  0xfd   : > { %v11200_v5 = vpack.c.bf16 %v6127_v0, %v6126_v51  ;;  %v6125_v7 = vsel %vm5101_vm1, %v3837_v53, %v5613_v60  ;;  %v10555_v10 = vpack.c.bf16 %v5869_v6, %v5868_v52  ;;  %vm4850_vm2 = vcmp.gt.f32.partialorder %v2834_v1, 0.0  ;;  %v2828_v14 = vpop.f32.mrb[11].mxu0  ;;  %v3852_v19 = vpop.f32.mrb[11].mxu1 }
  0xfe   : > { %v11195_v11 = vpack.c.bf16 %v6125_v7, %v6124_v62  ;;  %v5362_v12 = vmul.f32 0.2, %v2834_v1  ;;  %12456 = vmatmul.mubr.msk.bf16.gmra.mrb[116].mxu0 %vm1990_vm0, %v12983_v50  ;;  %11824 = vst [vmem:[%s13428_s27 + $0x18] sm:$0xff] %v10560_v4   ;;  %v2826_v16 = vadd.f32 %v13399_v48, %v2825_v3  ;;  %v3850_v17 = vadd.f32 %v13399_v48, %v3849_v8  ;;  %v12991_v4 = vld [vmem:[%s13177_s22 + $0x1f8] sm:$0xff]  }
  0xff   : > { %11952 = vst [vmem:[%s13428_s27 + $0x418] sm:$0xff] %v11200_v5   ;;  %v2837_v18 = vadd.f32 %v12350_v9, %v13399_v48  ;;  %12712 = vmatmul.mubr.msk.bf16.gmra.mrb[116].mxu1 %vm1990_vm0, %v12984_v55  ;;  %11823 = vst [vmem:[%s13428_s27 + $0x10] sm:$0xff] %v10555_v10   ;;  %v3861_v21 = vadd.f32 %v12606_v13, %v13399_v48  ;;  %v2829_v22 = vadd.f32 %v13399_v48, %v2828_v14  ;;  %v12992_v5 = vld [vmem:[%s13177_s22 + $0x5f8] sm:$0xff]   ;;  %v12994_v13 = vld [vmem:[%s13177_s22 + $0x600] sm:$0xff]  }
 0x100   : > { %11951 = vst [vmem:[%s13428_s27 + $0x410] sm:$0xff] %v11195_v11   ;;  %v5874_v20 = vsel %vm4850_vm2, %v2834_v1, %v5362_v12  ;;  %v3853_v23 = vadd.f32 %v13399_v48, %v3852_v19  ;;  %12459 = vmatprep.mubr.msk.bf16.mxu0 %vm1990_vm0, %v12985_v58  ;;  %vm5106_vm3 = vcmp.gt.f32.partialorder %v3858_v15, 0.0  ;;  %v5618_v25 = vmul.f32 0.2, %v3858_v15  ;;  %12715 = vmatprep.mubr.msk.bf16.mxu1 %vm1990_vm0, %v12986_v61  ;;  %v12993_v12 = vld [vmem:[%s13177_s22 + $0x200] sm:$0xff]  }
 0x101   : > { %vm4848_vm4 = vcmp.gt.f32.partialorder %v2826_v16, 0.0  ;;  %v5360_v26 = vmul.f32 0.2, %v2826_v16  ;;  %vm5104_vm5 = vcmp.gt.f32.partialorder %v3850_v17, 0.0  ;;  %v5616_v28 = vmul.f32 0.2, %v3850_v17 }
 0x102   : > { %vm4851_vm6 = vcmp.gt.f32.partialorder %v2837_v18, 0.0  ;;  %v5363_v29 = vmul.f32 0.2, %v2837_v18  ;;  %v6130_v30 = vsel %vm5106_vm3, %v3858_v15, %v5618_v25  ;;  %vm5107_vm7 = vcmp.gt.f32.partialorder %v3861_v21, 0.0  ;;  %v12353_v33 = vpop.f32.mrb[12].mxu0  ;;  %v12609_v34 = vpop.f32.mrb[12].mxu1 }
 0x103   : > { %v5872_v31 = vsel %vm4848_vm4, %v2826_v16, %v5360_v26  ;;  %v5619_v32 = vmul.f32 0.2, %v3861_v21  ;;  %v6128_v36 = vsel %vm5104_vm5, %v3850_v17, %v5616_v28  ;;  %vm4849_vm8 = vcmp.gt.f32.partialorder %v2829_v22, 0.0  ;;  %v2841_v39 = vpop.f32.mrb[13].mxu0  ;;  %v3865_v40 = vpop.f32.mrb[13].mxu1 }
 0x104   : > { %v5875_v37 = vsel %vm4851_vm6, %v2837_v18, %v5363_v29  ;;  %v5361_v38 = vmul.f32 0.2, %v2829_v22  ;;  %vm5105_vm9 = vcmp.gt.f32.partialorder %v3853_v23, 0.0  ;;  %v5617_v44 = vmul.f32 0.2, %v3853_v23  ;;  %v12354_v45 = vpop.f32.mrb[14].mxu0 }
 0x105   : > { %v10570_v42 = vpack.c.bf16 %v5875_v37, %v5874_v20  ;;  %v6131_v43 = vsel %vm5107_vm7, %v3861_v21, %v5619_v32  ;;  %v12610_v46 = vpop.f32.mrb[14].mxu1  ;;  %v2850_v50 = vadd.f32 %v12353_v33, %v13399_v48  ;;  %v3874_v51 = vadd.f32 %v12609_v34, %v13399_v48  ;;  %v2844_v52 = vpop.f32.mrb[15].mxu0 }
 0x106   : > { %v11210_v47 = vpack.c.bf16 %v6131_v43, %v6130_v30  ;;  %v5873_v49 = vsel %vm4849_vm8, %v2829_v22, %v5361_v38  ;;  %v3868_v53 = vpop.f32.mrb[15].mxu1  ;;  %12460 = vmatmul.mubr.msk.bf16.gmra.mrb[120].mxu0 %vm1990_vm0, %v12987_v24  ;;  %v6129_v55 = vsel %vm5105_vm9, %v3853_v23, %v5617_v44  ;;  %v2842_v56 = vadd.f32 %v13399_v48, %v2841_v39 }
 0x107   : > { %11826 = vst [vmem:[%s13428_s27 + $0x28] sm:$0xff] %v10570_v42   ;;  %v10565_v54 = vpack.c.bf16 %v5873_v49, %v5872_v31  ;;  %v3866_v57 = vadd.f32 %v13399_v48, %v3865_v40  ;;  %12716 = vmatmul.mubr.msk.bf16.gmra.mrb[120].mxu1 %vm1990_vm0, %v12988_v27  ;;  %v11205_v58 = vpack.c.bf16 %v6129_v55, %v6128_v36  ;;  %vm4854_vm10 = vcmp.gt.f32.partialorder %v2850_v50, 0.0  ;;  %v12995_v42 = vld [vmem:[%s13177_s22 + $0x208] sm:$0xff]  }
 0x108   : > { %11954 = vst [vmem:[%s13428_s27 + $0x428] sm:$0xff] %v11210_v47   ;;  %v5366_v59 = vmul.f32 0.2, %v2850_v50  ;;  %vm5110_vm11 = vcmp.gt.f32.partialorder %v3874_v51, 0.0  ;;  %12463 = vmatprep.mubr.msk.bf16.mxu0 %vm1990_vm0, %v12989_v35  ;;  %12719 = vmatprep.mubr.msk.bf16.mxu1 %vm1990_vm0, %v12990_v41  ;;  %v5622_v60 = vmul.f32 0.2, %v3874_v51  ;;  %v2853_v0 = vadd.f32 %v12354_v45, %v13399_v48 }
 0x109   : > { %11825 = vst [vmem:[%s13428_s27 + $0x20] sm:$0xff] %v10565_v54   ;;  %vm4852_vm12 = vcmp.gt.f32.partialorder %v2842_v56, 0.0  ;;  %v5364_v61 = vmul.f32 0.2, %v2842_v56  ;;  %vm5108_vm13 = vcmp.gt.f32.partialorder %v3866_v57, 0.0  ;;  %11953 = vst [vmem:[%s13428_s27 + $0x420] sm:$0xff] %v11205_v58   ;;  %v3877_v1 = vadd.f32 %v12610_v46, %v13399_v48 }
 0x10a   : > { %v5878_v62 = vsel %vm4854_vm10, %v2850_v50, %v5366_v59  ;;  %v5620_v63 = vmul.f32 0.2, %v3866_v57  ;;  %v12357_v2 = vpop.f32.mrb[16].mxu0  ;;  %v12613_v3 = vpop.f32.mrb[16].mxu1  ;;  %v6134_v6 = vsel %vm5110_vm11, %v3874_v51, %v5622_v60  ;;  %v2845_v8 = vadd.f32 %v13399_v48, %v2844_v52  ;;  %v12996_v50 = vld [vmem:[%s13177_s22 + $0x608] sm:$0xff]   ;;  %v12997_v51 = vld [vmem:[%s13177_s22 + $0x210] sm:$0xff]  }
 0x10b   : > { %v5876_v7 = vsel %vm4852_vm12, %v2842_v56, %v5364_v61  ;;  %v3869_v9 = vadd.f32 %v13399_v48, %v3868_v53  ;;  %v2857_v10 = vpop.f32.mrb[17].mxu0  ;;  %v3881_v11 = vpop.f32.mrb[17].mxu1  ;;  %vm4855_vm14 = vcmp.gt.f32.partialorder %v2853_v0, 0.0  ;;  %v5367_v15 = vmul.f32 0.2, %v2853_v0  ;;  %v12998_v52 = vld [vmem:[%s13177_s22 + $0x610] sm:$0xff]  }
 0x10c   : > { %v6132_v14 = vsel %vm5108_vm13, %v3866_v57, %v5620_v63  ;;  %vm5111_vm15 = vcmp.gt.f32.partialorder %v3877_v1, 0.0  ;;  %v12358_v16 = vpop.f32.mrb[18].mxu0  ;;  %v12614_v17 = vpop.f32.mrb[18].mxu1  ;;  %v5623_v18 = vmul.f32 0.2, %v3877_v1  ;;  %vm4853_vm1 = vcmp.gt.f32.partialorder %v2845_v8, 0.0 }
 0x10d   : > { %v5365_v19 = vmul.f32 0.2, %v2845_v8  ;;  %vm5109_vm2 = vcmp.gt.f32.partialorder %v3869_v9, 0.0  ;;  %v5879_v20 = vsel %vm4855_vm14, %v2853_v0, %v5367_v15  ;;  %v5621_v21 = vmul.f32 0.2, %v3869_v9  ;;  %v2860_v24 = vpop.f32.mrb[19].mxu0 }
 0x10e   : > { %v2866_v22 = vadd.f32 %v12357_v2, %v13399_v48  ;;  %v3890_v23 = vadd.f32 %v12613_v3, %v13399_v48  ;;  %v3884_v25 = vpop.f32.mrb[19].mxu1  ;;  %12464 = vmatmul.mubr.msk.bf16.gmra.mrb[124].mxu0 %vm1990_vm0, %v12991_v4  ;;  %v10580_v26 = vpack.c.bf16 %v5879_v20, %v5878_v62  ;;  %v6135_v27 = vsel %vm5111_vm15, %v3877_v1, %v5623_v18  ;;  %v13000_v20 = vld [vmem:[%s13177_s22 + $0x618] sm:$0xff]  }
 0x10f   : > { %v5877_v28 = vsel %vm4853_vm1, %v2845_v8, %v5365_v19  ;;  %v2858_v29 = vadd.f32 %v13399_v48, %v2857_v10  ;;  %12720 = vmatmul.mubr.msk.bf16.gmra.mrb[124].mxu1 %vm1990_vm0, %v12992_v5  ;;  %v11220_v30 = vpack.c.bf16 %v6135_v27, %v6134_v6  ;;  %v6133_v32 = vsel %vm5109_vm2, %v3869_v9, %v5621_v21  ;;  %v13001_v27 = vld [vmem:[%s13177_s22 + $0x220] sm:$0xff]  }
 0x110   : > { %v10575_v31 = vpack.c.bf16 %v5877_v28, %v5876_v7  ;;  %vm4858_vm3 = vcmp.gt.f32.partialorder %v2866_v22, 0.0  ;;  %12467 = vmatprep.mubr.msk.bf16.mxu0 %vm1990_vm0, %v12993_v12  ;;  %12723 = vmatprep.mubr.msk.bf16.mxu1 %vm1990_vm0, %v12994_v13  ;;  %11828 = vst [vmem:[%s13428_s27 + $0x38] sm:$0xff] %v10580_v26   ;;  %v11215_v33 = vpack.c.bf16 %v6133_v32, %v6132_v14  ;;  %v5370_v34 = vmul.f32 0.2, %v2866_v22  ;;  %v12999_v7 = vld [vmem:[%s13177_s22 + $0x218] sm:$0xff]   ;;  %v13002_v28 = vld [vmem:[%s13177_s22 + $0x620] sm:$0xff]  }
 0x111   : > { %vm5114_vm4 = vcmp.gt.f32.partialorder %v3890_v23, 0.0  ;;  %v5626_v35 = vmul.f32 0.2, %v3890_v23  ;;  %v12361_v36 = vpop.f32.mrb[20].mxu0  ;;  %11956 = vst [vmem:[%s13428_s27 + $0x438] sm:$0xff] %v11220_v30   ;;  %vm4856_vm5 = vcmp.gt.f32.partialorder %v2858_v29, 0.0  ;;  %v3882_v38 = vadd.f32 %v13399_v48, %v3881_v11 }
 0x112   : > { %11827 = vst [vmem:[%s13428_s27 + $0x30] sm:$0xff] %v10575_v31   ;;  %v5368_v37 = vmul.f32 0.2, %v2858_v29  ;;  %v2869_v39 = vadd.f32 %v12358_v16, %v13399_v48  ;;  %v12617_v40 = vpop.f32.mrb[20].mxu1  ;;  %v2873_v41 = vpop.f32.mrb[21].mxu0  ;;  %11955 = vst [vmem:[%s13428_s27 + $0x430] sm:$0xff] %v11215_v33   ;;  %v5882_v43 = vsel %vm4858_vm3, %v2866_v22, %v5370_v34  ;;  %v3893_v45 = vadd.f32 %v12614_v17, %v13399_v48 }
 0x113   : > { %v6138_v44 = vsel %vm5114_vm4, %v3890_v23, %v5626_v35  ;;  %v2861_v46 = vadd.f32 %v13399_v48, %v2860_v24  ;;  %v3897_v47 = vpop.f32.mrb[21].mxu1  ;;  %v12362_v49 = vpop.f32.mrb[22].mxu0  ;;  %vm5112_vm6 = vcmp.gt.f32.partialorder %v3882_v38, 0.0  ;;  %v5624_v54 = vmul.f32 0.2, %v3882_v38 }
 0x114   : > { %v5880_v53 = vsel %vm4856_vm5, %v2858_v29, %v5368_v37  ;;  %vm4859_vm7 = vcmp.gt.f32.partialorder %v2869_v39, 0.0  ;;  %v12618_v55 = vpop.f32.mrb[22].mxu1  ;;  %v2876_v56 = vpop.f32.mrb[23].mxu0  ;;  %v5371_v57 = vmul.f32 0.2, %v2869_v39  ;;  %vm5115_vm8 = vcmp.gt.f32.partialorder %v3893_v45, 0.0 }
 0x115   : > { %v5627_v58 = vmul.f32 0.2, %v3893_v45  ;;  %vm4857_vm9 = vcmp.gt.f32.partialorder %v2861_v46, 0.0  ;;  %v6136_v59 = vsel %vm5112_vm6, %v3882_v38, %v5624_v54  ;;  %v5369_v60 = vmul.f32 0.2, %v2861_v46  ;;  %v3900_v63 = vpop.f32.mrb[23].mxu1 }
 0x116   : > { %v3885_v61 = vadd.f32 %v13399_v48, %v3884_v25  ;;  %v2882_v62 = vadd.f32 %v12361_v36, %v13399_v48  ;;  %12468 = vmatmul.mubr.msk.bf16.gmra.mrb[128].mxu0 %vm1990_vm0, %v12995_v42  ;;  %v5883_v0 = vsel %vm4859_vm7, %v2869_v39, %v5371_v57  ;;  %v3906_v2 = vadd.f32 %v12617_v40, %v13399_v48 }
 0x117   : > { %v6139_v1 = vsel %vm5115_vm8, %v3893_v45, %v5627_v58  ;;  %v2874_v3 = vadd.f32 %v13399_v48, %v2873_v41  ;;  %12724 = vmatmul.mubr.msk.bf16.gmra.mrb[128].mxu1 %vm1990_vm0, %v12996_v50  ;;  %v10590_v4 = vpack.c.bf16 %v5883_v0, %v5882_v43  ;;  %v5881_v6 = vsel %vm4857_vm9, %v2861_v46, %v5369_v60 }
 0x118   : > { %v11230_v5 = vpack.c.bf16 %v6139_v1, %v6138_v44  ;;  %vm5113_vm10 = vcmp.gt.f32.partialorder %v3885_v61, 0.0  ;;  %12471 = vmatprep.mubr.msk.bf16.mxu0 %vm1990_vm0, %v12997_v51  ;;  %12727 = vmatprep.mubr.msk.bf16.mxu1 %vm1990_vm0, %v12998_v52  ;;  %v10585_v8 = vpack.c.bf16 %v5881_v6, %v5880_v53  ;;  %v5625_v9 = vmul.f32 0.2, %v3885_v61 }
 0x119   : > { %vm4862_vm11 = vcmp.gt.f32.partialorder %v2882_v62, 0.0  ;;  %v5374_v10 = vmul.f32 0.2, %v2882_v62  ;;  %v12365_v11 = vpop.f32.mrb[24].mxu0  ;;  %11830 = vst [vmem:[%s13428_s27 + $0x48] sm:$0xff] %v10590_v4   ;;  %vm5118_vm12 = vcmp.gt.f32.partialorder %v3906_v2, 0.0  ;;  %v3898_v16 = vadd.f32 %v13399_v48, %v3897_v47 }
 0x11a   : > { %11958 = vst [vmem:[%s13428_s27 + $0x448] sm:$0xff] %v11230_v5   ;;  %v5630_v12 = vmul.f32 0.2, %v3906_v2  ;;  %vm4860_vm13 = vcmp.gt.f32.partialorder %v2874_v3, 0.0  ;;  %v5372_v13 = vmul.f32 0.2, %v2874_v3  ;;  %v6137_v14 = vsel %vm5113_vm10, %v3885_v61, %v5625_v9 }
 0x11b   : > { %11829 = vst [vmem:[%s13428_s27 + $0x40] sm:$0xff] %v10585_v8   ;;  %v5886_v15 = vsel %vm4862_vm11, %v2882_v62, %v5374_v10  ;;  %v2885_v17 = vadd.f32 %v12362_v49, %v13399_v48  ;;  %v12621_v18 = vpop.f32.mrb[24].mxu1  ;;  %v2889_v19 = vpop.f32.mrb[25].mxu0  ;;  %v11225_v21 = vpack.c.bf16 %v6137_v14, %v6136_v59  ;;  %v3909_v24 = vadd.f32 %v12618_v55, %v13399_v48  ;;  %v13003_v47 = vld [vmem:[%s13177_s22 + $0x228] sm:$0xff]  }
 0x11c   : > { %v6142_v22 = vsel %vm5118_vm12, %v3906_v2, %v5630_v12  ;;  %v5884_v23 = vsel %vm4860_vm13, %v2874_v3, %v5372_v13  ;;  %v3913_v25 = vpop.f32.mrb[25].mxu1  ;;  %v12366_v26 = vpop.f32.mrb[26].mxu0  ;;  %vm5116_vm14 = vcmp.gt.f32.partialorder %v3898_v16, 0.0  ;;  %v5628_v29 = vmul.f32 0.2, %v3898_v16  ;;  %v13004_v59 = vld [vmem:[%s13177_s22 + $0x628] sm:$0xff]  }
 0x11d   : > { %vm4863_vm15 = vcmp.gt.f32.partialorder %v2885_v17, 0.0  ;;  %v5375_v30 = vmul.f32 0.2, %v2885_v17  ;;  %11957 = vst [vmem:[%s13428_s27 + $0x440] sm:$0xff] %v11225_v21   ;;  %vm5119_vm1 = vcmp.gt.f32.partialorder %v3909_v24, 0.0  ;;  %v2877_v32 = vadd.f32 %v13399_v48, %v2876_v56  ;;  %v12622_v34 = vpop.f32.mrb[26].mxu1 }
 0x11e   : > { %v5631_v31 = vmul.f32 0.2, %v3909_v24  ;;  %v3901_v33 = vadd.f32 %v13399_v48, %v3900_v63  ;;  %v2892_v35 = vpop.f32.mrb[27].mxu0  ;;  %12472 = vmatmul.mubr.msk.bf16.gmra.mrb[132].mxu0 %vm1990_vm0, %v12999_v7  ;;  %v6140_v36 = vsel %vm5116_vm14, %v3898_v16, %v5628_v29  ;;  %v2898_v38 = vadd.f32 %v12365_v11, %v13399_v48  ;;  %v3916_v40 = vpop.f32.mrb[27].mxu1  ;;  %v13005_v2 = vld [vmem:[%s13177_s22 + $0x230] sm:$0xff]  }
 0x11f   : > { %v5887_v37 = vsel %vm4863_vm15, %v2885_v17, %v5375_v30  ;;  %v3922_v39 = vadd.f32 %v12621_v18, %v13399_v48  ;;  %12728 = vmatmul.mubr.msk.bf16.gmra.mrb[132].mxu1 %vm1990_vm0, %v13000_v20  ;;  %vm4861_vm2 = vcmp.gt.f32.partialorder %v2877_v32, 0.0  ;;  %v5373_v43 = vmul.f32 0.2, %v2877_v32  ;;  %12475 = vmatprep.mubr.msk.bf16.mxu0 %vm1990_vm0, %v13001_v27  ;;  %v13006_v3 = vld [vmem:[%s13177_s22 + $0x630] sm:$0xff]  }
 0x120   : > { %v10600_v41 = vpack.c.bf16 %v5887_v37, %v5886_v15  ;;  %v6143_v42 = vsel %vm5119_vm1, %v3909_v24, %v5631_v31  ;;  %12731 = vmatprep.mubr.msk.bf16.mxu1 %vm1990_vm0, %v13002_v28  ;;  %vm5117_vm3 = vcmp.gt.f32.partialorder %v3901_v33, 0.0  ;;  %v5629_v45 = vmul.f32 0.2, %v3901_v33 }
 0x121   : > { %v11240_v44 = vpack.c.bf16 %v6143_v42, %v6142_v22  ;;  %vm4866_vm4 = vcmp.gt.f32.partialorder %v2898_v38, 0.0  ;;  %v12369_v46 = vpop.f32.mrb[28].mxu0  ;;  %v5885_v49 = vsel %vm4861_vm2, %v2877_v32, %v5373_v43  ;;  %v5378_v50 = vmul.f32 0.2, %v2898_v38  ;;  %v12625_v52 = vpop.f32.mrb[28].mxu1 }
 0x122   : > { %11832 = vst [vmem:[%s13428_s27 + $0x58] sm:$0xff] %v10600_v41   ;;  %vm5122_vm5 = vcmp.gt.f32.partialorder %v3922_v39, 0.0  ;;  %v5634_v51 = vmul.f32 0.2, %v3922_v39  ;;  %v10595_v53 = vpack.c.bf16 %v5885_v49, %v5884_v23  ;;  %v6141_v54 = vsel %vm5117_vm3, %v3901_v33, %v5629_v45  ;;  %v2905_v57 = vpop.f32.mrb[29].mxu0  ;;  %v13552_v58 = vpop.f32.mrb[29].mxu1 }
 0x123   : > { %11960 = vst [vmem:[%s13428_s27 + $0x458] sm:$0xff] %v11240_v44   ;;  %v2890_v55 = vadd.f32 %v13399_v48, %v2889_v19  ;;  %v3914_v56 = vadd.f32 %v13399_v48, %v3913_v25  ;;  %v11235_v60 = vpack.c.bf16 %v6141_v54, %v6140_v36  ;;  %v5890_v61 = vsel %vm4866_vm4, %v2898_v38, %v5378_v50  ;;  %v13557_v0 = vpop.f32.mrb[30].mxu0  ;;  %v13559_v1 = vpop.f32.mrb[30].mxu1  ;;  %v13008_v33 = vld [vmem:[%s13177_s22 + $0x638] sm:$0xff]  }
 0x124   : > { %v6146_v62 = vsel %vm5122_vm5, %v3922_v39, %v5634_v51  ;;  %v2901_v63 = vadd.f32 %v12366_v26, %v13399_v48  ;;  %11831 = vst [vmem:[%s13428_s27 + $0x50] sm:$0xff] %v10595_v53   ;;  %v3925_v7 = vadd.f32 %v12622_v34, %v13399_v48  ;;  %v2893_v8 = vadd.f32 %v13399_v48, %v2892_v35  ;;  %v2908_v9 = vpop.f32.mrb[31].mxu0  ;;  %v3932_v10 = vpop.f32.mrb[31].mxu1  ;;  %v13007_v26 = vld [vmem:[%s13177_s22 + $0x238] sm:$0xff]   ;;  %v13009_v34 = vld [vmem:[%s13177_s22 + $0x240] sm:$0xff]  }
 0x125   : > { %vm4864_vm6 = vcmp.gt.f32.partialorder %v2890_v55, 0.0  ;;  %v5376_v4 = vmul.f32 0.2, %v2890_v55  ;;  %vm5120_vm7 = vcmp.gt.f32.partialorder %v3914_v56, 0.0  ;;  %v5632_v5 = vmul.f32 0.2, %v3914_v56 }
 0x126   : > { %11959 = vst [vmem:[%s13428_s27 + $0x450] sm:$0xff] %v11235_v60   ;;  %vm4867_vm8 = vcmp.gt.f32.partialorder %v2901_v63, 0.0  ;;  %v5379_v6 = vmul.f32 0.2, %v2901_v63  ;;  %12476 = vmatmul.mubr.msk.bf16.gmra.mrb[136].mxu0 %vm1990_vm0, %v13003_v47  ;;  %v3917_v13 = vadd.f32 %v13399_v48, %v3916_v40  ;;  %v2914_v14 = vadd.f32 %v12369_v46, %v13399_v48  ;;  %v13010_v40 = vld [vmem:[%s13177_s22 + $0x640] sm:$0xff]  }
 0x127   : > { %v5888_v11 = vsel %vm4864_vm6, %v2890_v55, %v5376_v4  ;;  %v6144_v12 = vsel %vm5120_vm7, %v3914_v56, %v5632_v5  ;;  %12732 = vmatmul.mubr.msk.bf16.gmra.mrb[136].mxu1 %vm1990_vm0, %v13004_v59  ;;  %vm5123_vm9 = vcmp.gt.f32.partialorder %v3925_v7, 0.0  ;;  %v5635_v16 = vmul.f32 0.2, %v3925_v7  ;;  %12479 = vmatprep.mubr.msk.bf16.mxu0 %vm1990_vm0, %v13005_v2 }
 0x128   : > { %v5891_v15 = vsel %vm4867_vm8, %v2901_v63, %v5379_v6  ;;  %vm4865_vm10 = vcmp.gt.f32.partialorder %v2893_v8, 0.0  ;;  %12735 = vmatprep.mubr.msk.bf16.mxu1 %vm1990_vm0, %v13006_v3  ;;  %v5377_v18 = vmul.f32 0.2, %v2893_v8  ;;  %vm5121_vm11 = vcmp.gt.f32.partialorder %v3917_v13, 0.0 }
 0x129   : > { %v10610_v17 = vpack.c.bf16 %v5891_v15, %v5890_v61  ;;  %v5633_v19 = vmul.f32 0.2, %v3917_v13  ;;  %v12373_v20 = vpop.f32.mrb[32].mxu0  ;;  %v6147_v21 = vsel %vm5123_vm9, %v3925_v7, %v5635_v16  ;;  %vm4870_vm12 = vcmp.gt.f32.partialorder %v2914_v14, 0.0  ;;  %v12629_v24 = vpop.f32.mrb[32].mxu1  ;;  %v13012_v7 = vld [vmem:[%s13177_s22 + $0x648] sm:$0xff]  }
 0x12a   : > { %v5382_v22 = vmul.f32 0.2, %v2914_v14  ;;  %v3938_v23 = vadd.f32 %v12625_v52, %v13399_v48  ;;  %v13574_v25 = vpop.f32.mrb[33].mxu0  ;;  %v11250_v27 = vpack.c.bf16 %v6147_v21, %v6146_v62  ;;  %v5889_v28 = vsel %vm4865_vm10, %v2893_v8, %v5377_v18  ;;  %v13580_v31 = vpop.f32.mrb[33].mxu1  ;;  %v13013_v8 = vld [vmem:[%s13177_s22 + $0x250] sm:$0xff]  }
 0x12b   : > { %11834 = vst [vmem:[%s13428_s27 + $0x68] sm:$0xff] %v10610_v17   ;;  %v6145_v29 = vsel %vm5121_vm11, %v3917_v13, %v5633_v19  ;;  %v2906_v30 = vadd.f32 %v13399_v48, %v2905_v57  ;;  %v13582_v32 = vpop.f32.mrb[34].mxu0  ;;  %v10605_v35 = vpack.c.bf16 %v5889_v28, %v5888_v11  ;;  %v13587_v38 = vpop.f32.mrb[34].mxu1  ;;  %v3930_v43 = vadd.f32 %v13399_v48, %v13552_v58  ;;  %v13634_v16 = vld [vmem:[%s15901_s2] ss:$0 sm:$0xff] }
 0x12c   : > { %v11245_v36 = vpack.c.bf16 %v6145_v29, %v6144_v12  ;;  %v5894_v37 = vsel %vm4870_vm12, %v2914_v14, %v5382_v22  ;;  %vm5126_vm13 = vcmp.gt.f32.partialorder %v3938_v23, 0.0  ;;  %v13589_v39 = vpop.f32.mrb[35].mxu0  ;;  %11962 = vst [vmem:[%s13428_s27 + $0x468] sm:$0xff] %v11250_v27   ;;  %v5638_v41 = vmul.f32 0.2, %v3938_v23  ;;  %v13595_v44 = vpop.f32.mrb[35].mxu1 }
 0x12d   : > { %vm4868_vm14 = vcmp.gt.f32.partialorder %v2906_v30, 0.0  ;;  %v5380_v42 = vmul.f32 0.2, %v2906_v30  ;;  %11833 = vst [vmem:[%s13428_s27 + $0x60] sm:$0xff] %v10605_v35   ;;  %v2917_v45 = vadd.f32 %v13557_v0, %v13399_v48  ;;  %v3941_v46 = vadd.f32 %v13559_v1, %v13399_v48  ;;  %v13011_v0 = vld [vmem:[%s13177_s22 + $0x248] sm:$0xff]   ;;  %v13014_v14 = vld [vmem:[%s13177_s22 + $0x650] sm:$0xff]  }
 0x12e   : > { %11961 = vst [vmem:[%s13428_s27 + $0x460] sm:$0xff] %v11245_v36   ;;  %v2909_v47 = vadd.f32 %v13399_v48, %v2908_v9  ;;  %v3933_v49 = vadd.f32 %v13399_v48, %v3932_v10  ;;  %12480 = vmatmul.mubr.msk.bf16.gmra.mrb[140].mxu0 %vm1990_vm0, %v13007_v26  ;;  %v6150_v50 = vsel %vm5126_vm13, %v3938_v23, %v5638_v41  ;;  %vm5124_vm15 = vcmp.gt.f32.partialorder %v3930_v43, 0.0 }
 0x12f   : > { %v5892_v51 = vsel %vm4868_vm14, %v2906_v30, %v5380_v42  ;;  %v5636_v52 = vmul.f32 0.2, %v3930_v43  ;;  %12736 = vmatmul.mubr.msk.bf16.gmra.mrb[140].mxu1 %vm1990_vm0, %v13008_v33  ;;  %12483 = vmatprep.mubr.msk.bf16.mxu0 %vm1990_vm0, %v13009_v34  ;;  %vm4871_vm1 = vcmp.gt.f32.partialorder %v2917_v45, 0.0  ;;  %v5383_v53 = vmul.f32 0.2, %v2917_v45 }
 0x130   : > { %vm5127_vm2 = vcmp.gt.f32.partialorder %v3941_v46, 0.0  ;;  %v5639_v54 = vmul.f32 0.2, %v3941_v46  ;;  %12739 = vmatprep.mubr.msk.bf16.mxu1 %vm1990_vm0, %v13010_v40  ;;  %vm4869_vm3 = vcmp.gt.f32.partialorder %v2909_v47, 0.0  ;;  %v5381_v56 = vmul.f32 0.2, %v2909_v47 }
 0x131   : > { %v6148_v55 = vsel %vm5124_vm15, %v3930_v43, %v5636_v52  ;;  %vm5125_vm4 = vcmp.gt.f32.partialorder %v3933_v49, 0.0  ;;  %v13610_v57 = vpop.f32.mrb[36].mxu0  ;;  %v5895_v58 = vsel %vm4871_vm1, %v2917_v45, %v5383_v53  ;;  %v5637_v60 = vmul.f32 0.2, %v3933_v49  ;;  %v12633_v62 = vpop.f32.mrb[36].mxu1  ;;  %v13016_v45 = vld [vmem:[%s13177_s22 + $0x658] sm:$0xff]  }
 0x132   : > { %v6151_v59 = vsel %vm5127_vm2, %v3941_v46, %v5639_v54  ;;  %v2930_v61 = vadd.f32 %v12373_v20, %v13399_v48  ;;  %v13613_v63 = vpop.f32.mrb[37].mxu0  ;;  %v10620_v1 = vpack.c.bf16 %v5895_v58, %v5894_v37  ;;  %v5893_v3 = vsel %vm4869_vm3, %v2909_v47, %v5381_v56  ;;  %v13617_v5 = vpop.f32.mrb[37].mxu1  ;;  %v13015_v37 = vld [vmem:[%s13177_s22 + $0x258] sm:$0xff]   ;;  %v13018_v52 = vld [vmem:[%s13177_s22 + $0x660] sm:$0xff]  }
 0x133   : > { %v11260_v2 = vpack.c.bf16 %v6151_v59, %v6150_v50  ;;  %v3954_v4 = vadd.f32 %v12629_v24, %v13399_v48  ;;  %v13619_v6 = vpop.f32.mrb[38].mxu0  ;;  %v10615_v9 = vpack.c.bf16 %v5893_v3, %v5892_v51  ;;  %v6149_v10 = vsel %vm5125_vm4, %v3933_v49, %v5637_v60  ;;  %v13624_v12 = vpop.f32.mrb[38].mxu1 }
 0x134   : > { %vm4874_vm5 = vcmp.gt.f32.partialorder %v2930_v61, 0.0  ;;  %v5386_v11 = vmul.f32 0.2, %v2930_v61  ;;  %v13626_v13 = vpop.f32.mrb[39].mxu0  ;;  %11836 = vst [vmem:[%s13428_s27 + $0x78] sm:$0xff] %v10620_v1   ;;  %v11255_v48 = vpack.c.bf16 %v6149_v10, %v6148_v55  ;;  %v2922_v17 = vadd.f32 %v13634_v16, %v13574_v25  ;;  %v13638_v18 = vpop.f32.mrb[39].mxu1 }
 0x135   : > { %11964 = vst [vmem:[%s13428_s27 + $0x478] sm:$0xff] %v11260_v2   ;;  %vm5130_vm6 = vcmp.gt.f32.partialorder %v3954_v4, 0.0  ;;  %v5642_v15 = vmul.f32 0.2, %v3954_v4  ;;  %11835 = vst [vmem:[%s13428_s27 + $0x70] sm:$0xff] %v10615_v9   ;;  %v3946_v20 = vadd.f32 %v13634_v16, %v13580_v31  ;;  %v2933_v21 = vadd.f32 %v13634_v16, %v13582_v32  ;;  %v13019_v10 = vld [vmem:[%s13177_s22 + $0x268] sm:$0xff]  }
 0x136   : > { %v5898_v19 = vsel %vm4874_vm5, %v2930_v61, %v5386_v11  ;;  %v3957_v22 = vadd.f32 %v13634_v16, %v13587_v38  ;;  %12484 = vmatmul.mubr.msk.bf16.gmra.mrb[144].mxu0 %vm1990_vm0, %v13011_v0  ;;  %11963 = vst [vmem:[%s13428_s27 + $0x470] sm:$0xff] %v11255_v48   ;;  %vm4872_vm7 = vcmp.gt.f32.partialorder %v2922_v17, 0.0  ;;  %v5384_v24 = vmul.f32 0.2, %v2922_v17 }
 0x137   : > { %v6154_v23 = vsel %vm5130_vm6, %v3954_v4, %v5642_v15  ;;  %v2925_v25 = vadd.f32 %v13634_v16, %v13589_v39  ;;  %12740 = vmatmul.mubr.msk.bf16.gmra.mrb[144].mxu1 %vm1990_vm0, %v13012_v7  ;;  %12487 = vmatprep.mubr.msk.bf16.mxu0 %vm1990_vm0, %v13013_v8  ;;  %vm5128_vm8 = vcmp.gt.f32.partialorder %v3946_v20, 0.0  ;;  %v5640_v26 = vmul.f32 0.2, %v3946_v20 }
 0x138   : > { %vm4875_vm9 = vcmp.gt.f32.partialorder %v2933_v21, 0.0  ;;  %v5387_v27 = vmul.f32 0.2, %v2933_v21  ;;  %12743 = vmatprep.mubr.msk.bf16.mxu1 %vm1990_vm0, %v13014_v14  ;;  %v5896_v28 = vsel %vm4872_vm7, %v2922_v17, %v5384_v24  ;;  %vm5131_vm10 = vcmp.gt.f32.partialorder %v3957_v22, 0.0  ;;  %v13022_v24 = vld [vmem:[%s13177_s22 + $0x670] sm:$0xff]  }
 0x139   : > { %v5643_v29 = vmul.f32 0.2, %v3957_v22  ;;  %vm4873_vm11 = vcmp.gt.f32.partialorder %v2925_v25, 0.0  ;;  %v12381_v30 = vpop.f32.mrb[40].mxu0  ;;  %v6152_v31 = vsel %vm5128_vm8, %v3946_v20, %v5640_v26  ;;  %v5385_v33 = vmul.f32 0.2, %v2925_v25 }
 0x13a   : > { %v5899_v32 = vsel %vm4875_vm9, %v2933_v21, %v5387_v27  ;;  %v3949_v34 = vadd.f32 %v13634_v16, %v13595_v44  ;;  %v12637_v35 = vpop.f32.mrb[40].mxu1  ;;  %v13656_v36 = vpop.f32.mrb[41].mxu0  ;;  %v2946_v40 = vadd.f32 %v13634_v16, %v13610_v57  ;;  %v3970_v41 = vadd.f32 %v13634_v16, %v12633_v62  ;;  %v13017_v44 = vld [vmem:[%s13177_s22 + $0x260] sm:$0xff]  }
 0x13b   : > { %v10630_v38 = vpack.c.bf16 %v5899_v32, %v5898_v19  ;;  %v6155_v39 = vsel %vm5131_vm10, %v3957_v22, %v5643_v29  ;;  %v13662_v42 = vpop.f32.mrb[41].mxu1  ;;  %v13664_v43 = vpop.f32.mrb[42].mxu0  ;;  %v5897_v47 = vsel %vm4873_vm11, %v2925_v25, %v5385_v33  ;;  %v2938_v58 = vadd.f32 %v13634_v16, %v13613_v63  ;;  %v13021_v19 = vld [vmem:[%s13177_s22 + $0x270] sm:$0xff]  }
 0x13c   : > { %v11270_v46 = vpack.c.bf16 %v6155_v39, %v6154_v23  ;;  %vm5129_vm12 = vcmp.gt.f32.partialorder %v3949_v34, 0.0  ;;  %v5641_v49 = vmul.f32 0.2, %v3949_v34  ;;  %v13669_v50 = vpop.f32.mrb[42].mxu1  ;;  %v13671_v51 = vpop.f32.mrb[43].mxu0  ;;  %v10625_v53 = vpack.c.bf16 %v5897_v47, %v5896_v28  ;;  %v13023_v47 = vld [vmem:[%s13177_s22 + $0x278] sm:$0xff]  }
 0x13d   : > { %11838 = vst [vmem:[%s13428_s27 + $0x88] sm:$0xff] %v10630_v38   ;;  %vm4878_vm13 = vcmp.gt.f32.partialorder %v2946_v40, 0.0  ;;  %v5390_v54 = vmul.f32 0.2, %v2946_v40  ;;  %vm5134_vm14 = vcmp.gt.f32.partialorder %v3970_v41, 0.0  ;;  %v13675_v55 = vpop.f32.mrb[43].mxu1  ;;  %v3962_v59 = vadd.f32 %v13634_v16, %v13617_v5 }
 0x13e   : > { %11966 = vst [vmem:[%s13428_s27 + $0x488] sm:$0xff] %v11270_v46   ;;  %v6153_v56 = vsel %vm5129_vm12, %v3949_v34, %v5641_v49  ;;  %v5646_v57 = vmul.f32 0.2, %v3970_v41  ;;  %12488 = vmatmul.mubr.msk.bf16.gmra.mrb[148].mxu0 %vm1990_vm0, %v13015_v37  ;;  %11837 = vst [vmem:[%s13428_s27 + $0x80] sm:$0xff] %v10625_v53   ;;  %v2949_v62 = vadd.f32 %v13634_v16, %v13619_v6  ;;  %vm4876_vm15 = vcmp.gt.f32.partialorder %v2938_v58, 0.0 }
 0x13f   : > { %v11265_v60 = vpack.c.bf16 %v6153_v56, %v6152_v31  ;;  %v5902_v61 = vsel %vm4878_vm13, %v2946_v40, %v5390_v54  ;;  %v3973_v0 = vadd.f32 %v13634_v16, %v13624_v12  ;;  %12744 = vmatmul.mubr.msk.bf16.gmra.mrb[148].mxu1 %vm1990_vm0, %v13016_v45  ;;  %v5388_v63 = vmul.f32 0.2, %v2938_v58  ;;  %12491 = vmatprep.mubr.msk.bf16.mxu0 %vm1990_vm0, %v13017_v44 }
 0x140   : > { %v6158_v1 = vsel %vm5134_vm14, %v3970_v41, %v5646_v57  ;;  %vm5132_vm1 = vcmp.gt.f32.partialorder %v3962_v59, 0.0  ;;  %12747 = vmatprep.mubr.msk.bf16.mxu1 %vm1990_vm0, %v13018_v52  ;;  %v5644_v2 = vmul.f32 0.2, %v3962_v59  ;;  %vm4879_vm2 = vcmp.gt.f32.partialorder %v2949_v62, 0.0 }
 0x141   : > { %11965 = vst [vmem:[%s13428_s27 + $0x480] sm:$0xff] %v11265_v60   ;;  %v5391_v3 = vmul.f32 0.2, %v2949_v62  ;;  %vm5135_vm3 = vcmp.gt.f32.partialorder %v3973_v0, 0.0  ;;  %v5900_v4 = vsel %vm4876_vm15, %v2938_v58, %v5388_v63  ;;  %v5647_v5 = vmul.f32 0.2, %v3973_v0 }
 0x142   : > { %v2941_v6 = vadd.f32 %v13634_v16, %v13626_v13  ;;  %v3965_v7 = vadd.f32 %v13634_v16, %v13638_v18  ;;  %v12385_v8 = vpop.f32.mrb[44].mxu0  ;;  %v13696_v9 = vpop.f32.mrb[44].mxu1  ;;  %v6156_v11 = vsel %vm5132_vm1, %v3962_v59, %v5644_v2  ;;  %v2962_v14 = vadd.f32 %v13634_v16, %v12381_v30  ;;  %v13020_v13 = vld [vmem:[%s13177_s22 + $0x668] sm:$0xff]   ;;  %v13025_v58 = vld [vmem:[%s13177_s22 + $0x280] sm:$0xff]  }
 0x143   : > { %v5903_v12 = vsel %vm4879_vm2, %v2949_v62, %v5391_v3  ;;  %v3986_v48 = vadd.f32 %v13634_v16, %v12637_v35  ;;  %v13701_v15 = vpop.f32.mrb[45].mxu0  ;;  %v13703_v17 = vpop.f32.mrb[45].mxu1  ;;  %v6159_v18 = vsel %vm5135_vm3, %v3973_v0, %v5647_v5  ;;  %v2954_v34 = vadd.f32 %v13634_v16, %v13656_v36  ;;  %v13026_v59 = vld [vmem:[%s13177_s22 + $0x680] sm:$0xff]  }
 0x144   : > { %v10640_v20 = vpack.c.bf16 %v5903_v12, %v5902_v61  ;;  %vm4877_vm4 = vcmp.gt.f32.partialorder %v2941_v6, 0.0  ;;  %v5389_v21 = vmul.f32 0.2, %v2941_v6  ;;  %v13708_v22 = vpop.f32.mrb[46].mxu0  ;;  %v13710_v23 = vpop.f32.mrb[46].mxu1  ;;  %v11280_v25 = vpack.c.bf16 %v6159_v18, %v6158_v1 }
 0x145   : > { %vm5133_vm5 = vcmp.gt.f32.partialorder %v3965_v7, 0.0  ;;  %v5645_v26 = vmul.f32 0.2, %v3965_v7  ;;  %vm4882_vm6 = vcmp.gt.f32.partialorder %v2962_v14, 0.0  ;;  %v13713_v27 = vpop.f32.mrb[47].mxu0  ;;  %v13715_v28 = vpop.f32.mrb[47].mxu1  ;;  %v3978_v35 = vadd.f32 %v13634_v16, %v13662_v42 }
 0x146   : > { %11840 = vst [vmem:[%s13428_s27 + $0x98] sm:$0xff] %v10640_v20   ;;  %v5901_v29 = vsel %vm4877_vm4, %v2941_v6, %v5389_v21  ;;  %v5394_v30 = vmul.f32 0.2, %v2962_v14  ;;  %vm5138_vm7 = vcmp.gt.f32.partialorder %v3986_v48, 0.0  ;;  %v5650_v31 = vmul.f32 0.2, %v3986_v48  ;;  %12492 = vmatmul.mubr.msk.bf16.gmra.mrb[152].mxu0 %vm1990_vm0, %v13019_v10 }
 0x147   : > { %11968 = vst [vmem:[%s13428_s27 + $0x498] sm:$0xff] %v11280_v25   ;;  %v10635_v32 = vpack.c.bf16 %v5901_v29, %v5900_v4  ;;  %v6157_v33 = vsel %vm5133_vm5, %v3965_v7, %v5645_v26  ;;  %12748 = vmatmul.mubr.msk.bf16.gmra.mrb[152].mxu1 %vm1990_vm0, %v13020_v13  ;;  %v2965_v40 = vadd.f32 %v13634_v16, %v13664_v43  ;;  %vm4880_vm8 = vcmp.gt.f32.partialorder %v2954_v34, 0.0  ;;  %v13027_v25 = vld [vmem:[%s13177_s22 + $0x288] sm:$0xff]   ;;  %v13029_v29 = vld [vmem:[%s13177_s22 + $0x290] sm:$0xff]  }
 0x148   : > { %v11275_v37 = vpack.c.bf16 %v6157_v33, %v6156_v11  ;;  %v5906_v38 = vsel %vm4882_vm6, %v2962_v14, %v5394_v30  ;;  %v6162_v39 = vsel %vm5138_vm7, %v3986_v48, %v5650_v31  ;;  %12495 = vmatprep.mubr.msk.bf16.mxu0 %vm1990_vm0, %v13021_v19  ;;  %v5392_v41 = vmul.f32 0.2, %v2954_v34  ;;  %12751 = vmatprep.mubr.msk.bf16.mxu1 %vm1990_vm0, %v13022_v24  ;;  %v13028_v26 = vld [vmem:[%s13177_s22 + $0x688] sm:$0xff]  }
 0x149   : > { %11839 = vst [vmem:[%s13428_s27 + $0x90] sm:$0xff] %v10635_v32   ;;  %vm5136_vm9 = vcmp.gt.f32.partialorder %v3978_v35, 0.0  ;;  %v5648_v36 = vmul.f32 0.2, %v3978_v35  ;;  %vm4883_vm10 = vcmp.gt.f32.partialorder %v2965_v40, 0.0  ;;  %v3989_v45 = vadd.f32 %v13634_v16, %v13669_v50  ;;  %v13736_v44 = vpop.f32.mrb[48].mxu0 }
 0x14a   : > { %11967 = vst [vmem:[%s13428_s27 + $0x490] sm:$0xff] %v11275_v37   ;;  %v5395_v42 = vmul.f32 0.2, %v2965_v40  ;;  %v2957_v43 = vadd.f32 %v13634_v16, %v13671_v51  ;;  %v13738_v46 = vpop.f32.mrb[48].mxu1  ;;  %v5904_v49 = vsel %vm4880_vm8, %v2954_v34, %v5392_v41  ;;  %v3981_v53 = vadd.f32 %v13634_v16, %v13675_v55  ;;  %v13744_v56 = vpop.f32.mrb[49].mxu0  ;;  %v13024_v50 = vld [vmem:[%s13177_s22 + $0x678] sm:$0xff]  }
 0x14b   : > { %v6160_v52 = vsel %vm5136_vm9, %v3978_v35, %v5648_v36  ;;  %v2978_v54 = vadd.f32 %v13634_v16, %v12385_v8  ;;  %v13746_v57 = vpop.f32.mrb[49].mxu1  ;;  %vm5139_vm11 = vcmp.gt.f32.partialorder %v3989_v45, 0.0  ;;  %v5651_v60 = vmul.f32 0.2, %v3989_v45  ;;  %v13752_v61 = vpop.f32.mrb[50].mxu0 }
 0x14c   : > { %v5907_v51 = vsel %vm4883_vm10, %v2965_v40, %v5395_v42  ;;  %vm4881_vm12 = vcmp.gt.f32.partialorder %v2957_v43, 0.0  ;;  %v13754_v62 = vpop.f32.mrb[50].mxu1  ;;  %v5393_v0 = vmul.f32 0.2, %v2957_v43  ;;  %vm5137_vm13 = vcmp.gt.f32.partialorder %v3981_v53, 0.0  ;;  %v13756_v63 = vpop.f32.mrb[51].mxu0 }
 0x14d   : > { %v10650_v55 = vpack.c.bf16 %v5907_v51, %v5906_v38  ;;  %v5649_v1 = vmul.f32 0.2, %v3981_v53  ;;  %v6163_v2 = vsel %vm5139_vm11, %v3989_v45, %v5651_v60  ;;  %vm4886_vm14 = vcmp.gt.f32.partialorder %v2978_v54, 0.0  ;;  %v13760_v5 = vpop.f32.mrb[51].mxu1 }
 0x14e   : > { %v5398_v3 = vmul.f32 0.2, %v2978_v54  ;;  %v4002_v4 = vadd.f32 %v13634_v16, %v13696_v9  ;;  %12496 = vmatmul.mubr.msk.bf16.gmra.mrb[156].mxu0 %vm1990_vm0, %v13023_v47  ;;  %v11290_v6 = vpack.c.bf16 %v6163_v2, %v6162_v39  ;;  %v5905_v7 = vsel %vm4881_vm12, %v2957_v43, %v5393_v0  ;;  %v13031_v2 = vld [vmem:[%s13177_s22 + $0x298] sm:$0xff]  }
 0x14f   : > { %11842 = vst [vmem:[%s13428_s27 + $0xa8] sm:$0xff] %v10650_v55   ;;  %v6161_v8 = vsel %vm5137_vm13, %v3981_v53, %v5649_v1  ;;  %v2970_v10 = vadd.f32 %v13634_v16, %v13701_v15  ;;  %12752 = vmatmul.mubr.msk.bf16.gmra.mrb[156].mxu1 %vm1990_vm0, %v13024_v50  ;;  %v10645_v11 = vpack.c.bf16 %v5905_v7, %v5904_v49 }
 0x150   : > { %v11285_v12 = vpack.c.bf16 %v6161_v8, %v6160_v52  ;;  %v5910_v14 = vsel %vm4886_vm14, %v2978_v54, %v5398_v3  ;;  %vm5142_vm15 = vcmp.gt.f32.partialorder %v4002_v4, 0.0  ;;  %12499 = vmatprep.mubr.msk.bf16.mxu0 %vm1990_vm0, %v13025_v58  ;;  %12755 = vmatprep.mubr.msk.bf16.mxu1 %vm1990_vm0, %v13026_v59  ;;  %11970 = vst [vmem:[%s13428_s27 + $0x4a8] sm:$0xff] %v11290_v6   ;;  %v5654_v9 = vmul.f32 0.2, %v4002_v4  ;;  %v13033_v3 = vld [vmem:[%s13177_s22 + $0x2a0] sm:$0xff]  }
 0x151   : > { %vm4884_vm1 = vcmp.gt.f32.partialorder %v2970_v10, 0.0  ;;  %v5396_v48 = vmul.f32 0.2, %v2970_v10  ;;  %v3994_v15 = vadd.f32 %v13634_v16, %v13703_v17  ;;  %v13773_v13 = vpop.f32.mrb[52].mxu0  ;;  %11841 = vst [vmem:[%s13428_s27 + $0xa0] sm:$0xff] %v10645_v11   ;;  %v2981_v19 = vadd.f32 %v13634_v16, %v13708_v22  ;;  %v13785_v24 = vpop.f32.mrb[52].mxu1 }
 0x152   : > { %11969 = vst [vmem:[%s13428_s27 + $0x4a0] sm:$0xff] %v11285_v12   ;;  %v4005_v20 = vadd.f32 %v13634_v16, %v13710_v23  ;;  %v2973_v18 = vadd.f32 %v13634_v16, %v13713_v27  ;;  %v3997_v21 = vadd.f32 %v13634_v16, %v13715_v28  ;;  %v13787_v17 = vpop.f32.mrb[53].mxu0  ;;  %v6166_v30 = vsel %vm5142_vm15, %v4002_v4, %v5654_v9  ;;  %v13794_v23 = vpop.f32.mrb[53].mxu1  ;;  %v13030_v27 = vld [vmem:[%s13177_s22 + $0x690] sm:$0xff]   ;;  %v13034_v8 = vld [vmem:[%s13177_s22 + $0x6a0] sm:$0xff]  }
 0x153   : > { %v5908_v22 = vsel %vm4884_vm1, %v2970_v10, %v5396_v48  ;;  %vm5140_vm2 = vcmp.gt.f32.partialorder %v3994_v15, 0.0  ;;  %v5652_v31 = vmul.f32 0.2, %v3994_v15  ;;  %v13796_v32 = vpop.f32.mrb[54].mxu0  ;;  %vm4887_vm3 = vcmp.gt.f32.partialorder %v2981_v19, 0.0  ;;  %v13799_v37 = vpop.f32.mrb[54].mxu1 }
 0x154   : > { %v5399_v28 = vmul.f32 0.2, %v2981_v19  ;;  %vm5143_vm4 = vcmp.gt.f32.partialorder %v4005_v20, 0.0  ;;  %v5655_v33 = vmul.f32 0.2, %v4005_v20  ;;  %vm4885_vm5 = vcmp.gt.f32.partialorder %v2973_v18, 0.0 }
 0x155   : > { %v6164_v34 = vsel %vm5140_vm2, %v3994_v15, %v5652_v31  ;;  %v5397_v35 = vmul.f32 0.2, %v2973_v18  ;;  %vm5141_vm6 = vcmp.gt.f32.partialorder %v3997_v21, 0.0  ;;  %v13801_v38 = vpop.f32.mrb[55].mxu0  ;;  %v5653_v41 = vmul.f32 0.2, %v3997_v21 }
 0x156   : > { %v5911_v39 = vsel %vm4887_vm3, %v2981_v19, %v5399_v28  ;;  %v6167_v40 = vsel %vm5143_vm4, %v4005_v20, %v5655_v33  ;;  %v2994_v36 = vadd.f32 %v13634_v16, %v13736_v44  ;;  %v13805_v42 = vpop.f32.mrb[55].mxu1  ;;  %12500 = vmatmul.mubr.msk.bf16.gmra.mrb[160].mxu0 %vm1990_vm0, %v13027_v25  ;;  %v4018_v49 = vadd.f32 %v13634_v16, %v13738_v46 }
 0x157   : > { %v10660_v45 = vpack.c.bf16 %v5911_v39, %v5910_v14  ;;  %v11300_v43 = vpack.c.bf16 %v6167_v40, %v6166_v30  ;;  %v5909_v47 = vsel %vm4885_vm5, %v2973_v18, %v5397_v35  ;;  %12756 = vmatmul.mubr.msk.bf16.gmra.mrb[160].mxu1 %vm1990_vm0, %v13028_v26  ;;  %v6165_v53 = vsel %vm5141_vm6, %v3997_v21, %v5653_v41  ;;  %v13035_v39 = vld [vmem:[%s13177_s22 + $0x2a8] sm:$0xff]  }
 0x158   : > { %v10655_v52 = vpack.c.bf16 %v5909_v47, %v5908_v22  ;;  %vm4890_vm7 = vcmp.gt.f32.partialorder %v2994_v36, 0.0  ;;  %v5402_v54 = vmul.f32 0.2, %v2994_v36  ;;  %12503 = vmatprep.mubr.msk.bf16.mxu0 %vm1990_vm0, %v13029_v29  ;;  %12759 = vmatprep.mubr.msk.bf16.mxu1 %vm1990_vm0, %v13030_v27  ;;  %v11295_v44 = vpack.c.bf16 %v6165_v53, %v6164_v34  ;;  %v13037_v47 = vld [vmem:[%s13177_s22 + $0x2b0] sm:$0xff]  }
 0x159   : > { %11844 = vst [vmem:[%s13428_s27 + $0xb8] sm:$0xff] %v10660_v45   ;;  %11972 = vst [vmem:[%s13428_s27 + $0x4b8] sm:$0xff] %v11300_v43   ;;  %vm5146_vm8 = vcmp.gt.f32.partialorder %v4018_v49, 0.0  ;;  %v5658_v50 = vmul.f32 0.2, %v4018_v49  ;;  %v2986_v46 = vadd.f32 %v13634_v16, %v13744_v56  ;;  %v13817_v58 = vpop.f32.mrb[56].mxu0  ;;  %v4010_v51 = vadd.f32 %v13634_v16, %v13746_v57 }
 0x15a   : > { %11843 = vst [vmem:[%s13428_s27 + $0xb0] sm:$0xff] %v10655_v52   ;;  %v5914_v59 = vsel %vm4890_vm7, %v2994_v36, %v5402_v54  ;;  %v2997_v60 = vadd.f32 %v13634_v16, %v13752_v61  ;;  %v4021_v55 = vadd.f32 %v13634_v16, %v13754_v62  ;;  %v13826_v0 = vpop.f32.mrb[56].mxu1  ;;  %v13828_v1 = vpop.f32.mrb[57].mxu0  ;;  %v13032_v56 = vld [vmem:[%s13177_s22 + $0x698] sm:$0xff]   ;;  %11971 = vst [vmem:[%s13428_s27 + $0x4b0] sm:$0xff] %v11295_v44  }
 0x15b   : > { %v6170_v4 = vsel %vm5146_vm8, %v4018_v49, %v5658_v50  ;;  %vm4888_vm9 = vcmp.gt.f32.partialorder %v2986_v46, 0.0  ;;  %v5400_v6 = vmul.f32 0.2, %v2986_v46  ;;  %v2989_v57 = vadd.f32 %v13634_v16, %v13756_v63  ;;  %v13836_v7 = vpop.f32.mrb[57].mxu1  ;;  %v13838_v61 = vpop.f32.mrb[58].mxu0  ;;  %v13038_v49 = vld [vmem:[%s13177_s22 + $0x6b0] sm:$0xff]  }
 0x15c   : > { %vm5144_vm10 = vcmp.gt.f32.partialorder %v4010_v51, 0.0  ;;  %v5656_v62 = vmul.f32 0.2, %v4010_v51  ;;  %vm4891_vm11 = vcmp.gt.f32.partialorder %v2997_v60, 0.0  ;;  %v5403_v10 = vmul.f32 0.2, %v2997_v60 }
 0x15d   : > { %v5912_v11 = vsel %vm4888_vm9, %v2986_v46, %v5400_v6  ;;  %vm5147_vm12 = vcmp.gt.f32.partialorder %v4021_v55, 0.0  ;;  %v5659_v12 = vmul.f32 0.2, %v4021_v55  ;;  %vm4889_vm13 = vcmp.gt.f32.partialorder %v2989_v57, 0.0  ;;  %v13841_v14 = vpop.f32.mrb[58].mxu1  ;;  %v13843_v9 = vpop.f32.mrb[59].mxu0 }
 0x15e   : > { %v6168_v48 = vsel %vm5144_vm10, %v4010_v51, %v5656_v62  ;;  %v5915_v15 = vsel %vm4891_vm11, %v2997_v60, %v5403_v10  ;;  %v5401_v63 = vmul.f32 0.2, %v2989_v57  ;;  %v4013_v19 = vadd.f32 %v13634_v16, %v13760_v5  ;;  %v13847_v20 = vpop.f32.mrb[59].mxu1  ;;  %12504 = vmatmul.mubr.msk.bf16.gmra.mrb[164].mxu0 %vm1990_vm0, %v13031_v2 }
 0x15f   : > { %v10670_v18 = vpack.c.bf16 %v5915_v15, %v5914_v59  ;;  %v6171_v21 = vsel %vm5147_vm12, %v4021_v55, %v5659_v12  ;;  %v3010_v25 = vadd.f32 %v13634_v16, %v13773_v13  ;;  %v4034_v26 = vadd.f32 %v13634_v16, %v13785_v24  ;;  %12760 = vmatmul.mubr.msk.bf16.gmra.mrb[164].mxu1 %vm1990_vm0, %v13032_v56 }
 0x160   : > { %v11310_v29 = vpack.c.bf16 %v6171_v21, %v6170_v4  ;;  %v5913_v30 = vsel %vm4889_vm13, %v2989_v57, %v5401_v63  ;;  %vm5145_vm14 = vcmp.gt.f32.partialorder %v4013_v19, 0.0  ;;  %v5657_v22 = vmul.f32 0.2, %v4013_v19  ;;  %12507 = vmatprep.mubr.msk.bf16.mxu0 %vm1990_vm0, %v13033_v3  ;;  %12763 = vmatprep.mubr.msk.bf16.mxu1 %vm1990_vm0, %v13034_v8  ;;  %v13039_v8 = vld [vmem:[%s13177_s22 + $0x2b8] sm:$0xff]  }
 0x161   : > { %11846 = vst [vmem:[%s13428_s27 + $0xc8] sm:$0xff] %v10670_v18   ;;  %v10665_v5 = vpack.c.bf16 %v5913_v30, %v5912_v11  ;;  %vm4894_vm15 = vcmp.gt.f32.partialorder %v3010_v25, 0.0  ;;  %v5406_v31 = vmul.f32 0.2, %v3010_v25  ;;  %vm5150_vm1 = vcmp.gt.f32.partialorder %v4034_v26, 0.0  ;;  %v13858_v13 = vpop.f32.mrb[60].mxu0 }
 0x162   : > { %11974 = vst [vmem:[%s13428_s27 + $0x4c8] sm:$0xff] %v11310_v29   ;;  %v6169_v24 = vsel %vm5145_vm14, %v4013_v19, %v5657_v22  ;;  %v5662_v27 = vmul.f32 0.2, %v4034_v26  ;;  %v3002_v28 = vadd.f32 %v13634_v16, %v13787_v17  ;;  %v4026_v33 = vadd.f32 %v13634_v16, %v13794_v23  ;;  %v13865_v34 = vpop.f32.mrb[60].mxu1  ;;  %v13867_v35 = vpop.f32.mrb[61].mxu0  ;;  %v13036_v23 = vld [vmem:[%s13177_s22 + $0x6a8] sm:$0xff]  }
 0x163   : > { %11845 = vst [vmem:[%s13428_s27 + $0xc0] sm:$0xff] %v10665_v5   ;;  %v11305_v40 = vpack.c.bf16 %v6169_v24, %v6168_v48  ;;  %v5918_v41 = vsel %vm4894_vm15, %v3010_v25, %v5406_v31  ;;  %v3013_v36 = vadd.f32 %v13634_v16, %v13796_v32  ;;  %v4037_v45 = vadd.f32 %v13634_v16, %v13799_v37  ;;  %v13875_v43 = vpop.f32.mrb[61].mxu1  ;;  %v13877_v17 = vpop.f32.mrb[62].mxu0  ;;  %v13040_v21 = vld [vmem:[%s13177_s22 + $0x6b8] sm:$0xff]   ;;  %v13042_v31 = vld [vmem:[%s13177_s22 + $0x6c0] sm:$0xff]  }
 0x164   : > { %v6174_v52 = vsel %vm5150_vm1, %v4034_v26, %v5662_v27  ;;  %vm4892_vm2 = vcmp.gt.f32.partialorder %v3002_v28, 0.0  ;;  %v5404_v53 = vmul.f32 0.2, %v3002_v28  ;;  %vm5148_vm3 = vcmp.gt.f32.partialorder %v4026_v33, 0.0  ;;  %v13883_v54 = vpop.f32.mrb[62].mxu1  ;;  %v13885_v44 = vpop.f32.mrb[63].mxu0 }
 0x165   : > { %11973 = vst [vmem:[%s13428_s27 + $0x4c0] sm:$0xff] %v11305_v40   ;;  %v5660_v32 = vmul.f32 0.2, %v4026_v33  ;;  %vm4895_vm4 = vcmp.gt.f32.partialorder %v3013_v36, 0.0  ;;  %v5407_v37 = vmul.f32 0.2, %v3013_v36  ;;  %v3005_v59 = vadd.f32 %v13634_v16, %v13801_v38 }
 0x166   : > { %vm5151_vm5 = vcmp.gt.f32.partialorder %v4037_v45, 0.0  ;;  %v5916_v50 = vsel %vm4892_vm2, %v3002_v28, %v5404_v53  ;;  %v5663_v46 = vmul.f32 0.2, %v4037_v45  ;;  %v4029_v51 = vadd.f32 %v13634_v16, %v13805_v42  ;;  %v13892_v60 = vpop.f32.mrb[63].mxu1  ;;  %12508 = vmatmul.mubr.msk.bf16.gmra.mrb[168].mxu0 %vm1990_vm0, %v13035_v39 }
 0x167   : > { %v6172_v55 = vsel %vm5148_vm3, %v4026_v33, %v5660_v32  ;;  %v5919_v2 = vsel %vm4895_vm4, %v3013_v36, %v5407_v37  ;;  %v3026_v56 = vadd.f32 %v13634_v16, %v13817_v58  ;;  %v4050_v3 = vadd.f32 %v13634_v16, %v13826_v0  ;;  %12764 = vmatmul.mubr.msk.bf16.gmra.mrb[168].mxu1 %vm1990_vm0, %v13036_v23 }
 0x168   : > { %v10680_v38 = vpack.c.bf16 %v5919_v2, %v5918_v41  ;;  %v6175_v4 = vsel %vm5151_vm5, %v4037_v45, %v5663_v46  ;;  %vm4893_vm6 = vcmp.gt.f32.partialorder %v3005_v59, 0.0  ;;  %v5405_v42 = vmul.f32 0.2, %v3005_v59  ;;  %12511 = vmatprep.mubr.msk.bf16.mxu0 %vm1990_vm0, %v13037_v47  ;;  %12767 = vmatprep.mubr.msk.bf16.mxu1 %vm1990_vm0, %v13038_v49 }
 0x169   : > { %v11320_v6 = vpack.c.bf16 %v6175_v4, %v6174_v52  ;;  %vm5149_vm7 = vcmp.gt.f32.partialorder %v4029_v51, 0.0  ;;  %v5661_v57 = vmul.f32 0.2, %v4029_v51  ;;  %vm4898_vm8 = vcmp.gt.f32.partialorder %v3026_v56, 0.0  ;;  %v13902_v58 = vpop.f32.mrb[64].mxu0  ;;  %v13906_v11 = vpop.f32.mrb[64].mxu1 }
 0x16a   : > { %11848 = vst [vmem:[%s13428_s27 + $0xd8] sm:$0xff] %v10680_v38   ;;  %v5917_v0 = vsel %vm4893_vm6, %v3005_v59, %v5405_v42  ;;  %v5410_v62 = vmul.f32 0.2, %v3026_v56  ;;  %vm5154_vm9 = vcmp.gt.f32.partialorder %v4050_v3, 0.0  ;;  %v5666_v10 = vmul.f32 0.2, %v4050_v3 }
 0x16b   : > { %11976 = vst [vmem:[%s13428_s27 + $0x4d8] sm:$0xff] %v11320_v6   ;;  %v10675_v12 = vpack.c.bf16 %v5917_v0, %v5916_v50  ;;  %v6173_v48 = vsel %vm5149_vm7, %v4029_v51, %v5661_v57  ;;  %v3018_v15 = vadd.f32 %v13634_v16, %v13828_v1  ;;  %v4042_v63 = vadd.f32 %v13634_v16, %v13836_v7  ;;  %v13913_v19 = vpop.f32.mrb[65].mxu0  ;;  %v13915_v18 = vpop.f32.mrb[65].mxu1  ;;  %v13041_v1 = vld [vmem:[%s13177_s22 + $0x2c0] sm:$0xff]   ;;  %v13043_v50 = vld [vmem:[%s13177_s22 + $0x2c8] sm:$0xff]  }
 0x16c   : > { %v11315_v25 = vpack.c.bf16 %v6173_v48, %v6172_v55  ;;  %v5922_v26 = vsel %vm4898_vm8, %v3026_v56, %v5410_v62  ;;  %v6178_v29 = vsel %vm5154_vm9, %v4050_v3, %v5666_v10  ;;  %v3029_v30 = vadd.f32 %v13634_v16, %v13838_v61  ;;  %v13921_v22 = vpop.f32.mrb[66].mxu0  ;;  %v13923_v5 = vpop.f32.mrb[66].mxu1  ;;  %v13045_v3 = vld [vmem:[%s13177_s22 + $0x2d0] sm:$0xff]  }
 0x16d   : > { %11847 = vst [vmem:[%s13428_s27 + $0xd0] sm:$0xff] %v10675_v12   ;;  %vm4896_vm10 = vcmp.gt.f32.partialorder %v3018_v15, 0.0  ;;  %v5408_v7 = vmul.f32 0.2, %v3018_v15  ;;  %vm5152_vm11 = vcmp.gt.f32.partialorder %v4042_v63, 0.0  ;;  %v4053_v28 = vadd.f32 %v13634_v16, %v13841_v14  ;;  %v13933_v33 = vpop.f32.mrb[67].mxu0 }
 0x16e   : > { %v5664_v24 = vmul.f32 0.2, %v4042_v63  ;;  %11975 = vst [vmem:[%s13428_s27 + $0x4d0] sm:$0xff] %v11315_v25   ;;  %vm4899_vm12 = vcmp.gt.f32.partialorder %v3029_v30, 0.0  ;;  %v5411_v27 = vmul.f32 0.2, %v3029_v30  ;;  %v3021_v61 = vadd.f32 %v13634_v16, %v13843_v9  ;;  %12512 = vmatmul.mubr.msk.bf16.gmra.mrb[172].mxu0 %vm1990_vm0, %v13039_v8 }
 0x16f   : > { %v13935_v39 = vpop.f32.mrb[67].mxu1  ;;  %v5920_v40 = vsel %vm4896_vm10, %v3018_v15, %v5408_v7  ;;  %v4045_v36 = vadd.f32 %v13634_v16, %v13847_v20  ;;  %v3042_v45 = vadd.f32 %v13634_v16, %v13858_v13  ;;  %12768 = vmatmul.mubr.msk.bf16.gmra.mrb[172].mxu1 %vm1990_vm0, %v13040_v21  ;;  %vm5155_vm13 = vcmp.gt.f32.partialorder %v4053_v28, 0.0  ;;  %12515 = vmatprep.mubr.msk.bf16.mxu0 %vm1990_vm0, %v13041_v1  ;;  %v13046_v8 = vld [vmem:[%s13177_s22 + $0x6d0] sm:$0xff]  }
 0x170   : > { %v6176_v41 = vsel %vm5152_vm11, %v4042_v63, %v5664_v24  ;;  %v5923_v14 = vsel %vm4899_vm12, %v3029_v30, %v5411_v27  ;;  %v5667_v9 = vmul.f32 0.2, %v4053_v28  ;;  %vm4897_vm14 = vcmp.gt.f32.partialorder %v3021_v61, 0.0  ;;  %12771 = vmatprep.mubr.msk.bf16.mxu1 %vm1990_vm0, %v13042_v31  ;;  %v13047_v27 = vld [vmem:[%s13177_s22 + $0x2d8] sm:$0xff]  }
 0x171   : > { %v10690_v23 = vpack.c.bf16 %v5923_v14, %v5922_v26  ;;  %v5409_v47 = vmul.f32 0.2, %v3021_v61  ;;  %vm5153_vm15 = vcmp.gt.f32.partialorder %v4045_v36, 0.0  ;;  %v5665_v49 = vmul.f32 0.2, %v4045_v36  ;;  %v13945_v20 = vpop.f32.mrb[68].mxu0 }
 0x172   : > { %v6179_v13 = vsel %vm5155_vm13, %v4053_v28, %v5667_v9  ;;  %vm4902_vm1 = vcmp.gt.f32.partialorder %v3042_v45, 0.0  ;;  %v5414_v52 = vmul.f32 0.2, %v3042_v45  ;;  %v4066_v53 = vadd.f32 %v13634_v16, %v13865_v34  ;;  %v13949_v32 = vpop.f32.mrb[68].mxu1  ;;  %v13951_v37 = vpop.f32.mrb[69].mxu0  ;;  %v13044_v34 = vld [vmem:[%s13177_s22 + $0x6c8] sm:$0xff]  }
 0x173   : > { %11850 = vst [vmem:[%s13428_s27 + $0xe8] sm:$0xff] %v10690_v23   ;;  %v11330_v46 = vpack.c.bf16 %v6179_v13, %v6178_v29  ;;  %v5921_v59 = vsel %vm4897_vm14, %v3021_v61, %v5409_v47  ;;  %v6177_v51 = vsel %vm5153_vm15, %v4045_v36, %v5665_v49  ;;  %v3034_v55 = vadd.f32 %v13634_v16, %v13867_v35  ;;  %v13958_v2 = vpop.f32.mrb[69].mxu1  ;;  %v13960_v56 = vpop.f32.mrb[70].mxu0  ;;  %v13048_v14 = vld [vmem:[%s13177_s22 + $0x6d8] sm:$0xff]  }
 0x174   : > { %v10685_v38 = vpack.c.bf16 %v5921_v59, %v5920_v40  ;;  %v11325_v4 = vpack.c.bf16 %v6177_v51, %v6176_v41  ;;  %v5926_v42 = vsel %vm4902_vm1, %v3042_v45, %v5414_v52  ;;  %vm5158_vm2 = vcmp.gt.f32.partialorder %v4066_v53, 0.0  ;;  %v13965_v6 = vpop.f32.mrb[70].mxu1  ;;  %v13967_v57 = vpop.f32.mrb[71].mxu0  ;;  %v13050_v52 = vld [vmem:[%s13177_s22 + $0x6e0] sm:$0xff]  }
 0x175   : > { %11978 = vst [vmem:[%s13428_s27 + $0x4e8] sm:$0xff] %v11330_v46   ;;  %v5670_v35 = vmul.f32 0.2, %v4066_v53  ;;  %vm4900_vm3 = vcmp.gt.f32.partialorder %v3034_v55, 0.0  ;;  %v5412_v0 = vmul.f32 0.2, %v3034_v55  ;;  %v4058_v62 = vadd.f32 %v13634_v16, %v13875_v43 }
 0x176   : > { %v13973_v10 = vpop.f32.mrb[71].mxu1  ;;  %11849 = vst [vmem:[%s13428_s27 + $0xe0] sm:$0xff] %v10685_v38   ;;  %11977 = vst [vmem:[%s13428_s27 + $0x4e0] sm:$0xff] %v11325_v4   ;;  %v3045_v12 = vadd.f32 %v13634_v16, %v13877_v17  ;;  %v4069_v48 = vadd.f32 %v13634_v16, %v13883_v54  ;;  %v3037_v15 = vadd.f32 %v13634_v16, %v13885_v44  ;;  %12516 = vmatmul.mubr.msk.bf16.gmra.mrb[176].mxu0 %vm1990_vm0, %v13043_v50 }
 0x177   : > { %v4061_v63 = vadd.f32 %v13634_v16, %v13892_v60  ;;  %v6182_v43 = vsel %vm5158_vm2, %v4066_v53, %v5670_v35  ;;  %v5924_v21 = vsel %vm4900_vm3, %v3034_v55, %v5412_v0  ;;  %vm5156_vm4 = vcmp.gt.f32.partialorder %v4058_v62, 0.0  ;;  %12772 = vmatmul.mubr.msk.bf16.gmra.mrb[176].mxu1 %vm1990_vm0, %v13044_v34  ;;  %12519 = vmatprep.mubr.msk.bf16.mxu0 %vm1990_vm0, %v13045_v3 }
 0x178   : > { %v5668_v25 = vmul.f32 0.2, %v4058_v62  ;;  %vm4903_vm5 = vcmp.gt.f32.partialorder %v3045_v12, 0.0  ;;  %v5415_v17 = vmul.f32 0.2, %v3045_v12  ;;  %vm5159_vm6 = vcmp.gt.f32.partialorder %v4069_v48, 0.0  ;;  %12775 = vmatprep.mubr.msk.bf16.mxu1 %vm1990_vm0, %v13046_v8 }
 0x179   : > { %v5671_v54 = vmul.f32 0.2, %v4069_v48  ;;  %vm4901_vm7 = vcmp.gt.f32.partialorder %v3037_v15, 0.0  ;;  %v5413_v60 = vmul.f32 0.2, %v3037_v15  ;;  %vm5157_vm8 = vcmp.gt.f32.partialorder %v4061_v63, 0.0 }
 0x17a   : > { %v6180_v44 = vsel %vm5156_vm4, %v4058_v62, %v5668_v25  ;;  %v13990_v26 = vpop.f32.mrb[72].mxu0  ;;  %v5927_v29 = vsel %vm4903_vm5, %v3045_v12, %v5415_v17  ;;  %v5669_v1 = vmul.f32 0.2, %v4061_v63  ;;  %v3058_v31 = vadd.f32 %v13634_v16, %v13902_v58  ;;  %v13994_v7 = vpop.f32.mrb[72].mxu1  ;;  %v13049_v58 = vld [vmem:[%s13177_s22 + $0x2e0] sm:$0xff]  }
 0x17b   : > { %v6183_v30 = vsel %vm5159_vm6, %v4069_v48, %v5671_v54  ;;  %v13996_v24 = vpop.f32.mrb[73].mxu0  ;;  %v10700_v28 = vpack.c.bf16 %v5927_v29, %v5926_v42  ;;  %v5925_v40 = vsel %vm4901_vm7, %v3037_v15, %v5413_v60  ;;  %v4082_v41 = vadd.f32 %v13634_v16, %v13906_v11  ;;  %v14001_v36 = vpop.f32.mrb[73].mxu1  ;;  %v13051_v48 = vld [vmem:[%s13177_s22 + $0x2e8] sm:$0xff]   ;;  %v13053_v54 = vld [vmem:[%s13177_s22 + $0x2f0] sm:$0xff]  }
 0x17c   : > { %v11340_v61 = vpack.c.bf16 %v6183_v30, %v6182_v43  ;;  %v14003_v45 = vpop.f32.mrb[74].mxu0  ;;  %v10695_v9 = vpack.c.bf16 %v5925_v40, %v5924_v21  ;;  %v6181_v23 = vsel %vm5157_vm8, %v4061_v63, %v5669_v1  ;;  %vm4906_vm9 = vcmp.gt.f32.partialorder %v3058_v31, 0.0  ;;  %v14008_v49 = vpop.f32.mrb[74].mxu1 }
 0x17d   : > { %v5418_v47 = vmul.f32 0.2, %v3058_v31  ;;  %v14010_v13 = vpop.f32.mrb[75].mxu0  ;;  %11852 = vst [vmem:[%s13428_s27 + $0xf8] sm:$0xff] %v10700_v28   ;;  %v11335_v11 = vpack.c.bf16 %v6181_v23, %v6180_v44  ;;  %vm5162_vm10 = vcmp.gt.f32.partialorder %v4082_v41, 0.0  ;;  %v3050_v50 = vadd.f32 %v13634_v16, %v13913_v19  ;;  %v14017_v46 = vpop.f32.mrb[75].mxu1 }
 0x17e   : > { %11980 = vst [vmem:[%s13428_s27 + $0x4f8] sm:$0xff] %v11340_v61   ;;  %v5674_v53 = vmul.f32 0.2, %v4082_v41  ;;  %11851 = vst [vmem:[%s13428_s27 + $0xf0] sm:$0xff] %v10695_v9   ;;  %v4074_v51 = vadd.f32 %v13634_v16, %v13915_v18  ;;  %v3061_v55 = vadd.f32 %v13634_v16, %v13921_v22  ;;  %v4085_v34 = vadd.f32 %v13634_v16, %v13923_v5  ;;  %v14065_v61 = vld [vmem:[%s15901_s2] ss:$0 sm:$0xff] }
 0x17f   : > { %v5930_v59 = vsel %vm4906_vm9, %v3058_v31, %v5418_v47  ;;  %12520 = vmatmul.mubr.msk.bf16.gmra.mrb[180].mxu0 %vm1990_vm0, %v13047_v27  ;;  %11979 = vst [vmem:[%s13428_s27 + $0x4f0] sm:$0xff] %v11335_v11   ;;  %vm4904_vm11 = vcmp.gt.f32.partialorder %v3050_v50, 0.0  ;;  %v5416_v38 = vmul.f32 0.2, %v3050_v50  ;;  %v3053_v19 = vadd.f32 %v13634_v16, %v13933_v33  ;;  %12776 = vmatmul.mubr.msk.bf16.gmra.mrb[180].mxu1 %vm1990_vm0, %v13048_v14 }
 0x180   : > { %v6186_v3 = vsel %vm5162_vm10, %v4082_v41, %v5674_v53  ;;  %12523 = vmatprep.mubr.msk.bf16.mxu0 %vm1990_vm0, %v13049_v58  ;;  %vm5160_vm12 = vcmp.gt.f32.partialorder %v4074_v51, 0.0  ;;  %v5672_v18 = vmul.f32 0.2, %v4074_v51  ;;  %vm4907_vm13 = vcmp.gt.f32.partialorder %v3061_v55, 0.0  ;;  %12779 = vmatprep.mubr.msk.bf16.mxu1 %vm1990_vm0, %v13050_v52 }
 0x181   : > { %v5419_v22 = vmul.f32 0.2, %v3061_v55  ;;  %v5928_v5 = vsel %vm4904_vm11, %v3050_v50, %v5416_v38  ;;  %vm5163_vm14 = vcmp.gt.f32.partialorder %v4085_v34, 0.0  ;;  %v5675_v4 = vmul.f32 0.2, %v4085_v34  ;;  %v14033_v42 = vpop.f32.mrb[76].mxu0 }
 0x182   : > { %vm4905_vm15 = vcmp.gt.f32.partialorder %v3053_v19, 0.0  ;;  %v6184_v33 = vsel %vm5160_vm12, %v4074_v51, %v5672_v18  ;;  %v5417_v35 = vmul.f32 0.2, %v3053_v19  ;;  %v4077_v0 = vadd.f32 %v13634_v16, %v13935_v39  ;;  %v14037_v62 = vpop.f32.mrb[76].mxu1  ;;  %v14039_v12 = vpop.f32.mrb[77].mxu0  ;;  %v13052_v39 = vld [vmem:[%s13177_s22 + $0x6e8] sm:$0xff]  }
 0x183   : > { %v5931_v8 = vsel %vm4907_vm13, %v3061_v55, %v5419_v22  ;;  %v6187_v63 = vsel %vm5163_vm14, %v4085_v34, %v5675_v4  ;;  %v3074_v43 = vadd.f32 %v13634_v16, %v13945_v20  ;;  %v4098_v21 = vadd.f32 %v13634_v16, %v13949_v32  ;;  %v14046_v25 = vpop.f32.mrb[77].mxu1  ;;  %v14048_v17 = vpop.f32.mrb[78].mxu0  ;;  %v13054_v20 = vld [vmem:[%s13177_s22 + $0x6f0] sm:$0xff]   ;;  %v13055_v51 = vld [vmem:[%s13177_s22 + $0x2f8] sm:$0xff]   ;;  %v13057_v18 = vld [vmem:[%s13177_s22 + $0x300] sm:$0xff]  }
 0x184   : > { %v10710_v15 = vpack.c.bf16 %v5931_v8, %v5930_v59  ;;  %v11350_v44 = vpack.c.bf16 %v6187_v63, %v6186_v3  ;;  %v5929_v60 = vsel %vm4905_vm15, %v3053_v19, %v5417_v35  ;;  %vm5161_vm1 = vcmp.gt.f32.partialorder %v4077_v0, 0.0  ;;  %v14053_v30 = vpop.f32.mrb[78].mxu1  ;;  %v14055_v1 = vpop.f32.mrb[79].mxu0 }
 0x185   : > { %v5673_v29 = vmul.f32 0.2, %v4077_v0  ;;  %v10705_v16 = vpack.c.bf16 %v5929_v60, %v5928_v5  ;;  %vm4910_vm2 = vcmp.gt.f32.partialorder %v3074_v43, 0.0  ;;  %v5422_v32 = vmul.f32 0.2, %v3074_v43  ;;  %v14059_v31 = vpop.f32.mrb[79].mxu1 }
 0x186   : > { %11854 = vst [vmem:[%s13428_s27 + $0x108] sm:$0xff] %v10710_v15   ;;  %vm5166_vm3 = vcmp.gt.f32.partialorder %v4098_v21, 0.0  ;;  %11982 = vst [vmem:[%s13428_s27 + $0x508] sm:$0xff] %v11350_v44   ;;  %v5678_v28 = vmul.f32 0.2, %v4098_v21  ;;  %v3066_v40 = vadd.f32 %v14065_v61, %v13951_v37  ;;  %v4090_v41 = vadd.f32 %v14065_v61, %v13958_v2 }
 0x187   : > { %v6185_v27 = vsel %vm5161_vm1, %v4077_v0, %v5673_v29  ;;  %12524 = vmatmul.mubr.msk.bf16.gmra.mrb[184].mxu0 %vm1990_vm0, %v13051_v48  ;;  %11853 = vst [vmem:[%s13428_s27 + $0x100] sm:$0xff] %v10705_v16   ;;  %v5934_v58 = vsel %vm4910_vm2, %v3074_v43, %v5422_v32  ;;  %v3077_v9 = vadd.f32 %v14065_v61, %v13960_v56 }
 0x188   : > { %v11345_v14 = vpack.c.bf16 %v6185_v27, %v6184_v33  ;;  %v4101_v23 = vadd.f32 %v14065_v61, %v13965_v6  ;;  %12780 = vmatmul.mubr.msk.bf16.gmra.mrb[184].mxu1 %vm1990_vm0, %v13052_v39  ;;  %v6190_v47 = vsel %vm5166_vm3, %v4098_v21, %v5678_v28  ;;  %vm4908_vm4 = vcmp.gt.f32.partialorder %v3066_v40, 0.0  ;;  %12527 = vmatprep.mubr.msk.bf16.mxu0 %vm1990_vm0, %v13053_v54 }
 0x189   : > { %v5420_v37 = vmul.f32 0.2, %v3066_v40  ;;  %vm5164_vm5 = vcmp.gt.f32.partialorder %v4090_v41, 0.0  ;;  %12783 = vmatprep.mubr.msk.bf16.mxu1 %vm1990_vm0, %v13054_v20  ;;  %v5676_v2 = vmul.f32 0.2, %v4090_v41  ;;  %vm4911_vm6 = vcmp.gt.f32.partialorder %v3077_v9, 0.0 }
 0x18a   : > { %11981 = vst [vmem:[%s13428_s27 + $0x500] sm:$0xff] %v11345_v14   ;;  %v5423_v52 = vmul.f32 0.2, %v3077_v9  ;;  %vm5167_vm7 = vcmp.gt.f32.partialorder %v4101_v23, 0.0  ;;  %v5679_v6 = vmul.f32 0.2, %v4101_v23  ;;  %v3069_v11 = vadd.f32 %v14065_v61, %v13967_v57 }
 0x18b   : > { %v5932_v56 = vsel %vm4908_vm4, %v3066_v40, %v5420_v37  ;;  %v4093_v53 = vadd.f32 %v14065_v61, %v13973_v10  ;;  %v14085_v50 = vpop.f32.mrb[80].mxu0  ;;  %v14087_v59 = vpop.f32.mrb[80].mxu1  ;;  %v6188_v55 = vsel %vm5164_vm5, %v4090_v41, %v5676_v2  ;;  %v3090_v3 = vadd.f32 %v14065_v61, %v13990_v26  ;;  %v13056_v10 = vld [vmem:[%s13177_s22 + $0x6f8] sm:$0xff]   ;;  %v13058_v26 = vld [vmem:[%s13177_s22 + $0x700] sm:$0xff]   ;;  %v13059_v41 = vld [vmem:[%s13177_s22 + $0x308] sm:$0xff]  }
 0x18c   : > { %v5935_v34 = vsel %vm4911_vm6, %v3077_v9, %v5423_v52  ;;  %v4114_v38 = vadd.f32 %v14065_v61, %v13994_v7  ;;  %v14094_v19 = vpop.f32.mrb[81].mxu0  ;;  %v14096_v57 = vpop.f32.mrb[81].mxu1  ;;  %v6191_v5 = vsel %vm5167_vm7, %v4101_v23, %v5679_v6  ;;  %vm4909_vm8 = vcmp.gt.f32.partialorder %v3069_v11, 0.0  ;;  %v13061_v2 = vld [vmem:[%s13177_s22 + $0x310] sm:$0xff]  }
 0x18d   : > { %v10720_v22 = vpack.c.bf16 %v5935_v34, %v5934_v58  ;;  %v5421_v4 = vmul.f32 0.2, %v3069_v11  ;;  %v14101_v33 = vpop.f32.mrb[82].mxu0  ;;  %v14103_v8 = vpop.f32.mrb[82].mxu1  ;;  %v11360_v35 = vpack.c.bf16 %v6191_v5, %v6190_v47  ;;  %vm5165_vm9 = vcmp.gt.f32.partialorder %v4093_v53, 0.0 }
 0x18e   : > { %v5677_v7 = vmul.f32 0.2, %v4093_v53  ;;  %vm4914_vm10 = vcmp.gt.f32.partialorder %v3090_v3, 0.0  ;;  %v14106_v0 = vpop.f32.mrb[83].mxu0  ;;  %v14108_v48 = vpop.f32.mrb[83].mxu1  ;;  %vm5170_vm11 = vcmp.gt.f32.partialorder %v4114_v38, 0.0  ;;  %v3082_v54 = vadd.f32 %v14065_v61, %v13996_v24 }
 0x18f   : > { %11856 = vst [vmem:[%s13428_s27 + $0x118] sm:$0xff] %v10720_v22   ;;  %v5933_v15 = vsel %vm4909_vm8, %v3069_v11, %v5421_v4  ;;  %v5426_v63 = vmul.f32 0.2, %v3090_v3  ;;  %v5682_v43 = vmul.f32 0.2, %v4114_v38  ;;  %12528 = vmatmul.mubr.msk.bf16.gmra.mrb[188].mxu0 %vm1990_vm0, %v13055_v51  ;;  %11984 = vst [vmem:[%s13428_s27 + $0x518] sm:$0xff] %v11360_v35   ;;  %v4106_v44 = vadd.f32 %v14065_v61, %v14001_v36 }
 0x190   : > { %v10715_v21 = vpack.c.bf16 %v5933_v15, %v5932_v56  ;;  %v6189_v39 = vsel %vm5165_vm9, %v4093_v53, %v5677_v7  ;;  %12784 = vmatmul.mubr.msk.bf16.gmra.mrb[188].mxu1 %vm1990_vm0, %v13056_v10  ;;  %v3093_v16 = vadd.f32 %v14065_v61, %v14003_v45  ;;  %12531 = vmatprep.mubr.msk.bf16.mxu0 %vm1990_vm0, %v13057_v18  ;;  %vm4912_vm12 = vcmp.gt.f32.partialorder %v3082_v54, 0.0 }
 0x191   : > { %v11355_v60 = vpack.c.bf16 %v6189_v39, %v6188_v55  ;;  %v5938_v29 = vsel %vm4914_vm10, %v3090_v3, %v5426_v63  ;;  %v6194_v20 = vsel %vm5170_vm11, %v4114_v38, %v5682_v43  ;;  %v5424_v32 = vmul.f32 0.2, %v3082_v54  ;;  %12787 = vmatprep.mubr.msk.bf16.mxu1 %vm1990_vm0, %v13058_v26  ;;  %v14129_v28 = vpop.f32.mrb[84].mxu0  ;;  %v14131_v40 = vpop.f32.mrb[84].mxu1 }
 0x192   : > { %11855 = vst [vmem:[%s13428_s27 + $0x110] sm:$0xff] %v10715_v21   ;;  %vm5168_vm13 = vcmp.gt.f32.partialorder %v4106_v44, 0.0  ;;  %v5680_v24 = vmul.f32 0.2, %v4106_v44  ;;  %vm4915_vm14 = vcmp.gt.f32.partialorder %v3093_v16, 0.0  ;;  %v4117_v27 = vadd.f32 %v14065_v61, %v14008_v49  ;;  %v14138_v47 = vpop.f32.mrb[85].mxu0 }
 0x193   : > { %11983 = vst [vmem:[%s13428_s27 + $0x510] sm:$0xff] %v11355_v60   ;;  %v5427_v36 = vmul.f32 0.2, %v3093_v16  ;;  %v3085_v45 = vadd.f32 %v14065_v61, %v14010_v13  ;;  %v5936_v14 = vsel %vm4912_vm12, %v3082_v54, %v5424_v32  ;;  %v4109_v9 = vadd.f32 %v14065_v61, %v14017_v46  ;;  %v14140_v37 = vpop.f32.mrb[85].mxu1  ;;  %v13060_v49 = vld [vmem:[%s13177_s22 + $0x708] sm:$0xff]   ;;  %v13062_v13 = vld [vmem:[%s13177_s22 + $0x710] sm:$0xff]  }
 0x194   : > { %v6192_v58 = vsel %vm5168_vm13, %v4106_v44, %v5680_v24  ;;  %v3106_v23 = vadd.f32 %v14065_v61, %v14033_v42  ;;  %vm5171_vm15 = vcmp.gt.f32.partialorder %v4117_v27, 0.0  ;;  %v5683_v56 = vmul.f32 0.2, %v4117_v27  ;;  %v14146_v6 = vpop.f32.mrb[86].mxu0  ;;  %v14148_v11 = vpop.f32.mrb[86].mxu1  ;;  %v13063_v44 = vld [vmem:[%s13177_s22 + $0x318] sm:$0xff]  }
 0x195   : > { %v5939_v52 = vsel %vm4915_vm14, %v3093_v16, %v5427_v36  ;;  %vm4913_vm1 = vcmp.gt.f32.partialorder %v3085_v45, 0.0  ;;  %v5425_v53 = vmul.f32 0.2, %v3085_v45  ;;  %vm5169_vm2 = vcmp.gt.f32.partialorder %v4109_v9, 0.0  ;;  %v14150_v51 = vpop.f32.mrb[87].mxu0  ;;  %v14154_v38 = vpop.f32.mrb[87].mxu1 }
 0x196   : > { %v10730_v46 = vpack.c.bf16 %v5939_v52, %v5938_v29  ;;  %v5681_v42 = vmul.f32 0.2, %v4109_v9  ;;  %v6195_v55 = vsel %vm5171_vm15, %v4117_v27, %v5683_v56  ;;  %vm4918_vm3 = vcmp.gt.f32.partialorder %v3106_v23, 0.0  ;;  %v13064_v60 = vld [vmem:[%s13177_s22 + $0x718] sm:$0xff]   ;;  %v13065_v29 = vld [vmem:[%s13177_s22 + $0x320] sm:$0xff]  }
 0x197   : > { %v5430_v34 = vmul.f32 0.2, %v3106_v23  ;;  %v4130_v3 = vadd.f32 %v14065_v61, %v14037_v62  ;;  %12532 = vmatmul.mubr.msk.bf16.gmra.mrb[192].mxu0 %vm1990_vm0, %v13059_v41  ;;  %v11370_v10 = vpack.c.bf16 %v6195_v55, %v6194_v20  ;;  %v5937_v18 = vsel %vm4913_vm1, %v3085_v45, %v5425_v53 }
 0x198   : > { %11858 = vst [vmem:[%s13428_s27 + $0x128] sm:$0xff] %v10730_v46   ;;  %v6193_v22 = vsel %vm5169_vm2, %v4109_v9, %v5681_v42  ;;  %v3098_v5 = vadd.f32 %v14065_v61, %v14039_v12  ;;  %12788 = vmatmul.mubr.msk.bf16.gmra.mrb[192].mxu1 %vm1990_vm0, %v13060_v49  ;;  %v10725_v4 = vpack.c.bf16 %v5937_v18, %v5936_v14 }
 0x199   : > { %v11365_v26 = vpack.c.bf16 %v6193_v22, %v6192_v58  ;;  %v5942_v35 = vsel %vm4918_vm3, %v3106_v23, %v5430_v34  ;;  %vm5174_vm4 = vcmp.gt.f32.partialorder %v4130_v3, 0.0  ;;  %12535 = vmatprep.mubr.msk.bf16.mxu0 %vm1990_vm0, %v13061_v2  ;;  %12791 = vmatprep.mubr.msk.bf16.mxu1 %vm1990_vm0, %v13062_v13  ;;  %11986 = vst [vmem:[%s13428_s27 + $0x528] sm:$0xff] %v11370_v10   ;;  %v5686_v62 = vmul.f32 0.2, %v4130_v3  ;;  %v14167_v15 = vpop.f32.mrb[88].mxu0  ;;  %v14179_v54 = vpop.f32.mrb[88].mxu1 }
 0x19a   : > { %vm4916_vm5 = vcmp.gt.f32.partialorder %v3098_v5, 0.0  ;;  %v5428_v7 = vmul.f32 0.2, %v3098_v5  ;;  %v4122_v12 = vadd.f32 %v14065_v61, %v14046_v25  ;;  %11857 = vst [vmem:[%s13428_s27 + $0x120] sm:$0xff] %v10725_v4   ;;  %v3109_v63 = vadd.f32 %v14065_v61, %v14048_v17  ;;  %v14181_v25 = vpop.f32.mrb[89].mxu0 }
 0x19b   : > { %11985 = vst [vmem:[%s13428_s27 + $0x520] sm:$0xff] %v11365_v26   ;;  %v4133_v43 = vadd.f32 %v14065_v61, %v14053_v30  ;;  %v3101_v21 = vadd.f32 %v14065_v61, %v14055_v1  ;;  %v4125_v39 = vadd.f32 %v14065_v61, %v14059_v31  ;;  %v6198_v20 = vsel %vm5174_vm4, %v4130_v3, %v5686_v62  ;;  %v14188_v30 = vpop.f32.mrb[89].mxu1  ;;  %v14190_v32 = vpop.f32.mrb[90].mxu0  ;;  %v13066_v1 = vld [vmem:[%s13177_s22 + $0x720] sm:$0xff]   ;;  %v13067_v26 = vld [vmem:[%s13177_s22 + $0x328] sm:$0xff]  }
 0x19c   : > { %v5940_v17 = vsel %vm4916_vm5, %v3098_v5, %v5428_v7  ;;  %vm5172_vm6 = vcmp.gt.f32.partialorder %v4122_v12, 0.0  ;;  %v5684_v16 = vmul.f32 0.2, %v4122_v12  ;;  %vm4919_vm7 = vcmp.gt.f32.partialorder %v3109_v63, 0.0  ;;  %v14193_v45 = vpop.f32.mrb[90].mxu1  ;;  %v14195_v41 = vpop.f32.mrb[91].mxu0 }
 0x19d   : > { %v5431_v31 = vmul.f32 0.2, %v3109_v63  ;;  %vm5175_vm8 = vcmp.gt.f32.partialorder %v4133_v43, 0.0  ;;  %v5687_v24 = vmul.f32 0.2, %v4133_v43  ;;  %vm4917_vm9 = vcmp.gt.f32.partialorder %v3101_v21, 0.0 }
 0x19e   : > { %v6196_v36 = vsel %vm5172_vm6, %v4122_v12, %v5684_v16  ;;  %v5429_v27 = vmul.f32 0.2, %v3101_v21  ;;  %vm5173_vm10 = vcmp.gt.f32.partialorder %v4125_v39, 0.0  ;;  %v5685_v9 = vmul.f32 0.2, %v4125_v39  ;;  %v14199_v49 = vpop.f32.mrb[91].mxu1 }
 0x19f   : > { %v5943_v14 = vsel %vm4919_vm7, %v3109_v63, %v5431_v31  ;;  %v6199_v58 = vsel %vm5175_vm8, %v4133_v43, %v5687_v24  ;;  %v3122_v23 = vadd.f32 %v14065_v61, %v14085_v50  ;;  %12536 = vmatmul.mubr.msk.bf16.gmra.mrb[196].mxu0 %vm1990_vm0, %v13063_v44  ;;  %v4146_v56 = vadd.f32 %v14065_v61, %v14087_v59  ;;  %v13070_v63 = vld [vmem:[%s13177_s22 + $0x730] sm:$0xff]  }
 0x1a0   : > { %v10740_v2 = vpack.c.bf16 %v5943_v14, %v5942_v35  ;;  %v11380_v13 = vpack.c.bf16 %v6199_v58, %v6198_v20  ;;  %v5941_v52 = vsel %vm4917_vm9, %v3101_v21, %v5429_v27  ;;  %12792 = vmatmul.mubr.msk.bf16.gmra.mrb[196].mxu1 %vm1990_vm0, %v13064_v60  ;;  %v6197_v53 = vsel %vm5173_vm10, %v4125_v39, %v5685_v9  ;;  %v13069_v35 = vld [vmem:[%s13177_s22 + $0x330] sm:$0xff]  }
 0x1a1   : > { %v10735_v46 = vpack.c.bf16 %v5941_v52, %v5940_v17  ;;  %vm4922_vm11 = vcmp.gt.f32.partialorder %v3122_v23, 0.0  ;;  %v5434_v42 = vmul.f32 0.2, %v3122_v23  ;;  %12539 = vmatprep.mubr.msk.bf16.mxu0 %vm1990_vm0, %v13065_v29  ;;  %12795 = vmatprep.mubr.msk.bf16.mxu1 %vm1990_vm0, %v13066_v1  ;;  %v11375_v50 = vpack.c.bf16 %v6197_v53, %v6196_v36  ;;  %v14211_v34 = vpop.f32.mrb[92].mxu0  ;;  %v14220_v5 = vpop.f32.mrb[92].mxu1 }
 0x1a2   : > { %11860 = vst [vmem:[%s13428_s27 + $0x138] sm:$0xff] %v10740_v2   ;;  %11988 = vst [vmem:[%s13428_s27 + $0x538] sm:$0xff] %v11380_v13   ;;  %vm5178_vm12 = vcmp.gt.f32.partialorder %v4146_v56, 0.0  ;;  %v5690_v55 = vmul.f32 0.2, %v4146_v56  ;;  %v3114_v59 = vadd.f32 %v14065_v61, %v14094_v19  ;;  %v4138_v10 = vadd.f32 %v14065_v61, %v14096_v57  ;;  %v14222_v4 = vpop.f32.mrb[93].mxu0 }
 0x1a3   : > { %11859 = vst [vmem:[%s13428_s27 + $0x130] sm:$0xff] %v10735_v46   ;;  %v5946_v3 = vsel %vm4922_vm11, %v3122_v23, %v5434_v42  ;;  %v3125_v18 = vadd.f32 %v14065_v61, %v14101_v33  ;;  %v4149_v22 = vadd.f32 %v14065_v61, %v14103_v8  ;;  %v13068_v19 = vld [vmem:[%s13177_s22 + $0x728] sm:$0xff]   ;;  %11987 = vst [vmem:[%s13428_s27 + $0x530] sm:$0xff] %v11375_v50   ;;  %v14230_v12 = vpop.f32.mrb[93].mxu1  ;;  %v14232_v33 = vpop.f32.mrb[94].mxu0  ;;  %v13071_v46 = vld [vmem:[%s13177_s22 + $0x338] sm:$0xff]  }
 0x1a4   : > { %v6202_v62 = vsel %vm5178_vm12, %v4146_v56, %v5690_v55  ;;  %vm4920_vm13 = vcmp.gt.f32.partialorder %v3114_v59, 0.0  ;;  %v5432_v7 = vmul.f32 0.2, %v3114_v59  ;;  %v3117_v57 = vadd.f32 %v14065_v61, %v14106_v0  ;;  %v14235_v44 = vpop.f32.mrb[94].mxu1  ;;  %v14237_v60 = vpop.f32.mrb[95].mxu0 }
 0x1a5   : > { %vm5176_vm14 = vcmp.gt.f32.partialorder %v4138_v10, 0.0  ;;  %v5688_v8 = vmul.f32 0.2, %v4138_v10  ;;  %vm4923_vm15 = vcmp.gt.f32.partialorder %v3125_v18, 0.0  ;;  %v5435_v43 = vmul.f32 0.2, %v3125_v18 }
 0x1a6   : > { %v5944_v21 = vsel %vm4920_vm13, %v3114_v59, %v5432_v7  ;;  %vm5179_vm1 = vcmp.gt.f32.partialorder %v4149_v22, 0.0  ;;  %v5691_v39 = vmul.f32 0.2, %v4149_v22  ;;  %vm4921_vm2 = vcmp.gt.f32.partialorder %v3117_v57, 0.0  ;;  %v14241_v16 = vpop.f32.mrb[95].mxu1 }
 0x1a7   : > { %v6200_v29 = vsel %vm5176_vm14, %v4138_v10, %v5688_v8  ;;  %v5947_v20 = vsel %vm4923_vm15, %v3125_v18, %v5435_v43  ;;  %v5433_v0 = vmul.f32 0.2, %v3117_v57  ;;  %v4141_v17 = vadd.f32 %v14065_v61, %v14108_v48  ;;  %12540 = vmatmul.mubr.msk.bf16.gmra.mrb[200].mxu0 %vm1990_vm0, %v13067_v26  ;;  %v13074_v10 = vld [vmem:[%s13177_s22 + $0x740] sm:$0xff]  }
 0x1a8   : > { %v10750_v1 = vpack.c.bf16 %v5947_v20, %v5946_v3  ;;  %v6203_v31 = vsel %vm5179_vm1, %v4149_v22, %v5691_v39  ;;  %v3138_v24 = vadd.f32 %v14065_v61, %v14129_v28  ;;  %v4162_v36 = vadd.f32 %v14065_v61, %v14131_v40  ;;  %12796 = vmatmul.mubr.msk.bf16.gmra.mrb[200].mxu1 %vm1990_vm0, %v13068_v19  ;;  %v13073_v3 = vld [vmem:[%s13177_s22 + $0x340] sm:$0xff]  }
 0x1a9   : > { %v11390_v27 = vpack.c.bf16 %v6203_v31, %v6202_v62  ;;  %v5945_v14 = vsel %vm4921_vm2, %v3117_v57, %v5433_v0  ;;  %vm5177_vm3 = vcmp.gt.f32.partialorder %v4141_v17, 0.0  ;;  %v5689_v58 = vmul.f32 0.2, %v4141_v17  ;;  %12543 = vmatprep.mubr.msk.bf16.mxu0 %vm1990_vm0, %v13069_v35  ;;  %12799 = vmatprep.mubr.msk.bf16.mxu1 %vm1990_vm0, %v13070_v63  ;;  %v14252_v28 = vpop.f32.mrb[96].mxu0  ;;  %v14259_v52 = vpop.f32.mrb[96].mxu1 }
 0x1aa   : > { %11862 = vst [vmem:[%s13428_s27 + $0x148] sm:$0xff] %v10750_v1   ;;  %v10745_v48 = vpack.c.bf16 %v5945_v14, %v5944_v21  ;;  %vm4926_vm4 = vcmp.gt.f32.partialorder %v3138_v24, 0.0  ;;  %v5438_v9 = vmul.f32 0.2, %v3138_v24  ;;  %vm5182_vm5 = vcmp.gt.f32.partialorder %v4162_v36, 0.0  ;;  %v14261_v56 = vpop.f32.mrb[97].mxu0 }
 0x1ab   : > { %11990 = vst [vmem:[%s13428_s27 + $0x548] sm:$0xff] %v11390_v27   ;;  %v6201_v40 = vsel %vm5177_vm3, %v4141_v17, %v5689_v58  ;;  %v5694_v23 = vmul.f32 0.2, %v4162_v36  ;;  %v3130_v2 = vadd.f32 %v14065_v61, %v14138_v47  ;;  %v4154_v13 = vadd.f32 %v14065_v61, %v14140_v37  ;;  %v14269_v59 = vpop.f32.mrb[97].mxu1  ;;  %v14271_v47 = vpop.f32.mrb[98].mxu0  ;;  %v13072_v37 = vld [vmem:[%s13177_s22 + $0x738] sm:$0xff]  }
 0x1ac   : > { %11861 = vst [vmem:[%s13428_s27 + $0x140] sm:$0xff] %v10745_v48   ;;  %v11385_v53 = vpack.c.bf16 %v6201_v40, %v6200_v29  ;;  %v5950_v42 = vsel %vm4926_vm4, %v3138_v24, %v5438_v9  ;;  %v3141_v50 = vadd.f32 %v14065_v61, %v14146_v6  ;;  %v4165_v55 = vadd.f32 %v14065_v61, %v14148_v11  ;;  %v14277_v26 = vpop.f32.mrb[98].mxu1  ;;  %v14279_v19 = vpop.f32.mrb[99].mxu0  ;;  %v13075_v17 = vld [vmem:[%s13177_s22 + $0x348] sm:$0xff]  }
 0x1ad   : > { %v6206_v18 = vsel %vm5182_vm5, %v4162_v36, %v5694_v23  ;;  %vm4924_vm6 = vcmp.gt.f32.partialorder %v3130_v2, 0.0  ;;  %v5436_v22 = vmul.f32 0.2, %v3130_v2  ;;  %vm5180_vm7 = vcmp.gt.f32.partialorder %v4154_v13, 0.0  ;;  %v14286_v63 = vpop.f32.mrb[99].mxu1  ;;  %v13076_v40 = vld [vmem:[%s13177_s22 + $0x748] sm:$0xff]  }
 0x1ae   : > { %11989 = vst [vmem:[%s13428_s27 + $0x540] sm:$0xff] %v11385_v53   ;;  %v5692_v6 = vmul.f32 0.2, %v4154_v13  ;;  %vm4927_vm8 = vcmp.gt.f32.partialorder %v3141_v50, 0.0  ;;  %v5439_v11 = vmul.f32 0.2, %v3141_v50  ;;  %v3133_v7 = vadd.f32 %v14065_v61, %v14150_v51 }
 0x1af   : > { %vm5183_vm9 = vcmp.gt.f32.partialorder %v4165_v55, 0.0  ;;  %v5948_v35 = vsel %vm4924_vm6, %v3130_v2, %v5436_v22  ;;  %v5695_v62 = vmul.f32 0.2, %v4165_v55  ;;  %v4157_v57 = vadd.f32 %v14065_v61, %v14154_v38  ;;  %12544 = vmatmul.mubr.msk.bf16.gmra.mrb[204].mxu0 %vm1990_vm0, %v13071_v46 }
 0x1b0   : > { %v6204_v8 = vsel %vm5180_vm7, %v4154_v13, %v5692_v6  ;;  %v5951_v43 = vsel %vm4927_vm8, %v3141_v50, %v5439_v11  ;;  %v3154_v21 = vadd.f32 %v14065_v61, %v14167_v15  ;;  %v4178_v39 = vadd.f32 %v14065_v61, %v14179_v54  ;;  %12800 = vmatmul.mubr.msk.bf16.gmra.mrb[204].mxu1 %vm1990_vm0, %v13072_v37  ;;  %v13078_v50 = vld [vmem:[%s13177_s22 + $0x750] sm:$0xff]  }
 0x1b1   : > { %v10760_v51 = vpack.c.bf16 %v5951_v43, %v5950_v42  ;;  %v6207_v29 = vsel %vm5183_vm9, %v4165_v55, %v5695_v62  ;;  %vm4925_vm10 = vcmp.gt.f32.partialorder %v3133_v7, 0.0  ;;  %v5437_v38 = vmul.f32 0.2, %v3133_v7  ;;  %12547 = vmatprep.mubr.msk.bf16.mxu0 %vm1990_vm0, %v13073_v3  ;;  %12803 = vmatprep.mubr.msk.bf16.mxu1 %vm1990_vm0, %v13074_v10  ;;  %v14296_v15 = vpop.f32.mrb[100].mxu0  ;;  %v14300_v24 = vpop.f32.mrb[100].mxu1 }
 0x1b2   : > { %v11400_v20 = vpack.c.bf16 %v6207_v29, %v6206_v18  ;;  %vm5181_vm11 = vcmp.gt.f32.partialorder %v4157_v57, 0.0  ;;  %v5693_v0 = vmul.f32 0.2, %v4157_v57  ;;  %vm4930_vm12 = vcmp.gt.f32.partialorder %v3154_v21, 0.0  ;;  %v14307_v48 = vpop.f32.mrb[101].mxu0  ;;  %v14309_v9 = vpop.f32.mrb[101].mxu1 }
 0x1b3   : > { %11864 = vst [vmem:[%s13428_s27 + $0x158] sm:$0xff] %v10760_v51   ;;  %v5949_v54 = vsel %vm4925_vm10, %v3133_v7, %v5437_v38  ;;  %v5442_v1 = vmul.f32 0.2, %v3154_v21  ;;  %vm5186_vm13 = vcmp.gt.f32.partialorder %v4178_v39, 0.0  ;;  %v5698_v31 = vmul.f32 0.2, %v4178_v39 }
 0x1b4   : > { %11992 = vst [vmem:[%s13428_s27 + $0x558] sm:$0xff] %v11400_v20   ;;  %v10755_v36 = vpack.c.bf16 %v5949_v54, %v5948_v35  ;;  %v6205_v27 = vsel %vm5181_vm11, %v4157_v57, %v5693_v0  ;;  %v3146_v14 = vadd.f32 %v14065_v61, %v14181_v25  ;;  %v4170_v58 = vadd.f32 %v14065_v61, %v14188_v30  ;;  %v14315_v53 = vpop.f32.mrb[102].mxu0  ;;  %v14317_v42 = vpop.f32.mrb[102].mxu1  ;;  %v13077_v25 = vld [vmem:[%s13177_s22 + $0x350] sm:$0xff]   ;;  %v13079_v51 = vld [vmem:[%s13177_s22 + $0x358] sm:$0xff]  }
 0x1b5   : > { %v11395_v23 = vpack.c.bf16 %v6205_v27, %v6204_v8  ;;  %v5954_v2 = vsel %vm4930_vm12, %v3154_v21, %v5442_v1  ;;  %v6210_v13 = vsel %vm5186_vm13, %v4178_v39, %v5698_v31  ;;  %v3157_v46 = vadd.f32 %v14065_v61, %v14190_v32  ;;  %v14327_v10 = vpop.f32.mrb[103].mxu0  ;;  %v14329_v18 = vpop.f32.mrb[103].mxu1  ;;  %v13081_v1 = vld [vmem:[%s13177_s22 + $0x360] sm:$0xff]  }
 0x1b6   : > { %11863 = vst [vmem:[%s13428_s27 + $0x150] sm:$0xff] %v10755_v36   ;;  %vm4928_vm14 = vcmp.gt.f32.partialorder %v3146_v14, 0.0  ;;  %v5440_v30 = vmul.f32 0.2, %v3146_v14  ;;  %vm5184_vm15 = vcmp.gt.f32.partialorder %v4170_v58, 0.0  ;;  %v4181_v3 = vadd.f32 %v14065_v61, %v14193_v45 }
 0x1b7   : > { %v5696_v55 = vmul.f32 0.2, %v4170_v58  ;;  %11991 = vst [vmem:[%s13428_s27 + $0x550] sm:$0xff] %v11395_v23   ;;  %vm4931_vm1 = vcmp.gt.f32.partialorder %v3157_v46, 0.0  ;;  %v5443_v37 = vmul.f32 0.2, %v3157_v46  ;;  %v3149_v32 = vadd.f32 %v14065_v61, %v14195_v41  ;;  %12548 = vmatmul.mubr.msk.bf16.gmra.mrb[208].mxu0 %vm1990_vm0, %v13075_v17 }
 0x1b8   : > { %v5952_v22 = vsel %vm4928_vm14, %v3146_v14, %v5440_v30  ;;  %v4173_v11 = vadd.f32 %v14065_v61, %v14199_v49  ;;  %v3170_v35 = vadd.f32 %v14065_v61, %v14211_v34  ;;  %12804 = vmatmul.mubr.msk.bf16.gmra.mrb[208].mxu1 %vm1990_vm0, %v13076_v40  ;;  %vm5187_vm2 = vcmp.gt.f32.partialorder %v4181_v3, 0.0  ;;  %12551 = vmatprep.mubr.msk.bf16.mxu0 %vm1990_vm0, %v13077_v25  ;;  %v13082_v40 = vld [vmem:[%s13177_s22 + $0x760] sm:$0xff]  }
 0x1b9   : > { %v6208_v6 = vsel %vm5184_vm15, %v4170_v58, %v5696_v55  ;;  %v5955_v45 = vsel %vm4931_vm1, %v3157_v46, %v5443_v37  ;;  %v5699_v41 = vmul.f32 0.2, %v4181_v3  ;;  %vm4929_vm3 = vcmp.gt.f32.partialorder %v3149_v32, 0.0  ;;  %12807 = vmatprep.mubr.msk.bf16.mxu1 %vm1990_vm0, %v13078_v50  ;;  %v14339_v49 = vpop.f32.mrb[104].mxu0  ;;  %v14343_v21 = vpop.f32.mrb[104].mxu1 }
 0x1ba   : > { %v10770_v62 = vpack.c.bf16 %v5955_v45, %v5954_v2  ;;  %v5441_v7 = vmul.f32 0.2, %v3149_v32  ;;  %vm5185_vm4 = vcmp.gt.f32.partialorder %v4173_v11, 0.0  ;;  %v5697_v57 = vmul.f32 0.2, %v4173_v11  ;;  %v14345_v39 = vpop.f32.mrb[105].mxu0 }
 0x1bb   : > { %v6211_v34 = vsel %vm5187_vm2, %v4181_v3, %v5699_v41  ;;  %vm4934_vm5 = vcmp.gt.f32.partialorder %v3170_v35, 0.0  ;;  %v5446_v8 = vmul.f32 0.2, %v3170_v35  ;;  %v4194_v43 = vadd.f32 %v14065_v61, %v14220_v5  ;;  %v14352_v17 = vpop.f32.mrb[105].mxu1  ;;  %v14354_v54 = vpop.f32.mrb[106].mxu0  ;;  %v13080_v5 = vld [vmem:[%s13177_s22 + $0x758] sm:$0xff]  }
 0x1bc   : > { %11866 = vst [vmem:[%s13428_s27 + $0x168] sm:$0xff] %v10770_v62   ;;  %v11410_v29 = vpack.c.bf16 %v6211_v34, %v6210_v13  ;;  %v5953_v38 = vsel %vm4929_vm3, %v3149_v32, %v5441_v7  ;;  %v6209_v20 = vsel %vm5185_vm4, %v4173_v11, %v5697_v57  ;;  %v3162_v0 = vadd.f32 %v14065_v61, %v14222_v4  ;;  %v14359_v14 = vpop.f32.mrb[106].mxu1  ;;  %v14361_v58 = vpop.f32.mrb[107].mxu0  ;;  %v13083_v41 = vld [vmem:[%s13177_s22 + $0x368] sm:$0xff]  }
 0x1bd   : > { %v10765_v31 = vpack.c.bf16 %v5953_v38, %v5952_v22  ;;  %v11405_v36 = vpack.c.bf16 %v6209_v20, %v6208_v6  ;;  %v5958_v27 = vsel %vm4934_vm5, %v3170_v35, %v5446_v8  ;;  %vm5190_vm6 = vcmp.gt.f32.partialorder %v4194_v43, 0.0  ;;  %v14367_v13 = vpop.f32.mrb[107].mxu1 }
 0x1be   : > { %11994 = vst [vmem:[%s13428_s27 + $0x568] sm:$0xff] %v11410_v29   ;;  %v5702_v4 = vmul.f32 0.2, %v4194_v43  ;;  %vm4932_vm7 = vcmp.gt.f32.partialorder %v3162_v0, 0.0  ;;  %v5444_v23 = vmul.f32 0.2, %v3162_v0  ;;  %v4186_v2 = vadd.f32 %v14065_v61, %v14230_v12 }
 0x1bf   : > { %11865 = vst [vmem:[%s13428_s27 + $0x160] sm:$0xff] %v10765_v31   ;;  %11993 = vst [vmem:[%s13428_s27 + $0x560] sm:$0xff] %v11405_v36   ;;  %v3173_v46 = vadd.f32 %v14065_v61, %v14232_v33  ;;  %v4197_v25 = vadd.f32 %v14065_v61, %v14235_v44  ;;  %v3165_v50 = vadd.f32 %v14065_v61, %v14237_v60  ;;  %12552 = vmatmul.mubr.msk.bf16.gmra.mrb[212].mxu0 %vm1990_vm0, %v13079_v51  ;;  %v13084_v51 = vld [vmem:[%s13177_s22 + $0x768] sm:$0xff]  }
 0x1c0   : > { %v4189_v30 = vadd.f32 %v14065_v61, %v14241_v16  ;;  %v6214_v12 = vsel %vm5190_vm6, %v4194_v43, %v5702_v4  ;;  %v5956_v55 = vsel %vm4932_vm7, %v3162_v0, %v5444_v23  ;;  %vm5188_vm8 = vcmp.gt.f32.partialorder %v4186_v2, 0.0  ;;  %12808 = vmatmul.mubr.msk.bf16.gmra.mrb[212].mxu1 %vm1990_vm0, %v13080_v5  ;;  %12555 = vmatprep.mubr.msk.bf16.mxu0 %vm1990_vm0, %v13081_v1  ;;  %v13086_v1 = vld [vmem:[%s13177_s22 + $0x770] sm:$0xff]  }
 0x1c1   : > { %v5700_v37 = vmul.f32 0.2, %v4186_v2  ;;  %vm4935_vm9 = vcmp.gt.f32.partialorder %v3173_v46, 0.0  ;;  %v5447_v33 = vmul.f32 0.2, %v3173_v46  ;;  %vm5191_vm10 = vcmp.gt.f32.partialorder %v4197_v25, 0.0  ;;  %12811 = vmatprep.mubr.msk.bf16.mxu1 %vm1990_vm0, %v13082_v40 }
 0x1c2   : > { %v5703_v44 = vmul.f32 0.2, %v4197_v25  ;;  %vm4933_vm11 = vcmp.gt.f32.partialorder %v3165_v50, 0.0  ;;  %v5445_v16 = vmul.f32 0.2, %v3165_v50  ;;  %vm5189_vm12 = vcmp.gt.f32.partialorder %v4189_v30, 0.0 }
 0x1c3   : > { %v6212_v60 = vsel %vm5188_vm8, %v4186_v2, %v5700_v37  ;;  %v14384_v3 = vpop.f32.mrb[108].mxu0  ;;  %v5959_v32 = vsel %vm4935_vm9, %v3173_v46, %v5447_v33  ;;  %v5701_v6 = vmul.f32 0.2, %v4189_v30  ;;  %v3186_v11 = vadd.f32 %v14065_v61, %v14252_v28  ;;  %v14388_v35 = vpop.f32.mrb[108].mxu1  ;;  %v13085_v28 = vld [vmem:[%s13177_s22 + $0x370] sm:$0xff]  }
 0x1c4   : > { %v6215_v22 = vsel %vm5191_vm10, %v4197_v25, %v5703_v44  ;;  %v14390_v45 = vpop.f32.mrb[109].mxu0  ;;  %v10780_v62 = vpack.c.bf16 %v5959_v32, %v5958_v27  ;;  %v5957_v57 = vsel %vm4933_vm11, %v3165_v50, %v5445_v16  ;;  %v4210_v34 = vadd.f32 %v14065_v61, %v14259_v52  ;;  %v14395_v8 = vpop.f32.mrb[109].mxu1 }
 0x1c5   : > { %v11420_v7 = vpack.c.bf16 %v6215_v22, %v6214_v12  ;;  %v14397_v43 = vpop.f32.mrb[110].mxu0  ;;  %v10775_v29 = vpack.c.bf16 %v5957_v57, %v5956_v55  ;;  %v6213_v38 = vsel %vm5189_vm12, %v4189_v30, %v5701_v6  ;;  %vm4938_vm13 = vcmp.gt.f32.partialorder %v3186_v11, 0.0  ;;  %v14402_v0 = vpop.f32.mrb[110].mxu1 }
 0x1c6   : > { %v5450_v20 = vmul.f32 0.2, %v3186_v11  ;;  %v14404_v5 = vpop.f32.mrb[111].mxu0  ;;  %11868 = vst [vmem:[%s13428_s27 + $0x178] sm:$0xff] %v10780_v62   ;;  %v11415_v52 = vpack.c.bf16 %v6213_v38, %v6212_v60  ;;  %vm5194_vm14 = vcmp.gt.f32.partialorder %v4210_v34, 0.0  ;;  %v3178_v36 = vadd.f32 %v14065_v61, %v14261_v56  ;;  %v14411_v27 = vpop.f32.mrb[111].mxu1 }
 0x1c7   : > { %11996 = vst [vmem:[%s13428_s27 + $0x578] sm:$0xff] %v11420_v7   ;;  %v5706_v31 = vmul.f32 0.2, %v4210_v34  ;;  %11867 = vst [vmem:[%s13428_s27 + $0x170] sm:$0xff] %v10775_v29   ;;  %v4202_v4 = vadd.f32 %v14065_v61, %v14269_v59  ;;  %v3189_v23 = vadd.f32 %v14065_v61, %v14271_v47  ;;  %v4213_v2 = vadd.f32 %v14065_v61, %v14277_v26  ;;  %v13087_v60 = vld [vmem:[%s13177_s22 + $0x378] sm:$0xff]   ;;  %v13089_v62 = vld [vmem:[%s13177_s22 + $0x380] sm:$0xff]  }
 0x1c8   : > { %v5962_v40 = vsel %vm4938_vm13, %v3186_v11, %v5450_v20  ;;  %12556 = vmatmul.mubr.msk.bf16.gmra.mrb[216].mxu0 %vm1990_vm0, %v13083_v41  ;;  %11995 = vst [vmem:[%s13428_s27 + $0x570] sm:$0xff] %v11415_v52   ;;  %vm4936_vm15 = vcmp.gt.f32.partialorder %v3178_v36, 0.0  ;;  %v5448_v25 = vmul.f32 0.2, %v3178_v36  ;;  %v3181_v56 = vadd.f32 %v14065_v61, %v14279_v19  ;;  %12812 = vmatmul.mubr.msk.bf16.gmra.mrb[216].mxu1 %vm1990_vm0, %v13084_v51 }
 0x1c9   : > { %v6218_v46 = vsel %vm5194_vm14, %v4210_v34, %v5706_v31  ;;  %12559 = vmatprep.mubr.msk.bf16.mxu0 %vm1990_vm0, %v13085_v28  ;;  %vm5192_vm1 = vcmp.gt.f32.partialorder %v4202_v4, 0.0  ;;  %v5704_v59 = vmul.f32 0.2, %v4202_v4  ;;  %vm4939_vm2 = vcmp.gt.f32.partialorder %v3189_v23, 0.0  ;;  %12815 = vmatprep.mubr.msk.bf16.mxu1 %vm1990_vm0, %v13086_v1  ;;  %v14427_v30 = vpop.f32.mrb[112].mxu0  ;;  %v14431_v33 = vpop.f32.mrb[112].mxu1 }
 0x1ca   : > { %v5451_v47 = vmul.f32 0.2, %v3189_v23  ;;  %v5960_v26 = vsel %vm4936_vm15, %v3178_v36, %v5448_v25  ;;  %vm5195_vm3 = vcmp.gt.f32.partialorder %v4213_v2, 0.0  ;;  %v5707_v50 = vmul.f32 0.2, %v4213_v2  ;;  %v14433_v44 = vpop.f32.mrb[113].mxu0 }
 0x1cb   : > { %vm4937_vm4 = vcmp.gt.f32.partialorder %v3181_v56, 0.0  ;;  %v6216_v19 = vsel %vm5192_vm1, %v4202_v4, %v5704_v59  ;;  %v5449_v55 = vmul.f32 0.2, %v3181_v56  ;;  %v4205_v37 = vadd.f32 %v14065_v61, %v14286_v63  ;;  %v14440_v11 = vpop.f32.mrb[113].mxu1  ;;  %v14442_v41 = vpop.f32.mrb[114].mxu0  ;;  %v13088_v63 = vld [vmem:[%s13177_s22 + $0x778] sm:$0xff]  }
 0x1cc   : > { %v5963_v12 = vsel %vm4939_vm2, %v3189_v23, %v5451_v47  ;;  %v6219_v32 = vsel %vm5195_vm3, %v4213_v2, %v5707_v50  ;;  %v3202_v22 = vadd.f32 %v14065_v61, %v14296_v15  ;;  %v4226_v6 = vadd.f32 %v14065_v61, %v14300_v24  ;;  %v14447_v51 = vpop.f32.mrb[114].mxu1  ;;  %v14449_v28 = vpop.f32.mrb[115].mxu0  ;;  %v13090_v15 = vld [vmem:[%s13177_s22 + $0x780] sm:$0xff]  }
 0x1cd   : > { %v10790_v16 = vpack.c.bf16 %v5963_v12, %v5962_v40  ;;  %v11430_v7 = vpack.c.bf16 %v6219_v32, %v6218_v46  ;;  %v5961_v57 = vsel %vm4937_vm4, %v3181_v56, %v5449_v55  ;;  %vm5193_vm5 = vcmp.gt.f32.partialorder %v4205_v37, 0.0  ;;  %v14453_v38 = vpop.f32.mrb[115].mxu1 }
 0x1ce   : > { %v5705_v34 = vmul.f32 0.2, %v4205_v37  ;;  %v10785_v24 = vpack.c.bf16 %v5961_v57, %v5960_v26  ;;  %vm4942_vm6 = vcmp.gt.f32.partialorder %v3202_v22, 0.0  ;;  %v5454_v29 = vmul.f32 0.2, %v3202_v22  ;;  %v13091_v26 = vld [vmem:[%s13177_s22 + $0x388] sm:$0xff]  }
 0x1cf   : > { %11870 = vst [vmem:[%s13428_s27 + $0x188] sm:$0xff] %v10790_v16   ;;  %vm5198_vm7 = vcmp.gt.f32.partialorder %v4226_v6, 0.0  ;;  %11998 = vst [vmem:[%s13428_s27 + $0x588] sm:$0xff] %v11430_v7   ;;  %v5710_v1 = vmul.f32 0.2, %v4226_v6  ;;  %v3194_v52 = vadd.f32 %v14065_v61, %v14307_v48  ;;  %v4218_v31 = vadd.f32 %v14065_v61, %v14309_v9 }
 0x1d0   : > { %v6217_v20 = vsel %vm5193_vm5, %v4205_v37, %v5705_v34  ;;  %12560 = vmatmul.mubr.msk.bf16.gmra.mrb[220].mxu0 %vm1990_vm0, %v13087_v60  ;;  %11869 = vst [vmem:[%s13428_s27 + $0x180] sm:$0xff] %v10785_v24   ;;  %v5966_v40 = vsel %vm4942_vm6, %v3202_v22, %v5454_v29  ;;  %v3205_v4 = vadd.f32 %v14065_v61, %v14315_v53  ;;  %v13093_v60 = vld [vmem:[%s13177_s22 + $0x390] sm:$0xff]  }
 0x1d1   : > { %v11425_v36 = vpack.c.bf16 %v6217_v20, %v6216_v19  ;;  %v4229_v23 = vadd.f32 %v14065_v61, %v14317_v42  ;;  %12816 = vmatmul.mubr.msk.bf16.gmra.mrb[220].mxu1 %vm1990_vm0, %v13088_v63  ;;  %v6222_v2 = vsel %vm5198_vm7, %v4226_v6, %v5710_v1  ;;  %vm4940_vm8 = vcmp.gt.f32.partialorder %v3194_v52, 0.0  ;;  %12563 = vmatprep.mubr.msk.bf16.mxu0 %vm1990_vm0, %v13089_v62  ;;  %v14474_v59 = vpop.f32.mrb[116].mxu0  ;;  %v14505_v20 = vld [vmem:[%s15901_s2] ss:$0 sm:$0xff] }
 0x1d2   : > { %v5452_v48 = vmul.f32 0.2, %v3194_v52  ;;  %vm5196_vm9 = vcmp.gt.f32.partialorder %v4218_v31, 0.0  ;;  %12819 = vmatprep.mubr.msk.bf16.mxu1 %vm1990_vm0, %v13090_v15  ;;  %v5708_v9 = vmul.f32 0.2, %v4218_v31  ;;  %vm4943_vm10 = vcmp.gt.f32.partialorder %v3205_v4, 0.0 }
 0x1d3   : > { %11997 = vst [vmem:[%s13428_s27 + $0x580] sm:$0xff] %v11425_v36   ;;  %v5455_v46 = vmul.f32 0.2, %v3205_v4  ;;  %vm5199_vm11 = vcmp.gt.f32.partialorder %v4229_v23, 0.0  ;;  %v5711_v42 = vmul.f32 0.2, %v4229_v23  ;;  %v3197_v25 = vadd.f32 %v14065_v61, %v14327_v10 }
 0x1d4   : > { %v5964_v53 = vsel %vm4940_vm8, %v3194_v52, %v5452_v48  ;;  %v4221_v56 = vadd.f32 %v14065_v61, %v14329_v18  ;;  %v14476_v47 = vpop.f32.mrb[116].mxu1  ;;  %v6220_v50 = vsel %vm5196_vm9, %v4218_v31, %v5708_v9  ;;  %v3218_v12 = vadd.f32 %v14065_v61, %v14339_v49  ;;  %v14483_v37 = vpop.f32.mrb[117].mxu0  ;;  %v13092_v18 = vld [vmem:[%s13177_s22 + $0x788] sm:$0xff]   ;;  %v13094_v49 = vld [vmem:[%s13177_s22 + $0x790] sm:$0xff]  }
 0x1d5   : > { %v5967_v19 = vsel %vm4943_vm10, %v3205_v4, %v5455_v46  ;;  %v4242_v55 = vadd.f32 %v14065_v61, %v14343_v21  ;;  %v14485_v10 = vpop.f32.mrb[117].mxu1  ;;  %v6223_v32 = vsel %vm5199_vm11, %v4229_v23, %v5711_v42  ;;  %vm4941_vm12 = vcmp.gt.f32.partialorder %v3197_v25, 0.0  ;;  %v14490_v6 = vpop.f32.mrb[118].mxu0  ;;  %v13095_v46 = vld [vmem:[%s13177_s22 + $0x398] sm:$0xff]  }
 0x1d6   : > { %v10800_v16 = vpack.c.bf16 %v5967_v19, %v5966_v40  ;;  %v5453_v22 = vmul.f32 0.2, %v3197_v25  ;;  %v14492_v63 = vpop.f32.mrb[118].mxu1  ;;  %v11440_v62 = vpack.c.bf16 %v6223_v32, %v6222_v2  ;;  %vm5197_vm13 = vcmp.gt.f32.partialorder %v4221_v56, 0.0  ;;  %v14495_v21 = vpop.f32.mrb[119].mxu0  ;;  %v13097_v19 = vld [vmem:[%s13177_s22 + $0x3a0] sm:$0xff]  }
 0x1d7   : > { %v5709_v61 = vmul.f32 0.2, %v4221_v56  ;;  %vm4946_vm14 = vcmp.gt.f32.partialorder %v3218_v12, 0.0  ;;  %v14497_v7 = vpop.f32.mrb[119].mxu1  ;;  %v5458_v34 = vmul.f32 0.2, %v3218_v12  ;;  %v3210_v1 = vadd.f32 %v14505_v20, %v14345_v39 }
 0x1d8   : > { %11872 = vst [vmem:[%s13428_s27 + $0x198] sm:$0xff] %v10800_v16   ;;  %v5965_v57 = vsel %vm4941_vm12, %v3197_v25, %v5453_v22  ;;  %vm5202_vm15 = vcmp.gt.f32.partialorder %v4242_v55, 0.0  ;;  %v5714_v15 = vmul.f32 0.2, %v4242_v55  ;;  %12564 = vmatmul.mubr.msk.bf16.gmra.mrb[224].mxu0 %vm1990_vm0, %v13091_v26  ;;  %12000 = vst [vmem:[%s13428_s27 + $0x598] sm:$0xff] %v11440_v62   ;;  %v4234_v52 = vadd.f32 %v14505_v20, %v14352_v17 }
 0x1d9   : > { %v10795_v24 = vpack.c.bf16 %v5965_v57, %v5964_v53  ;;  %v6221_v29 = vsel %vm5197_vm13, %v4221_v56, %v5709_v61  ;;  %12820 = vmatmul.mubr.msk.bf16.gmra.mrb[224].mxu1 %vm1990_vm0, %v13092_v18  ;;  %v5970_v36 = vsel %vm4946_vm14, %v3218_v12, %v5458_v34  ;;  %v3221_v4 = vadd.f32 %v14505_v20, %v14354_v54  ;;  %v14523_v48 = vpop.f32.mrb[120].mxu0 }
 0x1da   : > { %v11435_v31 = vpack.c.bf16 %v6221_v29, %v6220_v50  ;;  %v6226_v40 = vsel %vm5202_vm15, %v4242_v55, %v5714_v15  ;;  %12567 = vmatprep.mubr.msk.bf16.mxu0 %vm1990_vm0, %v13093_v60  ;;  %vm4944_vm1 = vcmp.gt.f32.partialorder %v3210_v1, 0.0  ;;  %v5456_v23 = vmul.f32 0.2, %v3210_v1  ;;  %12823 = vmatprep.mubr.msk.bf16.mxu1 %vm1990_vm0, %v13094_v49  ;;  %v14525_v9 = vpop.f32.mrb[120].mxu1  ;;  %v14532_v26 = vpop.f32.mrb[121].mxu0 }
 0x1db   : > { %11871 = vst [vmem:[%s13428_s27 + $0x190] sm:$0xff] %v10795_v24   ;;  %vm5200_vm2 = vcmp.gt.f32.partialorder %v4234_v52, 0.0  ;;  %v5712_v39 = vmul.f32 0.2, %v4234_v52  ;;  %vm4947_vm3 = vcmp.gt.f32.partialorder %v3221_v4, 0.0  ;;  %v4245_v2 = vadd.f32 %v14505_v20, %v14359_v14  ;;  %v14534_v50 = vpop.f32.mrb[121].mxu1 }
 0x1dc   : > { %11999 = vst [vmem:[%s13428_s27 + $0x590] sm:$0xff] %v11435_v31   ;;  %v5459_v17 = vmul.f32 0.2, %v3221_v4  ;;  %v3213_v54 = vadd.f32 %v14505_v20, %v14361_v58  ;;  %v5968_v53 = vsel %vm4944_vm1, %v3210_v1, %v5456_v23  ;;  %v4237_v25 = vadd.f32 %v14505_v20, %v14367_v13  ;;  %v13096_v14 = vld [vmem:[%s13177_s22 + $0x798] sm:$0xff]   ;;  %v13098_v58 = vld [vmem:[%s13177_s22 + $0x7a0] sm:$0xff]   ;;  %v14540_v18 = vpop.f32.mrb[122].mxu0 }
 0x1dd   : > { %v6224_v42 = vsel %vm5200_vm2, %v4234_v52, %v5712_v39  ;;  %v3234_v56 = vadd.f32 %v14505_v20, %v14384_v3  ;;  %vm5203_vm4 = vcmp.gt.f32.partialorder %v4245_v2, 0.0  ;;  %v5715_v55 = vmul.f32 0.2, %v4245_v2  ;;  %v14542_v60 = vpop.f32.mrb[122].mxu1  ;;  %v14544_v32 = vpop.f32.mrb[123].mxu0 }
 0x1de   : > { %v5971_v12 = vsel %vm4947_vm3, %v3221_v4, %v5459_v17  ;;  %vm4945_vm5 = vcmp.gt.f32.partialorder %v3213_v54, 0.0  ;;  %v5457_v16 = vmul.f32 0.2, %v3213_v54  ;;  %vm5201_vm6 = vcmp.gt.f32.partialorder %v4237_v25, 0.0  ;;  %v14548_v61 = vpop.f32.mrb[123].mxu1 }
 0x1df   : > { %v10810_v13 = vpack.c.bf16 %v5971_v12, %v5970_v36  ;;  %v5713_v3 = vmul.f32 0.2, %v4237_v25  ;;  %v6227_v22 = vsel %vm5203_vm4, %v4245_v2, %v5715_v55  ;;  %vm4950_vm7 = vcmp.gt.f32.partialorder %v3234_v56, 0.0  ;;  %v13099_v2 = vld [vmem:[%s13177_s22 + $0x3a8] sm:$0xff]  }
 0x1e0   : > { %v5462_v49 = vmul.f32 0.2, %v3234_v56  ;;  %v4258_v62 = vadd.f32 %v14505_v20, %v14388_v35  ;;  %12568 = vmatmul.mubr.msk.bf16.gmra.mrb[228].mxu0 %vm1990_vm0, %v13095_v46  ;;  %v11450_v57 = vpack.c.bf16 %v6227_v22, %v6226_v40  ;;  %v5969_v34 = vsel %vm4945_vm5, %v3213_v54, %v5457_v16  ;;  %v13100_v54 = vld [vmem:[%s13177_s22 + $0x7a8] sm:$0xff]   ;;  %v13101_v46 = vld [vmem:[%s13177_s22 + $0x3b0] sm:$0xff]  }
 0x1e1   : > { %11874 = vst [vmem:[%s13428_s27 + $0x1a8] sm:$0xff] %v10810_v13   ;;  %v6225_v15 = vsel %vm5201_vm6, %v4237_v25, %v5713_v3  ;;  %v3226_v24 = vadd.f32 %v14505_v20, %v14390_v45  ;;  %12824 = vmatmul.mubr.msk.bf16.gmra.mrb[228].mxu1 %vm1990_vm0, %v13096_v14  ;;  %v10805_v29 = vpack.c.bf16 %v5969_v34, %v5968_v53  ;;  %v14561_v36 = vpop.f32.mrb[124].mxu0 }
 0x1e2   : > { %v11445_v1 = vpack.c.bf16 %v6225_v15, %v6224_v42  ;;  %v5974_v52 = vsel %vm4950_vm7, %v3234_v56, %v5462_v49  ;;  %vm5206_vm8 = vcmp.gt.f32.partialorder %v4258_v62, 0.0  ;;  %12571 = vmatprep.mubr.msk.bf16.mxu0 %vm1990_vm0, %v13097_v19  ;;  %12827 = vmatprep.mubr.msk.bf16.mxu1 %vm1990_vm0, %v13098_v58  ;;  %12002 = vst [vmem:[%s13428_s27 + $0x5a8] sm:$0xff] %v11450_v57   ;;  %v5718_v35 = vmul.f32 0.2, %v4258_v62  ;;  %v14573_v17 = vpop.f32.mrb[124].mxu1 }
 0x1e3   : > { %vm4948_vm9 = vcmp.gt.f32.partialorder %v3226_v24, 0.0  ;;  %v5460_v31 = vmul.f32 0.2, %v3226_v24  ;;  %v4250_v45 = vadd.f32 %v14505_v20, %v14395_v8  ;;  %11873 = vst [vmem:[%s13428_s27 + $0x1a0] sm:$0xff] %v10805_v29   ;;  %v3237_v40 = vadd.f32 %v14505_v20, %v14397_v43  ;;  %v14575_v8 = vpop.f32.mrb[125].mxu0 }
 0x1e4   : > { %12001 = vst [vmem:[%s13428_s27 + $0x5a0] sm:$0xff] %v11445_v1   ;;  %v4261_v4 = vadd.f32 %v14505_v20, %v14402_v0  ;;  %v3229_v23 = vadd.f32 %v14505_v20, %v14404_v5  ;;  %v4253_v39 = vadd.f32 %v14505_v20, %v14411_v27  ;;  %v6230_v53 = vsel %vm5206_vm8, %v4258_v62, %v5718_v35  ;;  %v14582_v0 = vpop.f32.mrb[125].mxu1  ;;  %v14584_v25 = vpop.f32.mrb[126].mxu0  ;;  %v13102_v5 = vld [vmem:[%s13177_s22 + $0x7b0] sm:$0xff]  }
 0x1e5   : > { %v5972_v43 = vsel %vm4948_vm9, %v3226_v24, %v5460_v31  ;;  %vm5204_vm10 = vcmp.gt.f32.partialorder %v4250_v45, 0.0  ;;  %v5716_v42 = vmul.f32 0.2, %v4250_v45  ;;  %vm4951_vm11 = vcmp.gt.f32.partialorder %v3237_v40, 0.0  ;;  %v14587_v58 = vpop.f32.mrb[126].mxu1  ;;  %v14589_v12 = vpop.f32.mrb[127].mxu0 }
 0x1e6   : > { %v5463_v27 = vmul.f32 0.2, %v3237_v40  ;;  %vm5207_vm12 = vcmp.gt.f32.partialorder %v4261_v4, 0.0  ;;  %v5719_v56 = vmul.f32 0.2, %v4261_v4  ;;  %vm4949_vm13 = vcmp.gt.f32.partialorder %v3229_v23, 0.0 }
 0x1e7   : > { %v6228_v14 = vsel %vm5204_vm10, %v4250_v45, %v5716_v42  ;;  %v5461_v19 = vmul.f32 0.2, %v3229_v23  ;;  %vm5205_vm14 = vcmp.gt.f32.partialorder %v4253_v39, 0.0  ;;  %v5717_v16 = vmul.f32 0.2, %v4253_v39  ;;  %v14593_v22 = vpop.f32.mrb[127].mxu1 }
 0x1e8   : > { %v5975_v55 = vsel %vm4951_vm11, %v3237_v40, %v5463_v27  ;;  %v6231_v13 = vsel %vm5207_vm12, %v4261_v4, %v5719_v56  ;;  %v3250_v3 = vadd.f32 %v14505_v20, %v14427_v30  ;;  %12572 = vmatmul.mubr.msk.bf16.gmra.mrb[232].mxu0 %vm1990_vm0, %v13099_v2  ;;  %v4274_v34 = vadd.f32 %v14505_v20, %v14431_v33  ;;  %v13105_v2 = vld [vmem:[%s13177_s22 + $0x3c0] sm:$0xff]  }
 0x1e9   : > { %v10820_v49 = vpack.c.bf16 %v5975_v55, %v5974_v52  ;;  %v11460_v62 = vpack.c.bf16 %v6231_v13, %v6230_v53  ;;  %v5973_v57 = vsel %vm4949_vm13, %v3229_v23, %v5461_v19  ;;  %12828 = vmatmul.mubr.msk.bf16.gmra.mrb[232].mxu1 %vm1990_vm0, %v13100_v54  ;;  %v6229_v24 = vsel %vm5205_vm14, %v4253_v39, %v5717_v16  ;;  %v14605_v52 = vpop.f32.mrb[128].mxu0  ;;  %v13103_v39 = vld [vmem:[%s13177_s22 + $0x3b8] sm:$0xff]  }
 0x1ea   : > { %v10815_v15 = vpack.c.bf16 %v5973_v57, %v5972_v43  ;;  %vm4954_vm15 = vcmp.gt.f32.partialorder %v3250_v3, 0.0  ;;  %v5466_v29 = vmul.f32 0.2, %v3250_v3  ;;  %12575 = vmatprep.mubr.msk.bf16.mxu0 %vm1990_vm0, %v13101_v46  ;;  %12831 = vmatprep.mubr.msk.bf16.mxu1 %vm1990_vm0, %v13102_v5  ;;  %v11455_v30 = vpack.c.bf16 %v6229_v24, %v6228_v14  ;;  %v14614_v4 = vpop.f32.mrb[128].mxu1  ;;  %v14616_v23 = vpop.f32.mrb[129].mxu0  ;;  %v13106_v43 = vld [vmem:[%s13177_s22 + $0x7c0] sm:$0xff]  }
 0x1eb   : > { %11876 = vst [vmem:[%s13428_s27 + $0x1b8] sm:$0xff] %v10820_v49   ;;  %12004 = vst [vmem:[%s13428_s27 + $0x5b8] sm:$0xff] %v11460_v62   ;;  %vm5210_vm1 = vcmp.gt.f32.partialorder %v4274_v34, 0.0  ;;  %v5722_v1 = vmul.f32 0.2, %v4274_v34  ;;  %v3242_v33 = vadd.f32 %v14505_v20, %v14433_v44  ;;  %v4266_v31 = vadd.f32 %v14505_v20, %v14440_v11  ;;  %v13104_v44 = vld [vmem:[%s13177_s22 + $0x7b8] sm:$0xff]  }
 0x1ec   : > { %11875 = vst [vmem:[%s13428_s27 + $0x1b0] sm:$0xff] %v10815_v15   ;;  %v5978_v35 = vsel %vm4954_vm15, %v3250_v3, %v5466_v29  ;;  %v3253_v45 = vadd.f32 %v14505_v20, %v14442_v41  ;;  %v4277_v40 = vadd.f32 %v14505_v20, %v14447_v51  ;;  %12003 = vst [vmem:[%s13428_s27 + $0x5b0] sm:$0xff] %v11455_v30   ;;  %v14624_v53 = vpop.f32.mrb[129].mxu1  ;;  %v14626_v41 = vpop.f32.mrb[130].mxu0 }
 0x1ed   : > { %v6234_v54 = vsel %vm5210_vm1, %v4274_v34, %v5722_v1  ;;  %vm4952_vm2 = vcmp.gt.f32.partialorder %v3242_v33, 0.0  ;;  %v5464_v46 = vmul.f32 0.2, %v3242_v33  ;;  %v3245_v11 = vadd.f32 %v14505_v20, %v14449_v28  ;;  %v14629_v56 = vpop.f32.mrb[130].mxu1  ;;  %v14631_v14 = vpop.f32.mrb[131].mxu0 }
 0x1ee   : > { %vm5208_vm3 = vcmp.gt.f32.partialorder %v4266_v31, 0.0  ;;  %v5720_v51 = vmul.f32 0.2, %v4266_v31  ;;  %vm4955_vm4 = vcmp.gt.f32.partialorder %v3253_v45, 0.0  ;;  %v5467_v42 = vmul.f32 0.2, %v3253_v45 }
 0x1ef   : > { %v5976_v5 = vsel %vm4952_vm2, %v3242_v33, %v5464_v46  ;;  %vm5211_vm5 = vcmp.gt.f32.partialorder %v4277_v40, 0.0  ;;  %v5723_v27 = vmul.f32 0.2, %v4277_v40  ;;  %vm4953_vm6 = vcmp.gt.f32.partialorder %v3245_v11, 0.0  ;;  %v14635_v16 = vpop.f32.mrb[131].mxu1  ;;  %v13109_v46 = vld [vmem:[%s13177_s22 + $0x3d0] sm:$0xff]  }
 0x1f0   : > { %v6232_v19 = vsel %vm5208_vm3, %v4266_v31, %v5720_v51  ;;  %v5979_v55 = vsel %vm4955_vm4, %v3253_v45, %v5467_v42  ;;  %v5465_v28 = vmul.f32 0.2, %v3245_v11  ;;  %v4269_v13 = vadd.f32 %v14505_v20, %v14453_v38  ;;  %12576 = vmatmul.mubr.msk.bf16.gmra.mrb[236].mxu0 %vm1990_vm0, %v13103_v39  ;;  %v13107_v45 = vld [vmem:[%s13177_s22 + $0x3c8] sm:$0xff]  }
 0x1f1   : > { %v10830_v3 = vpack.c.bf16 %v5979_v55, %v5978_v35  ;;  %v6235_v49 = vsel %vm5211_vm5, %v4277_v40, %v5723_v27  ;;  %v3266_v62 = vadd.f32 %v14505_v20, %v14474_v59  ;;  %v4290_v57 = vadd.f32 %v14505_v20, %v14476_v47  ;;  %12832 = vmatmul.mubr.msk.bf16.gmra.mrb[236].mxu1 %vm1990_vm0, %v13104_v44  ;;  %v14646_v59 = vpop.f32.mrb[132].mxu0 }
 0x1f2   : > { %v11470_v34 = vpack.c.bf16 %v6235_v49, %v6234_v54  ;;  %v5977_v15 = vsel %vm4953_vm6, %v3245_v11, %v5465_v28  ;;  %vm5209_vm7 = vcmp.gt.f32.partialorder %v4269_v13, 0.0  ;;  %v5721_v24 = vmul.f32 0.2, %v4269_v13  ;;  %12579 = vmatprep.mubr.msk.bf16.mxu0 %vm1990_vm0, %v13105_v2  ;;  %12835 = vmatprep.mubr.msk.bf16.mxu1 %vm1990_vm0, %v13106_v43  ;;  %v14653_v35 = vpop.f32.mrb[132].mxu1  ;;  %v14655_v31 = vpop.f32.mrb[133].mxu0  ;;  %v13110_v11 = vld [vmem:[%s13177_s22 + $0x7d0] sm:$0xff]  }
 0x1f3   : > { %11878 = vst [vmem:[%s13428_s27 + $0x1c8] sm:$0xff] %v10830_v3   ;;  %v10825_v38 = vpack.c.bf16 %v5977_v15, %v5976_v5  ;;  %vm4958_vm8 = vcmp.gt.f32.partialorder %v3266_v62, 0.0  ;;  %v5470_v29 = vmul.f32 0.2, %v3266_v62  ;;  %vm5214_vm9 = vcmp.gt.f32.partialorder %v4290_v57, 0.0  ;;  %v14663_v54 = vpop.f32.mrb[133].mxu1 }
 0x1f4   : > { %12006 = vst [vmem:[%s13428_s27 + $0x5c8] sm:$0xff] %v11470_v34   ;;  %v6233_v47 = vsel %vm5209_vm7, %v4269_v13, %v5721_v24  ;;  %v5726_v30 = vmul.f32 0.2, %v4290_v57  ;;  %v3258_v1 = vadd.f32 %v14505_v20, %v14483_v37  ;;  %v4282_v33 = vadd.f32 %v14505_v20, %v14485_v10  ;;  %v14665_v37 = vpop.f32.mrb[134].mxu0  ;;  %v13108_v10 = vld [vmem:[%s13177_s22 + $0x7c8] sm:$0xff]   ;;  %v14671_v42 = vpop.f32.mrb[134].mxu1 }
 0x1f5   : > { %11877 = vst [vmem:[%s13428_s27 + $0x1c0] sm:$0xff] %v10825_v38   ;;  %v11465_v40 = vpack.c.bf16 %v6233_v47, %v6232_v19  ;;  %v5982_v39 = vsel %vm4958_vm8, %v3266_v62, %v5470_v29  ;;  %v3269_v44 = vadd.f32 %v14505_v20, %v14490_v6  ;;  %v4293_v2 = vadd.f32 %v14505_v20, %v14492_v63  ;;  %v14673_v5 = vpop.f32.mrb[135].mxu0  ;;  %v14680_v13 = vpop.f32.mrb[135].mxu1  ;;  %v13111_v38 = vld [vmem:[%s13177_s22 + $0x3d8] sm:$0xff]  }
 0x1f6   : > { %v6238_v43 = vsel %vm5214_vm9, %v4290_v57, %v5726_v30  ;;  %vm4956_vm10 = vcmp.gt.f32.partialorder %v3258_v1, 0.0  ;;  %v5468_v51 = vmul.f32 0.2, %v3258_v1  ;;  %vm5212_vm11 = vcmp.gt.f32.partialorder %v4282_v33, 0.0 }
 0x1f7   : > { %12005 = vst [vmem:[%s13428_s27 + $0x5c0] sm:$0xff] %v11465_v40   ;;  %v5724_v6 = vmul.f32 0.2, %v4282_v33  ;;  %vm4959_vm12 = vcmp.gt.f32.partialorder %v3269_v44, 0.0  ;;  %v5471_v63 = vmul.f32 0.2, %v3269_v44  ;;  %v3261_v55 = vadd.f32 %v14505_v20, %v14495_v21 }
 0x1f8   : > { %vm5215_vm13 = vcmp.gt.f32.partialorder %v4293_v2, 0.0  ;;  %v5980_v27 = vsel %vm4956_vm10, %v3258_v1, %v5468_v51  ;;  %v5727_v19 = vmul.f32 0.2, %v4293_v2  ;;  %v4285_v28 = vadd.f32 %v14505_v20, %v14497_v7  ;;  %12580 = vmatmul.mubr.msk.bf16.gmra.mrb[240].mxu0 %vm1990_vm0, %v13107_v45 }
 0x1f9   : > { %v6236_v3 = vsel %vm5212_vm11, %v4282_v33, %v5724_v6  ;;  %v5983_v49 = vsel %vm4959_vm12, %v3269_v44, %v5471_v63  ;;  %v3282_v62 = vadd.f32 %v14505_v20, %v14523_v48  ;;  %v4306_v57 = vadd.f32 %v14505_v20, %v14525_v9  ;;  %12836 = vmatmul.mubr.msk.bf16.gmra.mrb[240].mxu1 %vm1990_vm0, %v13108_v10  ;;  %v14690_v48 = vpop.f32.mrb[136].mxu0  ;;  %v13114_v63 = vld [vmem:[%s13177_s22 + $0x7e0] sm:$0xff]  }
 0x1fa   : > { %v10840_v21 = vpack.c.bf16 %v5983_v49, %v5982_v39  ;;  %v6239_v34 = vsel %vm5215_vm13, %v4293_v2, %v5727_v19  ;;  %vm4957_vm14 = vcmp.gt.f32.partialorder %v3261_v55, 0.0  ;;  %v5469_v7 = vmul.f32 0.2, %v3261_v55  ;;  %12583 = vmatprep.mubr.msk.bf16.mxu0 %vm1990_vm0, %v13109_v46  ;;  %12839 = vmatprep.mubr.msk.bf16.mxu1 %vm1990_vm0, %v13110_v11  ;;  %v14694_v30 = vpop.f32.mrb[136].mxu1  ;;  %v14701_v39 = vpop.f32.mrb[137].mxu0  ;;  %v13112_v2 = vld [vmem:[%s13177_s22 + $0x7d8] sm:$0xff]  }
 0x1fb   : > { %v11480_v15 = vpack.c.bf16 %v6239_v34, %v6238_v43  ;;  %vm5213_vm15 = vcmp.gt.f32.partialorder %v4285_v28, 0.0  ;;  %v5725_v24 = vmul.f32 0.2, %v4285_v28  ;;  %vm4962_vm1 = vcmp.gt.f32.partialorder %v3282_v62, 0.0  ;;  %v14703_v44 = vpop.f32.mrb[137].mxu1  ;;  %v14709_v51 = vpop.f32.mrb[138].mxu0 }
 0x1fc   : > { %11880 = vst [vmem:[%s13428_s27 + $0x1d8] sm:$0xff] %v10840_v21   ;;  %v5981_v9 = vsel %vm4957_vm14, %v3261_v55, %v5469_v7  ;;  %v5474_v29 = vmul.f32 0.2, %v3282_v62  ;;  %vm5218_vm2 = vcmp.gt.f32.partialorder %v4306_v57, 0.0  ;;  %v5730_v47 = vmul.f32 0.2, %v4306_v57 }
 0x1fd   : > { %12008 = vst [vmem:[%s13428_s27 + $0x5d8] sm:$0xff] %v11480_v15   ;;  %v10835_v1 = vpack.c.bf16 %v5981_v9, %v5980_v27  ;;  %v6237_v33 = vsel %vm5213_vm15, %v4285_v28, %v5725_v24  ;;  %v3274_v45 = vadd.f32 %v14505_v20, %v14532_v26  ;;  %v4298_v40 = vadd.f32 %v14505_v20, %v14534_v50  ;;  %v14711_v6 = vpop.f32.mrb[138].mxu1  ;;  %v13113_v26 = vld [vmem:[%s13177_s22 + $0x3e0] sm:$0xff]   ;;  %v14721_v28 = vpop.f32.mrb[139].mxu0 }
 0x1fe   : > { %v11475_v10 = vpack.c.bf16 %v6237_v33, %v6236_v3  ;;  %v5986_v46 = vsel %vm4962_vm1, %v3282_v62, %v5474_v29  ;;  %v6242_v11 = vsel %vm5218_vm2, %v4306_v57, %v5730_v47  ;;  %v3285_v43 = vadd.f32 %v14505_v20, %v14540_v18  ;;  %v14723_v3 = vpop.f32.mrb[139].mxu1  ;;  %v13115_v47 = vld [vmem:[%s13177_s22 + $0x3e8] sm:$0xff]  }
 0x1ff   : > { %11879 = vst [vmem:[%s13428_s27 + $0x1d0] sm:$0xff] %v10835_v1   ;;  %vm4960_vm3 = vcmp.gt.f32.partialorder %v3274_v45, 0.0  ;;  %v5472_v50 = vmul.f32 0.2, %v3274_v45  ;;  %vm5216_vm4 = vcmp.gt.f32.partialorder %v4298_v40, 0.0  ;;  %v4309_v55 = vadd.f32 %v14505_v20, %v14542_v60 }
 0x200   : > { %v5728_v27 = vmul.f32 0.2, %v4298_v40  ;;  %12007 = vst [vmem:[%s13428_s27 + $0x5d0] sm:$0xff] %v11475_v10   ;;  %vm4963_vm5 = vcmp.gt.f32.partialorder %v3285_v43, 0.0  ;;  %v5475_v19 = vmul.f32 0.2, %v3285_v43  ;;  %v3277_v18 = vadd.f32 %v14505_v20, %v14544_v32  ;;  %12584 = vmatmul.mubr.msk.bf16.gmra.mrb[244].mxu0 %vm1990_vm0, %v13111_v38 }
 0x201   : > { %v5984_v49 = vsel %vm4960_vm3, %v3274_v45, %v5472_v50  ;;  %v4301_v57 = vadd.f32 %v14505_v20, %v14548_v61  ;;  %v3298_v21 = vadd.f32 %v14505_v20, %v14561_v36  ;;  %12840 = vmatmul.mubr.msk.bf16.gmra.mrb[244].mxu1 %vm1990_vm0, %v13112_v2  ;;  %vm5219_vm6 = vcmp.gt.f32.partialorder %v4309_v55, 0.0  ;;  %12587 = vmatprep.mubr.msk.bf16.mxu0 %vm1990_vm0, %v13113_v26  ;;  %v14733_v61 = vpop.f32.mrb[140].mxu0 }
 0x202   : > { %v6240_v62 = vsel %vm5216_vm4, %v4298_v40, %v5728_v27  ;;  %v5987_v60 = vsel %vm4963_vm5, %v3285_v43, %v5475_v19  ;;  %v5731_v32 = vmul.f32 0.2, %v4309_v55  ;;  %vm4961_vm7 = vcmp.gt.f32.partialorder %v3277_v18, 0.0  ;;  %12843 = vmatprep.mubr.msk.bf16.mxu1 %vm1990_vm0, %v13114_v63  ;;  %v14737_v9 = vpop.f32.mrb[140].mxu1  ;;  %v14739_v29 = vpop.f32.mrb[141].mxu0  ;;  %v13118_v27 = vld [vmem:[%s13177_s22 + $0x7f0] sm:$0xff]  }
 0x203   : > { %v10850_v34 = vpack.c.bf16 %v5987_v60, %v5986_v46  ;;  %v5473_v7 = vmul.f32 0.2, %v3277_v18  ;;  %vm5217_vm8 = vcmp.gt.f32.partialorder %v4301_v57, 0.0  ;;  %v5729_v15 = vmul.f32 0.2, %v4301_v57  ;;  %v14746_v2 = vpop.f32.mrb[141].mxu1 }
 0x204   : > { %v6243_v36 = vsel %vm5219_vm6, %v4309_v55, %v5731_v32  ;;  %vm4966_vm9 = vcmp.gt.f32.partialorder %v3298_v21, 0.0  ;;  %v5478_v24 = vmul.f32 0.2, %v3298_v21  ;;  %v4322_v38 = vadd.f32 %v14505_v20, %v14573_v17  ;;  %v14748_v10 = vpop.f32.mrb[142].mxu0  ;;  %v13116_v17 = vld [vmem:[%s13177_s22 + $0x7e8] sm:$0xff]   ;;  %v13117_v46 = vld [vmem:[%s13177_s22 + $0x3f0] sm:$0xff]  }
 0x205   : > { %11882 = vst [vmem:[%s13428_s27 + $0x1e8] sm:$0xff] %v10850_v34   ;;  %v11490_v1 = vpack.c.bf16 %v6243_v36, %v6242_v11  ;;  %v5985_v33 = vsel %vm4961_vm7, %v3277_v18, %v5473_v7  ;;  %v6241_v45 = vsel %vm5217_vm8, %v4301_v57, %v5729_v15  ;;  %v3290_v40 = vadd.f32 %v14505_v20, %v14575_v8  ;;  %v14753_v11 = vpop.f32.mrb[142].mxu1  ;;  %v14755_v50 = vpop.f32.mrb[143].mxu0 }
 0x206   : > { %v10845_v43 = vpack.c.bf16 %v5985_v33, %v5984_v49  ;;  %v11485_v26 = vpack.c.bf16 %v6241_v45, %v6240_v62  ;;  %v5990_v63 = vsel %vm4966_vm9, %v3298_v21, %v5478_v24  ;;  %vm5222_vm10 = vcmp.gt.f32.partialorder %v4322_v38, 0.0  ;;  %v14761_v18 = vpop.f32.mrb[143].mxu1 }
 0x207   : > { %12010 = vst [vmem:[%s13428_s27 + $0x5e8] sm:$0xff] %v11490_v1   ;;  %v5734_v8 = vmul.f32 0.2, %v4322_v38  ;;  %vm4964_vm11 = vcmp.gt.f32.partialorder %v3290_v40, 0.0  ;;  %v5476_v19 = vmul.f32 0.2, %v3290_v40  ;;  %v4314_v55 = vadd.f32 %v14505_v20, %v14582_v0 }
 0x208   : > { %11881 = vst [vmem:[%s13428_s27 + $0x1e0] sm:$0xff] %v10845_v43   ;;  %12009 = vst [vmem:[%s13428_s27 + $0x5e0] sm:$0xff] %v11485_v26   ;;  %v3301_v49 = vadd.f32 %v14505_v20, %v14584_v25  ;;  %v4325_v62 = vadd.f32 %v14505_v20, %v14587_v58  ;;  %v3293_v57 = vadd.f32 %v14505_v20, %v14589_v12  ;;  %12588 = vmatmul.mubr.msk.bf16.gmra.mrb[248].mxu0 %vm1990_vm0, %v13115_v47  ;;  %v13119_v1 = vld [vmem:[%s13177_s22 + $0x3f8] sm:$0xff]  }
 0x209   : > { %v4317_v21 = vadd.f32 %v14505_v20, %v14593_v22  ;;  %v6246_v0 = vsel %vm5222_vm10, %v4322_v38, %v5734_v8  ;;  %v5988_v60 = vsel %vm4964_vm11, %v3290_v40, %v5476_v19  ;;  %vm5220_vm12 = vcmp.gt.f32.partialorder %v4314_v55, 0.0  ;;  %12844 = vmatmul.mubr.msk.bf16.gmra.mrb[248].mxu1 %vm1990_vm0, %v13116_v17  ;;  %12591 = vmatprep.mubr.msk.bf16.mxu0 %vm1990_vm0, %v13117_v46  ;;  %v14778_v34 = vpop.f32.mrb[144].mxu0  ;;  %v13120_v26 = vld [vmem:[%s13177_s22 + $0x7f8] sm:$0xff]  }
 0x20a   : > { %v5732_v32 = vmul.f32 0.2, %v4314_v55  ;;  %vm4967_vm13 = vcmp.gt.f32.partialorder %v3301_v49, 0.0  ;;  %v5479_v25 = vmul.f32 0.2, %v3301_v49  ;;  %vm5223_vm14 = vcmp.gt.f32.partialorder %v4325_v62, 0.0  ;;  %12847 = vmatprep.mubr.msk.bf16.mxu1 %vm1990_vm0, %v13118_v27 }
 0x20b   : > { %v5735_v58 = vmul.f32 0.2, %v4325_v62  ;;  %vm4965_vm15 = vcmp.gt.f32.partialorder %v3293_v57, 0.0  ;;  %v5477_v22 = vmul.f32 0.2, %v3293_v57  ;;  %vm5221_vm1 = vcmp.gt.f32.partialorder %v4317_v21, 0.0 }
 0x20c   : > { %v6244_v12 = vsel %vm5220_vm12, %v4314_v55, %v5732_v32  ;;  %v5991_v7 = vsel %vm4967_vm13, %v3301_v49, %v5479_v25  ;;  %v5733_v36 = vmul.f32 0.2, %v4317_v21  ;;  %v3314_v24 = vadd.f32 %v14505_v20, %v14605_v52  ;;  %v14782_v38 = vpop.f32.mrb[144].mxu1  ;;  %v14784_v47 = vpop.f32.mrb[145].mxu0 }
 0x20d   : > { %v6247_v15 = vsel %vm5223_vm14, %v4325_v62, %v5735_v58  ;;  %v10860_v33 = vpack.c.bf16 %v5991_v7, %v5990_v63  ;;  %v5989_v40 = vsel %vm4965_vm15, %v3293_v57, %v5477_v22  ;;  %v4338_v17 = vadd.f32 %v14505_v20, %v14614_v4  ;;  %v14789_v46 = vpop.f32.mrb[145].mxu1  ;;  %v14791_v43 = vpop.f32.mrb[146].mxu0 }
 0x20e   : > { %v11500_v45 = vpack.c.bf16 %v6247_v15, %v6246_v0  ;;  %v10855_v52 = vpack.c.bf16 %v5989_v40, %v5988_v60  ;;  %v6245_v27 = vsel %vm5221_vm1, %v4317_v21, %v5733_v36  ;;  %vm4970_vm2 = vcmp.gt.f32.partialorder %v3314_v24, 0.0  ;;  %v14795_v19 = vpop.f32.mrb[146].mxu1  ;;  %v14797_v63 = vpop.f32.mrb[147].mxu0 }
 0x20f   : > { %v5482_v8 = vmul.f32 0.2, %v3314_v24  ;;  %11884 = vst [vmem:[%s13428_s27 + $0x1f8] sm:$0xff] %v10860_v33   ;;  %v11495_v55 = vpack.c.bf16 %v6245_v27, %v6244_v12  ;;  %vm5226_vm3 = vcmp.gt.f32.partialorder %v4338_v17, 0.0  ;;  %v5738_v4 = vmul.f32 0.2, %v4338_v17 }
 0x210   : > { %12012 = vst [vmem:[%s13428_s27 + $0x5f8] sm:$0xff] %v11500_v45   ;;  %v3306_v49 = vadd.f32 %v14505_v20, %v14616_v23  ;;  %v14803_v62 = vpop.f32.mrb[147].mxu1  ;;  %11883 = vst [vmem:[%s13428_s27 + $0x1f0] sm:$0xff] %v10855_v52   ;;  %v4330_v21 = vadd.f32 %v14505_v20, %v14624_v53  ;;  %v3317_v0 = vadd.f32 %v14505_v20, %v14626_v41  ;;  %12592 = vmatmul.mubr.msk.bf16.gmra.mrb[252].mxu0 %vm1990_vm0, %v13119_v1 }
 0x211   : > { %v5994_v57 = vsel %vm4970_vm2, %v3314_v24, %v5482_v8  ;;  %v4341_v60 = vadd.f32 %v14505_v20, %v14629_v56  ;;  %12011 = vst [vmem:[%s13428_s27 + $0x5f0] sm:$0xff] %v11495_v55   ;;  %v6250_v32 = vsel %vm5226_vm3, %v4338_v17, %v5738_v4  ;;  %v3309_v23 = vadd.f32 %v14505_v20, %v14631_v14  ;;  %v14817_v56 = vpop.f32.mrb[148].mxu0 }
 0x212   : > { %vm4968_vm4 = vcmp.gt.f32.partialorder %v3306_v49, 0.0  ;;  %v5480_v25 = vmul.f32 0.2, %v3306_v49  ;;  %12848 = vmatmul.mubr.msk.bf16.gmra.mrb[252].mxu1 %vm1990_vm0, %v13120_v26  ;;  %vm5224_vm5 = vcmp.gt.f32.partialorder %v4330_v21, 0.0  ;;  %v5736_v58 = vmul.f32 0.2, %v4330_v21 }
 0x213   : > { %vm4971_vm6 = vcmp.gt.f32.partialorder %v3317_v0, 0.0  ;;  %v5483_v53 = vmul.f32 0.2, %v3317_v0  ;;  %vm5227_vm7 = vcmp.gt.f32.partialorder %v4341_v60, 0.0  ;;  %v5739_v41 = vmul.f32 0.2, %v4341_v60 }
 0x214   : > { %v5992_v12 = vsel %vm4968_vm4, %v3306_v49, %v5480_v25  ;;  %vm4969_vm8 = vcmp.gt.f32.partialorder %v3309_v23, 0.0  ;;  %v6248_v22 = vsel %vm5224_vm5, %v4330_v21, %v5736_v58  ;;  %v5481_v15 = vmul.f32 0.2, %v3309_v23  ;;  %v14821_v14 = vpop.f32.mrb[148].mxu1  ;;  %v14823_v24 = vpop.f32.mrb[149].mxu0 }
 0x215   : > { %v5995_v7 = vsel %vm4971_vm6, %v3317_v0, %v5483_v53  ;;  %v4333_v36 = vadd.f32 %v14505_v20, %v14635_v16  ;;  %v6251_v33 = vsel %vm5227_vm7, %v4341_v60, %v5739_v41  ;;  %v3330_v45 = vadd.f32 %v14505_v20, %v14646_v59  ;;  %v14829_v17 = vpop.f32.mrb[149].mxu1  ;;  %v14831_v26 = vpop.f32.mrb[150].mxu0 }
 0x216   : > { %v10870_v1 = vpack.c.bf16 %v5995_v7, %v5994_v57  ;;  %v4354_v40 = vadd.f32 %v14505_v20, %v14653_v35  ;;  %v11510_v52 = vpack.c.bf16 %v6251_v33, %v6250_v32  ;;  %v5993_v27 = vsel %vm4969_vm8, %v3309_v23, %v5481_v15  ;;  %v14833_v8 = vpop.f32.mrb[150].mxu1  ;;  %v14835_v55 = vpop.f32.mrb[151].mxu0 }
 0x217   : > { %vm5225_vm0 = vcmp.gt.f32.partialorder %v4333_v36, 0.0  ;;  %v5737_v16 = vmul.f32 0.2, %v4333_v36  ;;  %v10865_v4 = vpack.c.bf16 %v5993_v27, %v5992_v12  ;;  %vm4974_vm9 = vcmp.gt.f32.partialorder %v3330_v45, 0.0  ;;  %v14838_v35 = vpop.f32.mrb[151].mxu1 }
 0x218   : > { %11886 = vst [vmem:[%s13428_s27 + $0x208] sm:$0xff] %v10870_v1   ;;  %v5486_v59 = vmul.f32 0.2, %v3330_v45  ;;  %vm5230_vm10 = vcmp.gt.f32.partialorder %v4354_v40, 0.0  ;;  %12014 = vst [vmem:[%s13428_s27 + $0x608] sm:$0xff] %v11510_v52   ;;  %v3322_v21 = vadd.f32 %v14505_v20, %v14655_v31  ;;  %v4346_v0 = vadd.f32 %v14505_v20, %v14663_v54 }
 0x219   : > { %v6249_v49 = vsel %vm5225_vm0, %v4333_v36, %v5737_v16  ;;  %v5742_v57 = vmul.f32 0.2, %v4354_v40  ;;  %11885 = vst [vmem:[%s13428_s27 + $0x200] sm:$0xff] %v10865_v4   ;;  %v3333_v25 = vadd.f32 %v14505_v20, %v14665_v37  ;;  %v4357_v23 = vadd.f32 %v14505_v20, %v14671_v42  ;;  %v14855_v7 = vpop.f32.mrb[152].mxu0 }
 0x21a   : > { %v11505_v60 = vpack.c.bf16 %v6249_v49, %v6248_v22  ;;  %v5998_v32 = vsel %vm4974_vm9, %v3330_v45, %v5486_v59  ;;  %vm4972_vm11 = vcmp.gt.f32.partialorder %v3322_v21, 0.0  ;;  %v5484_v53 = vmul.f32 0.2, %v3322_v21  ;;  %v14857_v42 = vpop.f32.mrb[152].mxu1  ;;  %v14863_v45 = vpop.f32.mrb[153].mxu0 }
 0x21b   : > { %v6254_v58 = vsel %vm5230_vm10, %v4354_v40, %v5742_v57  ;;  %vm5228_vm12 = vcmp.gt.f32.partialorder %v4346_v0, 0.0  ;;  %v5740_v12 = vmul.f32 0.2, %v4346_v0  ;;  %vm4975_vm13 = vcmp.gt.f32.partialorder %v3333_v25, 0.0  ;;  %v14865_v40 = vpop.f32.mrb[153].mxu1  ;;  %v14867_v27 = vpop.f32.mrb[154].mxu0 }
 0x21c   : > { %12013 = vst [vmem:[%s13428_s27 + $0x600] sm:$0xff] %v11505_v60   ;;  %v5487_v31 = vmul.f32 0.2, %v3333_v25  ;;  %vm5231_vm14 = vcmp.gt.f32.partialorder %v4357_v23, 0.0  ;;  %v5996_v41 = vsel %vm4972_vm11, %v3322_v21, %v5484_v53  ;;  %v5743_v54 = vmul.f32 0.2, %v4357_v23 }
 0x21d   : > { %v3325_v22 = vadd.f32 %v14505_v20, %v14673_v5  ;;  %v4349_v37 = vadd.f32 %v14505_v20, %v14680_v13  ;;  %v6252_v15 = vsel %vm5228_vm12, %v4346_v0, %v5740_v12  ;;  %v3346_v1 = vadd.f32 %v14505_v20, %v14690_v48  ;;  %v14869_v16 = vpop.f32.mrb[154].mxu1  ;;  %v14871_v59 = vpop.f32.mrb[155].mxu0 }
 0x21e   : > { %v5999_v36 = vsel %vm4975_vm13, %v3333_v25, %v5487_v31  ;;  %v4370_v33 = vadd.f32 %v14505_v20, %v14694_v30  ;;  %v6255_v52 = vsel %vm5231_vm14, %v4357_v23, %v5743_v54  ;;  %v14873_v30 = vpop.f32.mrb[155].mxu1  ;;  %v4362_v25 = vadd.f32 %v14505_v20, %v14703_v44 }
 0x21f   : > { %v10880_v5 = vpack.c.bf16 %v5999_v36, %v5998_v32  ;;  %vm4973_vm15 = vcmp.gt.f32.partialorder %v3325_v22, 0.0  ;;  %v5485_v13 = vmul.f32 0.2, %v3325_v22  ;;  %v11520_v4 = vpack.c.bf16 %v6255_v52, %v6254_v58 }
 0x220   : > { %vm5229_vm1 = vcmp.gt.f32.partialorder %v4349_v37, 0.0  ;;  %v5741_v48 = vmul.f32 0.2, %v4349_v37  ;;  %vm4978_vm2 = vcmp.gt.f32.partialorder %v3346_v1, 0.0  ;;  %v5490_v57 = vmul.f32 0.2, %v3346_v1 }
 0x221   : > { %11888 = vst [vmem:[%s13428_s27 + $0x218] sm:$0xff] %v10880_v5   ;;  %v5997_v49 = vsel %vm4973_vm15, %v3325_v22, %v5485_v13  ;;  %vm5234_vm3 = vcmp.gt.f32.partialorder %v4370_v33, 0.0  ;;  %v5746_v21 = vmul.f32 0.2, %v4370_v33  ;;  %12016 = vst [vmem:[%s13428_s27 + $0x618] sm:$0xff] %v11520_v4   ;;  %v3338_v32 = vadd.f32 %v14505_v20, %v14701_v39  ;;  %v14889_v22 = vpop.f32.mrb[156].mxu0 }
 0x222   : > { %v10875_v0 = vpack.c.bf16 %v5997_v49, %v5996_v41  ;;  %v6253_v60 = vsel %vm5229_vm1, %v4349_v37, %v5741_v48  ;;  %v6002_v58 = vsel %vm4978_vm2, %v3346_v1, %v5490_v57  ;;  %v3349_v12 = vadd.f32 %v14505_v20, %v14709_v51  ;;  %v14891_v37 = vpop.f32.mrb[156].mxu1 }
 0x223   : > { %v11515_v23 = vpack.c.bf16 %v6253_v60, %v6252_v15  ;;  %v6258_v53 = vsel %vm5234_vm3, %v4370_v33, %v5746_v21  ;;  %vm4976_vm4 = vcmp.gt.f32.partialorder %v3338_v32, 0.0  ;;  %v5488_v31 = vmul.f32 0.2, %v3338_v32  ;;  %v14897_v33 = vpop.f32.mrb[157].mxu0  ;;  %v14899_v5 = vpop.f32.mrb[157].mxu1 }
 0x224   : > { %11887 = vst [vmem:[%s13428_s27 + $0x210] sm:$0xff] %v10875_v0   ;;  %vm5232_vm5 = vcmp.gt.f32.partialorder %v4362_v25, 0.0  ;;  %v5744_v54 = vmul.f32 0.2, %v4362_v25  ;;  %vm4979_vm6 = vcmp.gt.f32.partialorder %v3349_v12, 0.0  ;;  %v4373_v39 = vadd.f32 %v14505_v20, %v14711_v6  ;;  %v14901_v52 = vpop.f32.mrb[158].mxu0 }
 0x225   : > { %12015 = vst [vmem:[%s13428_s27 + $0x610] sm:$0xff] %v11515_v23   ;;  %v5491_v41 = vmul.f32 0.2, %v3349_v12  ;;  %v3341_v44 = vadd.f32 %v14505_v20, %v14721_v28  ;;  %v6000_v15 = vsel %vm4976_vm4, %v3338_v32, %v5488_v31  ;;  %v4365_v36 = vadd.f32 %v14505_v20, %v14723_v3  ;;  %v14903_v13 = vpop.f32.mrb[158].mxu1  ;;  %v14905_v49 = vpop.f32.mrb[159].mxu0 }
 0x226   : > { %v6256_v51 = vsel %vm5232_vm5, %v4362_v25, %v5744_v54  ;;  %v3362_v1 = vadd.f32 %v14505_v20, %v14733_v61  ;;  %vm5235_vm7 = vcmp.gt.f32.partialorder %v4373_v39, 0.0  ;;  %v5747_v28 = vmul.f32 0.2, %v4373_v39  ;;  %v14909_v0 = vpop.f32.mrb[159].mxu1 }
 0x227   : > { %v6003_v6 = vsel %vm4979_vm6, %v3349_v12, %v5491_v41  ;;  %vm4977_vm8 = vcmp.gt.f32.partialorder %v3341_v44, 0.0  ;;  %v5489_v48 = vmul.f32 0.2, %v3341_v44  ;;  %vm5233_vm0 = vcmp.gt.f32.partialorder %v4365_v36, 0.0 }
 0x228   : > { %v10890_v4 = vpack.c.bf16 %v6003_v6, %v6002_v58  ;;  %v5745_v3 = vmul.f32 0.2, %v4365_v36  ;;  %v6259_v61 = vsel %vm5235_vm7, %v4373_v39, %v5747_v28  ;;  %vm4982_vm9 = vcmp.gt.f32.partialorder %v3362_v1, 0.0 }
 0x229   : > { %v5494_v57 = vmul.f32 0.2, %v3362_v1  ;;  %v4386_v21 = vadd.f32 %v14505_v20, %v14737_v9  ;;  %v11530_v60 = vpack.c.bf16 %v6259_v61, %v6258_v53  ;;  %v6001_v32 = vsel %vm4977_vm8, %v3341_v44, %v5489_v48  ;;  %v14917_v39 = vpop.f32.mrb[160].mxu0 }
 0x22a   : > { %11890 = vst [vmem:[%s13428_s27 + $0x228] sm:$0xff] %v10890_v4   ;;  %v6257_v25 = vsel %vm5233_vm0, %v4365_v36, %v5745_v3  ;;  %v3354_v23 = vadd.f32 %v14505_v20, %v14739_v29  ;;  %v10885_v58 = vpack.c.bf16 %v6001_v32, %v6000_v15  ;;  %v4378_v9 = vadd.f32 %v14505_v20, %v14746_v2  ;;  %v14931_v36 = vpop.f32.mrb[161].mxu0 }
 0x22b   : > { %v11525_v12 = vpack.c.bf16 %v6257_v25, %v6256_v51  ;;  %v6006_v31 = vsel %vm4982_vm9, %v3362_v1, %v5494_v57  ;;  %vm5238_vm10 = vcmp.gt.f32.partialorder %v4386_v21, 0.0  ;;  %12018 = vst [vmem:[%s13428_s27 + $0x628] sm:$0xff] %v11530_v60   ;;  %v5750_v54 = vmul.f32 0.2, %v4386_v21  ;;  %v14929_v51 = vpop.f32.mrb[160].mxu1 }
 0x22c   : > { %vm4980_vm11 = vcmp.gt.f32.partialorder %v3354_v23, 0.0  ;;  %v5492_v41 = vmul.f32 0.2, %v3354_v23  ;;  %11889 = vst [vmem:[%s13428_s27 + $0x220] sm:$0xff] %v10885_v58   ;;  %v3365_v53 = vadd.f32 %v14505_v20, %v14748_v10  ;;  %v4389_v29 = vadd.f32 %v14505_v20, %v14753_v11  ;;  %v14933_v28 = vpop.f32.mrb[161].mxu1  ;;  %v14935_v10 = vpop.f32.mrb[162].mxu0 }
 0x22d   : > { %12017 = vst [vmem:[%s13428_s27 + $0x620] sm:$0xff] %v11525_v12   ;;  %v3357_v44 = vadd.f32 %v14505_v20, %v14755_v50  ;;  %v4381_v15 = vadd.f32 %v14505_v20, %v14761_v18  ;;  %v6262_v2 = vsel %vm5238_vm10, %v4386_v21, %v5750_v54  ;;  %vm5236_vm12 = vcmp.gt.f32.partialorder %v4378_v9, 0.0  ;;  %v14937_v20 = vpop.f32.mrb[162].mxu1  ;;  %v14939_v18 = vpop.f32.mrb[163].mxu0  ;;  %v14944_v21 = vld [vmem:[%s15901_s2] ss:$0 sm:$0xff] }
 0x22e   : > { %v6004_v1 = vsel %vm4980_vm11, %v3354_v23, %v5492_v41  ;;  %v5748_v6 = vmul.f32 0.2, %v4378_v9  ;;  %vm4983_vm13 = vcmp.gt.f32.partialorder %v3365_v53, 0.0  ;;  %v5495_v11 = vmul.f32 0.2, %v3365_v53  ;;  %v14948_v32 = vpop.f32.mrb[163].mxu1 }
 0x22f   : > { %vm5239_vm14 = vcmp.gt.f32.partialorder %v4389_v29, 0.0  ;;  %v5751_v4 = vmul.f32 0.2, %v4389_v29  ;;  %vm4981_vm15 = vcmp.gt.f32.partialorder %v3357_v44, 0.0  ;;  %v5493_v48 = vmul.f32 0.2, %v3357_v44 }
 0x230   : > { %v6260_v50 = vsel %vm5236_vm12, %v4378_v9, %v5748_v6  ;;  %vm5237_vm1 = vcmp.gt.f32.partialorder %v4381_v15, 0.0  ;;  %v6007_v3 = vsel %vm4983_vm13, %v3365_v53, %v5495_v11  ;;  %v5749_v57 = vmul.f32 0.2, %v4381_v15 }
 0x231   : > { %v6263_v61 = vsel %vm5239_vm14, %v4389_v29, %v5751_v4  ;;  %v3378_v60 = vadd.f32 %v14944_v21, %v14778_v34  ;;  %v10900_v25 = vpack.c.bf16 %v6007_v3, %v6006_v31  ;;  %v6005_v58 = vsel %vm4981_vm15, %v3357_v44, %v5493_v48  ;;  %v14956_v6 = vpop.f32.mrb[164].mxu0 }
 0x232   : > { %v11540_v23 = vpack.c.bf16 %v6263_v61, %v6262_v2  ;;  %v4402_v12 = vadd.f32 %v14944_v21, %v14782_v38  ;;  %v10895_v54 = vpack.c.bf16 %v6005_v58, %v6004_v1  ;;  %v6261_v41 = vsel %vm5237_vm1, %v4381_v15, %v5749_v57  ;;  %v14965_v2 = vpop.f32.mrb[164].mxu1  ;;  %v14967_v1 = vpop.f32.mrb[165].mxu0 }
 0x233   : > { %vm4986_vm2 = vcmp.gt.f32.partialorder %v3378_v60, 0.0  ;;  %v5498_v9 = vmul.f32 0.2, %v3378_v60  ;;  %11892 = vst [vmem:[%s13428_s27 + $0x238] sm:$0xff] %v10900_v25   ;;  %v11535_v53 = vpack.c.bf16 %v6261_v41, %v6260_v50  ;;  %v3370_v34 = vadd.f32 %v14944_v21, %v14784_v47  ;;  %v14972_v50 = vpop.f32.mrb[165].mxu1 }
 0x234   : > { %12020 = vst [vmem:[%s13428_s27 + $0x638] sm:$0xff] %v11540_v23   ;;  %vm5242_vm3 = vcmp.gt.f32.partialorder %v4402_v12, 0.0  ;;  %v5754_v29 = vmul.f32 0.2, %v4402_v12  ;;  %11891 = vst [vmem:[%s13428_s27 + $0x230] sm:$0xff] %v10895_v54   ;;  %v4394_v38 = vadd.f32 %v14944_v21, %v14789_v46  ;;  %v3381_v44 = vadd.f32 %v14944_v21, %v14791_v43  ;;  %v14974_v46 = vpop.f32.mrb[166].mxu0 }
 0x235   : > { %v6010_v31 = vsel %vm4986_vm2, %v3378_v60, %v5498_v9  ;;  %v4405_v15 = vadd.f32 %v14944_v21, %v14795_v19  ;;  %12019 = vst [vmem:[%s13428_s27 + $0x630] sm:$0xff] %v11535_v53   ;;  %vm4984_vm4 = vcmp.gt.f32.partialorder %v3370_v34, 0.0  ;;  %v5496_v47 = vmul.f32 0.2, %v3370_v34  ;;  %v14976_v61 = vpop.f32.mrb[166].mxu1  ;;  %v14978_v57 = vpop.f32.mrb[167].mxu0 }
 0x236   : > { %v6266_v11 = vsel %vm5242_vm3, %v4402_v12, %v5754_v29  ;;  %v3373_v4 = vadd.f32 %v14944_v21, %v14797_v63  ;;  %vm5240_vm5 = vcmp.gt.f32.partialorder %v4394_v38, 0.0  ;;  %v5752_v43 = vmul.f32 0.2, %v4394_v38  ;;  %v14982_v58 = vpop.f32.mrb[167].mxu1 }
 0x237   : > { %vm4987_vm6 = vcmp.gt.f32.partialorder %v3381_v44, 0.0  ;;  %v5499_v48 = vmul.f32 0.2, %v3381_v44  ;;  %v6008_v19 = vsel %vm4984_vm4, %v3370_v34, %v5496_v47  ;;  %vm5243_vm7 = vcmp.gt.f32.partialorder %v4405_v15, 0.0 }
 0x238   : > { %v5755_v3 = vmul.f32 0.2, %v4405_v15  ;;  %vm4985_vm8 = vcmp.gt.f32.partialorder %v3373_v4, 0.0  ;;  %v6264_v60 = vsel %vm5240_vm5, %v4394_v38, %v5752_v43  ;;  %v5497_v63 = vmul.f32 0.2, %v3373_v4 }
 0x239   : > { %v6011_v25 = vsel %vm4987_vm6, %v3381_v44, %v5499_v48  ;;  %v4397_v23 = vadd.f32 %v14944_v21, %v14803_v62  ;;  %v3394_v41 = vadd.f32 %v14944_v21, %v14817_v56  ;;  %v4418_v9 = vadd.f32 %v14944_v21, %v14821_v14  ;;  %v14989_v44 = vpop.f32.mrb[168].mxu0 }
 0x23a   : > { %v10910_v12 = vpack.c.bf16 %v6011_v25, %v6010_v31  ;;  %v6267_v54 = vsel %vm5243_vm7, %v4405_v15, %v5755_v3  ;;  %v6009_v29 = vsel %vm4985_vm8, %v3373_v4, %v5497_v63  ;;  %v3386_v56 = vadd.f32 %v14944_v21, %v14823_v24  ;;  %v14998_v47 = vpop.f32.mrb[169].mxu0 }
 0x23b   : > { %v11550_v53 = vpack.c.bf16 %v6267_v54, %v6266_v11  ;;  %vm5241_vm0 = vcmp.gt.f32.partialorder %v4397_v23, 0.0  ;;  %v5753_v34 = vmul.f32 0.2, %v4397_v23  ;;  %v10905_v38 = vpack.c.bf16 %v6009_v29, %v6008_v19  ;;  %v14996_v11 = vpop.f32.mrb[168].mxu1  ;;  %v15007_v24 = vpop.f32.mrb[170].mxu0 }
 0x23c   : > { %11894 = vst [vmem:[%s13428_s27 + $0x248] sm:$0xff] %v10910_v12   ;;  %vm4990_vm9 = vcmp.gt.f32.partialorder %v3394_v41, 0.0  ;;  %v5502_v62 = vmul.f32 0.2, %v3394_v41  ;;  %vm5246_vm10 = vcmp.gt.f32.partialorder %v4418_v9, 0.0  ;;  %v4410_v14 = vadd.f32 %v14944_v21, %v14829_v17  ;;  %v15005_v3 = vpop.f32.mrb[169].mxu1 }
 0x23d   : > { %12022 = vst [vmem:[%s13428_s27 + $0x648] sm:$0xff] %v11550_v53   ;;  %v6265_v31 = vsel %vm5241_vm0, %v4397_v23, %v5753_v34  ;;  %v5758_v15 = vmul.f32 0.2, %v4418_v9  ;;  %11893 = vst [vmem:[%s13428_s27 + $0x240] sm:$0xff] %v10905_v38   ;;  %v3397_v48 = vadd.f32 %v14944_v21, %v14831_v26  ;;  %v4421_v19 = vadd.f32 %v14944_v21, %v14833_v8  ;;  %v15010_v63 = vpop.f32.mrb[170].mxu1  ;;  %v15012_v23 = vpop.f32.mrb[171].mxu0 }
 0x23e   : > { %v11545_v4 = vpack.c.bf16 %v6265_v31, %v6264_v60  ;;  %v6014_v43 = vsel %vm4990_vm9, %v3394_v41, %v5502_v62  ;;  %vm4988_vm11 = vcmp.gt.f32.partialorder %v3386_v56, 0.0  ;;  %v5500_v25 = vmul.f32 0.2, %v3386_v56 }
 0x23f   : > { %v6270_v17 = vsel %vm5246_vm10, %v4418_v9, %v5758_v15  ;;  %vm5244_vm12 = vcmp.gt.f32.partialorder %v4410_v14, 0.0  ;;  %v5756_v60 = vmul.f32 0.2, %v4410_v14  ;;  %vm4991_vm13 = vcmp.gt.f32.partialorder %v3397_v48, 0.0  ;;  %v15019_v9 = vpop.f32.mrb[171].mxu1 }
 0x240   : > { %12021 = vst [vmem:[%s13428_s27 + $0x640] sm:$0xff] %v11545_v4   ;;  %v5503_v26 = vmul.f32 0.2, %v3397_v48  ;;  %vm5247_vm14 = vcmp.gt.f32.partialorder %v4421_v19, 0.0  ;;  %v6012_v12 = vsel %vm4988_vm11, %v3386_v56, %v5500_v25  ;;  %v5759_v8 = vmul.f32 0.2, %v4421_v19 }
 0x241   : > { %v3389_v54 = vadd.f32 %v14944_v21, %v14835_v55  ;;  %v4413_v41 = vadd.f32 %v14944_v21, %v14838_v35  ;;  %v6268_v53 = vsel %vm5244_vm12, %v4410_v14, %v5756_v60  ;;  %v3410_v34 = vadd.f32 %v14944_v21, %v14855_v7  ;;  %v15025_v35 = vpop.f32.mrb[172].mxu0 }
 0x242   : > { %v6015_v29 = vsel %vm4991_vm13, %v3397_v48, %v5503_v26  ;;  %v4434_v38 = vadd.f32 %v14944_v21, %v14857_v42  ;;  %v6271_v31 = vsel %vm5247_vm14, %v4421_v19, %v5759_v8  ;;  %v15028_v48 = vpop.f32.mrb[172].mxu1  ;;  %v3402_v19 = vadd.f32 %v14944_v21, %v14863_v45  ;;  %v15035_v25 = vpop.f32.mrb[173].mxu0 }
 0x243   : > { %v10920_v62 = vpack.c.bf16 %v6015_v29, %v6014_v43  ;;  %vm4989_vm15 = vcmp.gt.f32.partialorder %v3389_v54, 0.0  ;;  %v5501_v15 = vmul.f32 0.2, %v3389_v54  ;;  %v11560_v55 = vpack.c.bf16 %v6271_v31, %v6270_v17  ;;  %v15037_v60 = vpop.f32.mrb[173].mxu1 }
 0x244   : > { %vm5245_vm1 = vcmp.gt.f32.partialorder %v4413_v41, 0.0  ;;  %v5757_v56 = vmul.f32 0.2, %v4413_v41  ;;  %vm4994_vm2 = vcmp.gt.f32.partialorder %v3410_v34, 0.0  ;;  %v5506_v4 = vmul.f32 0.2, %v3410_v34 }
 0x245   : > { %11896 = vst [vmem:[%s13428_s27 + $0x258] sm:$0xff] %v10920_v62   ;;  %v6013_v14 = vsel %vm4989_vm15, %v3389_v54, %v5501_v15  ;;  %vm5250_vm3 = vcmp.gt.f32.partialorder %v4434_v38, 0.0  ;;  %v5762_v7 = vmul.f32 0.2, %v4434_v38  ;;  %12024 = vst [vmem:[%s13428_s27 + $0x658] sm:$0xff] %v11560_v55   ;;  %v4426_v17 = vadd.f32 %v14944_v21, %v14865_v40 }
 0x246   : > { %v10915_v42 = vpack.c.bf16 %v6013_v14, %v6012_v12  ;;  %v6269_v43 = vsel %vm5245_vm1, %v4413_v41, %v5757_v56  ;;  %v6018_v8 = vsel %vm4994_vm2, %v3410_v34, %v5506_v4  ;;  %v3413_v29 = vadd.f32 %v14944_v21, %v14867_v27  ;;  %v15042_v12 = vpop.f32.mrb[174].mxu0  ;;  %v15044_v41 = vpop.f32.mrb[174].mxu1 }
 0x247   : > { %v11555_v26 = vpack.c.bf16 %v6269_v43, %v6268_v53  ;;  %v6274_v54 = vsel %vm5250_vm3, %v4434_v38, %v5762_v7  ;;  %vm4992_vm4 = vcmp.gt.f32.partialorder %v3402_v19, 0.0  ;;  %v5504_v45 = vmul.f32 0.2, %v3402_v19  ;;  %v15052_v38 = vpop.f32.mrb[175].mxu0  ;;  %v15054_v27 = vpop.f32.mrb[175].mxu1 }
 0x248   : > { %11895 = vst [vmem:[%s13428_s27 + $0x250] sm:$0xff] %v10915_v42   ;;  %vm5248_vm5 = vcmp.gt.f32.partialorder %v4426_v17, 0.0  ;;  %v5760_v40 = vmul.f32 0.2, %v4426_v17  ;;  %vm4995_vm6 = vcmp.gt.f32.partialorder %v3413_v29, 0.0  ;;  %v4437_v53 = vadd.f32 %v14944_v21, %v14869_v16 }
 0x249   : > { %12023 = vst [vmem:[%s13428_s27 + $0x650] sm:$0xff] %v11555_v26   ;;  %v5507_v62 = vmul.f32 0.2, %v3413_v29  ;;  %v3405_v34 = vadd.f32 %v14944_v21, %v14871_v59  ;;  %v6016_v31 = vsel %vm4992_vm4, %v3402_v19, %v5504_v45  ;;  %v4429_v55 = vadd.f32 %v14944_v21, %v14873_v30  ;;  %v15060_v42 = vpop.f32.mrb[176].mxu0 }
 0x24a   : > { %v6272_v15 = vsel %vm5248_vm5, %v4426_v17, %v5760_v40  ;;  %v3426_v56 = vadd.f32 %v14944_v21, %v14889_v22  ;;  %vm5251_vm7 = vcmp.gt.f32.partialorder %v4437_v53, 0.0  ;;  %v5763_v4 = vmul.f32 0.2, %v4437_v53  ;;  %v15064_v17 = vpop.f32.mrb[176].mxu1  ;;  %v15066_v22 = vpop.f32.mrb[177].mxu0 }
 0x24b   : > { %v6019_v14 = vsel %vm4995_vm6, %v3413_v29, %v5507_v62  ;;  %vm4993_vm8 = vcmp.gt.f32.partialorder %v3405_v34, 0.0  ;;  %v5505_v7 = vmul.f32 0.2, %v3405_v34  ;;  %vm5249_vm0 = vcmp.gt.f32.partialorder %v4429_v55, 0.0  ;;  %15903 = vst [vmem:[#allocation2_spill] sm:$0xff] %v15066_v22  ;;  %v15071_v40 = vpop.f32.mrb[177].mxu1 }
 0x24c   : > { %v10930_v16 = vpack.c.bf16 %v6019_v14, %v6018_v8  ;;  %v5761_v59 = vmul.f32 0.2, %v4429_v55  ;;  %v6275_v43 = vsel %vm5251_vm7, %v4437_v53, %v5763_v4  ;;  %vm4998_vm9 = vcmp.gt.f32.partialorder %v3426_v56, 0.0  ;;  %v15073_v62 = vpop.f32.mrb[178].mxu0  ;;  %v15075_v4 = vpop.f32.mrb[178].mxu1 }
 0x24d   : > { %v5510_v19 = vmul.f32 0.2, %v3426_v56  ;;  %v4450_v30 = vadd.f32 %v14944_v21, %v14891_v37  ;;  %v11570_v26 = vpack.c.bf16 %v6275_v43, %v6274_v54  ;;  %v6017_v29 = vsel %vm4993_vm8, %v3405_v34, %v5505_v7  ;;  %v15077_v22 = vpop.f32.mrb[179].mxu0 }
 0x24e   : > { %11898 = vst [vmem:[%s13428_s27 + $0x268] sm:$0xff] %v10930_v16   ;;  %v6273_v8 = vsel %vm5249_vm0, %v4429_v55, %v5761_v59  ;;  %v3418_v45 = vadd.f32 %v14944_v21, %v14897_v33  ;;  %v10925_v53 = vpack.c.bf16 %v6017_v29, %v6016_v31  ;;  %v4442_v33 = vadd.f32 %v14944_v21, %v14899_v5  ;;  %v15082_v55 = vpop.f32.mrb[179].mxu1 }
 0x24f   : > { %v11565_v37 = vpack.c.bf16 %v6273_v8, %v6272_v15  ;;  %v6022_v14 = vsel %vm4998_vm9, %v3426_v56, %v5510_v19  ;;  %vm5254_vm10 = vcmp.gt.f32.partialorder %v4450_v30, 0.0  ;;  %12026 = vst [vmem:[%s13428_s27 + $0x668] sm:$0xff] %v11570_v26   ;;  %v5766_v54 = vmul.f32 0.2, %v4450_v30 }
 0x250   : > { %vm4996_vm11 = vcmp.gt.f32.partialorder %v3418_v45, 0.0  ;;  %v5508_v34 = vmul.f32 0.2, %v3418_v45  ;;  %11897 = vst [vmem:[%s13428_s27 + $0x260] sm:$0xff] %v10925_v53   ;;  %v3429_v31 = vadd.f32 %v14944_v21, %v14901_v52  ;;  %v4453_v15 = vadd.f32 %v14944_v21, %v14903_v13 }
 0x251   : > { %12025 = vst [vmem:[%s13428_s27 + $0x660] sm:$0xff] %v11565_v37   ;;  %v3421_v56 = vadd.f32 %v14944_v21, %v14905_v49  ;;  %v4445_v16 = vadd.f32 %v14944_v21, %v14909_v0  ;;  %v6278_v7 = vsel %vm5254_vm10, %v4450_v30, %v5766_v54  ;;  %vm5252_vm12 = vcmp.gt.f32.partialorder %v4442_v33, 0.0 }
 0x252   : > { %v6020_v59 = vsel %vm4996_vm11, %v3418_v45, %v5508_v34  ;;  %v5764_v5 = vmul.f32 0.2, %v4442_v33  ;;  %vm4999_vm13 = vcmp.gt.f32.partialorder %v3429_v31, 0.0  ;;  %v5511_v43 = vmul.f32 0.2, %v3429_v31  ;;  %v15094_v29 = vpop.f32.mrb[180].mxu0 }
 0x253   : > { %vm5255_vm14 = vcmp.gt.f32.partialorder %v4453_v15, 0.0  ;;  %v5767_v19 = vmul.f32 0.2, %v4453_v15  ;;  %vm4997_vm15 = vcmp.gt.f32.partialorder %v3421_v56, 0.0  ;;  %v5509_v52 = vmul.f32 0.2, %v3421_v56 }
 0x254   : > { %v6276_v26 = vsel %vm5252_vm12, %v4442_v33, %v5764_v5  ;;  %vm5253_vm1 = vcmp.gt.f32.partialorder %v4445_v16, 0.0  ;;  %v6023_v13 = vsel %vm4999_vm13, %v3429_v31, %v5511_v43  ;;  %v5765_v49 = vmul.f32 0.2, %v4445_v16  ;;  %v15098_v30 = vpop.f32.mrb[180].mxu1  ;;  %v15100_v45 = vpop.f32.mrb[181].mxu0 }
 0x255   : > { %v6279_v8 = vsel %vm5255_vm14, %v4453_v15, %v5767_v19  ;;  %v3442_v0 = vadd.f32 %v14944_v21, %v14917_v39  ;;  %v10940_v53 = vpack.c.bf16 %v6023_v13, %v6022_v14  ;;  %v6021_v54 = vsel %vm4997_vm15, %v3421_v56, %v5509_v52  ;;  %v15104_v33 = vpop.f32.mrb[181].mxu1  ;;  %v15106_v31 = vpop.f32.mrb[182].mxu0 }
 0x256   : > { %v11580_v37 = vpack.c.bf16 %v6279_v8, %v6278_v7  ;;  %v4466_v34 = vadd.f32 %v14944_v21, %v14929_v51  ;;  %v10935_v15 = vpack.c.bf16 %v6021_v54, %v6020_v59  ;;  %v6277_v5 = vsel %vm5253_vm1, %v4445_v16, %v5765_v49  ;;  %v15108_v43 = vpop.f32.mrb[182].mxu1  ;;  %v15110_v19 = vpop.f32.mrb[183].mxu0 }
 0x257   : > { %vm5002_vm2 = vcmp.gt.f32.partialorder %v3442_v0, 0.0  ;;  %v5514_v39 = vmul.f32 0.2, %v3442_v0  ;;  %11900 = vst [vmem:[%s13428_s27 + $0x278] sm:$0xff] %v10940_v53   ;;  %v11575_v14 = vpack.c.bf16 %v6277_v5, %v6276_v26  ;;  %v3434_v51 = vadd.f32 %v14944_v21, %v14931_v36  ;;  %v15116_v7 = vpop.f32.mrb[183].mxu1 }
 0x258   : > { %12028 = vst [vmem:[%s13428_s27 + $0x678] sm:$0xff] %v11580_v37   ;;  %vm5258_vm3 = vcmp.gt.f32.partialorder %v4466_v34, 0.0  ;;  %v5770_v56 = vmul.f32 0.2, %v4466_v34  ;;  %11899 = vst [vmem:[%s13428_s27 + $0x270] sm:$0xff] %v10935_v15   ;;  %v4458_v16 = vadd.f32 %v14944_v21, %v14933_v28  ;;  %v3445_v52 = vadd.f32 %v14944_v21, %v14935_v10 }
 0x259   : > { %v6026_v59 = vsel %vm5002_vm2, %v3442_v0, %v5514_v39  ;;  %v4469_v13 = vadd.f32 %v14944_v21, %v14937_v20  ;;  %12027 = vst [vmem:[%s13428_s27 + $0x670] sm:$0xff] %v11575_v14   ;;  %vm5000_vm4 = vcmp.gt.f32.partialorder %v3434_v51, 0.0  ;;  %v5512_v8 = vmul.f32 0.2, %v3434_v51 }
 0x25a   : > { %v6282_v26 = vsel %vm5258_vm3, %v4466_v34, %v5770_v56  ;;  %v3437_v36 = vadd.f32 %v14944_v21, %v14939_v18  ;;  %vm5256_vm5 = vcmp.gt.f32.partialorder %v4458_v16, 0.0  ;;  %v5768_v49 = vmul.f32 0.2, %v4458_v16  ;;  %v15128_v37 = vpop.f32.mrb[184].mxu0 }
 0x25b   : > { %vm5003_vm6 = vcmp.gt.f32.partialorder %v3445_v52, 0.0  ;;  %v5515_v0 = vmul.f32 0.2, %v3445_v52  ;;  %v6024_v53 = vsel %vm5000_vm4, %v3434_v51, %v5512_v8  ;;  %vm5259_vm7 = vcmp.gt.f32.partialorder %v4469_v13, 0.0  ;;  %v15132_v15 = vpop.f32.mrb[184].mxu1  ;;  %v15134_v18 = vpop.f32.mrb[185].mxu0 }
 0x25c   : > { %v5771_v28 = vmul.f32 0.2, %v4469_v13  ;;  %vm5001_vm8 = vcmp.gt.f32.partialorder %v3437_v36, 0.0  ;;  %v6280_v10 = vsel %vm5256_vm5, %v4458_v16, %v5768_v49  ;;  %v5513_v20 = vmul.f32 0.2, %v3437_v36  ;;  %v15140_v51 = vpop.f32.mrb[185].mxu1 }
 0x25d   : > { %v6027_v54 = vsel %vm5003_vm6, %v3445_v52, %v5515_v0  ;;  %v4461_v34 = vadd.f32 %v14944_v21, %v14948_v32  ;;  %v3458_v14 = vadd.f32 %v14944_v21, %v14956_v6  ;;  %v4482_v56 = vadd.f32 %v14944_v21, %v14965_v2  ;;  %v15142_v16 = vpop.f32.mrb[186].mxu0  ;;  %v15144_v49 = vpop.f32.mrb[186].mxu1 }
 0x25e   : > { %v10950_v5 = vpack.c.bf16 %v6027_v54, %v6026_v59  ;;  %v6283_v39 = vsel %vm5259_vm7, %v4469_v13, %v5771_v28  ;;  %v6025_v8 = vsel %vm5001_vm8, %v3437_v36, %v5513_v20  ;;  %v15146_v59 = vpop.f32.mrb[187].mxu0  ;;  %v15149_v2 = vpop.f32.mrb[187].mxu1  ;;  %v4474_v36 = vadd.f32 %v14944_v21, %v14972_v50 }
 0x25f   : > { %v11590_v52 = vpack.c.bf16 %v6283_v39, %v6282_v26  ;;  %vm5257_vm0 = vcmp.gt.f32.partialorder %v4461_v34, 0.0  ;;  %v5769_v32 = vmul.f32 0.2, %v4461_v34  ;;  %v10945_v13 = vpack.c.bf16 %v6025_v8, %v6024_v53 }
 0x260   : > { %11902 = vst [vmem:[%s13428_s27 + $0x288] sm:$0xff] %v10950_v5   ;;  %vm5006_vm9 = vcmp.gt.f32.partialorder %v3458_v14, 0.0  ;;  %v5518_v6 = vmul.f32 0.2, %v3458_v14  ;;  %vm5262_vm10 = vcmp.gt.f32.partialorder %v4482_v56, 0.0  ;;  %v3450_v26 = vadd.f32 %v14944_v21, %v14967_v1 }
 0x261   : > { %12030 = vst [vmem:[%s13428_s27 + $0x688] sm:$0xff] %v11590_v52   ;;  %v6281_v0 = vsel %vm5257_vm0, %v4461_v34, %v5769_v32  ;;  %v5774_v28 = vmul.f32 0.2, %v4482_v56  ;;  %11901 = vst [vmem:[%s13428_s27 + $0x280] sm:$0xff] %v10945_v13   ;;  %v3461_v53 = vadd.f32 %v14944_v21, %v14974_v46  ;;  %v4485_v5 = vadd.f32 %v14944_v21, %v14976_v61 }
 0x262   : > { %v11585_v54 = vpack.c.bf16 %v6281_v0, %v6280_v10  ;;  %v6030_v20 = vsel %vm5006_vm9, %v3458_v14, %v5518_v6  ;;  %vm5004_vm11 = vcmp.gt.f32.partialorder %v3450_v26, 0.0  ;;  %v5516_v52 = vmul.f32 0.2, %v3450_v26  ;;  %v15166_v14 = vpop.f32.mrb[188].mxu0 }
 0x263   : > { %v6286_v39 = vsel %vm5262_vm10, %v4482_v56, %v5774_v28  ;;  %vm5260_vm12 = vcmp.gt.f32.partialorder %v4474_v36, 0.0  ;;  %v5772_v34 = vmul.f32 0.2, %v4474_v36  ;;  %vm5007_vm13 = vcmp.gt.f32.partialorder %v3461_v53, 0.0  ;;  %v15168_v61 = vpop.f32.mrb[188].mxu1  ;;  %v15174_v0 = vpop.f32.mrb[189].mxu0 }
 0x264   : > { %12029 = vst [vmem:[%s13428_s27 + $0x680] sm:$0xff] %v11585_v54   ;;  %v5519_v1 = vmul.f32 0.2, %v3461_v53  ;;  %vm5263_vm14 = vcmp.gt.f32.partialorder %v4485_v5, 0.0  ;;  %v6028_v8 = vsel %vm5004_vm11, %v3450_v26, %v5516_v52  ;;  %v5775_v50 = vmul.f32 0.2, %v4485_v5 }
 0x265   : > { %v3453_v10 = vadd.f32 %v14944_v21, %v14978_v57  ;;  %v4477_v46 = vadd.f32 %v14944_v21, %v14982_v58  ;;  %v6284_v56 = vsel %vm5260_vm12, %v4474_v36, %v5772_v34  ;;  %v3474_v13 = vadd.f32 %v14944_v21, %v14989_v44  ;;  %v15176_v28 = vpop.f32.mrb[189].mxu1  ;;  %v15178_v54 = vpop.f32.mrb[190].mxu0 }
 0x266   : > { %v6031_v32 = vsel %vm5007_vm13, %v3461_v53, %v5519_v1  ;;  %v4498_v6 = vadd.f32 %v14944_v21, %v14996_v11  ;;  %v6287_v26 = vsel %vm5263_vm14, %v4485_v5, %v5775_v50  ;;  %v15180_v36 = vpop.f32.mrb[190].mxu1  ;;  %v15182_v52 = vpop.f32.mrb[191].mxu0 }
 0x267   : > { %v10960_v57 = vpack.c.bf16 %v6031_v32, %v6030_v20  ;;  %vm5005_vm15 = vcmp.gt.f32.partialorder %v3453_v10, 0.0  ;;  %v5517_v58 = vmul.f32 0.2, %v3453_v10  ;;  %15904 = vst [vmem:[#allocation3_spill] sm:$0xff] %v15180_v36  ;;  %v11600_v53 = vpack.c.bf16 %v6287_v26, %v6286_v39  ;;  %15905 = vst [vmem:[#allocation4_spill] sm:$0xff] %v15182_v52  ;;  %v15184_v11 = vpop.f32.mrb[191].mxu1 }
 0x268   : > { %vm5261_vm1 = vcmp.gt.f32.partialorder %v4477_v46, 0.0  ;;  %v5773_v44 = vmul.f32 0.2, %v4477_v46  ;;  %vm5010_vm2 = vcmp.gt.f32.partialorder %v3474_v13, 0.0  ;;  %v5522_v20 = vmul.f32 0.2, %v3474_v13 }
 0x269   : > { %11904 = vst [vmem:[%s13428_s27 + $0x298] sm:$0xff] %v10960_v57   ;;  %v6029_v34 = vsel %vm5005_vm15, %v3453_v10, %v5517_v58  ;;  %vm5266_vm3 = vcmp.gt.f32.partialorder %v4498_v6, 0.0  ;;  %v5778_v5 = vmul.f32 0.2, %v4498_v6  ;;  %12032 = vst [vmem:[%s13428_s27 + $0x698] sm:$0xff] %v11600_v53   ;;  %v3466_v39 = vadd.f32 %v14944_v21, %v14998_v47 }
 0x26a   : > { %v10955_v1 = vpack.c.bf16 %v6029_v34, %v6028_v8  ;;  %v6285_v50 = vsel %vm5261_vm1, %v4477_v46, %v5773_v44  ;;  %v4490_v32 = vadd.f32 %v14944_v21, %v15005_v3  ;;  %v6034_v52 = vsel %vm5010_vm2, %v3474_v13, %v5522_v20  ;;  %v15200_v46 = vpop.f32.mrb[192].mxu0 }
 0x26b   : > { %v11595_v26 = vpack.c.bf16 %v6285_v50, %v6284_v56  ;;  %v6290_v36 = vsel %vm5266_vm3, %v4498_v6, %v5778_v5  ;;  %v3477_v57 = vadd.f32 %v14944_v21, %v15007_v24  ;;  %vm5008_vm4 = vcmp.gt.f32.partialorder %v3466_v39, 0.0  ;;  %v15202_v56 = vpop.f32.mrb[192].mxu1  ;;  %v15208_v44 = vpop.f32.mrb[193].mxu0 }
 0x26c   : > { %11903 = vst [vmem:[%s13428_s27 + $0x290] sm:$0xff] %v10955_v1   ;;  %v5520_v10 = vmul.f32 0.2, %v3466_v39  ;;  %vm5264_vm5 = vcmp.gt.f32.partialorder %v4490_v32, 0.0  ;;  %v5776_v58 = vmul.f32 0.2, %v4490_v32  ;;  %v4501_v47 = vadd.f32 %v14944_v21, %v15010_v63 }
 0x26d   : > { %12031 = vst [vmem:[%s13428_s27 + $0x690] sm:$0xff] %v11595_v26   ;;  %vm5011_vm6 = vcmp.gt.f32.partialorder %v3477_v57, 0.0  ;;  %v5523_v8 = vmul.f32 0.2, %v3477_v57  ;;  %v3469_v3 = vadd.f32 %v14944_v21, %v15012_v23  ;;  %v4493_v6 = vadd.f32 %v14944_v21, %v15019_v9  ;;  %v15210_v34 = vpop.f32.mrb[193].mxu1  ;;  %v15212_v20 = vpop.f32.mrb[194].mxu0 }
 0x26e   : > { %v6032_v13 = vsel %vm5008_vm4, %v3466_v39, %v5520_v10  ;;  %v6288_v24 = vsel %vm5264_vm5, %v4490_v32, %v5776_v58  ;;  %v3490_v53 = vadd.f32 %v14944_v21, %v15025_v35  ;;  %vm5267_vm7 = vcmp.gt.f32.partialorder %v4501_v47, 0.0  ;;  %v15214_v5 = vpop.f32.mrb[194].mxu1  ;;  %v15216_v39 = vpop.f32.mrb[195].mxu0 }
 0x26f   : > { %v6035_v63 = vsel %vm5011_vm6, %v3477_v57, %v5523_v8  ;;  %v5779_v23 = vmul.f32 0.2, %v4501_v47  ;;  %vm5009_vm8 = vcmp.gt.f32.partialorder %v3469_v3, 0.0  ;;  %15906 = vst [vmem:[#allocation5_spill] sm:$0xff] %v15214_v5  ;;  %v5521_v50 = vmul.f32 0.2, %v3469_v3 }
 0x270   : > { %v10970_v1 = vpack.c.bf16 %v6035_v63, %v6034_v52  ;;  %vm5265_vm0 = vcmp.gt.f32.partialorder %v4493_v6, 0.0  ;;  %v5777_v9 = vmul.f32 0.2, %v4493_v6  ;;  %15907 = vst [vmem:[#allocation6_spill] sm:$0xff] %v15216_v39  ;;  %vm5014_vm9 = vcmp.gt.f32.partialorder %v3490_v53, 0.0  ;;  %v15220_v57 = vpop.f32.mrb[195].mxu1 }
 0x271   : > { %v6291_v35 = vsel %vm5267_vm7, %v4501_v47, %v5779_v23  ;;  %v5526_v32 = vmul.f32 0.2, %v3490_v53  ;;  %v4514_v26 = vadd.f32 %v14944_v21, %v15028_v48  ;;  %15908 = vst [vmem:[#allocation7_spill] sm:$0xff] %v15220_v57  ;;  %v6033_v58 = vsel %vm5009_vm8, %v3469_v3, %v5521_v50 }
 0x272   : > { %11906 = vst [vmem:[%s13428_s27 + $0x2a8] sm:$0xff] %v10970_v1   ;;  %v11610_v10 = vpack.c.bf16 %v6291_v35, %v6290_v36  ;;  %v6289_v52 = vsel %vm5265_vm0, %v4493_v6, %v5777_v9  ;;  %v3482_v8 = vadd.f32 %v14944_v21, %v15035_v25  ;;  %v10965_v63 = vpack.c.bf16 %v6033_v58, %v6032_v13  ;;  %v15228_v57 = vpop.f32.mrb[196].mxu0 }
 0x273   : > { %v11605_v5 = vpack.c.bf16 %v6289_v52, %v6288_v24  ;;  %v6038_v39 = vsel %vm5014_vm9, %v3490_v53, %v5526_v32  ;;  %vm5270_vm10 = vcmp.gt.f32.partialorder %v4514_v26, 0.0  ;;  %v5782_v47 = vmul.f32 0.2, %v4514_v26  ;;  %v15240_v24 = vpop.f32.mrb[196].mxu1  ;;  %v15242_v6 = vpop.f32.mrb[197].mxu0 }
 0x274   : > { %12034 = vst [vmem:[%s13428_s27 + $0x6a8] sm:$0xff] %v11610_v10   ;;  %vm5012_vm11 = vcmp.gt.f32.partialorder %v3482_v8, 0.0  ;;  %v5524_v23 = vmul.f32 0.2, %v3482_v8  ;;  %v4506_v48 = vadd.f32 %v14944_v21, %v15037_v60  ;;  %11905 = vst [vmem:[%s13428_s27 + $0x2a0] sm:$0xff] %v10965_v63   ;;  %v3493_v36 = vadd.f32 %v14944_v21, %v15042_v12  ;;  %v15244_v1 = vpop.f32.mrb[197].mxu1 }
 0x275   : > { %12033 = vst [vmem:[%s13428_s27 + $0x6a0] sm:$0xff] %v11605_v5   ;;  %v4517_v25 = vadd.f32 %v14944_v21, %v15044_v41  ;;  %v3485_v3 = vadd.f32 %v14944_v21, %v15052_v38  ;;  %v4509_v13 = vadd.f32 %v14944_v21, %v15054_v27  ;;  %v6294_v60 = vsel %vm5270_vm10, %v4514_v26, %v5782_v47  ;;  %v15246_v12 = vpop.f32.mrb[198].mxu0  ;;  %v15248_v27 = vpop.f32.mrb[198].mxu1 }
 0x276   : > { %v6036_v53 = vsel %vm5012_vm11, %v3482_v8, %v5524_v23  ;;  %vm5268_vm12 = vcmp.gt.f32.partialorder %v4506_v48, 0.0  ;;  %v5780_v5 = vmul.f32 0.2, %v4506_v48  ;;  %vm5015_vm13 = vcmp.gt.f32.partialorder %v3493_v36, 0.0  ;;  %v15250_v35 = vpop.f32.mrb[199].mxu0  ;;  %v15254_v52 = vpop.f32.mrb[199].mxu1 }
 0x277   : > { %v5527_v41 = vmul.f32 0.2, %v3493_v36  ;;  %vm5271_vm14 = vcmp.gt.f32.partialorder %v4517_v25, 0.0  ;;  %v5783_v50 = vmul.f32 0.2, %v4517_v25  ;;  %vm5013_vm15 = vcmp.gt.f32.partialorder %v3485_v3, 0.0 }
 0x278   : > { %v6292_v38 = vsel %vm5268_vm12, %v4506_v48, %v5780_v5  ;;  %v5525_v9 = vmul.f32 0.2, %v3485_v3  ;;  %vm5269_vm1 = vcmp.gt.f32.partialorder %v4509_v13, 0.0  ;;  %15909 = vst [vmem:[#allocation8_spill] sm:$0xff] %v15250_v35  ;;  %v5781_v10 = vmul.f32 0.2, %v4509_v13 }
 0x279   : > { %v6039_v32 = vsel %vm5015_vm13, %v3493_v36, %v5527_v41  ;;  %v6295_v26 = vsel %vm5271_vm14, %v4517_v25, %v5783_v50  ;;  %v3506_v58 = vadd.f32 %v14944_v21, %v15060_v42  ;;  %v4530_v23 = vadd.f32 %v14944_v21, %v15064_v17  ;;  %v15910_v42 = vld [vmem:[#allocation2_spill] sm:$0xff] }
 0x27a   : > { %v10980_v8 = vpack.c.bf16 %v6039_v32, %v6038_v39  ;;  %v11620_v63 = vpack.c.bf16 %v6295_v26, %v6294_v60  ;;  %v6037_v47 = vsel %vm5013_vm15, %v3485_v3, %v5525_v9  ;;  %v6293_v5 = vsel %vm5269_vm1, %v4509_v13, %v5781_v10  ;;  %v15262_v50 = vpop.f32.mrb[200].mxu0 }
 0x27b   : > { %v10975_v48 = vpack.c.bf16 %v6037_v47, %v6036_v53  ;;  %vm5018_vm2 = vcmp.gt.f32.partialorder %v3506_v58, 0.0  ;;  %v5530_v35 = vmul.f32 0.2, %v3506_v58  ;;  %v11615_v36 = vpack.c.bf16 %v6293_v5, %v6292_v38  ;;  %v15271_v60 = vpop.f32.mrb[200].mxu1  ;;  %v15273_v53 = vpop.f32.mrb[201].mxu0 }
 0x27c   : > { %11908 = vst [vmem:[%s13428_s27 + $0x2b8] sm:$0xff] %v10980_v8   ;;  %12036 = vst [vmem:[%s13428_s27 + $0x6b8] sm:$0xff] %v11620_v63   ;;  %vm5274_vm3 = vcmp.gt.f32.partialorder %v4530_v23, 0.0  ;;  %v5786_v25 = vmul.f32 0.2, %v4530_v23  ;;  %v3498_v41 = vadd.f32 %v14944_v21, %v15910_v42  ;;  %v4522_v17 = vadd.f32 %v14944_v21, %v15071_v40  ;;  %v15278_v32 = vpop.f32.mrb[201].mxu1 }
 0x27d   : > { %11907 = vst [vmem:[%s13428_s27 + $0x2b0] sm:$0xff] %v10975_v48   ;;  %v6042_v39 = vsel %vm5018_vm2, %v3506_v58, %v5530_v35  ;;  %v3509_v3 = vadd.f32 %v14944_v21, %v15073_v62  ;;  %v4533_v13 = vadd.f32 %v14944_v21, %v15075_v4  ;;  %12035 = vst [vmem:[%s13428_s27 + $0x6b0] sm:$0xff] %v11615_v36   ;;  %v15280_v40 = vpop.f32.mrb[202].mxu0  ;;  %v15282_v58 = vpop.f32.mrb[202].mxu1 }
 0x27e   : > { %v6298_v38 = vsel %vm5274_vm3, %v4530_v23, %v5786_v25  ;;  %vm5016_vm4 = vcmp.gt.f32.partialorder %v3498_v41, 0.0  ;;  %v5528_v9 = vmul.f32 0.2, %v3498_v41  ;;  %v3501_v35 = vadd.f32 %v14944_v21, %v15077_v22  ;;  %v15284_v8 = vpop.f32.mrb[203].mxu0  ;;  %v15288_v48 = vpop.f32.mrb[203].mxu1 }
 0x27f   : > { %vm5272_vm5 = vcmp.gt.f32.partialorder %v4522_v17, 0.0  ;;  %v5784_v62 = vmul.f32 0.2, %v4522_v17  ;;  %vm5019_vm6 = vcmp.gt.f32.partialorder %v3509_v3, 0.0  ;;  %v5531_v26 = vmul.f32 0.2, %v3509_v3 }
 0x280   : > { %v6040_v4 = vsel %vm5016_vm4, %v3498_v41, %v5528_v9  ;;  %vm5275_vm7 = vcmp.gt.f32.partialorder %v4533_v13, 0.0  ;;  %v5787_v10 = vmul.f32 0.2, %v4533_v13  ;;  %vm5017_vm8 = vcmp.gt.f32.partialorder %v3501_v35, 0.0 }
 0x281   : > { %v6296_v63 = vsel %vm5272_vm5, %v4522_v17, %v5784_v62  ;;  %v6043_v47 = vsel %vm5019_vm6, %v3509_v3, %v5531_v26  ;;  %v5529_v22 = vmul.f32 0.2, %v3501_v35  ;;  %v4525_v23 = vadd.f32 %v14944_v21, %v15082_v55 }
 0x282   : > { %v10990_v5 = vpack.c.bf16 %v6043_v47, %v6042_v39  ;;  %v6299_v36 = vsel %vm5275_vm7, %v4533_v13, %v5787_v10  ;;  %v3522_v25 = vadd.f32 %v14944_v21, %v15094_v29  ;;  %v4546_v42 = vadd.f32 %v14944_v21, %v15098_v30  ;;  %v15295_v62 = vpop.f32.mrb[204].mxu0 }
 0x283   : > { %v11630_v41 = vpack.c.bf16 %v6299_v36, %v6298_v38  ;;  %v6041_v9 = vsel %vm5017_vm8, %v3501_v35, %v5529_v22  ;;  %vm5273_vm0 = vcmp.gt.f32.partialorder %v4525_v23, 0.0  ;;  %v5785_v17 = vmul.f32 0.2, %v4525_v23  ;;  %v15302_v38 = vpop.f32.mrb[204].mxu1  ;;  %v15304_v35 = vpop.f32.mrb[205].mxu0 }
 0x284   : > { %11910 = vst [vmem:[%s13428_s27 + $0x2c8] sm:$0xff] %v10990_v5   ;;  %v10985_v3 = vpack.c.bf16 %v6041_v9, %v6040_v4  ;;  %vm5022_vm9 = vcmp.gt.f32.partialorder %v3522_v25, 0.0  ;;  %v5534_v55 = vmul.f32 0.2, %v3522_v25  ;;  %vm5278_vm10 = vcmp.gt.f32.partialorder %v4546_v42, 0.0  ;;  %v15311_v22 = vpop.f32.mrb[205].mxu1 }
 0x285   : > { %12038 = vst [vmem:[%s13428_s27 + $0x6c8] sm:$0xff] %v11630_v41   ;;  %v6297_v39 = vsel %vm5273_vm0, %v4525_v23, %v5785_v17  ;;  %v5790_v13 = vmul.f32 0.2, %v4546_v42  ;;  %v3514_v29 = vadd.f32 %v14944_v21, %v15100_v45  ;;  %v4538_v30 = vadd.f32 %v14944_v21, %v15104_v33  ;;  %v15313_v45 = vpop.f32.mrb[206].mxu0  ;;  %v15316_v5 = vpop.f32.mrb[206].mxu1 }
 0x286   : > { %11909 = vst [vmem:[%s13428_s27 + $0x2c0] sm:$0xff] %v10985_v3   ;;  %v11625_v26 = vpack.c.bf16 %v6297_v39, %v6296_v63  ;;  %v6046_v4 = vsel %vm5022_vm9, %v3522_v25, %v5534_v55  ;;  %v3525_v10 = vadd.f32 %v14944_v21, %v15106_v31  ;;  %v4549_v47 = vadd.f32 %v14944_v21, %v15108_v43  ;;  %v15318_v36 = vpop.f32.mrb[207].mxu0  ;;  %v15325_v9 = vpop.f32.mrb[207].mxu1 }
 0x287   : > { %v6302_v33 = vsel %vm5278_vm10, %v4546_v42, %v5790_v13  ;;  %vm5020_vm11 = vcmp.gt.f32.partialorder %v3514_v29, 0.0  ;;  %v5532_v23 = vmul.f32 0.2, %v3514_v29  ;;  %vm5276_vm12 = vcmp.gt.f32.partialorder %v4538_v30, 0.0 }
 0x288   : > { %12037 = vst [vmem:[%s13428_s27 + $0x6c0] sm:$0xff] %v11625_v26   ;;  %v5788_v63 = vmul.f32 0.2, %v4538_v30  ;;  %vm5023_vm13 = vcmp.gt.f32.partialorder %v3525_v10, 0.0  ;;  %v5535_v31 = vmul.f32 0.2, %v3525_v10  ;;  %v3517_v41 = vadd.f32 %v14944_v21, %v15110_v19 }
 0x289   : > { %vm5279_vm14 = vcmp.gt.f32.partialorder %v4549_v47, 0.0  ;;  %v6044_v25 = vsel %vm5020_vm11, %v3514_v29, %v5532_v23  ;;  %v5791_v43 = vmul.f32 0.2, %v4549_v47  ;;  %v4541_v42 = vadd.f32 %v14944_v21, %v15116_v7 }
 0x28a   : > { %v6300_v17 = vsel %vm5276_vm12, %v4538_v30, %v5788_v63  ;;  %v6047_v3 = vsel %vm5023_vm13, %v3525_v10, %v5535_v31  ;;  %v3538_v55 = vadd.f32 %v14944_v21, %v15128_v37  ;;  %v4562_v39 = vadd.f32 %v14944_v21, %v15132_v15  ;;  %v15331_v7 = vpop.f32.mrb[208].mxu0 }
 0x28b   : > { %v11000_v13 = vpack.c.bf16 %v6047_v3, %v6046_v4  ;;  %v6303_v29 = vsel %vm5279_vm14, %v4549_v47, %v5791_v43  ;;  %vm5021_vm15 = vcmp.gt.f32.partialorder %v3517_v41, 0.0  ;;  %v5533_v26 = vmul.f32 0.2, %v3517_v41  ;;  %v15334_v63 = vpop.f32.mrb[208].mxu1  ;;  %v15341_v31 = vpop.f32.mrb[209].mxu0 }
 0x28c   : > { %v11640_v19 = vpack.c.bf16 %v6303_v29, %v6302_v33  ;;  %vm5277_vm1 = vcmp.gt.f32.partialorder %v4541_v42, 0.0  ;;  %v5789_v23 = vmul.f32 0.2, %v4541_v42  ;;  %vm5026_vm2 = vcmp.gt.f32.partialorder %v3538_v55, 0.0  ;;  %v15343_v43 = vpop.f32.mrb[209].mxu1 }
 0x28d   : > { %11912 = vst [vmem:[%s13428_s27 + $0x2d8] sm:$0xff] %v11000_v13   ;;  %v6045_v30 = vsel %vm5021_vm15, %v3517_v41, %v5533_v26  ;;  %v5538_v10 = vmul.f32 0.2, %v3538_v55  ;;  %vm5282_vm3 = vcmp.gt.f32.partialorder %v4562_v39, 0.0  ;;  %v5794_v37 = vmul.f32 0.2, %v4562_v39 }
 0x28e   : > { %12040 = vst [vmem:[%s13428_s27 + $0x6d8] sm:$0xff] %v11640_v19   ;;  %v10995_v15 = vpack.c.bf16 %v6045_v30, %v6044_v25  ;;  %v6301_v4 = vsel %vm5277_vm1, %v4541_v42, %v5789_v23  ;;  %v3530_v47 = vadd.f32 %v14944_v21, %v15134_v18  ;;  %v4554_v33 = vadd.f32 %v14944_v21, %v15140_v51  ;;  %v15348_v25 = vpop.f32.mrb[210].mxu0  ;;  %v15350_v42 = vpop.f32.mrb[210].mxu1 }
 0x28f   : > { %v11635_v41 = vpack.c.bf16 %v6301_v4, %v6300_v17  ;;  %v6050_v3 = vsel %vm5026_vm2, %v3538_v55, %v5538_v10  ;;  %v6306_v13 = vsel %vm5282_vm3, %v4562_v39, %v5794_v37  ;;  %v3541_v29 = vadd.f32 %v14944_v21, %v15142_v16  ;;  %v15357_v17 = vld [vmem:[%s15901_s2] ss:$0 sm:$0xff]  ;;  %v15363_v55 = vpop.f32.mrb[211].mxu0  ;;  %v15365_v39 = vpop.f32.mrb[211].mxu1 }
 0x290   : > { %11911 = vst [vmem:[%s13428_s27 + $0x2d0] sm:$0xff] %v10995_v15   ;;  %vm5024_vm4 = vcmp.gt.f32.partialorder %v3530_v47, 0.0  ;;  %v5536_v18 = vmul.f32 0.2, %v3530_v47  ;;  %vm5280_vm5 = vcmp.gt.f32.partialorder %v4554_v33, 0.0  ;;  %v4565_v21 = vadd.f32 %v15357_v17, %v15144_v49  ;;  %15911 = vst [vmem:[#allocation2_spill] sm:$0xff] %v15365_v39 }
 0x291   : > { %v5792_v51 = vmul.f32 0.2, %v4554_v33  ;;  %12039 = vst [vmem:[%s13428_s27 + $0x6d0] sm:$0xff] %v11635_v41   ;;  %vm5027_vm6 = vcmp.gt.f32.partialorder %v3541_v29, 0.0  ;;  %v5539_v26 = vmul.f32 0.2, %v3541_v29  ;;  %v3533_v16 = vadd.f32 %v15357_v17, %v15146_v59 }
 0x292   : > { %v6048_v19 = vsel %vm5024_vm4, %v3530_v47, %v5536_v18  ;;  %v4557_v30 = vadd.f32 %v15357_v17, %v15149_v2  ;;  %v3554_v10 = vadd.f32 %v15357_v17, %v15166_v14  ;;  %vm5283_vm7 = vcmp.gt.f32.partialorder %v4565_v21, 0.0  ;;  %v15371_v41 = vpop.f32.mrb[212].mxu0 }
 0x293   : > { %v6304_v23 = vsel %vm5280_vm5, %v4554_v33, %v5792_v51  ;;  %v6051_v37 = vsel %vm5027_vm6, %v3541_v29, %v5539_v26  ;;  %v5795_v15 = vmul.f32 0.2, %v4565_v21  ;;  %vm5025_vm8 = vcmp.gt.f32.partialorder %v3533_v16, 0.0  ;;  %v15375_v33 = vpop.f32.mrb[212].mxu1  ;;  %v15377_v14 = vpop.f32.mrb[213].mxu0 }
 0x294   : > { %v11010_v49 = vpack.c.bf16 %v6051_v37, %v6050_v3  ;;  %v5537_v4 = vmul.f32 0.2, %v3533_v16  ;;  %vm5281_vm0 = vcmp.gt.f32.partialorder %v4557_v30, 0.0  ;;  %v5793_v59 = vmul.f32 0.2, %v4557_v30  ;;  %15912 = vst [vmem:[#allocation9_spill] sm:$0xff] %v15375_v33 }
 0x295   : > { %v6307_v39 = vsel %vm5283_vm7, %v4565_v21, %v5795_v15  ;;  %vm5030_vm9 = vcmp.gt.f32.partialorder %v3554_v10, 0.0  ;;  %v5542_v47 = vmul.f32 0.2, %v3554_v10  ;;  %v4578_v2 = vadd.f32 %v15357_v17, %v15168_v61  ;;  %15913 = vst [vmem:[#allocation10_spill] sm:$0xff] %v15377_v14  ;;  %v15382_v26 = vpop.f32.mrb[213].mxu1  ;;  %v15384_v21 = vpop.f32.mrb[214].mxu0 }
 0x296   : > { %11914 = vst [vmem:[%s13428_s27 + $0x2e8] sm:$0xff] %v11010_v49   ;;  %v11650_v29 = vpack.c.bf16 %v6307_v39, %v6306_v13  ;;  %v6049_v18 = vsel %vm5025_vm8, %v3533_v16, %v5537_v4  ;;  %v6305_v3 = vsel %vm5281_vm0, %v4557_v30, %v5793_v59  ;;  %v3546_v51 = vadd.f32 %v15357_v17, %v15174_v0  ;;  %v15386_v33 = vpop.f32.mrb[214].mxu1  ;;  %v15388_v14 = vpop.f32.mrb[215].mxu0 }
 0x297   : > { %v11005_v37 = vpack.c.bf16 %v6049_v18, %v6048_v19  ;;  %v11645_v61 = vpack.c.bf16 %v6305_v3, %v6304_v23  ;;  %v6054_v15 = vsel %vm5030_vm9, %v3554_v10, %v5542_v47  ;;  %vm5286_vm10 = vcmp.gt.f32.partialorder %v4578_v2, 0.0  ;;  %v15393_v39 = vpop.f32.mrb[215].mxu1  ;;  %v15914_v23 = vld [vmem:[#allocation3_spill] sm:$0xff]  ;;  %v15915_v10 = vld [vmem:[#allocation4_spill] sm:$0xff] }
 0x298   : > { %12042 = vst [vmem:[%s13428_s27 + $0x6e8] sm:$0xff] %v11650_v29   ;;  %v5798_v13 = vmul.f32 0.2, %v4578_v2  ;;  %vm5028_vm11 = vcmp.gt.f32.partialorder %v3546_v51, 0.0  ;;  %v5540_v16 = vmul.f32 0.2, %v3546_v51  ;;  %v4570_v0 = vadd.f32 %v15357_v17, %v15176_v28 }
 0x299   : > { %11913 = vst [vmem:[%s13428_s27 + $0x2e0] sm:$0xff] %v11005_v37   ;;  %12041 = vst [vmem:[%s13428_s27 + $0x6e0] sm:$0xff] %v11645_v61   ;;  %v3557_v19 = vadd.f32 %v15357_v17, %v15178_v54  ;;  %v4581_v30 = vadd.f32 %v15357_v17, %v15914_v23  ;;  %v3549_v49 = vadd.f32 %v15357_v17, %v15915_v10 }
 0x29a   : > { %v4573_v4 = vadd.f32 %v15357_v17, %v15184_v11  ;;  %v6310_v59 = vsel %vm5286_vm10, %v4578_v2, %v5798_v13  ;;  %v6052_v47 = vsel %vm5028_vm11, %v3546_v51, %v5540_v16  ;;  %vm5284_vm12 = vcmp.gt.f32.partialorder %v4570_v0, 0.0 }
 0x29b   : > { %v5796_v28 = vmul.f32 0.2, %v4570_v0  ;;  %vm5031_vm13 = vcmp.gt.f32.partialorder %v3557_v19, 0.0  ;;  %v5543_v29 = vmul.f32 0.2, %v3557_v19  ;;  %vm5287_vm14 = vcmp.gt.f32.partialorder %v4581_v30, 0.0 }
 0x29c   : > { %v5799_v18 = vmul.f32 0.2, %v4581_v30  ;;  %vm5029_vm15 = vcmp.gt.f32.partialorder %v3549_v49, 0.0  ;;  %v5541_v54 = vmul.f32 0.2, %v3549_v49  ;;  %vm5285_vm1 = vcmp.gt.f32.partialorder %v4573_v4, 0.0 }
 0x29d   : > { %v6308_v3 = vsel %vm5284_vm12, %v4570_v0, %v5796_v28  ;;  %v15405_v37 = vpop.f32.mrb[216].mxu0  ;;  %v6055_v61 = vsel %vm5031_vm13, %v3557_v19, %v5543_v29  ;;  %v5797_v10 = vmul.f32 0.2, %v4573_v4  ;;  %v3570_v11 = vadd.f32 %v15357_v17, %v15200_v46  ;;  %v15409_v2 = vpop.f32.mrb[216].mxu1 }
 0x29e   : > { %15916 = vst [vmem:[#allocation3_spill] sm:$0xff] %v15405_v37  ;;  %v6311_v23 = vsel %vm5287_vm14, %v4581_v30, %v5799_v18  ;;  %15917 = vst [vmem:[#allocation4_spill] sm:$0xff] %v15409_v2  ;;  %v15411_v51 = vpop.f32.mrb[217].mxu0  ;;  %v11020_v13 = vpack.c.bf16 %v6055_v61, %v6054_v15  ;;  %v6053_v0 = vsel %vm5029_vm15, %v3549_v49, %v5541_v54  ;;  %v15415_v37 = vpop.f32.mrb[217].mxu1  ;;  %v15919_v61 = vld [vmem:[#allocation5_spill] sm:$0xff] }
 0x29f   : > { %v11660_v16 = vpack.c.bf16 %v6311_v23, %v6310_v59  ;;  %v4594_v28 = vadd.f32 %v15357_v17, %v15202_v56  ;;  %v15417_v19 = vpop.f32.mrb[218].mxu0  ;;  %v11015_v30 = vpack.c.bf16 %v6053_v0, %v6052_v47  ;;  %v6309_v29 = vsel %vm5285_vm1, %v4573_v4, %v5797_v10  ;;  %v15419_v18 = vpop.f32.mrb[218].mxu1 }
 0x2a0   : > { %vm5034_vm2 = vcmp.gt.f32.partialorder %v3570_v11, 0.0  ;;  %v5546_v46 = vmul.f32 0.2, %v3570_v11  ;;  %v15421_v2 = vpop.f32.mrb[219].mxu0  ;;  %11916 = vst [vmem:[%s13428_s27 + $0x2f8] sm:$0xff] %v11020_v13   ;;  %v11655_v15 = vpack.c.bf16 %v6309_v29, %v6308_v3  ;;  %v3562_v56 = vadd.f32 %v15357_v17, %v15208_v44  ;;  %v15427_v59 = vpop.f32.mrb[219].mxu1 }
 0x2a1   : > { %12044 = vst [vmem:[%s13428_s27 + $0x6f8] sm:$0xff] %v11660_v16   ;;  %vm5290_vm3 = vcmp.gt.f32.partialorder %v4594_v28, 0.0  ;;  %v5802_v49 = vmul.f32 0.2, %v4594_v28  ;;  %15918 = vst [vmem:[#allocation11_spill] sm:$0xff] %v15427_v59  ;;  %v4586_v4 = vadd.f32 %v15357_v17, %v15210_v34  ;;  %v3573_v54 = vadd.f32 %v15357_v17, %v15212_v20  ;;  %v15920_v13 = vld [vmem:[#allocation6_spill] sm:$0xff] }
 0x2a2   : > { %11915 = vst [vmem:[%s13428_s27 + $0x2f0] sm:$0xff] %v11015_v30   ;;  %v6058_v47 = vsel %vm5034_vm2, %v3570_v11, %v5546_v46  ;;  %v4597_v23 = vadd.f32 %v15357_v17, %v15919_v61  ;;  %12043 = vst [vmem:[%s13428_s27 + $0x6f0] sm:$0xff] %v11655_v15   ;;  %vm5032_vm4 = vcmp.gt.f32.partialorder %v3562_v56, 0.0  ;;  %v5544_v10 = vmul.f32 0.2, %v3562_v56  ;;  %v15921_v15 = vld [vmem:[#allocation7_spill] sm:$0xff] }
 0x2a3   : > { %v6314_v3 = vsel %vm5290_vm3, %v4594_v28, %v5802_v49  ;;  %v3565_v44 = vadd.f32 %v15357_v17, %v15920_v13  ;;  %vm5288_vm5 = vcmp.gt.f32.partialorder %v4586_v4, 0.0  ;;  %v5800_v16 = vmul.f32 0.2, %v4586_v4  ;;  %v15439_v30 = vpop.f32.mrb[220].mxu0 }
 0x2a4   : > { %vm5035_vm6 = vcmp.gt.f32.partialorder %v3573_v54, 0.0  ;;  %v5547_v11 = vmul.f32 0.2, %v3573_v54  ;;  %v6056_v0 = vsel %vm5032_vm4, %v3562_v56, %v5544_v10  ;;  %vm5291_vm7 = vcmp.gt.f32.partialorder %v4597_v23, 0.0  ;;  %v15443_v49 = vpop.f32.mrb[220].mxu1  ;;  %v15445_v61 = vpop.f32.mrb[221].mxu0 }
 0x2a5   : > { %v5803_v34 = vmul.f32 0.2, %v4597_v23  ;;  %vm5033_vm8 = vcmp.gt.f32.partialorder %v3565_v44, 0.0  ;;  %v6312_v20 = vsel %vm5288_vm5, %v4586_v4, %v5800_v16  ;;  %v5545_v46 = vmul.f32 0.2, %v3565_v44  ;;  %15922 = vst [vmem:[#allocation5_spill] sm:$0xff] %v15443_v49 }
 0x2a6   : > { %v6059_v29 = vsel %vm5035_vm6, %v3573_v54, %v5547_v11  ;;  %v4589_v28 = vadd.f32 %v15357_v17, %v15921_v15  ;;  %v3586_v56 = vadd.f32 %v15357_v17, %v15228_v57  ;;  %v4610_v10 = vadd.f32 %v15357_v17, %v15240_v24  ;;  %v15451_v4 = vpop.f32.mrb[221].mxu1  ;;  %v15453_v54 = vpop.f32.mrb[222].mxu0 }
 0x2a7   : > { %v11030_v13 = vpack.c.bf16 %v6059_v29, %v6058_v47  ;;  %v6315_v59 = vsel %vm5291_vm7, %v4597_v23, %v5803_v34  ;;  %v6057_v11 = vsel %vm5033_vm8, %v3565_v44, %v5545_v46  ;;  %v15455_v49 = vpop.f32.mrb[222].mxu1  ;;  %v15457_v47 = vpop.f32.mrb[223].mxu0 }
 0x2a8   : > { %v11670_v16 = vpack.c.bf16 %v6315_v59, %v6314_v3  ;;  %vm5289_vm0 = vcmp.gt.f32.partialorder %v4589_v28, 0.0  ;;  %v5801_v15 = vmul.f32 0.2, %v4589_v28  ;;  %v11025_v23 = vpack.c.bf16 %v6057_v11, %v6056_v0  ;;  %v15460_v24 = vpop.f32.mrb[223].mxu1 }
 0x2a9   : > { %11918 = vst [vmem:[%s13428_s27 + $0x308] sm:$0xff] %v11030_v13   ;;  %vm5038_vm9 = vcmp.gt.f32.partialorder %v3586_v56, 0.0  ;;  %v5550_v57 = vmul.f32 0.2, %v3586_v56  ;;  %vm5294_vm10 = vcmp.gt.f32.partialorder %v4610_v10, 0.0  ;;  %v3578_v59 = vadd.f32 %v15357_v17, %v15242_v6 }
 0x2aa   : > { %12046 = vst [vmem:[%s13428_s27 + $0x708] sm:$0xff] %v11670_v16   ;;  %v6313_v34 = vsel %vm5289_vm0, %v4589_v28, %v5801_v15  ;;  %v5806_v29 = vmul.f32 0.2, %v4610_v10  ;;  %v4602_v3 = vadd.f32 %v15357_v17, %v15244_v1  ;;  %11917 = vst [vmem:[%s13428_s27 + $0x300] sm:$0xff] %v11025_v23   ;;  %v3589_v0 = vadd.f32 %v15357_v17, %v15246_v12  ;;  %v15923_v23 = vld [vmem:[#allocation8_spill] sm:$0xff] }
 0x2ab   : > { %v11665_v44 = vpack.c.bf16 %v6313_v34, %v6312_v20  ;;  %v6062_v46 = vsel %vm5038_vm9, %v3586_v56, %v5550_v57  ;;  %v4613_v13 = vadd.f32 %v15357_v17, %v15248_v27  ;;  %vm5036_vm11 = vcmp.gt.f32.partialorder %v3578_v59, 0.0  ;;  %v15477_v56 = vpop.f32.mrb[224].mxu0 }
 0x2ac   : > { %v6318_v11 = vsel %vm5294_vm10, %v4610_v10, %v5806_v29  ;;  %v5548_v16 = vmul.f32 0.2, %v3578_v59  ;;  %vm5292_vm12 = vcmp.gt.f32.partialorder %v4602_v3, 0.0  ;;  %v5804_v28 = vmul.f32 0.2, %v4602_v3  ;;  %15924 = vst [vmem:[#allocation6_spill] sm:$0xff] %v15477_v56 }
 0x2ad   : > { %12045 = vst [vmem:[%s13428_s27 + $0x700] sm:$0xff] %v11665_v44   ;;  %vm5039_vm13 = vcmp.gt.f32.partialorder %v3589_v0, 0.0  ;;  %v5551_v6 = vmul.f32 0.2, %v3589_v0  ;;  %vm5295_vm14 = vcmp.gt.f32.partialorder %v4613_v13, 0.0  ;;  %v3581_v20 = vadd.f32 %v15357_v17, %v15923_v23  ;;  %v15479_v27 = vpop.f32.mrb[224].mxu1 }
 0x2ae   : > { %v6060_v15 = vsel %vm5036_vm11, %v3578_v59, %v5548_v16  ;;  %v5807_v1 = vmul.f32 0.2, %v4613_v13  ;;  %v4605_v12 = vadd.f32 %v15357_v17, %v15254_v52  ;;  %v6316_v10 = vsel %vm5292_vm12, %v4602_v3, %v5804_v28  ;;  %v15485_v59 = vpop.f32.mrb[225].mxu0  ;;  %v15487_v44 = vpop.f32.mrb[225].mxu1 }
 0x2af   : > { %v6063_v57 = vsel %vm5039_vm13, %v3589_v0, %v5551_v6  ;;  %v3602_v34 = vadd.f32 %v15357_v17, %v15262_v50  ;;  %v4626_v29 = vadd.f32 %v15357_v17, %v15271_v60  ;;  %vm5037_vm15 = vcmp.gt.f32.partialorder %v3581_v20, 0.0  ;;  %v15489_v56 = vpop.f32.mrb[226].mxu0  ;;  %v15491_v3 = vpop.f32.mrb[226].mxu1 }
 0x2b0   : > { %v11040_v16 = vpack.c.bf16 %v6063_v57, %v6062_v46  ;;  %v6319_v23 = vsel %vm5295_vm14, %v4613_v13, %v5807_v1  ;;  %v5549_v52 = vmul.f32 0.2, %v3581_v20  ;;  %15925 = vst [vmem:[#allocation7_spill] sm:$0xff] %v15489_v56  ;;  %15926 = vst [vmem:[#allocation8_spill] sm:$0xff] %v15491_v3  ;;  %vm5293_vm1 = vcmp.gt.f32.partialorder %v4605_v12, 0.0  ;;  %v15493_v28 = vpop.f32.mrb[227].mxu0 }
 0x2b1   : > { %v11680_v0 = vpack.c.bf16 %v6319_v23, %v6318_v11  ;;  %v5805_v50 = vmul.f32 0.2, %v4605_v12  ;;  %vm5042_vm2 = vcmp.gt.f32.partialorder %v3602_v34, 0.0  ;;  %15927 = vst [vmem:[#allocation12_spill] sm:$0xff] %v15493_v28  ;;  %v15495_v60 = vpop.f32.mrb[227].mxu1  ;;  %vm5298_vm3 = vcmp.gt.f32.partialorder %v4626_v29, 0.0 }
 0x2b2   : > { %11920 = vst [vmem:[%s13428_s27 + $0x318] sm:$0xff] %v11040_v16   ;;  %v6061_v6 = vsel %vm5037_vm15, %v3581_v20, %v5549_v52  ;;  %v5554_v46 = vmul.f32 0.2, %v3602_v34  ;;  %v5810_v13 = vmul.f32 0.2, %v4626_v29  ;;  %v3594_v11 = vadd.f32 %v15357_v17, %v15273_v53 }
 0x2b3   : > { %12048 = vst [vmem:[%s13428_s27 + $0x718] sm:$0xff] %v11680_v0   ;;  %v11035_v1 = vpack.c.bf16 %v6061_v6, %v6060_v15  ;;  %v6317_v57 = vsel %vm5293_vm1, %v4605_v12, %v5805_v50  ;;  %v4618_v23 = vadd.f32 %v15357_v17, %v15278_v32  ;;  %v3605_v16 = vadd.f32 %v15357_v17, %v15280_v40  ;;  %v15511_v12 = vpop.f32.mrb[228].mxu0 }
 0x2b4   : > { %v11675_v3 = vpack.c.bf16 %v6317_v57, %v6316_v10  ;;  %v6066_v28 = vsel %vm5042_vm2, %v3602_v34, %v5554_v46  ;;  %v6322_v56 = vsel %vm5298_vm3, %v4626_v29, %v5810_v13  ;;  %vm5040_vm4 = vcmp.gt.f32.partialorder %v3594_v11, 0.0  ;;  %v15513_v10 = vpop.f32.mrb[228].mxu1  ;;  %v15519_v0 = vpop.f32.mrb[229].mxu0 }
 0x2b5   : > { %11919 = vst [vmem:[%s13428_s27 + $0x310] sm:$0xff] %v11035_v1   ;;  %v5552_v20 = vmul.f32 0.2, %v3594_v11  ;;  %vm5296_vm5 = vcmp.gt.f32.partialorder %v4618_v23, 0.0  ;;  %v5808_v52 = vmul.f32 0.2, %v4618_v23  ;;  %v4629_v53 = vadd.f32 %v15357_v17, %v15282_v58 }
 0x2b6   : > { %12047 = vst [vmem:[%s13428_s27 + $0x710] sm:$0xff] %v11675_v3   ;;  %vm5043_vm6 = vcmp.gt.f32.partialorder %v3605_v16, 0.0  ;;  %v5555_v15 = vmul.f32 0.2, %v3605_v16  ;;  %v3597_v32 = vadd.f32 %v15357_v17, %v15284_v8  ;;  %v4621_v29 = vadd.f32 %v15357_v17, %v15288_v48  ;;  %v15521_v50 = vpop.f32.mrb[229].mxu1  ;;  %v15523_v6 = vpop.f32.mrb[230].mxu0 }
 0x2b7   : > { %v6064_v34 = vsel %vm5040_vm4, %v3594_v11, %v5552_v20  ;;  %v6320_v40 = vsel %vm5296_vm5, %v4618_v23, %v5808_v52  ;;  %v3618_v3 = vadd.f32 %v15357_v17, %v15295_v62  ;;  %vm5299_vm7 = vcmp.gt.f32.partialorder %v4629_v53, 0.0  ;;  %v15525_v46 = vpop.f32.mrb[230].mxu1  ;;  %v15527_v57 = vpop.f32.mrb[231].mxu0 }
 0x2b8   : > { %v6067_v58 = vsel %vm5043_vm6, %v3605_v16, %v5555_v15  ;;  %v5811_v8 = vmul.f32 0.2, %v4629_v53  ;;  %vm5041_vm8 = vcmp.gt.f32.partialorder %v3597_v32, 0.0  ;;  %15928 = vst [vmem:[#allocation13_spill] sm:$0xff] %v15525_v46  ;;  %v5553_v1 = vmul.f32 0.2, %v3597_v32 }
 0x2b9   : > { %v11050_v13 = vpack.c.bf16 %v6067_v58, %v6066_v28  ;;  %vm5297_vm0 = vcmp.gt.f32.partialorder %v4621_v29, 0.0  ;;  %v5809_v48 = vmul.f32 0.2, %v4621_v29  ;;  %15929 = vst [vmem:[#allocation14_spill] sm:$0xff] %v15527_v57  ;;  %vm5046_vm9 = vcmp.gt.f32.partialorder %v3618_v3, 0.0  ;;  %v15531_v16 = vpop.f32.mrb[231].mxu1 }
 0x2ba   : > { %v6323_v62 = vsel %vm5299_vm7, %v4629_v53, %v5811_v8  ;;  %v5558_v11 = vmul.f32 0.2, %v3618_v3  ;;  %v4642_v23 = vadd.f32 %v15357_v17, %v15302_v38  ;;  %15930 = vst [vmem:[#allocation15_spill] sm:$0xff] %v15531_v16  ;;  %v6065_v52 = vsel %vm5041_vm8, %v3597_v32, %v5553_v1 }
 0x2bb   : > { %11922 = vst [vmem:[%s13428_s27 + $0x328] sm:$0xff] %v11050_v13   ;;  %v11690_v20 = vpack.c.bf16 %v6323_v62, %v6322_v56  ;;  %v6321_v28 = vsel %vm5297_vm0, %v4621_v29, %v5809_v48  ;;  %v3610_v15 = vadd.f32 %v15357_v17, %v15304_v35  ;;  %v11045_v58 = vpack.c.bf16 %v6065_v52, %v6064_v34  ;;  %v15539_v16 = vpop.f32.mrb[232].mxu0 }
 0x2bc   : > { %v11685_v46 = vpack.c.bf16 %v6321_v28, %v6320_v40  ;;  %v6070_v57 = vsel %vm5046_vm9, %v3618_v3, %v5558_v11  ;;  %vm5302_vm10 = vcmp.gt.f32.partialorder %v4642_v23, 0.0  ;;  %v5814_v53 = vmul.f32 0.2, %v4642_v23  ;;  %v15551_v40 = vpop.f32.mrb[232].mxu1  ;;  %v15553_v29 = vpop.f32.mrb[233].mxu0 }
 0x2bd   : > { %12050 = vst [vmem:[%s13428_s27 + $0x728] sm:$0xff] %v11690_v20   ;;  %vm5044_vm11 = vcmp.gt.f32.partialorder %v3610_v15, 0.0  ;;  %v5556_v8 = vmul.f32 0.2, %v3610_v15  ;;  %v4634_v38 = vadd.f32 %v15357_v17, %v15311_v22  ;;  %11921 = vst [vmem:[%s13428_s27 + $0x320] sm:$0xff] %v11045_v58   ;;  %v3621_v56 = vadd.f32 %v15357_v17, %v15313_v45  ;;  %v15555_v13 = vpop.f32.mrb[233].mxu1 }
 0x2be   : > { %12049 = vst [vmem:[%s13428_s27 + $0x720] sm:$0xff] %v11685_v46   ;;  %v4645_v35 = vadd.f32 %v15357_v17, %v15316_v5  ;;  %v3613_v32 = vadd.f32 %v15357_v17, %v15318_v36  ;;  %v4637_v34 = vadd.f32 %v15357_v17, %v15325_v9  ;;  %v6326_v22 = vsel %vm5302_vm10, %v4642_v23, %v5814_v53  ;;  %v15557_v45 = vpop.f32.mrb[234].mxu0  ;;  %v15559_v9 = vpop.f32.mrb[234].mxu1 }
 0x2bf   : > { %v6068_v3 = vsel %vm5044_vm11, %v3610_v15, %v5556_v8  ;;  %vm5300_vm12 = vcmp.gt.f32.partialorder %v4634_v38, 0.0  ;;  %v5812_v46 = vmul.f32 0.2, %v4634_v38  ;;  %vm5047_vm13 = vcmp.gt.f32.partialorder %v3621_v56, 0.0  ;;  %v15561_v62 = vpop.f32.mrb[235].mxu0  ;;  %v15565_v28 = vpop.f32.mrb[235].mxu1 }
 0x2c0   : > { %v5559_v5 = vmul.f32 0.2, %v3621_v56  ;;  %vm5303_vm14 = vcmp.gt.f32.partialorder %v4645_v35, 0.0  ;;  %v5815_v1 = vmul.f32 0.2, %v4645_v35  ;;  %vm5045_vm15 = vcmp.gt.f32.partialorder %v3613_v32, 0.0 }
 0x2c1   : > { %v6324_v36 = vsel %vm5300_vm12, %v4634_v38, %v5812_v46  ;;  %v5557_v48 = vmul.f32 0.2, %v3613_v32  ;;  %vm5301_vm1 = vcmp.gt.f32.partialorder %v4637_v34, 0.0  ;;  %15931 = vst [vmem:[#allocation16_spill] sm:$0xff] %v15561_v62  ;;  %v5813_v20 = vmul.f32 0.2, %v4637_v34 }
 0x2c2   : > { %v6071_v11 = vsel %vm5047_vm13, %v3621_v56, %v5559_v5  ;;  %v6327_v23 = vsel %vm5303_vm14, %v4645_v35, %v5815_v1  ;;  %v3634_v52 = vadd.f32 %v15357_v17, %v15331_v7  ;;  %v4658_v8 = vadd.f32 %v15357_v17, %v15334_v63 }
 0x2c3   : > { %v11060_v15 = vpack.c.bf16 %v6071_v11, %v6070_v57  ;;  %v11700_v58 = vpack.c.bf16 %v6327_v23, %v6326_v22  ;;  %v6069_v53 = vsel %vm5045_vm15, %v3613_v32, %v5557_v48  ;;  %v6325_v46 = vsel %vm5301_vm1, %v4637_v34, %v5813_v20  ;;  %v15573_v5 = vpop.f32.mrb[236].mxu0 }
 0x2c4   : > { %v11055_v38 = vpack.c.bf16 %v6069_v53, %v6068_v3  ;;  %vm5050_vm2 = vcmp.gt.f32.partialorder %v3634_v52, 0.0  ;;  %v5562_v62 = vmul.f32 0.2, %v3634_v52  ;;  %v11695_v56 = vpack.c.bf16 %v6325_v46, %v6324_v36  ;;  %v15582_v22 = vpop.f32.mrb[236].mxu1  ;;  %v15584_v3 = vpop.f32.mrb[237].mxu0 }
 0x2c5   : > { %11924 = vst [vmem:[%s13428_s27 + $0x338] sm:$0xff] %v11060_v15   ;;  %12052 = vst [vmem:[%s13428_s27 + $0x738] sm:$0xff] %v11700_v58   ;;  %vm5306_vm3 = vcmp.gt.f32.partialorder %v4658_v8, 0.0  ;;  %v5818_v35 = vmul.f32 0.2, %v4658_v8  ;;  %v3626_v7 = vadd.f32 %v15357_v17, %v15341_v31  ;;  %v4650_v63 = vadd.f32 %v15357_v17, %v15343_v43  ;;  %v15589_v48 = vpop.f32.mrb[237].mxu1 }
 0x2c6   : > { %11923 = vst [vmem:[%s13428_s27 + $0x330] sm:$0xff] %v11055_v38   ;;  %v6074_v57 = vsel %vm5050_vm2, %v3634_v52, %v5562_v62  ;;  %v3637_v32 = vadd.f32 %v15357_v17, %v15348_v25  ;;  %v4661_v34 = vadd.f32 %v15357_v17, %v15350_v42  ;;  %12051 = vst [vmem:[%s13428_s27 + $0x730] sm:$0xff] %v11695_v56   ;;  %v15591_v43 = vpop.f32.mrb[238].mxu0  ;;  %v15593_v23 = vpop.f32.mrb[238].mxu1  ;;  %v15933_v58 = vld [vmem:[#allocation2_spill] sm:$0xff] }
 0x2c7   : > { %v6330_v1 = vsel %vm5306_vm3, %v4658_v8, %v5818_v35  ;;  %vm5048_vm4 = vcmp.gt.f32.partialorder %v3626_v7, 0.0  ;;  %v5560_v31 = vmul.f32 0.2, %v3626_v7  ;;  %v3629_v36 = vadd.f32 %v15357_v17, %v15363_v55  ;;  %15932 = vst [vmem:[#allocation17_spill] sm:$0xff] %v15593_v23  ;;  %v15595_v20 = vpop.f32.mrb[239].mxu0  ;;  %v15599_v8 = vpop.f32.mrb[239].mxu1 }
 0x2c8   : > { %vm5304_vm5 = vcmp.gt.f32.partialorder %v4650_v63, 0.0  ;;  %v5816_v25 = vmul.f32 0.2, %v4650_v63  ;;  %vm5051_vm6 = vcmp.gt.f32.partialorder %v3637_v32, 0.0  ;;  %v5563_v62 = vmul.f32 0.2, %v3637_v32 }
 0x2c9   : > { %v6072_v42 = vsel %vm5048_vm4, %v3626_v7, %v5560_v31  ;;  %vm5307_vm7 = vcmp.gt.f32.partialorder %v4661_v34, 0.0  ;;  %v5819_v11 = vmul.f32 0.2, %v4661_v34  ;;  %vm5049_vm8 = vcmp.gt.f32.partialorder %v3629_v36, 0.0  ;;  %v15934_v35 = vld [vmem:[#allocation9_spill] sm:$0xff] }
 0x2ca   : > { %v6328_v52 = vsel %vm5304_vm5, %v4650_v63, %v5816_v25  ;;  %v6075_v15 = vsel %vm5051_vm6, %v3637_v32, %v5563_v62  ;;  %v5561_v55 = vmul.f32 0.2, %v3629_v36  ;;  %v4653_v53 = vadd.f32 %v15357_v17, %v15933_v58 }
 0x2cb   : > { %v11070_v38 = vpack.c.bf16 %v6075_v15, %v6074_v57  ;;  %v6331_v46 = vsel %vm5307_vm7, %v4661_v34, %v5819_v11  ;;  %v3650_v56 = vadd.f32 %v15357_v17, %v15371_v41  ;;  %v4674_v7 = vadd.f32 %v15357_v17, %v15934_v35  ;;  %v15606_v62 = vpop.f32.mrb[240].mxu0  ;;  %v15935_v11 = vld [vmem:[#allocation10_spill] sm:$0xff] }
 0x2cc   : > { %v11710_v31 = vpack.c.bf16 %v6331_v46, %v6330_v1  ;;  %v6073_v23 = vsel %vm5049_vm8, %v3629_v36, %v5561_v55  ;;  %vm5305_vm0 = vcmp.gt.f32.partialorder %v4653_v53, 0.0  ;;  %v5817_v63 = vmul.f32 0.2, %v4653_v53  ;;  %v15613_v36 = vpop.f32.mrb[240].mxu1  ;;  %v15615_v15 = vpop.f32.mrb[241].mxu0 }
 0x2cd   : > { %11926 = vst [vmem:[%s13428_s27 + $0x348] sm:$0xff] %v11070_v38   ;;  %v11065_v32 = vpack.c.bf16 %v6073_v23, %v6072_v42  ;;  %vm5054_vm9 = vcmp.gt.f32.partialorder %v3650_v56, 0.0  ;;  %v5566_v25 = vmul.f32 0.2, %v3650_v56  ;;  %vm5310_vm10 = vcmp.gt.f32.partialorder %v4674_v7, 0.0  ;;  %v15624_v38 = vpop.f32.mrb[242].mxu0 }
 0x2ce   : > { %12054 = vst [vmem:[%s13428_s27 + $0x748] sm:$0xff] %v11710_v31   ;;  %v6329_v57 = vsel %vm5305_vm0, %v4653_v53, %v5817_v63  ;;  %v5822_v34 = vmul.f32 0.2, %v4674_v7  ;;  %v3642_v41 = vadd.f32 %v15357_v17, %v15935_v11  ;;  %v4666_v1 = vadd.f32 %v15357_v17, %v15382_v26  ;;  %v15622_v53 = vpop.f32.mrb[241].mxu1  ;;  %15936 = vst [vmem:[#allocation2_spill] sm:$0xff] %v15624_v38  ;;  %v15629_v31 = vpop.f32.mrb[243].mxu0 }
 0x2cf   : > { %11925 = vst [vmem:[%s13428_s27 + $0x340] sm:$0xff] %v11065_v32   ;;  %v11705_v42 = vpack.c.bf16 %v6329_v57, %v6328_v52  ;;  %v6078_v23 = vsel %vm5054_vm9, %v3650_v56, %v5566_v25  ;;  %v3653_v55 = vadd.f32 %v15357_v17, %v15384_v21  ;;  %v4677_v58 = vadd.f32 %v15357_v17, %v15386_v33  ;;  %v15627_v35 = vpop.f32.mrb[242].mxu1 }
 0x2d0   : > { %v6334_v26 = vsel %vm5310_vm10, %v4674_v7, %v5822_v34  ;;  %vm5052_vm11 = vcmp.gt.f32.partialorder %v3642_v41, 0.0  ;;  %v5564_v46 = vmul.f32 0.2, %v3642_v41  ;;  %vm5308_vm12 = vcmp.gt.f32.partialorder %v4666_v1, 0.0  ;;  %15937 = vst [vmem:[#allocation9_spill] sm:$0xff] %v15627_v35  ;;  %15938 = vst [vmem:[#allocation10_spill] sm:$0xff] %v15629_v31 }
 0x2d1   : > { %12053 = vst [vmem:[%s13428_s27 + $0x740] sm:$0xff] %v11705_v42   ;;  %v5820_v52 = vmul.f32 0.2, %v4666_v1  ;;  %vm5055_vm13 = vcmp.gt.f32.partialorder %v3653_v55, 0.0  ;;  %v5567_v21 = vmul.f32 0.2, %v3653_v55  ;;  %v3645_v63 = vadd.f32 %v15357_v17, %v15388_v14 }
 0x2d2   : > { %vm5311_vm14 = vcmp.gt.f32.partialorder %v4677_v58, 0.0  ;;  %v6076_v56 = vsel %vm5052_vm11, %v3642_v41, %v5564_v46  ;;  %v5823_v33 = vmul.f32 0.2, %v4677_v58  ;;  %v4669_v7 = vadd.f32 %v15357_v17, %v15393_v39  ;;  %v15636_v32 = vpop.f32.mrb[243].mxu1  ;;  %v15939_v34 = vld [vmem:[#allocation3_spill] sm:$0xff]  ;;  %v15940_v42 = vld [vmem:[#allocation4_spill] sm:$0xff] }
 0x2d3   : > { %v6332_v25 = vsel %vm5308_vm12, %v4666_v1, %v5820_v52  ;;  %v6079_v57 = vsel %vm5055_vm13, %v3653_v55, %v5567_v21  ;;  %v3666_v11 = vadd.f32 %v15357_v17, %v15939_v34  ;;  %v4690_v31 = vadd.f32 %v15357_v17, %v15940_v42  ;;  %v15642_v39 = vpop.f32.mrb[244].mxu0 }
 0x2d4   : > { %v11080_v41 = vpack.c.bf16 %v6079_v57, %v6078_v23  ;;  %v6335_v46 = vsel %vm5311_vm14, %v4677_v58, %v5823_v33  ;;  %vm5053_vm15 = vcmp.gt.f32.partialorder %v3645_v63, 0.0  ;;  %v5565_v35 = vmul.f32 0.2, %v3645_v63  ;;  %v15645_v21 = vpop.f32.mrb[244].mxu1  ;;  %v15652_v33 = vpop.f32.mrb[245].mxu0 }
 0x2d5   : > { %v11720_v14 = vpack.c.bf16 %v6335_v46, %v6334_v26  ;;  %vm5309_vm1 = vcmp.gt.f32.partialorder %v4669_v7, 0.0  ;;  %v5821_v38 = vmul.f32 0.2, %v4669_v7  ;;  %vm5058_vm2 = vcmp.gt.f32.partialorder %v3666_v11, 0.0  ;;  %v15654_v57 = vpop.f32.mrb[245].mxu1 }
 0x2d6   : > { %11928 = vst [vmem:[%s13428_s27 + $0x358] sm:$0xff] %v11080_v41   ;;  %v6077_v1 = vsel %vm5053_vm15, %v3645_v63, %v5565_v35  ;;  %v5570_v55 = vmul.f32 0.2, %v3666_v11  ;;  %vm5314_vm3 = vcmp.gt.f32.partialorder %v4690_v31, 0.0  ;;  %v5826_v52 = vmul.f32 0.2, %v4690_v31 }
 0x2d7   : > { %12056 = vst [vmem:[%s13428_s27 + $0x758] sm:$0xff] %v11720_v14   ;;  %v11075_v34 = vpack.c.bf16 %v6077_v1, %v6076_v56  ;;  %v6333_v23 = vsel %vm5309_vm1, %v4669_v7, %v5821_v38  ;;  %v3658_v58 = vadd.f32 %v15357_v17, %v15411_v51  ;;  %v4682_v26 = vadd.f32 %v15357_v17, %v15415_v37  ;;  %v15659_v56 = vpop.f32.mrb[246].mxu0  ;;  %v15661_v38 = vpop.f32.mrb[246].mxu1  ;;  %v15943_v1 = vld [vmem:[#allocation11_spill] sm:$0xff] }
 0x2d8   : > { %v11715_v35 = vpack.c.bf16 %v6333_v23, %v6332_v25  ;;  %v6082_v63 = vsel %vm5058_vm2, %v3666_v11, %v5570_v55  ;;  %v6338_v42 = vsel %vm5314_vm3, %v4690_v31, %v5826_v52  ;;  %v3669_v41 = vadd.f32 %v15357_v17, %v15417_v19  ;;  %v15669_v11 = vpop.f32.mrb[247].mxu0  ;;  %v15671_v19 = vpop.f32.mrb[247].mxu1 }
 0x2d9   : > { %11927 = vst [vmem:[%s13428_s27 + $0x350] sm:$0xff] %v11075_v34   ;;  %vm5056_vm4 = vcmp.gt.f32.partialorder %v3658_v58, 0.0  ;;  %v5568_v51 = vmul.f32 0.2, %v3658_v58  ;;  %vm5312_vm5 = vcmp.gt.f32.partialorder %v4682_v26, 0.0  ;;  %v4693_v25 = vadd.f32 %v15357_v17, %v15419_v18  ;;  %15941 = vst [vmem:[#allocation3_spill] sm:$0xff] %v15669_v11 }
 0x2da   : > { %v5824_v37 = vmul.f32 0.2, %v4682_v26  ;;  %12055 = vst [vmem:[%s13428_s27 + $0x750] sm:$0xff] %v11715_v35   ;;  %vm5059_vm6 = vcmp.gt.f32.partialorder %v3669_v41, 0.0  ;;  %v5571_v7 = vmul.f32 0.2, %v3669_v41  ;;  %v3661_v31 = vadd.f32 %v15357_v17, %v15421_v2 }
 0x2db   : > { %15942 = vst [vmem:[#allocation4_spill] sm:$0xff] %v15671_v19  ;;  %v6080_v46 = vsel %vm5056_vm4, %v3658_v58, %v5568_v51  ;;  %v4685_v55 = vadd.f32 %v15357_v17, %v15943_v1  ;;  %v3682_v52 = vadd.f32 %v15357_v17, %v15439_v30  ;;  %vm5315_vm7 = vcmp.gt.f32.partialorder %v4693_v25, 0.0  ;;  %v15677_v11 = vpop.f32.mrb[248].mxu0 }
 0x2dc   : > { %v6336_v14 = vsel %vm5312_vm5, %v4682_v26, %v5824_v37  ;;  %v6083_v34 = vsel %vm5059_vm6, %v3669_v41, %v5571_v7  ;;  %v5827_v23 = vmul.f32 0.2, %v4693_v25  ;;  %vm5057_vm8 = vcmp.gt.f32.partialorder %v3661_v31, 0.0  ;;  %15944 = vst [vmem:[#allocation11_spill] sm:$0xff] %v15677_v11  ;;  %v15945_v26 = vld [vmem:[#allocation5_spill] sm:$0xff]  ;;  %v15681_v37 = vpop.f32.mrb[248].mxu1 }
 0x2dd   : > { %v11090_v18 = vpack.c.bf16 %v6083_v34, %v6082_v63  ;;  %v5569_v35 = vmul.f32 0.2, %v3661_v31  ;;  %vm5313_vm0 = vcmp.gt.f32.partialorder %v4685_v55, 0.0  ;;  %v5825_v2 = vmul.f32 0.2, %v4685_v55  ;;  %15946 = vst [vmem:[#allocation5_spill] sm:$0xff] %v15681_v37 }
 0x2de   : > { %v6339_v19 = vsel %vm5315_vm7, %v4693_v25, %v5827_v23  ;;  %vm5062_vm9 = vcmp.gt.f32.partialorder %v3682_v52, 0.0  ;;  %v5574_v58 = vmul.f32 0.2, %v3682_v52  ;;  %v4706_v51 = vadd.f32 %v15357_v17, %v15945_v26  ;;  %v15683_v30 = vpop.f32.mrb[249].mxu0  ;;  %v15688_v25 = vpop.f32.mrb[249].mxu1 }
 0x2df   : > { %15947 = vst [vmem:[#allocation18_spill] sm:$0xff] %v15683_v30  ;;  %11930 = vst [vmem:[%s13428_s27 + $0x368] sm:$0xff] %v11090_v18   ;;  %v11730_v41 = vpack.c.bf16 %v6339_v19, %v6338_v42  ;;  %v6081_v7 = vsel %vm5057_vm8, %v3661_v31, %v5569_v35  ;;  %v6337_v63 = vsel %vm5313_vm0, %v4685_v55, %v5825_v2  ;;  %v15690_v34 = vpop.f32.mrb[250].mxu0  ;;  %v15692_v37 = vpop.f32.mrb[250].mxu1 }
 0x2e0   : > { %v3674_v1 = vadd.f32 %v15357_v17, %v15445_v61  ;;  %v11085_v23 = vpack.c.bf16 %v6081_v7, %v6080_v46  ;;  %v11725_v26 = vpack.c.bf16 %v6337_v63, %v6336_v14  ;;  %v6086_v11 = vsel %vm5062_vm9, %v3682_v52, %v5574_v58  ;;  %v15694_v30 = vpop.f32.mrb[251].mxu0  ;;  %v15699_v19 = vpop.f32.mrb[251].mxu1 }
 0x2e1   : > { %vm5318_vm10 = vcmp.gt.f32.partialorder %v4706_v51, 0.0  ;;  %12058 = vst [vmem:[%s13428_s27 + $0x768] sm:$0xff] %v11730_v41   ;;  %v5830_v42 = vmul.f32 0.2, %v4706_v51  ;;  %v4698_v61 = vadd.f32 %v15357_v17, %v15451_v4  ;;  %v3685_v46 = vadd.f32 %v15357_v17, %v15453_v54 }
 0x2e2   : > { %vm5060_vm11 = vcmp.gt.f32.partialorder %v3674_v1, 0.0  ;;  %v5572_v31 = vmul.f32 0.2, %v3674_v1  ;;  %11929 = vst [vmem:[%s13428_s27 + $0x360] sm:$0xff] %v11085_v23   ;;  %12057 = vst [vmem:[%s13428_s27 + $0x760] sm:$0xff] %v11725_v26   ;;  %v4709_v14 = vadd.f32 %v15357_v17, %v15455_v49  ;;  %v3677_v55 = vadd.f32 %v15357_v17, %v15457_v47  ;;  %v15948_v23 = vld [vmem:[#allocation6_spill] sm:$0xff] }
 0x2e3   : > { %v4701_v52 = vadd.f32 %v15357_v17, %v15460_v24  ;;  %v6342_v18 = vsel %vm5318_vm10, %v4706_v51, %v5830_v42  ;;  %vm5316_vm12 = vcmp.gt.f32.partialorder %v4698_v61, 0.0  ;;  %v5828_v4 = vmul.f32 0.2, %v4698_v61  ;;  %v15711_v7 = vpop.f32.mrb[252].mxu0 }
 0x2e4   : > { %v6084_v35 = vsel %vm5060_vm11, %v3674_v1, %v5572_v31  ;;  %vm5063_vm13 = vcmp.gt.f32.partialorder %v3685_v46, 0.0  ;;  %v5575_v2 = vmul.f32 0.2, %v3685_v46  ;;  %vm5319_vm14 = vcmp.gt.f32.partialorder %v4709_v14, 0.0  ;;  %v15717_v1 = vpop.f32.mrb[253].mxu0 }
 0x2e5   : > { %v5831_v58 = vmul.f32 0.2, %v4709_v14  ;;  %v6340_v41 = vsel %vm5316_vm12, %v4698_v61, %v5828_v4  ;;  %vm5061_vm15 = vcmp.gt.f32.partialorder %v3677_v55, 0.0  ;;  %v5573_v54 = vmul.f32 0.2, %v3677_v55  ;;  %v15715_v51 = vpop.f32.mrb[252].mxu1 }
 0x2e6   : > { %vm5317_vm1 = vcmp.gt.f32.partialorder %v4701_v52, 0.0  ;;  %v6087_v49 = vsel %vm5063_vm13, %v3685_v46, %v5575_v2  ;;  %v5829_v47 = vmul.f32 0.2, %v4701_v52  ;;  %v3698_v24 = vadd.f32 %v15357_v17, %v15948_v23  ;;  %15949 = vst [vmem:[#allocation6_spill] sm:$0xff] %v15715_v51  ;;  %v15721_v4 = vpop.f32.mrb[253].mxu1  ;;  %v15723_v46 = vpop.f32.mrb[254].mxu0 }
 0x2e7   : > { %v6343_v63 = vsel %vm5319_vm14, %v4709_v14, %v5831_v58  ;;  %v11100_v26 = vpack.c.bf16 %v6087_v49, %v6086_v11  ;;  %v6085_v31 = vsel %vm5061_vm15, %v3677_v55, %v5573_v54  ;;  %v4722_v61 = vadd.f32 %v15357_v17, %v15479_v27  ;;  %v15725_v23 = vpop.f32.mrb[254].mxu1  ;;  %v15727_v51 = vpop.f32.mrb[255].mxu0  ;;  %v15951_v54 = vld [vmem:[#allocation7_spill] sm:$0xff] }
 0x2e8   : > { %v11740_v42 = vpack.c.bf16 %v6343_v63, %v6342_v18  ;;  %v11095_v14 = vpack.c.bf16 %v6085_v31, %v6084_v35  ;;  %v6341_v2 = vsel %vm5317_vm1, %v4701_v52, %v5829_v47  ;;  %vm5066_vm2 = vcmp.gt.f32.partialorder %v3698_v24, 0.0  ;;  %v15733_v18 = vpop.f32.mrb[255].mxu1  ;;  %v15952_v63 = vld [vmem:[#allocation8_spill] sm:$0xff] }
 0x2e9   : > { %v5578_v58 = vmul.f32 0.2, %v3698_v24  ;;  %11932 = vst [vmem:[%s13428_s27 + $0x378] sm:$0xff] %v11100_v26   ;;  %v11735_v11 = vpack.c.bf16 %v6341_v2, %v6340_v41  ;;  %vm5322_vm3 = vcmp.gt.f32.partialorder %v4722_v61, 0.0  ;;  %v5834_v55 = vmul.f32 0.2, %v4722_v61 }
 0x2ea   : > { %12060 = vst [vmem:[%s13428_s27 + $0x778] sm:$0xff] %v11740_v42   ;;  %v3690_v27 = vadd.f32 %v15357_v17, %v15485_v59  ;;  %15950 = vst [vmem:[#allocation19_spill] sm:$0xff] %v15733_v18  ;;  %v4714_v52 = vadd.f32 %v15357_v17, %v15487_v44  ;;  %v3701_v49 = vadd.f32 %v15357_v17, %v15951_v54  ;;  %v15953_v42 = vld [vmem:[#allocation12_spill] sm:$0xff] }
 0x2eb   : > { %11931 = vst [vmem:[%s13428_s27 + $0x370] sm:$0xff] %v11095_v14   ;;  %v6090_v35 = vsel %vm5066_vm2, %v3698_v24, %v5578_v58  ;;  %v4725_v47 = vadd.f32 %v15357_v17, %v15952_v63  ;;  %12059 = vst [vmem:[%s13428_s27 + $0x770] sm:$0xff] %v11735_v11   ;;  %v6346_v41 = vsel %vm5322_vm3, %v4722_v61, %v5834_v55 }
 0x2ec   : > { %vm5064_vm4 = vcmp.gt.f32.partialorder %v3690_v27, 0.0  ;;  %v5576_v26 = vmul.f32 0.2, %v3690_v27  ;;  %v3693_v59 = vadd.f32 %v15357_v17, %v15953_v42  ;;  %vm5320_vm5 = vcmp.gt.f32.partialorder %v4714_v52, 0.0 }
 0x2ed   : > { %v5832_v31 = vmul.f32 0.2, %v4714_v52  ;;  %vm5067_vm6 = vcmp.gt.f32.partialorder %v3701_v49, 0.0  ;;  %v5579_v24 = vmul.f32 0.2, %v3701_v49  ;;  %vm5323_vm7 = vcmp.gt.f32.partialorder %v4725_v47, 0.0 }
 0x2ee   : > { %v6088_v14 = vsel %vm5064_vm4, %v3690_v27, %v5576_v26  ;;  %v5835_v44 = vmul.f32 0.2, %v4725_v47  ;;  %vm5065_vm8 = vcmp.gt.f32.partialorder %v3693_v59, 0.0  ;;  %v5577_v54 = vmul.f32 0.2, %v3693_v59 }
 0x2ef   : > { %v6344_v2 = vsel %vm5320_vm5, %v4714_v52, %v5832_v31  ;;  %v6091_v58 = vsel %vm5067_vm6, %v3701_v49, %v5579_v24  ;;  %v4717_v61 = vadd.f32 %v15357_v17, %v15495_v60  ;;  %v3714_v63 = vadd.f32 %v15357_v17, %v15511_v12  ;;  %v15756_v12 = vld [vmem:[%s15901_s2] ss:$0 sm:$0xff]  ;;  %v15954_v31 = vld [vmem:[#allocation13_spill] sm:$0xff] }
 0x2f0   : > { %v11110_v11 = vpack.c.bf16 %v6091_v58, %v6090_v35  ;;  %v6347_v55 = vsel %vm5323_vm7, %v4725_v47, %v5835_v44  ;;  %v4738_v42 = vadd.f32 %v15357_v17, %v15513_v10  ;;  %v6089_v26 = vsel %vm5065_vm8, %v3693_v59, %v5577_v54 }
 0x2f1   : > { %v11750_v27 = vpack.c.bf16 %v6347_v55, %v6346_v41  ;;  %vm5321_vm0 = vcmp.gt.f32.partialorder %v4717_v61, 0.0  ;;  %v5833_v18 = vmul.f32 0.2, %v4717_v61  ;;  %v11105_v52 = vpack.c.bf16 %v6089_v26, %v6088_v14 }
 0x2f2   : > { %11934 = vst [vmem:[%s13428_s27 + $0x388] sm:$0xff] %v11110_v11   ;;  %vm5070_vm9 = vcmp.gt.f32.partialorder %v3714_v63, 0.0  ;;  %v5582_v49 = vmul.f32 0.2, %v3714_v63  ;;  %vm5326_vm10 = vcmp.gt.f32.partialorder %v4738_v42, 0.0  ;;  %v3706_v17 = vadd.f32 %v15756_v12, %v15519_v0 }
 0x2f3   : > { %12062 = vst [vmem:[%s13428_s27 + $0x788] sm:$0xff] %v11750_v27   ;;  %v6345_v60 = vsel %vm5321_vm0, %v4717_v61, %v5833_v18  ;;  %v5838_v35 = vmul.f32 0.2, %v4738_v42  ;;  %v4730_v10 = vadd.f32 %v15756_v12, %v15521_v50  ;;  %11933 = vst [vmem:[%s13428_s27 + $0x380] sm:$0xff] %v11105_v52   ;;  %v3717_v59 = vadd.f32 %v15756_v12, %v15523_v6  ;;  %v15956_v61 = vld [vmem:[#allocation15_spill] sm:$0xff] }
 0x2f4   : > { %v11745_v47 = vpack.c.bf16 %v6345_v60, %v6344_v2  ;;  %v6094_v41 = vsel %vm5070_vm9, %v3714_v63, %v5582_v49  ;;  %v4741_v18 = vadd.f32 %v15756_v12, %v15954_v31  ;;  %vm5068_vm11 = vcmp.gt.f32.partialorder %v3706_v17, 0.0  ;;  %v15955_v2 = vld [vmem:[#allocation14_spill] sm:$0xff] }
 0x2f5   : > { %v6350_v24 = vsel %vm5326_vm10, %v4738_v42, %v5838_v35  ;;  %v5580_v14 = vmul.f32 0.2, %v3706_v17  ;;  %vm5324_vm12 = vcmp.gt.f32.partialorder %v4730_v10, 0.0  ;;  %v5836_v44 = vmul.f32 0.2, %v4730_v10 }
 0x2f6   : > { %12061 = vst [vmem:[%s13428_s27 + $0x780] sm:$0xff] %v11745_v47   ;;  %vm5071_vm13 = vcmp.gt.f32.partialorder %v3717_v59, 0.0  ;;  %v5583_v0 = vmul.f32 0.2, %v3717_v59  ;;  %vm5327_vm14 = vcmp.gt.f32.partialorder %v4741_v18, 0.0  ;;  %v3709_v54 = vadd.f32 %v15756_v12, %v15955_v2 }
 0x2f7   : > { %v6092_v58 = vsel %vm5068_vm11, %v3706_v17, %v5580_v14  ;;  %v5839_v50 = vmul.f32 0.2, %v4741_v18  ;;  %v4733_v6 = vadd.f32 %v15756_v12, %v15956_v61  ;;  %v6348_v11 = vsel %vm5324_vm12, %v4730_v10, %v5836_v44 }
 0x2f8   : > { %v6095_v55 = vsel %vm5071_vm13, %v3717_v59, %v5583_v0  ;;  %v3730_v63 = vadd.f32 %v15756_v12, %v15539_v16  ;;  %v4754_v42 = vadd.f32 %v15756_v12, %v15551_v40  ;;  %vm5069_vm15 = vcmp.gt.f32.partialorder %v3709_v54, 0.0 }
 0x2f9   : > { %v11120_v27 = vpack.c.bf16 %v6095_v55, %v6094_v41  ;;  %v6351_v26 = vsel %vm5327_vm14, %v4741_v18, %v5839_v50  ;;  %v5581_v52 = vmul.f32 0.2, %v3709_v54  ;;  %vm5325_vm1 = vcmp.gt.f32.partialorder %v4733_v6, 0.0 }
 0x2fa   : > { %v11760_v49 = vpack.c.bf16 %v6351_v26, %v6350_v24  ;;  %v5837_v60 = vmul.f32 0.2, %v4733_v6  ;;  %vm5074_vm2 = vcmp.gt.f32.partialorder %v3730_v63, 0.0  ;;  %v5586_v17 = vmul.f32 0.2, %v3730_v63 }
 0x2fb   : > { %11936 = vst [vmem:[%s13428_s27 + $0x398] sm:$0xff] %v11120_v27   ;;  %v6093_v35 = vsel %vm5069_vm15, %v3709_v54, %v5581_v52  ;;  %vm5330_vm3 = vcmp.gt.f32.partialorder %v4754_v42, 0.0  ;;  %v5842_v10 = vmul.f32 0.2, %v4754_v42  ;;  %v3722_v40 = vadd.f32 %v15756_v12, %v15553_v29 }
 0x2fc   : > { %12064 = vst [vmem:[%s13428_s27 + $0x798] sm:$0xff] %v11760_v49   ;;  %v11115_v16 = vpack.c.bf16 %v6093_v35, %v6092_v58  ;;  %v6349_v47 = vsel %vm5325_vm1, %v4733_v6, %v5837_v60  ;;  %v4746_v41 = vadd.f32 %v15756_v12, %v15555_v13  ;;  %v6098_v31 = vsel %vm5074_vm2, %v3730_v63, %v5586_v17  ;;  %v15957_v58 = vld [vmem:[#allocation16_spill] sm:$0xff] }
 0x2fd   : > { %v11755_v59 = vpack.c.bf16 %v6349_v47, %v6348_v11  ;;  %v6354_v18 = vsel %vm5330_vm3, %v4754_v42, %v5842_v10  ;;  %v3733_v24 = vadd.f32 %v15756_v12, %v15557_v45  ;;  %vm5072_vm4 = vcmp.gt.f32.partialorder %v3722_v40, 0.0  ;;  %v15958_v47 = vld [vmem:[#allocation17_spill] sm:$0xff] }
 0x2fe   : > { %11935 = vst [vmem:[%s13428_s27 + $0x390] sm:$0xff] %v11115_v16   ;;  %v5584_v14 = vmul.f32 0.2, %v3722_v40  ;;  %vm5328_vm5 = vcmp.gt.f32.partialorder %v4746_v41, 0.0  ;;  %v5840_v44 = vmul.f32 0.2, %v4746_v41  ;;  %v4757_v29 = vadd.f32 %v15756_v12, %v15559_v9 }
 0x2ff   : > { %12063 = vst [vmem:[%s13428_s27 + $0x790] sm:$0xff] %v11755_v59   ;;  %vm5075_vm6 = vcmp.gt.f32.partialorder %v3733_v24, 0.0  ;;  %v5587_v0 = vmul.f32 0.2, %v3733_v24  ;;  %v3725_v13 = vadd.f32 %v15756_v12, %v15957_v58  ;;  %v4749_v45 = vadd.f32 %v15756_v12, %v15565_v28 }
 0x300   : > { %v6096_v50 = vsel %vm5072_vm4, %v3722_v40, %v5584_v14  ;;  %v6352_v2 = vsel %vm5328_vm5, %v4746_v41, %v5840_v44  ;;  %v3746_v54 = vadd.f32 %v15756_v12, %v15573_v5  ;;  %vm5331_vm7 = vcmp.gt.f32.partialorder %v4757_v29, 0.0 }
 0x301   : > { %v6099_v61 = vsel %vm5075_vm6, %v3733_v24, %v5587_v0  ;;  %v5843_v6 = vmul.f32 0.2, %v4757_v29  ;;  %vm5073_vm8 = vcmp.gt.f32.partialorder %v3725_v13, 0.0  ;;  %v5585_v55 = vmul.f32 0.2, %v3725_v13 }
 0x302   : > { %v11130_v11 = vpack.c.bf16 %v6099_v61, %v6098_v31  ;;  %vm5329_vm0 = vcmp.gt.f32.partialorder %v4749_v45, 0.0  ;;  %v5841_v9 = vmul.f32 0.2, %v4749_v45  ;;  %vm5078_vm9 = vcmp.gt.f32.partialorder %v3746_v54, 0.0 }
 0x303   : > { %v6355_v63 = vsel %vm5331_vm7, %v4757_v29, %v5843_v6  ;;  %v5590_v42 = vmul.f32 0.2, %v3746_v54  ;;  %v4770_v27 = vadd.f32 %v15756_v12, %v15582_v22  ;;  %v6097_v5 = vsel %vm5073_vm8, %v3725_v13, %v5585_v55 }
 0x304   : > { %11938 = vst [vmem:[%s13428_s27 + $0x3a8] sm:$0xff] %v11130_v11   ;;  %v11770_v28 = vpack.c.bf16 %v6355_v63, %v6354_v18  ;;  %v6353_v26 = vsel %vm5329_vm0, %v4749_v45, %v5841_v9  ;;  %v3738_v52 = vadd.f32 %v15756_v12, %v15584_v3  ;;  %v11125_v49 = vpack.c.bf16 %v6097_v5, %v6096_v50  ;;  %v15959_v9 = vld [vmem:[#allocation2_spill] sm:$0xff]  ;;  %v15960_v63 = vld [vmem:[#allocation9_spill] sm:$0xff] }
 0x305   : > { %v11765_v60 = vpack.c.bf16 %v6353_v26, %v6352_v2  ;;  %v6102_v35 = vsel %vm5078_vm9, %v3746_v54, %v5590_v42  ;;  %vm5334_vm10 = vcmp.gt.f32.partialorder %v4770_v27, 0.0  ;;  %v5846_v17 = vmul.f32 0.2, %v4770_v27  ;;  %v15961_v5 = vld [vmem:[#allocation10_spill] sm:$0xff] }
 0x306   : > { %12066 = vst [vmem:[%s13428_s27 + $0x7a8] sm:$0xff] %v11770_v28   ;;  %vm5076_vm11 = vcmp.gt.f32.partialorder %v3738_v52, 0.0  ;;  %v5588_v10 = vmul.f32 0.2, %v3738_v52  ;;  %v4762_v16 = vadd.f32 %v15756_v12, %v15589_v48  ;;  %11937 = vst [vmem:[%s13428_s27 + $0x3a0] sm:$0xff] %v11125_v49   ;;  %v3749_v22 = vadd.f32 %v15756_v12, %v15591_v43 }
 0x307   : > { %12065 = vst [vmem:[%s13428_s27 + $0x7a0] sm:$0xff] %v11765_v60   ;;  %v4773_v40 = vadd.f32 %v15756_v12, %v15958_v47  ;;  %v3741_v3 = vadd.f32 %v15756_v12, %v15595_v20  ;;  %v4765_v41 = vadd.f32 %v15756_v12, %v15599_v8  ;;  %v6358_v59 = vsel %vm5334_vm10, %v4770_v27, %v5846_v17 }
 0x308   : > { %v6100_v31 = vsel %vm5076_vm11, %v3738_v52, %v5588_v10  ;;  %vm5332_vm12 = vcmp.gt.f32.partialorder %v4762_v16, 0.0  ;;  %v5844_v18 = vmul.f32 0.2, %v4762_v16  ;;  %vm5079_vm13 = vcmp.gt.f32.partialorder %v3749_v22, 0.0 }
 0x309   : > { %v5591_v48 = vmul.f32 0.2, %v3749_v22  ;;  %vm5335_vm14 = vcmp.gt.f32.partialorder %v4773_v40, 0.0  ;;  %v5847_v24 = vmul.f32 0.2, %v4773_v40  ;;  %vm5077_vm15 = vcmp.gt.f32.partialorder %v3741_v3, 0.0 }
 0x30a   : > { %v6356_v14 = vsel %vm5332_vm12, %v4762_v16, %v5844_v18  ;;  %v5589_v43 = vmul.f32 0.2, %v3741_v3  ;;  %vm5333_vm1 = vcmp.gt.f32.partialorder %v4765_v41, 0.0  ;;  %v5845_v20 = vmul.f32 0.2, %v4765_v41 }
 0x30b   : > { %v6103_v44 = vsel %vm5079_vm13, %v3749_v22, %v5591_v48  ;;  %v6359_v0 = vsel %vm5335_vm14, %v4773_v40, %v5847_v24  ;;  %v3762_v8 = vadd.f32 %v15756_v12, %v15606_v62  ;;  %v4786_v50 = vadd.f32 %v15756_v12, %v15613_v36 }
 0x30c   : > { %v11140_v29 = vpack.c.bf16 %v6103_v44, %v6102_v35  ;;  %v11780_v58 = vpack.c.bf16 %v6359_v0, %v6358_v59  ;;  %v6101_v13 = vsel %vm5077_vm15, %v3741_v3, %v5589_v43  ;;  %v6357_v45 = vsel %vm5333_vm1, %v4765_v41, %v5845_v20 }
 0x30d   : > { %v11135_v2 = vpack.c.bf16 %v6101_v13, %v6100_v31  ;;  %vm5082_vm2 = vcmp.gt.f32.partialorder %v3762_v8, 0.0  ;;  %v5594_v54 = vmul.f32 0.2, %v3762_v8  ;;  %v11775_v61 = vpack.c.bf16 %v6357_v45, %v6356_v14  ;;  %v15964_v45 = vld [vmem:[#allocation11_spill] sm:$0xff] }
 0x30e   : > { %11940 = vst [vmem:[%s13428_s27 + $0x3b8] sm:$0xff] %v11140_v29   ;;  %12068 = vst [vmem:[%s13428_s27 + $0x7b8] sm:$0xff] %v11780_v58   ;;  %vm5338_vm3 = vcmp.gt.f32.partialorder %v4786_v50, 0.0  ;;  %v5850_v6 = vmul.f32 0.2, %v4786_v50  ;;  %v3754_v11 = vadd.f32 %v15756_v12, %v15615_v15  ;;  %v4778_v55 = vadd.f32 %v15756_v12, %v15622_v53  ;;  %v15962_v58 = vld [vmem:[#allocation3_spill] sm:$0xff] }
 0x30f   : > { %11939 = vst [vmem:[%s13428_s27 + $0x3b0] sm:$0xff] %v11135_v2   ;;  %v6106_v62 = vsel %vm5082_vm2, %v3762_v8, %v5594_v54  ;;  %v3765_v36 = vadd.f32 %v15756_v12, %v15959_v9  ;;  %v4789_v42 = vadd.f32 %v15756_v12, %v15960_v63  ;;  %12067 = vst [vmem:[%s13428_s27 + $0x7b0] sm:$0xff] %v11775_v61   ;;  %v15965_v61 = vld [vmem:[#allocation5_spill] sm:$0xff] }
 0x310   : > { %v6362_v27 = vsel %vm5338_vm3, %v4786_v50, %v5850_v6  ;;  %vm5080_vm4 = vcmp.gt.f32.partialorder %v3754_v11, 0.0  ;;  %v5592_v28 = vmul.f32 0.2, %v3754_v11  ;;  %v3757_v26 = vadd.f32 %v15756_v12, %v15961_v5  ;;  %v15963_v50 = vld [vmem:[#allocation4_spill] sm:$0xff] }
 0x311   : > { %vm5336_vm5 = vcmp.gt.f32.partialorder %v4778_v55, 0.0  ;;  %v5848_v15 = vmul.f32 0.2, %v4778_v55  ;;  %vm5083_vm6 = vcmp.gt.f32.partialorder %v3765_v36, 0.0  ;;  %v5595_v52 = vmul.f32 0.2, %v3765_v36 }
 0x312   : > { %v6104_v49 = vsel %vm5080_vm4, %v3754_v11, %v5592_v28  ;;  %vm5339_vm7 = vcmp.gt.f32.partialorder %v4789_v42, 0.0  ;;  %v5851_v53 = vmul.f32 0.2, %v4789_v42  ;;  %vm5081_vm8 = vcmp.gt.f32.partialorder %v3757_v26, 0.0 }
 0x313   : > { %v6360_v60 = vsel %vm5336_vm5, %v4778_v55, %v5848_v15  ;;  %v6107_v35 = vsel %vm5083_vm6, %v3765_v36, %v5595_v52  ;;  %v5593_v17 = vmul.f32 0.2, %v3757_v26  ;;  %v4781_v10 = vadd.f32 %v15756_v12, %v15636_v32 }
 0x314   : > { %v11150_v16 = vpack.c.bf16 %v6107_v35, %v6106_v62  ;;  %v6363_v22 = vsel %vm5339_vm7, %v4789_v42, %v5851_v53  ;;  %v3778_v47 = vadd.f32 %v15756_v12, %v15642_v39  ;;  %v4802_v40 = vadd.f32 %v15756_v12, %v15645_v21 }
 0x315   : > { %v11790_v3 = vpack.c.bf16 %v6363_v22, %v6362_v27  ;;  %v6105_v41 = vsel %vm5081_vm8, %v3757_v26, %v5593_v17  ;;  %vm5337_vm0 = vcmp.gt.f32.partialorder %v4781_v10, 0.0  ;;  %v5849_v59 = vmul.f32 0.2, %v4781_v10  ;;  %v15966_v26 = vld [vmem:[#allocation18_spill] sm:$0xff] }
 0x316   : > { %11942 = vst [vmem:[%s13428_s27 + $0x3c8] sm:$0xff] %v11150_v16   ;;  %v11145_v31 = vpack.c.bf16 %v6105_v41, %v6104_v49  ;;  %vm5086_vm9 = vcmp.gt.f32.partialorder %v3778_v47, 0.0  ;;  %v5598_v18 = vmul.f32 0.2, %v3778_v47  ;;  %vm5342_vm10 = vcmp.gt.f32.partialorder %v4802_v40, 0.0 }
 0x317   : > { %12070 = vst [vmem:[%s13428_s27 + $0x7c8] sm:$0xff] %v11790_v3   ;;  %v6361_v32 = vsel %vm5337_vm0, %v4781_v10, %v5849_v59  ;;  %v5854_v48 = vmul.f32 0.2, %v4802_v40  ;;  %v3770_v39 = vadd.f32 %v15756_v12, %v15652_v33  ;;  %v4794_v24 = vadd.f32 %v15756_v12, %v15654_v57 }
 0x318   : > { %11941 = vst [vmem:[%s13428_s27 + $0x3c0] sm:$0xff] %v11145_v31   ;;  %v11785_v21 = vpack.c.bf16 %v6361_v32, %v6360_v60  ;;  %v6110_v14 = vsel %vm5086_vm9, %v3778_v47, %v5598_v18  ;;  %v3781_v43 = vadd.f32 %v15756_v12, %v15659_v56  ;;  %v4805_v44 = vadd.f32 %v15756_v12, %v15661_v38 }
 0x319   : > { %v6366_v0 = vsel %vm5342_vm10, %v4802_v40, %v5854_v48  ;;  %vm5084_vm11 = vcmp.gt.f32.partialorder %v3770_v39, 0.0  ;;  %v5596_v20 = vmul.f32 0.2, %v3770_v39  ;;  %vm5340_vm12 = vcmp.gt.f32.partialorder %v4794_v24, 0.0  ;;  %v15967_v48 = vld [vmem:[#allocation6_spill] sm:$0xff] }
 0x31a   : > { %12069 = vst [vmem:[%s13428_s27 + $0x7c0] sm:$0xff] %v11785_v21   ;;  %v5852_v8 = vmul.f32 0.2, %v4794_v24  ;;  %vm5087_vm13 = vcmp.gt.f32.partialorder %v3781_v43, 0.0  ;;  %v5599_v33 = vmul.f32 0.2, %v3781_v43  ;;  %v3773_v13 = vadd.f32 %v15756_v12, %v15962_v58 }
 0x31b   : > { %vm5343_vm14 = vcmp.gt.f32.partialorder %v4805_v44, 0.0  ;;  %v6108_v29 = vsel %vm5084_vm11, %v3770_v39, %v5596_v20  ;;  %v5855_v57 = vmul.f32 0.2, %v4805_v44  ;;  %v4797_v56 = vadd.f32 %v15756_v12, %v15963_v50 }
 0x31c   : > { %v6364_v2 = vsel %vm5340_vm12, %v4794_v24, %v5852_v8  ;;  %v6111_v38 = vsel %vm5087_vm13, %v3781_v43, %v5599_v33  ;;  %v3794_v54 = vadd.f32 %v15756_v12, %v15964_v45  ;;  %v4818_v6 = vadd.f32 %v15756_v12, %v15965_v61 }
 0x31d   : > { %v11160_v11 = vpack.c.bf16 %v6111_v38, %v6110_v14  ;;  %v6367_v62 = vsel %vm5343_vm14, %v4805_v44, %v5855_v57  ;;  %vm5085_vm15 = vcmp.gt.f32.partialorder %v3773_v13, 0.0  ;;  %v5597_v55 = vmul.f32 0.2, %v3773_v13 }
 0x31e   : > { %v11800_v9 = vpack.c.bf16 %v6367_v62, %v6366_v0  ;;  %vm5341_vm1 = vcmp.gt.f32.partialorder %v4797_v56, 0.0  ;;  %v5853_v36 = vmul.f32 0.2, %v4797_v56  ;;  %vm5090_vm2 = vcmp.gt.f32.partialorder %v3794_v54, 0.0 }
 0x31f   : > { %11944 = vst [vmem:[%s13428_s27 + $0x3d8] sm:$0xff] %v11160_v11   ;;  %v6109_v63 = vsel %vm5085_vm15, %v3773_v13, %v5597_v55  ;;  %v5602_v42 = vmul.f32 0.2, %v3794_v54  ;;  %vm5346_vm3 = vcmp.gt.f32.partialorder %v4818_v6, 0.0  ;;  %v5858_v27 = vmul.f32 0.2, %v4818_v6 }
 0x320   : > { %12072 = vst [vmem:[%s13428_s27 + $0x7d8] sm:$0xff] %v11800_v9   ;;  %v11155_v28 = vpack.c.bf16 %v6109_v63, %v6108_v29  ;;  %v6365_v5 = vsel %vm5341_vm1, %v4797_v56, %v5853_v36  ;;  %v3786_v15 = vadd.f32 %v15756_v12, %v15966_v26  ;;  %v4810_v52 = vadd.f32 %v15756_v12, %v15688_v25 }
 0x321   : > { %v11795_v49 = vpack.c.bf16 %v6365_v5, %v6364_v2  ;;  %v6114_v53 = vsel %vm5090_vm2, %v3794_v54, %v5602_v42  ;;  %v6370_v60 = vsel %vm5346_vm3, %v4818_v6, %v5858_v27  ;;  %v3797_v35 = vadd.f32 %v15756_v12, %v15690_v34 }
 0x322   : > { %11943 = vst [vmem:[%s13428_s27 + $0x3d0] sm:$0xff] %v11155_v28   ;;  %vm5088_vm4 = vcmp.gt.f32.partialorder %v3786_v15, 0.0  ;;  %v5600_v17 = vmul.f32 0.2, %v3786_v15  ;;  %vm5344_vm5 = vcmp.gt.f32.partialorder %v4810_v52, 0.0  ;;  %v4821_v22 = vadd.f32 %v15756_v12, %v15692_v37 }
 0x323   : > { %v5856_v10 = vmul.f32 0.2, %v4810_v52  ;;  %12071 = vst [vmem:[%s13428_s27 + $0x7d0] sm:$0xff] %v11795_v49   ;;  %vm5091_vm6 = vcmp.gt.f32.partialorder %v3797_v35, 0.0  ;;  %v5603_v16 = vmul.f32 0.2, %v3797_v35  ;;  %v3789_v25 = vadd.f32 %v15756_v12, %v15694_v30 }
 0x324   : > { %v6112_v47 = vsel %vm5088_vm4, %v3786_v15, %v5600_v17  ;;  %v4813_v34 = vadd.f32 %v15756_v12, %v15699_v19  ;;  %v3810_v3 = vadd.f32 %v15756_v12, %v15711_v7  ;;  %vm5347_vm7 = vcmp.gt.f32.partialorder %v4821_v22, 0.0 }
 0x325   : > { %v6368_v40 = vsel %vm5344_vm5, %v4810_v52, %v5856_v10  ;;  %v6115_v41 = vsel %vm5091_vm6, %v3797_v35, %v5603_v16  ;;  %v5859_v59 = vmul.f32 0.2, %v4821_v22  ;;  %vm5089_vm8 = vcmp.gt.f32.partialorder %v3789_v25, 0.0 }
 0x326   : > { %v11170_v31 = vpack.c.bf16 %v6115_v41, %v6114_v53  ;;  %v5601_v18 = vmul.f32 0.2, %v3789_v25  ;;  %vm5345_vm0 = vcmp.gt.f32.partialorder %v4813_v34, 0.0  ;;  %v5857_v37 = vmul.f32 0.2, %v4813_v34 }
 0x327   : > { %v6371_v30 = vsel %vm5347_vm7, %v4821_v22, %v5859_v59  ;;  %vm5094_vm9 = vcmp.gt.f32.partialorder %v3810_v3, 0.0  ;;  %v5606_v32 = vmul.f32 0.2, %v3810_v3  ;;  %v4834_v19 = vadd.f32 %v15756_v12, %v15967_v48 }
 0x328   : > { %11946 = vst [vmem:[%s13428_s27 + $0x3e8] sm:$0xff] %v11170_v31   ;;  %v11810_v39 = vpack.c.bf16 %v6371_v30, %v6370_v60  ;;  %v6113_v7 = vsel %vm5089_vm8, %v3789_v25, %v5601_v18  ;;  %v6369_v24 = vsel %vm5345_vm0, %v4813_v34, %v5857_v37  ;;  %v3802_v21 = vadd.f32 %v15756_v12, %v15717_v1  ;;  %v15968_v1 = vld [vmem:[#allocation19_spill] sm:$0xff] }
 0x329   : > { %v11165_v14 = vpack.c.bf16 %v6113_v7, %v6112_v47  ;;  %v11805_v43 = vpack.c.bf16 %v6369_v24, %v6368_v40  ;;  %v6118_v44 = vsel %vm5094_vm9, %v3810_v3, %v5606_v32  ;;  %v5862_v0 = vmul.f32 0.2, %v4834_v19 }
 0x32a   : > { %12074 = vst [vmem:[%s13428_s27 + $0x7e8] sm:$0xff] %v11810_v39   ;;  %v4826_v20 = vadd.f32 %v15756_v12, %v15721_v4  ;;  %v3813_v8 = vadd.f32 %v15756_v12, %v15723_v46  ;;  %v4837_v33 = vadd.f32 %v15756_v12, %v15725_v23  ;;  %v3805_v29 = vadd.f32 %v15756_v12, %v15727_v51 }
 0x32b   : > { %11945 = vst [vmem:[%s13428_s27 + $0x3e0] sm:$0xff] %v11165_v14   ;;  %12073 = vst [vmem:[%s13428_s27 + $0x7e0] sm:$0xff] %v11805_v43   ;;  %v4829_v57 = vadd.f32 %v15756_v12, %v15968_v1  ;;  %vm5350_vm10 = vcmp.gt.f32.partialorder %v4834_v19, 0.0  ;;  %vm5092_vm11 = vcmp.gt.f32.partialorder %v3802_v21, 0.0  ;;  %v5604_v58 = vmul.f32 0.2, %v3802_v21 }
 0x32c   : > { %v5860_v13 = vmul.f32 0.2, %v4826_v20  ;;  %vm5095_vm12 = vcmp.gt.f32.partialorder %v3813_v8, 0.0  ;;  %v5607_v4 = vmul.f32 0.2, %v3813_v8  ;;  %vm5351_vm13 = vcmp.gt.f32.partialorder %v4837_v33, 0.0 }
 0x32d   : > { %v5863_v50 = vmul.f32 0.2, %v4837_v33  ;;  %vm5348_vm14 = vcmp.gt.f32.partialorder %v4826_v20, 0.0  ;;  %vm5093_vm15 = vcmp.gt.f32.partialorder %v3805_v29, 0.0  ;;  %v5605_v46 = vmul.f32 0.2, %v3805_v29 }
 0x32e   : > { %vm5349_vm1 = vcmp.gt.f32.partialorder %v4829_v57, 0.0  ;;  %v6374_v51 = vsel %vm5350_vm10, %v4834_v19, %v5862_v0  ;;  %v6119_v23 = vsel %vm5095_vm12, %v3813_v8, %v5607_v4  ;;  %v5861_v12 = vmul.f32 0.2, %v4829_v57 }
 0x32f   : > { %v6375_v56 = vsel %vm5351_vm13, %v4837_v33, %v5863_v50  ;;  %v6116_v2 = vsel %vm5092_vm11, %v3802_v21, %v5604_v58  ;;  %v11180_v38 = vpack.c.bf16 %v6119_v23, %v6118_v44  ;;  %v6117_v54 = vsel %vm5093_vm15, %v3805_v29, %v5605_v46 }
 0x330   : > { %v11820_v45 = vpack.c.bf16 %v6375_v56, %v6374_v51  ;;  %v6372_v61 = vsel %vm5348_vm14, %v4826_v20, %v5860_v13  ;;  %v11175_v6 = vpack.c.bf16 %v6117_v54, %v6116_v2  ;;  %v6373_v11 = vsel %vm5349_vm1, %v4829_v57, %v5861_v12 }
 0x331   : > { %11948 = vst [vmem:[%s13428_s27 + $0x3f8] sm:$0xff] %v11180_v38   ;;  %v11815_v62 = vpack.c.bf16 %v6373_v11, %v6372_v61 }
 0x332   : > { %12076 = vst [vmem:[%s13428_s27 + $0x7f8] sm:$0xff] %v11820_v45   ;;  %11947 = vst [vmem:[%s13428_s27 + $0x3f0] sm:$0xff] %v11175_v6  }
 0x333   : > { %12075 = vst [vmem:[%s13428_s27 + $0x7f0] sm:$0xff] %v11815_v62  }
 0x334 PF: > { %s13_s12 = sadd.s32 1, %s13133_s12  }
 0x335   : > { %p10_p4 = scmp.ge.s32.totalorder %s13_s12, 4  }
 0x337   :  { %12 = sbr.rel (!%p10_p4) target bundleno = 1 (0x1), region = 62 }

// kernel: discriminator_forward.3
= control target key start
LH: loop header
LB: loop body
LE: loop exit
PB: predicated region body
PF: predicated region fallthrough
CT: control target
= control target key end

     0   :  { %s3002_s12 = smov 0   ;;  %s3476_s0 = inlined_call_operand.vmem [shape: bf16[1024,320], index: 0, kind: input, shape index: {}]   ;;  %s3477_s1 = inlined_call_operand.vmem [shape: bf16[320,128], index: 1, kind: input, shape index: {}]   ;;  %s3478_s2 = inlined_call_operand.vmem [shape: f32[1,128], index: 2, kind: input, shape index: {}]   ;;  %s3479_s3 = inlined_call_operand.vmem [shape: bf16[1024,128], index: 3, kind: output, shape index: {}]  }
   0x1 LB: > { %s2196_s13 = sadd.s32 4294967295, %s2979_s12   ;;  %p2200_p0 = scmp.ge.s32.totalorder %s2979_s12, 1  ;;  %s2979_s12 = sphi %s3002_s12, %s13_s12  }
   0x2   : > { %p139_p1 = scmp.lt.s32.totalorder %s2979_s12, 3 }
   0x4   : > { %p140_p2 = pnand %p2200_p0, %p139_p1 }
   0x5   : > { %v2825_v0 = vld [vmem:[%s3477_s1] sm:$0xff] (!%p140_p2)   ;;  %v2981_v1 = vmov (!%p140_p2), 0   ;;  %s2201_s16 = sshll.u32 (!%p140_p2), %s2196_s13, 6  ;;  %v2826_v2 = vld [vmem:[%s3477_s1 + $0x8] sm:$0xff] (!%p140_p2)   ;;  %v2827_v3 = vld [vmem:[%s3477_s1 + $0x10] sm:$0xff] (!%p140_p2)   ;;  %vm953_vm0 = vcmask (!%p140_p2), 523264  }
   0x6   : > { %143 = sbr.rel (%p140_p2) target bundleno = 478 (0x1de), region = 32  ;;  %1050 = vmatprep.subr.bf16.mxu0 (!%p140_p2), %v2981_v1  ;;  %2783 = vmatprep.subr.bf16.mxu1 (!%p140_p2), %v2981_v1  ;;  %p165_p3 = scmp.lt.s32.totalorder (!%p140_p2), %s2201_s16, 127  ;;  %v2828_v4 = vld [vmem:[%s3477_s1 + $0x18] sm:$0xff] (!%p140_p2)   ;;  %v2829_v5 = vld [vmem:[%s3477_s1 + $0x20] sm:$0xff] (!%p140_p2)   ;;  %v2830_v7 = vld [vmem:[%s3477_s1 + $0x28] sm:$0xff] (!%p140_p2)  }
   0x7   : > { %1051 = vmatpush1.bf16.msra.mxu0 (!%p140_p2), %v2825_v0  ;;  %2799 = vmatpush1.bf16.msra.mxu1 (!%p140_p2), %v2825_v0  ;;  %v2831_v9 = vld [vmem:[%s3477_s1 + $0x30] sm:$0xff] (!%p140_p2)   ;;  %v2832_v10 = vld [vmem:[%s3477_s1 + $0x38] sm:$0xff] (!%p140_p2)   ;;  %v2833_v11 = vld [vmem:[%s3477_s1 + $0x40] sm:$0xff] (!%p140_p2)  }
   0x8   : > { %1052 = vmatprep.subr.bf16.mxu0 (!%p140_p2), %v2981_v1  ;;  %2784 = vmatprep.subr.bf16.mxu1 (!%p140_p2), %v2981_v1  ;;  %v2834_v12 = vld [vmem:[%s3477_s1 + $0x48] sm:$0xff] (!%p140_p2)   ;;  %v2835_v13 = vld [vmem:[%s3477_s1 + $0x50] sm:$0xff] (!%p140_p2)   ;;  %v2836_v14 = vld [vmem:[%s3477_s1 + $0x58] sm:$0xff] (!%p140_p2)  }
   0x9   : > { %v2837_v15 = vld [vmem:[%s3477_s1 + $0x60] sm:$0xff] (!%p140_p2)   ;;  %v2838_v16 = vld [vmem:[%s3477_s1 + $0x68] sm:$0xff] (!%p140_p2)   ;;  %v2839_v17 = vld [vmem:[%s3477_s1 + $0x70] sm:$0xff] (!%p140_p2)  }
   0xa   : > { %v2840_v18 = vld [vmem:[%s3477_s1 + $0x78] sm:$0xff] (!%p140_p2)   ;;  %v2847_v19 = vld [vmem:[%s3477_s1 + $0x80] sm:$0xff] (!%p140_p2)   ;;  %v2860_v24 = vld [vmem:[%s3477_s1 + $0x88] sm:$0xff] (!%p140_p2)  }
   0xb   : > { %1053 = vmatpush1.bf16.msra.mxu0 (!%p140_p2), %v2826_v2  ;;  %2800 = vmatpush1.bf16.msra.mxu1 (!%p140_p2), %v2826_v2  ;;  %v2873_v26 = vld [vmem:[%s3477_s1 + $0x90] sm:$0xff] (!%p140_p2)   ;;  %v2886_v30 = vld [vmem:[%s3477_s1 + $0x98] sm:$0xff] (!%p140_p2)  }
   0xc   : > { %1054 = vmatprep.subr.bf16.mxu0 (!%p140_p2), %v2981_v1  ;;  %2785 = vmatprep.subr.bf16.mxu1 (!%p140_p2), %v2981_v1 }
   0xd   : > { %s3481_s16 = smov (!%p165_p3, %s2201_s16), 127 }
   0xe   : > { %s2815_s23 = smul.u32 12, %s3481_s16  ;;  %s2204_s9 = sshll.u32 %s3481_s16, 2 }
   0xf   : > { %1055 = vmatpush1.bf16.msra.mxu0 %v2827_v3  ;;  %2801 = vmatpush1.bf16.msra.mxu1 %v2827_v3  ;;  %s3319_s13 = scalar_lea.vmem %s3479_s3, %s2204_s9 }
  0x10   : > { %1056 = vmatprep.subr.bf16.mxu0 %v2981_v1  ;;  %2786 = vmatprep.subr.bf16.mxu1 %v2981_v1  ;;  %s3039_s28 = scalar_lea.vmem %s3476_s0, %s2815_s23 }
  0x11   : > { %v2843_v6 = vld [vmem:[%s3039_s28 + $0x4] ss:$12 sps:$4 sm:$0xff]   ;;  %v2841_v20 = vld [vmem:[%s3039_s28] ss:$12 sps:$4 sm:$0xff]   ;;  %v2848_v22 = vld [vmem:[%s3039_s28 + $0x1c] ss:$12 sps:$4 sm:$0xff]  }
  0x12   : > { %v2846_v8 = vld [vmem:[%s3039_s28 + $0x244] ss:$12 sps:$4 sm:$0xff]   ;;  %1082 = vmatprep.mubr.bf16.mxu0 %v2843_v6  ;;  %v2844_v21 = vld [vmem:[%s3039_s28 + $0x240] ss:$12 sps:$4 sm:$0xff]   ;;  %v2850_v23 = vld [vmem:[%s3039_s28 + $0x25c] ss:$12 sps:$4 sm:$0xff]  }
  0x13   : > { %1057 = vmatpush1.bf16.msra.mxu0 %v2828_v4  ;;  %2802 = vmatpush1.bf16.msra.mxu1 %v2828_v4  ;;  %v2852_v25 = vld [vmem:[%s3039_s28 + $0x18] ss:$12 sps:$4 sm:$0xff]   ;;  %v2854_v28 = vld [vmem:[%s3039_s28 + $0x34] ss:$12 sps:$4 sm:$0xff]   ;;  %v2858_v31 = vld [vmem:[%s3039_s28 + $0x30] ss:$12 sps:$4 sm:$0xff]  }
  0x14   : > { %1058 = vmatprep.subr.bf16.mxu0 %v2981_v1  ;;  %2787 = vmatprep.subr.bf16.mxu1 %v2981_v1  ;;  %v2853_v27 = vld [vmem:[%s3039_s28 + $0x258] ss:$12 sps:$4 sm:$0xff]   ;;  %v2856_v29 = vld [vmem:[%s3039_s28 + $0x274] ss:$12 sps:$4 sm:$0xff]   ;;  %v2859_v32 = vld [vmem:[%s3039_s28 + $0x270] ss:$12 sps:$4 sm:$0xff]  }
  0x15   : > { %1274 = vmatprep.mubr.bf16.mxu1 %v2846_v8  ;;  %v2861_v33 = vld [vmem:[%s3039_s28 + $0x4c] ss:$12 sps:$4 sm:$0xff]   ;;  %v2865_v35 = vld [vmem:[%s3039_s28 + $0x48] ss:$12 sps:$4 sm:$0xff]   ;;  %v2867_v37 = vld [vmem:[%s3039_s28 + $0x64] ss:$12 sps:$4 sm:$0xff]  }
  0x16   : > { %v2863_v34 = vld [vmem:[%s3039_s28 + $0x28c] ss:$12 sps:$4 sm:$0xff]   ;;  %v2866_v36 = vld [vmem:[%s3039_s28 + $0x288] ss:$12 sps:$4 sm:$0xff]   ;;  %v2869_v38 = vld [vmem:[%s3039_s28 + $0x2a4] ss:$12 sps:$4 sm:$0xff]  }
  0x17   : > { %1059 = vmatpush1.bf16.msra.mxu0 %v2829_v5  ;;  %2803 = vmatpush1.bf16.msra.mxu1 %v2829_v5  ;;  %v2871_v39 = vld [vmem:[%s3039_s28 + $0x60] ss:$12 sps:$4 sm:$0xff]   ;;  %v2874_v41 = vld [vmem:[%s3039_s28 + $0x7c] ss:$12 sps:$4 sm:$0xff]   ;;  %v2878_v43 = vld [vmem:[%s3039_s28 + $0x78] ss:$12 sps:$4 sm:$0xff]  }
  0x18   : > { %1060 = vmatprep.subr.bf16.mxu0 %v2981_v1  ;;  %2788 = vmatprep.subr.bf16.mxu1 %v2981_v1  ;;  %v2872_v40 = vld [vmem:[%s3039_s28 + $0x2a0] ss:$12 sps:$4 sm:$0xff]   ;;  %v2876_v42 = vld [vmem:[%s3039_s28 + $0x2bc] ss:$12 sps:$4 sm:$0xff]   ;;  %v2879_v44 = vld [vmem:[%s3039_s28 + $0x2b8] ss:$12 sps:$4 sm:$0xff]  }
  0x19   : > { %v2880_v45 = vld [vmem:[%s3039_s28 + $0x94] ss:$12 sps:$4 sm:$0xff]   ;;  %v2884_v47 = vld [vmem:[%s3039_s28 + $0x90] ss:$12 sps:$4 sm:$0xff]   ;;  %v2887_v49 = vld [vmem:[%s3039_s28 + $0xac] ss:$12 sps:$4 sm:$0xff]  }
  0x1a   : > { %v2882_v46 = vld [vmem:[%s3039_s28 + $0x2d4] ss:$12 sps:$4 sm:$0xff]   ;;  %v2885_v48 = vld [vmem:[%s3039_s28 + $0x2d0] ss:$12 sps:$4 sm:$0xff]   ;;  %v2889_v50 = vld [vmem:[%s3039_s28 + $0x2ec] ss:$12 sps:$4 sm:$0xff]  }
  0x1b   : > { %1061 = vmatpush1.bf16.msra.mxu0 %v2830_v7  ;;  %2804 = vmatpush1.bf16.msra.mxu1 %v2830_v7  ;;  %v2891_v51 = vld [vmem:[%s3039_s28 + $0xa8] ss:$12 sps:$4 sm:$0xff]   ;;  %v2893_v53 = vld [vmem:[%s3039_s28 + $0xc4] ss:$12 sps:$4 sm:$0xff]   ;;  %v2896_v55 = vld [vmem:[%s3039_s28 + $0xc0] ss:$12 sps:$4 sm:$0xff]  }
  0x1c   : > { %1062 = vmatprep.subr.bf16.mxu0 %v2981_v1  ;;  %2789 = vmatprep.subr.bf16.mxu1 %v2981_v1  ;;  %v2892_v52 = vld [vmem:[%s3039_s28 + $0x2e8] ss:$12 sps:$4 sm:$0xff]   ;;  %v2897_v56 = vld [vmem:[%s3039_s28 + $0x20] ss:$12 sps:$4 sm:$0xff]   ;;  %v2900_v58 = vld [vmem:[%s3039_s28 + $0x38] ss:$12 sps:$4 sm:$0xff]  }
  0x1d   : > { %v2895_v54 = vld [vmem:[%s3039_s28 + $0x8] ss:$12 sps:$4 sm:$0xff]   ;;  %v2901_v59 = vld [vmem:[%s3039_s28 + $0xd8] ss:$12 sps:$4 sm:$0xff]   ;;  %v2902_v60 = vld [vmem:[%s3039_s28 + $0x50] ss:$12 sps:$4 sm:$0xff]  }
  0x1e   : > { %v2898_v57 = vld [vmem:[%s3039_s28 + $0xdc] ss:$12 sps:$4 sm:$0xff]   ;;  %v2903_v61 = vld [vmem:[%s3039_s28 + $0xf4] ss:$12 sps:$4 sm:$0xff]   ;;  %v2910_v2 = vld [vmem:[%s3039_s28 + $0x98] ss:$12 sps:$4 sm:$0xff]  }
  0x1f   : > { %1063 = vmatpush1.bf16.msra.mxu0 %v2831_v9  ;;  %2805 = vmatpush1.bf16.msra.mxu1 %v2831_v9  ;;  %v2905_v62 = vld [vmem:[%s3039_s28 + $0x68] ss:$12 sps:$4 sm:$0xff]   ;;  %v2906_v63 = vld [vmem:[%s3039_s28 + $0xf0] ss:$12 sps:$4 sm:$0xff]   ;;  %v2907_v0 = vld [vmem:[%s3039_s28 + $0x80] ss:$12 sps:$4 sm:$0xff]  }
  0x20   : > { %1064 = vmatprep.subr.bf16.mxu0 %v2981_v1  ;;  %2790 = vmatprep.subr.bf16.mxu1 %v2981_v1  ;;  %v2911_v3 = vld [vmem:[%s3039_s28 + $0x108] ss:$12 sps:$4 sm:$0xff]   ;;  %v2912_v4 = vld [vmem:[%s3039_s28 + $0xb0] ss:$12 sps:$4 sm:$0xff]   ;;  %v2916_v7 = vld [vmem:[%s3039_s28 + $0x120] ss:$12 sps:$4 sm:$0xff]  }
  0x21   : > { %v2913_v5 = vld [vmem:[%s3039_s28 + $0x124] ss:$12 sps:$4 sm:$0xff]   ;;  %v2915_v6 = vld [vmem:[%s3039_s28 + $0xc8] ss:$12 sps:$4 sm:$0xff]   ;;  %v2917_v8 = vld [vmem:[%s3039_s28 + $0xe0] ss:$12 sps:$4 sm:$0xff]  }
  0x22   : > { %v2918_v9 = vld [vmem:[%s3039_s28 + $0x13c] ss:$12 sps:$4 sm:$0xff]  }
  0x23   : > { %1065 = vmatpush1.bf16.msra.mxu0 %v2832_v10  ;;  %2806 = vmatpush1.bf16.msra.mxu1 %v2832_v10  ;;  %v2920_v10 = vld [vmem:[%s3039_s28 + $0xf8] ss:$12 sps:$4 sm:$0xff]  }
  0x24   : > { %1066 = vmatprep.subr.bf16.mxu0 %v2981_v1  ;;  %2791 = vmatprep.subr.bf16.mxu1 %v2981_v1 }
  0x27   : > { %1067 = vmatpush1.bf16.msra.mxu0 %v2833_v11  ;;  %2807 = vmatpush1.bf16.msra.mxu1 %v2833_v11  ;;  %v2921_v11 = vld [vmem:[%s3039_s28 + $0x138] ss:$12 sps:$4 sm:$0xff]  }
  0x28   : > { %1068 = vmatprep.subr.bf16.mxu0 %v2981_v1  ;;  %2792 = vmatprep.subr.bf16.mxu1 %v2981_v1 }
  0x2b   : > { %1069 = vmatpush1.bf16.msra.mxu0 %v2834_v12  ;;  %2808 = vmatpush1.bf16.msra.mxu1 %v2834_v12  ;;  %v2922_v12 = vld [vmem:[%s3039_s28 + $0x110] ss:$12 sps:$4 sm:$0xff]  }
  0x2c   : > { %1070 = vmatprep.subr.bf16.mxu0 %v2981_v1  ;;  %2793 = vmatprep.subr.bf16.mxu1 %v2981_v1 }
  0x2f   : > { %1071 = vmatpush1.bf16.msra.mxu0 %v2835_v13  ;;  %2809 = vmatpush1.bf16.msra.mxu1 %v2835_v13  ;;  %v2923_v13 = vld [vmem:[%s3039_s28 + $0x154] ss:$12 sps:$4 sm:$0xff]  }
  0x30   : > { %1072 = vmatprep.subr.bf16.mxu0 %v2981_v1  ;;  %2794 = vmatprep.subr.bf16.mxu1 %v2981_v1 }
  0x33   : > { %1073 = vmatpush1.bf16.msra.mxu0 %v2836_v14  ;;  %2810 = vmatpush1.bf16.msra.mxu1 %v2836_v14  ;;  %v2925_v14 = vld [vmem:[%s3039_s28 + $0x128] ss:$12 sps:$4 sm:$0xff]  }
  0x34   : > { %1074 = vmatprep.subr.bf16.mxu0 %v2981_v1  ;;  %2795 = vmatprep.subr.bf16.mxu1 %v2981_v1 }
  0x37   : > { %1075 = vmatpush1.bf16.msra.mxu0 %v2837_v15  ;;  %2811 = vmatpush1.bf16.msra.mxu1 %v2837_v15  ;;  %v2926_v15 = vld [vmem:[%s3039_s28 + $0x150] ss:$12 sps:$4 sm:$0xff]  }
  0x38   : > { %1076 = vmatprep.subr.bf16.mxu0 %v2981_v1  ;;  %2796 = vmatprep.subr.bf16.mxu1 %v2981_v1 }
  0x3b   : > { %1077 = vmatpush1.bf16.msra.mxu0 %v2838_v16  ;;  %2812 = vmatpush1.bf16.msra.mxu1 %v2838_v16  ;;  %v2927_v16 = vld [vmem:[%s3039_s28 + $0x140] ss:$12 sps:$4 sm:$0xff]  }
  0x3c   : > { %1078 = vmatprep.subr.bf16.mxu0 %v2981_v1  ;;  %2797 = vmatprep.subr.bf16.mxu1 %v2981_v1 }
  0x3f   : > { %1079 = vmatpush1.bf16.msra.mxu0 %v2839_v17  ;;  %2813 = vmatpush1.bf16.msra.mxu1 %v2839_v17  ;;  %v2928_v17 = vld [vmem:[%s3039_s28 + $0x16c] ss:$12 sps:$4 sm:$0xff]  }
  0x40   : > { %1080 = vmatprep.subr.bf16.mxu0 %v2981_v1  ;;  %2798 = vmatprep.subr.bf16.mxu1 %v2981_v1  ;;  %v2908_v1 = vld [vmem:[%s3039_s28 + $0x10c] ss:$12 sps:$4 sm:$0xff]  }
  0x43   : > { %1081 = vmatpush1.bf16.msra.mxu0 %v2840_v18  ;;  %2814 = vmatpush1.bf16.msra.mxu1 %v2840_v18  ;;  %v2930_v18 = vld [vmem:[%s3039_s28 + $0x158] ss:$12 sps:$4 sm:$0xff]  }
  0x44   : > { %2711 = vmatprep.subr.bf16.mxu1 %v2847_v19 }
  0x46   : > { %1083 = vmatmul.mubr.bf16.vlgmr.msra.gmra.mrb[0].mxu0 %v2841_v20  ;;  %1275 = vmatmul.mubr.bf16.vlgmr.msra.gmra.mrb[0].mxu1 %v2844_v21  ;;  %v2932_v20 = vld [vmem:[%s3039_s28 + $0x170] ss:$12 sps:$4 sm:$0xff]  }
  0x47   : > { %2712 = vmatpush3.bf16.msra.mxu1 %v2847_v19  ;;  %1090 = vmatprep.mubr.bf16.mxu0 %v2848_v22  ;;  %v2931_v19 = vld [vmem:[%s3039_s28 + $0x168] ss:$12 sps:$4 sm:$0xff]   ;;  %v2933_v21 = vld [vmem:[%s3039_s28 + $0x184] ss:$12 sps:$4 sm:$0xff]  }
  0x48   : > { %1282 = vmatprep.mubr.bf16.mxu1 %v2850_v23  ;;  %2713 = vmatprep.subr.bf16.mxu1 %v2860_v24  ;;  %v2935_v22 = vld [vmem:[%s3039_s28 + $0x188] ss:$12 sps:$4 sm:$0xff]   ;;  %v2936_v23 = vld [vmem:[%s3039_s28 + $0x180] ss:$12 sps:$4 sm:$0xff]  }
  0x4b   : > { %2714 = vmatpush3.bf16.msra.mxu1 %v2860_v24  ;;  %v2937_v24 = vld [vmem:[%s3039_s28 + $0x1a0] ss:$12 sps:$4 sm:$0xff]  }
  0x4c   : > { %2715 = vmatprep.subr.bf16.mxu1 %v2873_v26 }
  0x4e   : > { %1091 = vmatmul.mubr.bf16.gmra.mrb[4].mxu0 %v2852_v25  ;;  %1283 = vmatmul.mubr.bf16.gmra.mrb[4].mxu1 %v2853_v27  ;;  %v2938_v25 = vld [vmem:[%s3039_s28 + $0x19c] ss:$12 sps:$4 sm:$0xff]   ;;  %v2941_v27 = vld [vmem:[%s3039_s28 + $0x198] ss:$12 sps:$4 sm:$0xff]  }
  0x4f   : > { %1098 = vmatprep.mubr.bf16.mxu0 %v2854_v28  ;;  %1290 = vmatprep.mubr.bf16.mxu1 %v2856_v29  ;;  %v2942_v28 = vld [vmem:[%s3039_s28 + $0x1d0] ss:$12 sps:$4 sm:$0xff]   ;;  %v2943_v29 = vld [vmem:[%s3039_s28 + $0x1b4] ss:$12 sps:$4 sm:$0xff]  }
  0x50   : > { %2716 = vmatpush3.bf16.msra.mxu1 %v2873_v26  ;;  %v2940_v26 = vld [vmem:[%s3039_s28 + $0x1b8] ss:$12 sps:$4 sm:$0xff]  }
  0x51   : > { %2717 = vmatprep.subr.bf16.mxu1 %v2886_v30 }
  0x54   : > { %2718 = vmatpush3.bf16.msra.mxu1 %v2886_v30  ;;  %v2945_v30 = vld [vmem:[%s3039_s28 + $0x1e8] ss:$12 sps:$4 sm:$0xff]  }
  0x56   : > { %1099 = vmatmul.mubr.bf16.gmra.mrb[8].mxu0 %v2858_v31  ;;  %1291 = vmatmul.mubr.bf16.gmra.mrb[8].mxu1 %v2859_v32  ;;  %v2946_v31 = vld [vmem:[%s3039_s28 + $0x1b0] ss:$12 sps:$4 sm:$0xff]   ;;  %v2947_v32 = vld [vmem:[%s3039_s28 + $0x200] ss:$12 sps:$4 sm:$0xff]  }
  0x57   : > { %1106 = vmatprep.mubr.bf16.mxu0 %v2861_v33  ;;  %1298 = vmatprep.mubr.bf16.mxu1 %v2863_v34  ;;  %v2948_v33 = vld [vmem:[%s3039_s28 + $0x1cc] ss:$12 sps:$4 sm:$0xff]  }
  0x58   : > { %v2950_v34 = vld [vmem:[%s3039_s28 + $0x218] ss:$12 sps:$4 sm:$0xff]  }
  0x5e   : > { %1107 = vmatmul.mubr.bf16.gmra.mrb[12].mxu0 %v2865_v35  ;;  %1299 = vmatmul.mubr.bf16.gmra.mrb[12].mxu1 %v2866_v36  ;;  %v2951_v35 = vld [vmem:[%s3039_s28 + $0x1c8] ss:$12 sps:$4 sm:$0xff]   ;;  %v2952_v36 = vld [vmem:[%s3039_s28 + $0x230] ss:$12 sps:$4 sm:$0xff]  }
  0x5f   : > { %1114 = vmatprep.mubr.bf16.mxu0 %v2867_v37  ;;  %1306 = vmatprep.mubr.bf16.mxu1 %v2869_v38  ;;  %v2953_v37 = vld [vmem:[%s3039_s28 + $0x1e4] ss:$12 sps:$4 sm:$0xff]   ;;  %v2955_v38 = vld [vmem:[%s3039_s28 + $0x248] ss:$12 sps:$4 sm:$0xff]  }
  0x66   : > { %1115 = vmatmul.mubr.bf16.gmra.mrb[16].mxu0 %v2871_v39  ;;  %1307 = vmatmul.mubr.bf16.gmra.mrb[16].mxu1 %v2872_v40  ;;  %v2956_v39 = vld [vmem:[%s3039_s28 + $0x1e0] ss:$12 sps:$4 sm:$0xff]  }
  0x67   : > { %1122 = vmatprep.mubr.bf16.mxu0 %v2874_v41  ;;  %1314 = vmatprep.mubr.bf16.mxu1 %v2876_v42  ;;  %v2957_v40 = vld [vmem:[%s3039_s28 + $0x260] ss:$12 sps:$4 sm:$0xff]   ;;  %v2958_v41 = vld [vmem:[%s3039_s28 + $0x1fc] ss:$12 sps:$4 sm:$0xff]   ;;  %v2960_v42 = vld [vmem:[%s3039_s28 + $0x278] ss:$12 sps:$4 sm:$0xff]  }
  0x6e   : > { %1123 = vmatmul.mubr.bf16.gmra.mrb[20].mxu0 %v2878_v43  ;;  %1315 = vmatmul.mubr.bf16.gmra.mrb[20].mxu1 %v2879_v44  ;;  %v2961_v43 = vld [vmem:[%s3039_s28 + $0x1f8] ss:$12 sps:$4 sm:$0xff]   ;;  %v2962_v44 = vld [vmem:[%s3039_s28 + $0x290] ss:$12 sps:$4 sm:$0xff]  }
  0x6f   : > { %1130 = vmatprep.mubr.bf16.mxu0 %v2880_v45  ;;  %1322 = vmatprep.mubr.bf16.mxu1 %v2882_v46  ;;  %v2963_v45 = vld [vmem:[%s3039_s28 + $0x214] ss:$12 sps:$4 sm:$0xff]  }
  0x70   : > { %v2965_v46 = vld [vmem:[%s3039_s28 + $0x2a8] ss:$12 sps:$4 sm:$0xff]  }
  0x76   : > { %1131 = vmatmul.mubr.bf16.gmra.mrb[24].mxu0 %v2884_v47  ;;  %1323 = vmatmul.mubr.bf16.gmra.mrb[24].mxu1 %v2885_v48  ;;  %v2966_v47 = vld [vmem:[%s3039_s28 + $0x210] ss:$12 sps:$4 sm:$0xff]   ;;  %v2967_v48 = vld [vmem:[%s3039_s28 + $0x2c0] ss:$12 sps:$4 sm:$0xff]  }
  0x77   : > { %1138 = vmatprep.mubr.bf16.mxu0 %v2887_v49  ;;  %1330 = vmatprep.mubr.bf16.mxu1 %v2889_v50  ;;  %v2968_v49 = vld [vmem:[%s3039_s28 + $0x22c] ss:$12 sps:$4 sm:$0xff]  }
  0x78   : > { %v2970_v50 = vld [vmem:[%s3039_s28 + $0x2d8] ss:$12 sps:$4 sm:$0xff]  }
  0x7e   : > { %1139 = vmatmul.mubr.bf16.gmra.mrb[28].mxu0 %v2891_v51  ;;  %1331 = vmatmul.mubr.bf16.gmra.mrb[28].mxu1 %v2892_v52  ;;  %v2971_v51 = vld [vmem:[%s3039_s28 + $0x228] ss:$12 sps:$4 sm:$0xff]   ;;  %v2972_v52 = vld [vmem:[%s3039_s28 + $0x2f0] ss:$12 sps:$4 sm:$0xff]  }
  0x7f   : > { %1146 = vmatprep.mubr.bf16.mxu0 %v2893_v53  ;;  %2719 = vmatprep.mubr.msk.bf16.mxu1 %vm953_vm0, %v2895_v54 }
  0x86   : > { %1147 = vmatmul.mubr.bf16.gmra.mrb[32].mxu0 %v2896_v55  ;;  %2720 = vmatmul.mubr.msk.bf16.vlgmr.msra.gmra.mrb[32].mxu1 %vm953_vm0, %v2897_v56 }
  0x87   : > { %1154 = vmatprep.mubr.bf16.mxu0 %v2898_v57  ;;  %2723 = vmatprep.mubr.msk.bf16.mxu1 %vm953_vm0, %v2900_v58 }
  0x8e   : > { %1155 = vmatmul.mubr.bf16.gmra.mrb[36].mxu0 %v2901_v59  ;;  %2724 = vmatmul.mubr.msk.bf16.gmra.mrb[36].mxu1 %vm953_vm0, %v2902_v60 }
  0x8f   : > { %1162 = vmatprep.mubr.bf16.mxu0 %v2903_v61  ;;  %2727 = vmatprep.mubr.msk.bf16.mxu1 %vm953_vm0, %v2905_v62 }
  0x96   : > { %1163 = vmatmul.mubr.bf16.gmra.mrb[40].mxu0 %v2906_v63  ;;  %2728 = vmatmul.mubr.msk.bf16.gmra.mrb[40].mxu1 %vm953_vm0, %v2907_v0 }
  0x97   : > { %1170 = vmatprep.mubr.bf16.mxu0 %v2908_v1  ;;  %2731 = vmatprep.mubr.msk.bf16.mxu1 %vm953_vm0, %v2910_v2 }
  0x9e   : > { %1171 = vmatmul.mubr.bf16.gmra.mrb[44].mxu0 %v2911_v3  ;;  %2732 = vmatmul.mubr.msk.bf16.gmra.mrb[44].mxu1 %vm953_vm0, %v2912_v4 }
  0x9f   : > { %1178 = vmatprep.mubr.bf16.mxu0 %v2913_v5  ;;  %2735 = vmatprep.mubr.msk.bf16.mxu1 %vm953_vm0, %v2915_v6 }
  0xa6   : > { %1179 = vmatmul.mubr.bf16.gmra.mrb[48].mxu0 %v2916_v7  ;;  %2736 = vmatmul.mubr.msk.bf16.gmra.mrb[48].mxu1 %vm953_vm0, %v2917_v8 }
  0xa7   : > { %1186 = vmatprep.mubr.bf16.mxu0 %v2918_v9  ;;  %2739 = vmatprep.mubr.msk.bf16.mxu1 %vm953_vm0, %v2920_v10 }
  0xae   : > { %1187 = vmatmul.mubr.bf16.gmra.mrb[52].mxu0 %v2921_v11  ;;  %2740 = vmatmul.mubr.msk.bf16.gmra.mrb[52].mxu1 %vm953_vm0, %v2922_v12 }
  0xaf   : > { %1194 = vmatprep.mubr.bf16.mxu0 %v2923_v13  ;;  %2743 = vmatprep.mubr.msk.bf16.mxu1 %vm953_vm0, %v2925_v14 }
  0xb6   : > { %1195 = vmatmul.mubr.bf16.gmra.mrb[56].mxu0 %v2926_v15  ;;  %2744 = vmatmul.mubr.msk.bf16.gmra.mrb[56].mxu1 %vm953_vm0, %v2927_v16 }
  0xb7   : > { %1202 = vmatprep.mubr.bf16.mxu0 %v2928_v17  ;;  %2747 = vmatprep.mubr.msk.bf16.mxu1 %vm953_vm0, %v2930_v18 }
  0xbe   : > { %1203 = vmatmul.mubr.bf16.gmra.mrb[60].mxu0 %v2931_v19  ;;  %2748 = vmatmul.mubr.msk.bf16.gmra.mrb[60].mxu1 %vm953_vm0, %v2932_v20 }
  0xbf   : > { %1210 = vmatprep.mubr.bf16.mxu0 %v2933_v21  ;;  %2751 = vmatprep.mubr.msk.bf16.mxu1 %vm953_vm0, %v2935_v22 }
  0xc6   : > { %1211 = vmatmul.mubr.bf16.gmra.mrb[64].mxu0 %v2936_v23  ;;  %2752 = vmatmul.mubr.msk.bf16.gmra.mrb[64].mxu1 %vm953_vm0, %v2937_v24 }
  0xc7   : > { %1218 = vmatprep.mubr.bf16.mxu0 %v2938_v25  ;;  %2755 = vmatprep.mubr.msk.bf16.mxu1 %vm953_vm0, %v2940_v26 }
  0xce   : > { %1219 = vmatmul.mubr.bf16.gmra.mrb[68].mxu0 %v2941_v27  ;;  %2756 = vmatmul.mubr.msk.bf16.gmra.mrb[68].mxu1 %vm953_vm0, %v2942_v28 }
  0xcf   : > { %1226 = vmatprep.mubr.bf16.mxu0 %v2943_v29  ;;  %2759 = vmatprep.mubr.msk.bf16.mxu1 %vm953_vm0, %v2945_v30 }
  0xd6   : > { %1227 = vmatmul.mubr.bf16.gmra.mrb[72].mxu0 %v2946_v31  ;;  %2760 = vmatmul.mubr.msk.bf16.gmra.mrb[72].mxu1 %vm953_vm0, %v2947_v32 }
  0xd7   : > { %1234 = vmatprep.mubr.bf16.mxu0 %v2948_v33  ;;  %2763 = vmatprep.mubr.msk.bf16.mxu1 %vm953_vm0, %v2950_v34 }
  0xde   : > { %1235 = vmatmul.mubr.bf16.gmra.mrb[76].mxu0 %v2951_v35  ;;  %2764 = vmatmul.mubr.msk.bf16.gmra.mrb[76].mxu1 %vm953_vm0, %v2952_v36 }
  0xdf   : > { %1242 = vmatprep.mubr.bf16.mxu0 %v2953_v37  ;;  %2767 = vmatprep.mubr.msk.bf16.mxu1 %vm953_vm0, %v2955_v38 }
  0xe6   : > { %1243 = vmatmul.mubr.bf16.gmra.mrb[80].mxu0 %v2956_v39  ;;  %2768 = vmatmul.mubr.msk.bf16.gmra.mrb[80].mxu1 %vm953_vm0, %v2957_v40 }
  0xe7   : > { %1250 = vmatprep.mubr.bf16.mxu0 %v2958_v41  ;;  %2771 = vmatprep.mubr.msk.bf16.mxu1 %vm953_vm0, %v2960_v42 }
  0xee   : > { %1251 = vmatmul.mubr.bf16.gmra.mrb[84].mxu0 %v2961_v43  ;;  %2772 = vmatmul.mubr.msk.bf16.gmra.mrb[84].mxu1 %vm953_vm0, %v2962_v44 }
  0xef   : > { %1258 = vmatprep.mubr.bf16.mxu0 %v2963_v45  ;;  %2775 = vmatprep.mubr.msk.bf16.mxu1 %vm953_vm0, %v2965_v46 }
  0xf6   : > { %1259 = vmatmul.mubr.bf16.gmra.mrb[88].mxu0 %v2966_v47  ;;  %2776 = vmatmul.mubr.msk.bf16.gmra.mrb[88].mxu1 %vm953_vm0, %v2967_v48 }
  0xf7   : > { %1266 = vmatprep.mubr.bf16.mxu0 %v2968_v49  ;;  %2779 = vmatprep.mubr.msk.bf16.mxu1 %vm953_vm0, %v2970_v50 }
  0xfe   : > { %1267 = vmatmul.mubr.bf16.gmra.mrb[92].mxu0 %v2971_v51  ;;  %2780 = vmatmul.mubr.msk.bf16.gmra.mrb[92].mxu1 %vm953_vm0, %v2972_v52 }
 0x119   : > { %v3238_v53 = vpop.f32.mrb[0].mxu0  ;;  %v3240_v54 = vpop.f32.mrb[0].mxu1 }
 0x11a   : > { %v1086_v55 = vpop.f32.mrb[1].mxu0  ;;  %v1278_v56 = vpop.f32.mrb[1].mxu1 }
 0x11b   : > { %v3242_v57 = vpop.f32.mrb[2].mxu0  ;;  %v3244_v58 = vpop.f32.mrb[2].mxu1  ;;  %v3301_v55 = vld [vmem:[%s3478_s2] ss:$0 sm:$0xff] }
 0x11c   : > { %v1089_v59 = vpop.f32.mrb[3].mxu0  ;;  %v1281_v60 = vpop.f32.mrb[3].mxu1 }
 0x11d   : > { %v1085_v59 = vadd.f32 %v3301_v55, %v3238_v53 }
 0x121   : > { %v1092_v61 = vpop.f32.mrb[4].mxu0  ;;  %v3246_v62 = vpop.f32.mrb[4].mxu1 }
 0x122   : > { %v1094_v63 = vpop.f32.mrb[5].mxu0  ;;  %v1286_v0 = vpop.f32.mrb[5].mxu1  ;;  %v1093_v56 = vadd.f32 %v3301_v55, %v1092_v61 }
 0x123   : > { %v1095_v1 = vpop.f32.mrb[6].mxu0  ;;  %v3248_v2 = vpop.f32.mrb[6].mxu1 }
 0x124   : > { %v1097_v3 = vpop.f32.mrb[7].mxu0  ;;  %v1289_v4 = vpop.f32.mrb[7].mxu1  ;;  %v1096_v0 = vadd.f32 %v3301_v55, %v1095_v1 }
 0x129   : > { %v3250_v5 = vpop.f32.mrb[8].mxu0  ;;  %v3252_v6 = vpop.f32.mrb[8].mxu1 }
 0x12a   : > { %v1102_v7 = vpop.f32.mrb[9].mxu0  ;;  %v1294_v8 = vpop.f32.mrb[9].mxu1 }
 0x12b   : > { %v3254_v9 = vpop.f32.mrb[10].mxu0  ;;  %v3256_v10 = vpop.f32.mrb[10].mxu1  ;;  %v1088_v8 = vadd.f32 %v3301_v55, %v3242_v57 }
 0x12c   : > { %v1105_v11 = vpop.f32.mrb[11].mxu0  ;;  %v1297_v12 = vpop.f32.mrb[11].mxu1 }
 0x131   : > { %v3258_v13 = vpop.f32.mrb[12].mxu0  ;;  %v3260_v14 = vpop.f32.mrb[12].mxu1 }
 0x132   : > { %v1110_v15 = vpop.f32.mrb[13].mxu0  ;;  %v1302_v16 = vpop.f32.mrb[13].mxu1  ;;  %v1109_v57 = vadd.f32 %v3301_v55, %v3258_v13 }
 0x133   : > { %v3262_v17 = vpop.f32.mrb[14].mxu0  ;;  %v3264_v18 = vpop.f32.mrb[14].mxu1 }
 0x134   : > { %v1113_v19 = vpop.f32.mrb[15].mxu0  ;;  %v1305_v20 = vpop.f32.mrb[15].mxu1  ;;  %v1112_v13 = vadd.f32 %v3301_v55, %v3262_v17 }
 0x139   : > { %v3266_v21 = vpop.f32.mrb[16].mxu0  ;;  %v3268_v22 = vpop.f32.mrb[16].mxu1 }
 0x13a   : > { %v1118_v23 = vpop.f32.mrb[17].mxu0  ;;  %v1310_v24 = vpop.f32.mrb[17].mxu1 }
 0x13b   : > { %v3270_v25 = vpop.f32.mrb[18].mxu0  ;;  %v3272_v26 = vpop.f32.mrb[18].mxu1 }
 0x13c   : > { %v1121_v27 = vpop.f32.mrb[19].mxu0  ;;  %v1313_v28 = vpop.f32.mrb[19].mxu1 }
 0x141   : > { %v3274_v29 = vpop.f32.mrb[20].mxu0  ;;  %v3276_v30 = vpop.f32.mrb[20].mxu1 }
 0x142   : > { %v1126_v31 = vpop.f32.mrb[21].mxu0  ;;  %v1318_v32 = vpop.f32.mrb[21].mxu1 }
 0x143   : > { %v3278_v33 = vpop.f32.mrb[22].mxu0  ;;  %v3280_v34 = vpop.f32.mrb[22].mxu1  ;;  %v1101_v31 = vadd.f32 %v3301_v55, %v3250_v5 }
 0x144   : > { %v1129_v35 = vpop.f32.mrb[23].mxu0  ;;  %v1321_v36 = vpop.f32.mrb[23].mxu1 }
 0x149   : > { %v3282_v37 = vpop.f32.mrb[24].mxu0  ;;  %v3284_v38 = vpop.f32.mrb[24].mxu1 }
 0x14a   : > { %v1134_v39 = vpop.f32.mrb[25].mxu0  ;;  %v1326_v40 = vpop.f32.mrb[25].mxu1 }
 0x14b   : > { %v3286_v41 = vpop.f32.mrb[26].mxu0  ;;  %v3288_v42 = vpop.f32.mrb[26].mxu1 }
 0x14c   : > { %v1137_v43 = vpop.f32.mrb[27].mxu0  ;;  %v1329_v44 = vpop.f32.mrb[27].mxu1 }
 0x151   : > { %v3290_v45 = vpop.f32.mrb[28].mxu0  ;;  %v3292_v46 = vpop.f32.mrb[28].mxu1 }
 0x152   : > { %v1142_v47 = vpop.f32.mrb[29].mxu0  ;;  %v1334_v48 = vpop.f32.mrb[29].mxu1 }
 0x153   : > { %v3294_v49 = vpop.f32.mrb[30].mxu0  ;;  %v3296_v50 = vpop.f32.mrb[30].mxu1 }
 0x154   : > { %v1145_v51 = vpop.f32.mrb[31].mxu0  ;;  %v1337_v52 = vpop.f32.mrb[31].mxu1 }
 0x155   : > { %v1104_v51 = vadd.f32 %v3301_v55, %v3254_v9  ;;  %v1125_v9 = vadd.f32 %v3301_v55, %v3274_v29  ;;  %v1120_v29 = vadd.f32 %v3301_v55, %v3270_v25  ;;  %v1141_v25 = vadd.f32 %v3301_v55, %v3290_v45 }
 0x156   : > { %v1136_v45 = vadd.f32 %v3301_v55, %v3286_v41 }
 0x159   : > { %v3306_v60 = vpop.f32.mrb[32].mxu0  ;;  %v2721_v63 = vpop.f32.mrb[32].mxu1 }
 0x15a   : > { %v1382_v3 = vadd.f32 %v2721_v63, %v1093_v56  ;;  %v1150_v4 = vpop.f32.mrb[33].mxu0  ;;  %v1373_v7 = vpop.f32.mrb[33].mxu1 }
 0x15b   : > { %v1374_v11 = vadd.f32 %v1373_v7, %v1085_v59  ;;  %v3311_v12 = vpop.f32.mrb[34].mxu0  ;;  %v2722_v15 = vpop.f32.mrb[34].mxu1 }
 0x15c   : > { %v1694_v61 = vmul.f32 0.2, %v1382_v3  ;;  %v1385_v16 = vadd.f32 %v2722_v15, %v1096_v0  ;;  %v1153_v19 = vpop.f32.mrb[35].mxu0  ;;  %v1376_v53 = vpop.f32.mrb[35].mxu1  ;;  %vm1630_vm1 = vcmp.gt.f32.partialorder %v1382_v3, 0.0 }
 0x15d   : > { %v1692_v20 = vmul.f32 0.2, %v1374_v11  ;;  %v1377_v23 = vadd.f32 %v1376_v53, %v1088_v8  ;;  %vm1628_vm2 = vcmp.gt.f32.partialorder %v1374_v11, 0.0 }
 0x15e   : > { %vm1631_vm3 = vcmp.gt.f32.partialorder %v1385_v16, 0.0  ;;  %v1695_v1 = vmul.f32 0.2, %v1385_v16  ;;  %v1758_v27 = vsel %vm1630_vm1, %v1382_v3, %v1694_v61  ;;  %v1117_v61 = vadd.f32 %v3301_v55, %v3266_v21 }
 0x15f   : > { %vm1629_vm4 = vcmp.gt.f32.partialorder %v1377_v23, 0.0  ;;  %v1693_v24 = vmul.f32 0.2, %v1377_v23  ;;  %v1756_v32 = vsel %vm1628_vm2, %v1374_v11, %v1692_v20 }
 0x160   : > { %v1759_v28 = vsel %vm1631_vm3, %v1385_v16, %v1695_v1  ;;  %v1128_v1 = vadd.f32 %v3301_v55, %v3278_v33 }
 0x161   : > { %v2492_v35 = vpack.c.bf16 %v1759_v28, %v1758_v27  ;;  %v1757_v36 = vsel %vm1629_vm4, %v1377_v23, %v1693_v24  ;;  %v3323_v39 = vpop.f32.mrb[36].mxu0  ;;  %v2725_v40 = vpop.f32.mrb[36].mxu1 }
 0x162   : > { %v2487_v43 = vpack.c.bf16 %v1757_v36, %v1756_v32  ;;  %v1398_v44 = vadd.f32 %v2725_v40, %v1109_v57  ;;  %v1158_v47 = vpop.f32.mrb[37].mxu0  ;;  %v1389_v48 = vpop.f32.mrb[37].mxu1  ;;  %v1157_v41 = vadd.f32 %v3301_v55, %v3323_v39  ;;  %v1152_v39 = vadd.f32 %v3301_v55, %v3311_v12 }
 0x163   : > { %2644 = vst [vmem:[%s3319_s13 + $0x8] sm:$0xff] %v2492_v35   ;;  %v1390_v52 = vadd.f32 %v1389_v48, %v1101_v31  ;;  %v3330_v5 = vpop.f32.mrb[38].mxu0  ;;  %v2726_v56 = vpop.f32.mrb[38].mxu1 }
 0x164   : > { %2488 = vst [vmem:[%s3319_s13] sm:$0xff] %v2487_v43   ;;  %v1698_v59 = vmul.f32 0.2, %v1398_v44  ;;  %v1401_v63 = vadd.f32 %v2726_v56, %v1112_v13  ;;  %v1161_v0 = vpop.f32.mrb[39].mxu0  ;;  %v1392_v3 = vpop.f32.mrb[39].mxu1  ;;  %vm1634_vm5 = vcmp.gt.f32.partialorder %v1398_v44, 0.0 }
 0x165   : > { %v1696_v4 = vmul.f32 0.2, %v1390_v52  ;;  %v1393_v17 = vadd.f32 %v1392_v3, %v1104_v51  ;;  %vm1632_vm6 = vcmp.gt.f32.partialorder %v1390_v52, 0.0 }
 0x166   : > { %vm1635_vm7 = vcmp.gt.f32.partialorder %v1401_v63, 0.0  ;;  %v1699_v7 = vmul.f32 0.2, %v1401_v63  ;;  %v1762_v11 = vsel %vm1634_vm5, %v1398_v44, %v1698_v59 }
 0x167   : > { %vm1633_vm8 = vcmp.gt.f32.partialorder %v1393_v17, 0.0  ;;  %v1697_v8 = vmul.f32 0.2, %v1393_v17  ;;  %v1760_v16 = vsel %vm1632_vm6, %v1390_v52, %v1696_v4  ;;  %v1133_v52 = vadd.f32 %v3301_v55, %v3282_v37 }
 0x168   : > { %v1763_v15 = vsel %vm1635_vm7, %v1401_v63, %v1699_v7  ;;  %v1144_v4 = vadd.f32 %v3301_v55, %v3294_v49 }
 0x169   : > { %v2502_v19 = vpack.c.bf16 %v1763_v15, %v1762_v11  ;;  %v1761_v53 = vsel %vm1633_vm8, %v1393_v17, %v1697_v8  ;;  %v3337_v20 = vpop.f32.mrb[40].mxu0  ;;  %v2729_v23 = vpop.f32.mrb[40].mxu1 }
 0x16a   : > { %v2497_v24 = vpack.c.bf16 %v1761_v53, %v1760_v16  ;;  %v1414_v57 = vadd.f32 %v2729_v23, %v1125_v9  ;;  %v1166_v27 = vpop.f32.mrb[41].mxu0  ;;  %v1405_v28 = vpop.f32.mrb[41].mxu1 }
 0x16b   : > { %2646 = vst [vmem:[%s3319_s13 + $0x18] sm:$0xff] %v2502_v19   ;;  %v1406_v31 = vadd.f32 %v1405_v28, %v1117_v61  ;;  %v3344_v21 = vpop.f32.mrb[42].mxu0  ;;  %v2730_v32 = vpop.f32.mrb[42].mxu1  ;;  %v1149_v28 = vadd.f32 %v3301_v55, %v3306_v60 }
 0x16c   : > { %2645 = vst [vmem:[%s3319_s13 + $0x10] sm:$0xff] %v2497_v24   ;;  %v1702_v35 = vmul.f32 0.2, %v1414_v57  ;;  %v1417_v36 = vadd.f32 %v2730_v32, %v1128_v1  ;;  %v1169_v40 = vpop.f32.mrb[43].mxu0  ;;  %v1408_v13 = vpop.f32.mrb[43].mxu1  ;;  %vm1638_vm9 = vcmp.gt.f32.partialorder %v1414_v57, 0.0 }
 0x16d   : > { %v1700_v43 = vmul.f32 0.2, %v1406_v31  ;;  %v1409_v33 = vadd.f32 %v1408_v13, %v1120_v29  ;;  %vm1636_vm10 = vcmp.gt.f32.partialorder %v1406_v31, 0.0  ;;  %v1160_v40 = vadd.f32 %v3301_v55, %v3330_v5 }
 0x16e   : > { %vm1639_vm11 = vcmp.gt.f32.partialorder %v1417_v36, 0.0  ;;  %v1703_v44 = vmul.f32 0.2, %v1417_v36  ;;  %v1766_v48 = vsel %vm1638_vm9, %v1414_v57, %v1702_v35 }
 0x16f   : > { %vm1637_vm12 = vcmp.gt.f32.partialorder %v1409_v33, 0.0  ;;  %v1701_v47 = vmul.f32 0.2, %v1409_v33  ;;  %v1764_v56 = vsel %vm1636_vm10, %v1406_v31, %v1700_v43 }
 0x170   : > { %v1767_v51 = vsel %vm1639_vm11, %v1417_v36, %v1703_v44 }
 0x171   : > { %v2512_v59 = vpack.c.bf16 %v1767_v51, %v1766_v48  ;;  %v1765_v63 = vsel %vm1637_vm12, %v1409_v33, %v1701_v47  ;;  %v1172_v0 = vpop.f32.mrb[44].mxu0  ;;  %v2733_v3 = vpop.f32.mrb[44].mxu1 }
 0x172   : > { %v2507_v17 = vpack.c.bf16 %v1765_v63, %v1764_v56  ;;  %v1430_v7 = vadd.f32 %v2733_v3, %v1141_v25  ;;  %v1174_v8 = vpop.f32.mrb[45].mxu0  ;;  %v1421_v9 = vpop.f32.mrb[45].mxu1  ;;  %v1173_v12 = vadd.f32 %v3301_v55, %v1172_v0  ;;  %v1168_v0 = vadd.f32 %v3301_v55, %v3344_v21 }
 0x173   : > { %2648 = vst [vmem:[%s3319_s13 + $0x28] sm:$0xff] %v2512_v59   ;;  %v1422_v11 = vadd.f32 %v1421_v9, %v1133_v52  ;;  %v1175_v15 = vpop.f32.mrb[46].mxu0  ;;  %v2734_v37 = vpop.f32.mrb[46].mxu1 }
 0x174   : > { %2647 = vst [vmem:[%s3319_s13 + $0x20] sm:$0xff] %v2507_v17   ;;  %v1706_v61 = vmul.f32 0.2, %v1430_v7  ;;  %v1433_v16 = vadd.f32 %v2734_v37, %v1144_v4  ;;  %v1177_v19 = vpop.f32.mrb[47].mxu0  ;;  %v1424_v53 = vpop.f32.mrb[47].mxu1  ;;  %vm1642_vm13 = vcmp.gt.f32.partialorder %v1430_v7, 0.0 }
 0x175   : > { %v1704_v23 = vmul.f32 0.2, %v1422_v11  ;;  %v1425_v1 = vadd.f32 %v1424_v53, %v1136_v45  ;;  %vm1640_vm14 = vcmp.gt.f32.partialorder %v1422_v11, 0.0 }
 0x176   : > { %vm1643_vm15 = vcmp.gt.f32.partialorder %v1433_v16, 0.0  ;;  %v1707_v49 = vmul.f32 0.2, %v1433_v16  ;;  %v1770_v57 = vsel %vm1642_vm13, %v1430_v7, %v1706_v61  ;;  %v1165_v7 = vadd.f32 %v3301_v55, %v3337_v20 }
 0x177   : > { %vm1641_vm0 = vcmp.gt.f32.partialorder %v1425_v1, 0.0  ;;  %v1705_v24 = vmul.f32 0.2, %v1425_v1  ;;  %v1768_v29 = vsel %vm1640_vm14, %v1422_v11, %v1704_v23  ;;  %v1176_v61 = vadd.f32 %v3301_v55, %v1175_v15 }
 0x178   : > { %v1771_v27 = vsel %vm1643_vm15, %v1433_v16, %v1707_v49 }
 0x179   : > { %v2522_v31 = vpack.c.bf16 %v1771_v27, %v1770_v57  ;;  %v1769_v32 = vsel %vm1641_vm0, %v1425_v1, %v1705_v24  ;;  %v1180_v35 = vpop.f32.mrb[48].mxu0  ;;  %v2737_v36 = vpop.f32.mrb[48].mxu1 }
 0x17a   : > { %v2517_v13 = vpack.c.bf16 %v1769_v32, %v1768_v29  ;;  %v1446_v43 = vadd.f32 %v2737_v36, %v1157_v41  ;;  %v1182_v33 = vpop.f32.mrb[49].mxu0  ;;  %v1437_v44 = vpop.f32.mrb[49].mxu1 }
 0x17b   : > { %2650 = vst [vmem:[%s3319_s13 + $0x38] sm:$0xff] %v2522_v31   ;;  %v1438_v47 = vadd.f32 %v1437_v44, %v1149_v28  ;;  %v1183_v25 = vpop.f32.mrb[50].mxu0  ;;  %v2738_v60 = vpop.f32.mrb[50].mxu1 }
 0x17c   : > { %2649 = vst [vmem:[%s3319_s13 + $0x30] sm:$0xff] %v2517_v13   ;;  %v1710_v48 = vmul.f32 0.2, %v1446_v43  ;;  %v1449_v51 = vadd.f32 %v2738_v60, %v1160_v40  ;;  %v1185_v52 = vpop.f32.mrb[51].mxu0  ;;  %v1440_v56 = vpop.f32.mrb[51].mxu1  ;;  %vm1646_vm1 = vcmp.gt.f32.partialorder %v1446_v43, 0.0  ;;  %v1181_v40 = vadd.f32 %v3301_v55, %v1180_v35 }
 0x17d   : > { %v1708_v59 = vmul.f32 0.2, %v1438_v47  ;;  %v1441_v63 = vadd.f32 %v1440_v56, %v1152_v39  ;;  %vm1644_vm2 = vcmp.gt.f32.partialorder %v1438_v47, 0.0  ;;  %v1184_v56 = vadd.f32 %v3301_v55, %v1183_v25 }
 0x17e   : > { %vm1647_vm3 = vcmp.gt.f32.partialorder %v1449_v51, 0.0  ;;  %v1711_v5 = vmul.f32 0.2, %v1449_v51  ;;  %v1774_v4 = vsel %vm1646_vm1, %v1446_v43, %v1710_v48 }
 0x17f   : > { %vm1645_vm4 = vcmp.gt.f32.partialorder %v1441_v63, 0.0  ;;  %v1709_v3 = vmul.f32 0.2, %v1441_v63  ;;  %v1772_v8 = vsel %vm1644_vm2, %v1438_v47, %v1708_v59 }
 0x180   : > { %v1775_v17 = vsel %vm1647_vm3, %v1449_v51, %v1711_v5 }
 0x181   : > { %v2532_v9 = vpack.c.bf16 %v1775_v17, %v1774_v4  ;;  %v1773_v45 = vsel %vm1645_vm4, %v1441_v63, %v1709_v3  ;;  %v1188_v11 = vpop.f32.mrb[52].mxu0  ;;  %v2741_v37 = vpop.f32.mrb[52].mxu1 }
 0x182   : > { %v2527_v16 = vpack.c.bf16 %v1773_v45, %v1772_v8  ;;  %v1462_v19 = vadd.f32 %v2741_v37, %v1173_v12  ;;  %v1190_v53 = vpop.f32.mrb[53].mxu0  ;;  %v1453_v23 = vpop.f32.mrb[53].mxu1  ;;  %v1189_v21 = vadd.f32 %v3301_v55, %v1188_v11 }
 0x183   : > { %2652 = vst [vmem:[%s3319_s13 + $0x48] sm:$0xff] %v2532_v9   ;;  %v1454_v1 = vadd.f32 %v1453_v23, %v1165_v7  ;;  %v1191_v49 = vpop.f32.mrb[54].mxu0  ;;  %v2742_v24 = vpop.f32.mrb[54].mxu1 }
 0x184   : > { %2651 = vst [vmem:[%s3319_s13 + $0x40] sm:$0xff] %v2527_v16   ;;  %v1714_v20 = vmul.f32 0.2, %v1462_v19  ;;  %v1465_v41 = vadd.f32 %v2742_v24, %v1176_v61  ;;  %v1193_v57 = vpop.f32.mrb[55].mxu0  ;;  %v1456_v27 = vpop.f32.mrb[55].mxu1  ;;  %vm1650_vm5 = vcmp.gt.f32.partialorder %v1462_v19, 0.0  ;;  %v1192_v47 = vadd.f32 %v3301_v55, %v1191_v49 }
 0x185   : > { %v1712_v28 = vmul.f32 0.2, %v1454_v1  ;;  %v1457_v29 = vadd.f32 %v1456_v27, %v1168_v0  ;;  %vm1648_vm6 = vcmp.gt.f32.partialorder %v1454_v1, 0.0 }
 0x186   : > { %vm1651_vm7 = vcmp.gt.f32.partialorder %v1465_v41, 0.0  ;;  %v1715_v15 = vmul.f32 0.2, %v1465_v41  ;;  %v1778_v32 = vsel %vm1650_vm5, %v1462_v19, %v1714_v20 }
 0x187   : > { %vm1649_vm8 = vcmp.gt.f32.partialorder %v1457_v29, 0.0  ;;  %v1713_v31 = vmul.f32 0.2, %v1457_v29  ;;  %v1776_v13 = vsel %vm1648_vm6, %v1454_v1, %v1712_v28 }
 0x188   : > { %v1779_v36 = vsel %vm1651_vm7, %v1465_v41, %v1715_v15 }
 0x189   : > { %v2542_v43 = vpack.c.bf16 %v1779_v36, %v1778_v32  ;;  %v1777_v33 = vsel %vm1649_vm8, %v1457_v29, %v1713_v31  ;;  %v1196_v44 = vpop.f32.mrb[56].mxu0  ;;  %v2745_v39 = vpop.f32.mrb[56].mxu1 }
 0x18a   : > { %v2537_v60 = vpack.c.bf16 %v1777_v33, %v1776_v13  ;;  %v1478_v48 = vadd.f32 %v2745_v39, %v1189_v21  ;;  %v1198_v51 = vpop.f32.mrb[57].mxu0  ;;  %v1469_v52 = vpop.f32.mrb[57].mxu1  ;;  %v1197_v11 = vadd.f32 %v3301_v55, %v1196_v44 }
 0x18b   : > { %2654 = vst [vmem:[%s3319_s13 + $0x58] sm:$0xff] %v2542_v43   ;;  %v1470_v59 = vadd.f32 %v1469_v52, %v1181_v40  ;;  %v1199_v63 = vpop.f32.mrb[58].mxu0  ;;  %v2746_v5 = vpop.f32.mrb[58].mxu1 }
 0x18c   : > { %2653 = vst [vmem:[%s3319_s13 + $0x50] sm:$0xff] %v2537_v60   ;;  %v1718_v35 = vmul.f32 0.2, %v1478_v48  ;;  %v1481_v3 = vadd.f32 %v2746_v5, %v1192_v47  ;;  %v1201_v12 = vpop.f32.mrb[59].mxu0  ;;  %v1472_v4 = vpop.f32.mrb[59].mxu1  ;;  %vm1654_vm9 = vcmp.gt.f32.partialorder %v1478_v48, 0.0  ;;  %v1200_v24 = vadd.f32 %v3301_v55, %v1199_v63 }
 0x18d   : > { %v1716_v17 = vmul.f32 0.2, %v1470_v59  ;;  %v1473_v7 = vadd.f32 %v1472_v4, %v1184_v56  ;;  %vm1652_vm10 = vcmp.gt.f32.partialorder %v1470_v59, 0.0 }
 0x18e   : > { %vm1655_vm11 = vcmp.gt.f32.partialorder %v1481_v3, 0.0  ;;  %v1719_v8 = vmul.f32 0.2, %v1481_v3  ;;  %v1782_v45 = vsel %vm1654_vm9, %v1478_v48, %v1718_v35 }
 0x18f   : > { %vm1653_vm12 = vcmp.gt.f32.partialorder %v1473_v7, 0.0  ;;  %v1717_v9 = vmul.f32 0.2, %v1473_v7  ;;  %v1780_v37 = vsel %vm1652_vm10, %v1470_v59, %v1716_v17 }
 0x190   : > { %v1783_v25 = vsel %vm1655_vm11, %v1481_v3, %v1719_v8 }
 0x191   : > { %v2552_v61 = vpack.c.bf16 %v1783_v25, %v1782_v45  ;;  %v1781_v16 = vsel %vm1653_vm12, %v1473_v7, %v1717_v9  ;;  %v1204_v19 = vpop.f32.mrb[60].mxu0  ;;  %v2749_v53 = vpop.f32.mrb[60].mxu1 }
 0x192   : > { %v2547_v23 = vpack.c.bf16 %v1781_v16, %v1780_v37  ;;  %v1205_v0 = vadd.f32 %v3301_v55, %v1204_v19  ;;  %v1206_v1 = vpop.f32.mrb[61].mxu0  ;;  %v1485_v49 = vpop.f32.mrb[61].mxu1 }
 0x193   : > { %2656 = vst [vmem:[%s3319_s13 + $0x68] sm:$0xff] %v2552_v61   ;;  %v1486_v20 = vadd.f32 %v1485_v49, %v1197_v11  ;;  %v1207_v41 = vpop.f32.mrb[62].mxu0  ;;  %v2750_v57 = vpop.f32.mrb[62].mxu1 }
 0x194   : > { %2655 = vst [vmem:[%s3319_s13 + $0x60] sm:$0xff] %v2547_v23   ;;  %v1494_v27 = vadd.f32 %v2749_v53, %v1205_v0  ;;  %v1208_v28 = vadd.f32 %v3301_v55, %v1207_v41  ;;  %v1209_v29 = vpop.f32.mrb[63].mxu0  ;;  %v1488_v15 = vpop.f32.mrb[63].mxu1 }
 0x195   : > { %v1720_v31 = vmul.f32 0.2, %v1486_v20  ;;  %v1489_v21 = vadd.f32 %v1488_v15, %v1200_v24  ;;  %vm1656_vm13 = vcmp.gt.f32.partialorder %v1486_v20, 0.0 }
 0x196   : > { %v1722_v32 = vmul.f32 0.2, %v1494_v27  ;;  %v1497_v36 = vadd.f32 %v2750_v57, %v1208_v28  ;;  %vm1658_vm14 = vcmp.gt.f32.partialorder %v1494_v27, 0.0 }
 0x197   : > { %vm1657_vm15 = vcmp.gt.f32.partialorder %v1489_v21, 0.0  ;;  %v1721_v40 = vmul.f32 0.2, %v1489_v21  ;;  %v1784_v43 = vsel %vm1656_vm13, %v1486_v20, %v1720_v31 }
 0x198   : > { %vm1659_vm0 = vcmp.gt.f32.partialorder %v1497_v36, 0.0  ;;  %v1723_v13 = vmul.f32 0.2, %v1497_v36  ;;  %v1786_v47 = vsel %vm1658_vm14, %v1494_v27, %v1722_v32 }
 0x199   : > { %v1785_v33 = vsel %vm1657_vm15, %v1489_v21, %v1721_v40  ;;  %v1212_v44 = vpop.f32.mrb[64].mxu0  ;;  %v2753_v39 = vpop.f32.mrb[64].mxu1 }
 0x19a   : > { %v1787_v60 = vsel %vm1659_vm0, %v1497_v36, %v1723_v13  ;;  %v2557_v48 = vpack.c.bf16 %v1785_v33, %v1784_v43  ;;  %v1213_v51 = vadd.f32 %v3301_v55, %v1212_v44  ;;  %v1214_v52 = vpop.f32.mrb[65].mxu0  ;;  %v1501_v56 = vpop.f32.mrb[65].mxu1 }
 0x19b   : > { %v2562_v59 = vpack.c.bf16 %v1787_v60, %v1786_v47  ;;  %v1215_v63 = vpop.f32.mrb[66].mxu0  ;;  %v2754_v5 = vpop.f32.mrb[66].mxu1 }
 0x19c   : > { %2657 = vst [vmem:[%s3319_s13 + $0x70] sm:$0xff] %v2557_v48   ;;  %v1502_v35 = vadd.f32 %v1501_v56, %v1213_v51  ;;  %v1216_v3 = vadd.f32 %v3301_v55, %v1215_v63  ;;  %v1217_v12 = vpop.f32.mrb[67].mxu0  ;;  %v1504_v4 = vpop.f32.mrb[67].mxu1 }
 0x19d   : > { %2658 = vst [vmem:[%s3319_s13 + $0x78] sm:$0xff] %v2562_v59  }
 0x19e   : > { %v1724_v17 = vmul.f32 0.2, %v1502_v35  ;;  %v1505_v7 = vadd.f32 %v1504_v4, %v1216_v3  ;;  %vm1660_vm1 = vcmp.gt.f32.partialorder %v1502_v35, 0.0 }
 0x1a0   : > { %vm1661_vm2 = vcmp.gt.f32.partialorder %v1505_v7, 0.0  ;;  %v1725_v8 = vmul.f32 0.2, %v1505_v7  ;;  %v1788_v25 = vsel %vm1660_vm1, %v1502_v35, %v1724_v17 }
 0x1a1   : > { %v1220_v9 = vpop.f32.mrb[68].mxu0  ;;  %v2757_v45 = vpop.f32.mrb[68].mxu1 }
 0x1a2   : > { %v1789_v11 = vsel %vm1661_vm2, %v1505_v7, %v1725_v8  ;;  %v1221_v37 = vadd.f32 %v3301_v55, %v1220_v9  ;;  %v1222_v61 = vpop.f32.mrb[69].mxu0  ;;  %v1517_v16 = vpop.f32.mrb[69].mxu1 }
 0x1a3   : > { %v2567_v19 = vpack.c.bf16 %v1789_v11, %v1788_v25  ;;  %v1223_v53 = vpop.f32.mrb[70].mxu0  ;;  %v2758_v23 = vpop.f32.mrb[70].mxu1 }
 0x1a4   : > { %v1510_v0 = vadd.f32 %v2753_v39, %v1221_v37  ;;  %v1224_v1 = vadd.f32 %v3301_v55, %v1223_v53  ;;  %v1225_v49 = vpop.f32.mrb[71].mxu0  ;;  %v1520_v24 = vpop.f32.mrb[71].mxu1  ;;  %v1285_v37 = vadd.f32 %v3301_v55, %v3246_v62  ;;  %v1288_v62 = vadd.f32 %v3301_v55, %v3248_v2 }
 0x1a5   : > { %2659 = vst [vmem:[%s3319_s13 + $0x80] sm:$0xff] %v2567_v19  }
 0x1a6   : > { %v1726_v20 = vmul.f32 0.2, %v1510_v0  ;;  %v1513_v41 = vadd.f32 %v2754_v5, %v1224_v1  ;;  %vm1662_vm3 = vcmp.gt.f32.partialorder %v1510_v0, 0.0 }
 0x1a8   : > { %vm1663_vm4 = vcmp.gt.f32.partialorder %v1513_v41, 0.0  ;;  %v1727_v57 = vmul.f32 0.2, %v1513_v41  ;;  %v1790_v29 = vsel %vm1662_vm3, %v1510_v0, %v1726_v20 }
 0x1a9   : > { %v1228_v27 = vpop.f32.mrb[72].mxu0  ;;  %v3394_v28 = vpop.f32.mrb[72].mxu1 }
 0x1aa   : > { %v1791_v15 = vsel %vm1663_vm4, %v1513_v41, %v1727_v57  ;;  %v1229_v31 = vadd.f32 %v3301_v55, %v1228_v27  ;;  %v1230_v21 = vpop.f32.mrb[73].mxu0  ;;  %v1533_v32 = vpop.f32.mrb[73].mxu1  ;;  %v1293_v41 = vadd.f32 %v3301_v55, %v3252_v6 }
 0x1ab   : > { %v2572_v36 = vpack.c.bf16 %v1791_v15, %v1790_v29  ;;  %v1231_v40 = vpop.f32.mrb[74].mxu0  ;;  %v3397_v13 = vpop.f32.mrb[74].mxu1  ;;  %v1296_v29 = vadd.f32 %v3301_v55, %v3256_v10 }
 0x1ac   : > { %v1518_v43 = vadd.f32 %v1517_v16, %v1229_v31  ;;  %v1232_v33 = vadd.f32 %v3301_v55, %v1231_v40  ;;  %v1233_v44 = vpop.f32.mrb[75].mxu0  ;;  %v1536_v39 = vpop.f32.mrb[75].mxu1  ;;  %v1277_v16 = vadd.f32 %v3301_v55, %v3240_v54 }
 0x1ad   : > { %2660 = vst [vmem:[%s3319_s13 + $0x88] sm:$0xff] %v2572_v36  }
 0x1ae   : > { %v1728_v47 = vmul.f32 0.2, %v1518_v43  ;;  %v1521_v60 = vadd.f32 %v1520_v24, %v1232_v33  ;;  %vm1664_vm5 = vcmp.gt.f32.partialorder %v1518_v43, 0.0 }
 0x1b0   : > { %vm1665_vm6 = vcmp.gt.f32.partialorder %v1521_v60, 0.0  ;;  %v1729_v48 = vmul.f32 0.2, %v1521_v60  ;;  %v1792_v56 = vsel %vm1664_vm5, %v1518_v43, %v1728_v47  ;;  %v1301_v47 = vadd.f32 %v3301_v55, %v3260_v14 }
 0x1b1   : > { %v1236_v51 = vpop.f32.mrb[76].mxu0  ;;  %v3401_v52 = vpop.f32.mrb[76].mxu1 }
 0x1b2   : > { %v1793_v59 = vsel %vm1665_vm6, %v1521_v60, %v1729_v48  ;;  %v1237_v63 = vadd.f32 %v3301_v55, %v1236_v51  ;;  %v1238_v5 = vpop.f32.mrb[77].mxu0  ;;  %v3404_v35 = vpop.f32.mrb[77].mxu1 }
 0x1b3   : > { %v2577_v3 = vpack.c.bf16 %v1793_v59, %v1792_v56  ;;  %v1239_v12 = vpop.f32.mrb[78].mxu0  ;;  %v3406_v4 = vpop.f32.mrb[78].mxu1 }
 0x1b4   : > { %v1526_v17 = vadd.f32 %v2757_v45, %v1237_v63  ;;  %v1240_v7 = vadd.f32 %v3301_v55, %v1239_v12  ;;  %v1241_v8 = vpop.f32.mrb[79].mxu0  ;;  %v3409_v9 = vpop.f32.mrb[79].mxu1  ;;  %v1280_v45 = vadd.f32 %v3301_v55, %v3244_v58 }
 0x1b5   : > { %2661 = vst [vmem:[%s3319_s13 + $0x90] sm:$0xff] %v2577_v3  }
 0x1b6   : > { %v1730_v25 = vmul.f32 0.2, %v1526_v17  ;;  %v1529_v11 = vadd.f32 %v2758_v23, %v1240_v7  ;;  %vm1666_vm7 = vcmp.gt.f32.partialorder %v1526_v17, 0.0 }
 0x1b8   : > { %vm1667_vm8 = vcmp.gt.f32.partialorder %v1529_v11, 0.0  ;;  %v1731_v61 = vmul.f32 0.2, %v1529_v11  ;;  %v1794_v0 = vsel %vm1666_vm7, %v1526_v17, %v1730_v25 }
 0x1b9   : > { %v1244_v19 = vpop.f32.mrb[80].mxu0  ;;  %v2769_v53 = vpop.f32.mrb[80].mxu1 }
 0x1ba   : > { %v1795_v1 = vsel %vm1667_vm8, %v1529_v11, %v1731_v61  ;;  %v1245_v49 = vadd.f32 %v3301_v55, %v1244_v19  ;;  %v1574_v23 = vadd.f32 %v2769_v53, %v1285_v37  ;;  %v1246_v24 = vpop.f32.mrb[81].mxu0  ;;  %v1565_v20 = vpop.f32.mrb[81].mxu1 }
 0x1bb   : > { %v2582_v54 = vpack.c.bf16 %v1795_v1, %v1794_v0  ;;  %v1566_v57 = vadd.f32 %v1565_v20, %v1277_v16  ;;  %v1247_v27 = vpop.f32.mrb[82].mxu0  ;;  %v2770_v58 = vpop.f32.mrb[82].mxu1  ;;  %v1317_v24 = vadd.f32 %v3301_v55, %v3276_v30 }
 0x1bc   : > { %v1534_v15 = vadd.f32 %v1533_v32, %v1245_v49  ;;  %vm1678_vm9 = vcmp.gt.f32.partialorder %v1574_v23, 0.0  ;;  %v1248_v31 = vadd.f32 %v3301_v55, %v1247_v27  ;;  %v1249_v21 = vpop.f32.mrb[83].mxu0  ;;  %v1568_v36 = vpop.f32.mrb[83].mxu1  ;;  %v1742_v40 = vmul.f32 0.2, %v1574_v23 }
 0x1bd   : > { %2662 = vst [vmem:[%s3319_s13 + $0x98] sm:$0xff] %v2582_v54   ;;  %v1740_v43 = vmul.f32 0.2, %v1566_v57  ;;  %v1577_v2 = vadd.f32 %v2770_v58, %v1288_v62  ;;  %v1569_v33 = vadd.f32 %v1568_v36, %v1280_v45  ;;  %vm1676_vm11 = vcmp.gt.f32.partialorder %v1566_v57, 0.0 }
 0x1be   : > { %vm1668_vm10 = vcmp.gt.f32.partialorder %v1534_v15, 0.0  ;;  %v1732_v6 = vmul.f32 0.2, %v1534_v15  ;;  %v1537_v44 = vadd.f32 %v1536_v39, %v1248_v31  ;;  %v1304_v32 = vadd.f32 %v3301_v55, %v3264_v18 }
 0x1bf   : > { %vm1679_vm12 = vcmp.gt.f32.partialorder %v1577_v2, 0.0  ;;  %v1743_v10 = vmul.f32 0.2, %v1577_v2  ;;  %vm1677_vm13 = vcmp.gt.f32.partialorder %v1569_v33, 0.0  ;;  %v1741_v48 = vmul.f32 0.2, %v1569_v33 }
 0x1c0   : > { %vm1669_vm14 = vcmp.gt.f32.partialorder %v1537_v44, 0.0  ;;  %v1733_v60 = vmul.f32 0.2, %v1537_v44  ;;  %v1796_v51 = vsel %vm1668_vm10, %v1534_v15, %v1732_v6  ;;  %v1806_v56 = vsel %vm1678_vm9, %v1574_v23, %v1742_v40 }
 0x1c1   : > { %v1804_v59 = vsel %vm1676_vm11, %v1566_v57, %v1740_v43  ;;  %v1807_v63 = vsel %vm1679_vm12, %v1577_v2, %v1743_v10  ;;  %v1252_v5 = vpop.f32.mrb[84].mxu0  ;;  %v2773_v39 = vpop.f32.mrb[84].mxu1  ;;  %v1805_v14 = vsel %vm1677_vm13, %v1569_v33, %v1741_v48  ;;  %v1309_v45 = vadd.f32 %v3301_v55, %v3268_v22 }
 0x1c2   : > { %v1797_v3 = vsel %vm1669_vm14, %v1537_v44, %v1733_v60  ;;  %v2612_v12 = vpack.c.bf16 %v1807_v63, %v1806_v56  ;;  %v1253_v17 = vadd.f32 %v3301_v55, %v1252_v5  ;;  %v1254_v7 = vpop.f32.mrb[85].mxu0  ;;  %v1581_v8 = vpop.f32.mrb[85].mxu1  ;;  %v2607_v25 = vpack.c.bf16 %v1805_v14, %v1804_v59 }
 0x1c3   : > { %v2587_v18 = vpack.c.bf16 %v1797_v3, %v1796_v51  ;;  %v1590_v11 = vadd.f32 %v2773_v39, %v1301_v47  ;;  %v1582_v37 = vadd.f32 %v1581_v8, %v1293_v41  ;;  %v1255_v61 = vpop.f32.mrb[86].mxu0  ;;  %v2774_v16 = vpop.f32.mrb[86].mxu1  ;;  %v1312_v23 = vadd.f32 %v3301_v55, %v3272_v26 }
 0x1c4   : > { %2668 = vst [vmem:[%s3319_s13 + $0xc8] sm:$0xff] %v2612_v12   ;;  %v1542_v19 = vadd.f32 %v3394_v28, %v1253_v17  ;;  %v1256_v53 = vadd.f32 %v3301_v55, %v1255_v61  ;;  %v1593_v0 = vadd.f32 %v2774_v16, %v1304_v32  ;;  %v1257_v1 = vpop.f32.mrb[87].mxu0  ;;  %v1584_v49 = vpop.f32.mrb[87].mxu1  ;;  %2667 = vst [vmem:[%s3319_s13 + $0xc0] sm:$0xff] %v2607_v25  }
 0x1c5   : > { %2663 = vst [vmem:[%s3319_s13 + $0xa0] sm:$0xff] %v2587_v18   ;;  %vm1682_vm15 = vcmp.gt.f32.partialorder %v1590_v11, 0.0  ;;  %v1746_v20 = vmul.f32 0.2, %v1590_v11  ;;  %v1320_v28 = vadd.f32 %v3301_v55, %v3280_v34  ;;  %v1744_v41 = vmul.f32 0.2, %v1582_v37 }
 0x1c6   : > { %vm1670_vm0 = vcmp.gt.f32.partialorder %v1542_v19, 0.0  ;;  %v1734_v22 = vmul.f32 0.2, %v1542_v19  ;;  %v1545_v62 = vadd.f32 %v3397_v13, %v1256_v53  ;;  %vm1683_vm1 = vcmp.gt.f32.partialorder %v1593_v0, 0.0 }
 0x1c7   : > { %v1747_v54 = vmul.f32 0.2, %v1593_v0  ;;  %v1585_v57 = vadd.f32 %v1584_v49, %v1296_v29  ;;  %v1810_v27 = vsel %vm1682_vm15, %v1590_v11, %v1746_v20  ;;  %vm1680_vm2 = vcmp.gt.f32.partialorder %v1582_v37, 0.0 }
 0x1c8   : > { %vm1671_vm3 = vcmp.gt.f32.partialorder %v1545_v62, 0.0  ;;  %v1735_v26 = vmul.f32 0.2, %v1545_v62  ;;  %v1798_v30 = vsel %vm1670_vm0, %v1542_v19, %v1734_v22  ;;  %v1808_v29 = vsel %vm1680_vm2, %v1582_v37, %v1744_v41 }
 0x1c9   : > { %v1811_v58 = vsel %vm1683_vm1, %v1593_v0, %v1747_v54  ;;  %vm1681_vm4 = vcmp.gt.f32.partialorder %v1585_v57, 0.0  ;;  %v1745_v15 = vmul.f32 0.2, %v1585_v57  ;;  %v1260_v31 = vpop.f32.mrb[88].mxu0  ;;  %v2777_v21 = vpop.f32.mrb[88].mxu1  ;;  %v1325_v32 = vadd.f32 %v3301_v55, %v3284_v38 }
 0x1ca   : > { %v1799_v36 = vsel %vm1671_vm3, %v1545_v62, %v1735_v26  ;;  %v2622_v13 = vpack.c.bf16 %v1811_v58, %v1810_v27  ;;  %v1261_v40 = vadd.f32 %v3301_v55, %v1260_v31  ;;  %v1606_v43 = vadd.f32 %v2777_v21, %v1317_v24  ;;  %v1262_v34 = vpop.f32.mrb[89].mxu0  ;;  %v1597_v2 = vpop.f32.mrb[89].mxu1 }
 0x1cb   : > { %v2592_v33 = vpack.c.bf16 %v1799_v36, %v1798_v30  ;;  %v1809_v6 = vsel %vm1681_vm4, %v1585_v57, %v1745_v15  ;;  %v1598_v44 = vadd.f32 %v1597_v2, %v1309_v45  ;;  %v1263_v47 = vpop.f32.mrb[90].mxu0  ;;  %v2778_v10 = vpop.f32.mrb[90].mxu1  ;;  %v1333_v3 = vadd.f32 %v3301_v55, %v3292_v46 }
 0x1cc   : > { %2670 = vst [vmem:[%s3319_s13 + $0xd8] sm:$0xff] %v2622_v13   ;;  %v2617_v60 = vpack.c.bf16 %v1809_v6, %v1808_v29  ;;  %v1550_v48 = vadd.f32 %v3404_v35, %v1261_v40  ;;  %v1750_v51 = vmul.f32 0.2, %v1606_v43  ;;  %v1265_v56 = vpop.f32.mrb[91].mxu0  ;;  %v1600_v59 = vpop.f32.mrb[91].mxu1  ;;  %vm1686_vm5 = vcmp.gt.f32.partialorder %v1606_v43, 0.0 }
 0x1cd   : > { %2664 = vst [vmem:[%s3319_s13 + $0xa8] sm:$0xff] %v2592_v33   ;;  %v1748_v63 = vmul.f32 0.2, %v1598_v44  ;;  %v1264_v5 = vadd.f32 %v3301_v55, %v1263_v47  ;;  %v1609_v39 = vadd.f32 %v2778_v10, %v1320_v28  ;;  %v1336_v12 = vadd.f32 %v3301_v55, %v3296_v50 }
 0x1ce   : > { %2669 = vst [vmem:[%s3319_s13 + $0xd0] sm:$0xff] %v2617_v60   ;;  %vm1684_vm6 = vcmp.gt.f32.partialorder %v1598_v44, 0.0  ;;  %v1601_v38 = vadd.f32 %v1600_v59, %v1312_v23  ;;  %v1736_v14 = vmul.f32 0.2, %v1550_v48  ;;  %vm1672_vm8 = vcmp.gt.f32.partialorder %v1550_v48, 0.0 }
 0x1cf   : > { %v1553_v35 = vadd.f32 %v3409_v9, %v1264_v5  ;;  %vm1687_vm7 = vcmp.gt.f32.partialorder %v1609_v39, 0.0  ;;  %v1751_v17 = vmul.f32 0.2, %v1609_v39  ;;  %v1814_v7 = vsel %vm1686_vm5, %v1606_v43, %v1750_v51 }
 0x1d0   : > { %vm1685_vm9 = vcmp.gt.f32.partialorder %v1601_v38, 0.0  ;;  %v1749_v8 = vmul.f32 0.2, %v1601_v38  ;;  %v1812_v18 = vsel %vm1684_vm6, %v1598_v44, %v1748_v63  ;;  %v1800_v53 = vsel %vm1672_vm8, %v1550_v48, %v1736_v14 }
 0x1d1   : > { %vm1673_vm10 = vcmp.gt.f32.partialorder %v1553_v35, 0.0  ;;  %v1737_v25 = vmul.f32 0.2, %v1553_v35  ;;  %v1815_v11 = vsel %vm1687_vm7, %v1609_v39, %v1751_v17  ;;  %v1268_v46 = vpop.f32.mrb[92].mxu0  ;;  %v2781_v37 = vpop.f32.mrb[92].mxu1  ;;  %v1328_v20 = vadd.f32 %v3301_v55, %v3288_v42 }
 0x1d2   : > { %v2632_v50 = vpack.c.bf16 %v1815_v11, %v1814_v7  ;;  %v1813_v61 = vsel %vm1685_vm9, %v1601_v38, %v1749_v8  ;;  %v1269_v16 = vadd.f32 %v3301_v55, %v1268_v46  ;;  %v1622_v45 = vadd.f32 %v2781_v37, %v1333_v3  ;;  %v1270_v9 = vpop.f32.mrb[93].mxu0  ;;  %v1613_v19 = vpop.f32.mrb[93].mxu1 }
 0x1d3   : > { %v1801_v0 = vsel %vm1673_vm10, %v1553_v35, %v1737_v25  ;;  %v2627_v1 = vpack.c.bf16 %v1813_v61, %v1812_v18  ;;  %v1614_v49 = vadd.f32 %v1613_v19, %v1325_v32  ;;  %v1271_v23 = vpop.f32.mrb[94].mxu0  ;;  %v2782_v24 = vpop.f32.mrb[94].mxu1 }
 0x1d4   : > { %v2597_v22 = vpack.c.bf16 %v1801_v0, %v1800_v53  ;;  %2672 = vst [vmem:[%s3319_s13 + $0xe8] sm:$0xff] %v2632_v50   ;;  %v1558_v62 = vadd.f32 %v3401_v52, %v1269_v16  ;;  %v1273_v28 = vpop.f32.mrb[95].mxu0  ;;  %v1616_v41 = vpop.f32.mrb[95].mxu1  ;;  %v1754_v54 = vmul.f32 0.2, %v1622_v45  ;;  %v1272_v57 = vadd.f32 %v3301_v55, %v1271_v23 }
 0x1d5   : > { %2671 = vst [vmem:[%s3319_s13 + $0xe0] sm:$0xff] %v2627_v1   ;;  %v1625_v27 = vadd.f32 %v2782_v24, %v1336_v12  ;;  %vm1690_vm11 = vcmp.gt.f32.partialorder %v1622_v45, 0.0  ;;  %vm1688_vm12 = vcmp.gt.f32.partialorder %v1614_v49, 0.0  ;;  %v1752_v26 = vmul.f32 0.2, %v1614_v49 }
 0x1d6   : > { %2665 = vst [vmem:[%s3319_s13 + $0xb0] sm:$0xff] %v2597_v22   ;;  %v1617_v30 = vadd.f32 %v1616_v41, %v1328_v20  ;;  %v1738_v58 = vmul.f32 0.2, %v1558_v62  ;;  %v1561_v15 = vadd.f32 %v3406_v4, %v1272_v57  ;;  %vm1674_vm14 = vcmp.gt.f32.partialorder %v1558_v62, 0.0 }
 0x1d7   : > { %vm1691_vm13 = vcmp.gt.f32.partialorder %v1625_v27, 0.0  ;;  %v1755_v42 = vmul.f32 0.2, %v1625_v27  ;;  %v1818_v31 = vsel %vm1690_vm11, %v1622_v45, %v1754_v54  ;;  %v1816_v36 = vsel %vm1688_vm12, %v1614_v49, %v1752_v26 }
 0x1d8   : > { %vm1689_vm15 = vcmp.gt.f32.partialorder %v1617_v30, 0.0  ;;  %v1753_v52 = vmul.f32 0.2, %v1617_v30  ;;  %vm1675_vm0 = vcmp.gt.f32.partialorder %v1561_v15, 0.0  ;;  %v1739_v55 = vmul.f32 0.2, %v1561_v15 }
 0x1d9   : > { %v1819_v21 = vsel %vm1691_vm13, %v1625_v27, %v1755_v42  ;;  %v1802_v43 = vsel %vm1674_vm14, %v1558_v62, %v1738_v58 }
 0x1da   : > { %v2642_v13 = vpack.c.bf16 %v1819_v21, %v1818_v31  ;;  %v1817_v40 = vsel %vm1689_vm15, %v1617_v30, %v1753_v52  ;;  %v1803_v34 = vsel %vm1675_vm0, %v1561_v15, %v1739_v55 }
 0x1db   : > { %v2637_v2 = vpack.c.bf16 %v1817_v40, %v1816_v36  ;;  %v2602_v29 = vpack.c.bf16 %v1803_v34, %v1802_v43 }
 0x1dc   : > { %2674 = vst [vmem:[%s3319_s13 + $0xf8] sm:$0xff] %v2642_v13  }
 0x1dd   : > { %2673 = vst [vmem:[%s3319_s13 + $0xf0] sm:$0xff] %v2637_v2   ;;  %2666 = vst [vmem:[%s3319_s13 + $0xb8] sm:$0xff] %v2602_v29  }
 0x1de PF: > { %s13_s12 = sadd.s32 1, %s2979_s12  }
 0x1df   : > { %p10_p4 = scmp.ge.s32.totalorder %s13_s12, 4  }
 0x1e1   :  { %12 = sbr.rel (!%p10_p4) target bundleno = 1 (0x1), region = 62 }

</bundles_post_ra>
